<compile_context>
chip_gen: v7x
topology: tpu7x:2x2x1
jax: 0.10.0
libtpu: 0.0.40
codegen_flags: <defaults>
</compile_context>

<pallas_src>
import math

import numpy as np
import jax
import jax.numpy as jnp
from jax import lax
from jax.experimental import pallas as pl
from jax.experimental.pallas import tpu as pltpu

HIDDEN = 24                      # `hidden_size`
BN_EPS = 1e-5
BLOCK_INPLANES = (8, 16, 24, 32)
LAYERS = (1, 1, 1, 1)
LAYER_STRIDES = (1, 2, 2, 2)
N_INPUT_CHANNELS = 3
LANE = 128
MATMUL_DTYPE = jnp.bfloat16      # MXU inputs only; VPU/BN math stays f32

_VMEM = pl.BlockSpec(memory_space=pltpu.MemorySpace.VMEM)


def _round_up(x, m):
    return (x + m - 1) // m * m


# ---------------------------------------------------------------------------
# fused conv (im2col matmul, lane-dense output) + train-mode BN (+res) (+ReLU)
# ---------------------------------------------------------------------------
def _conv_bn_kernel(act, has_residual, m_valid):
    def kernel(*refs):
        if has_residual:
            p_ref, w_ref, g_ref, b_ref, r_ref, o_ref = refs
        else:
            p_ref, w_ref, g_ref, b_ref, o_ref = refs
        p = p_ref[0]                                       # (K, Mp)   bf16
        w = w_ref[...]                                     # (Cout, K) bf16
        # lane-dense MXU matmul: output (Cout, Mp), Mp multiple of 128
        y = jnp.dot(w, p, preferred_element_type=jnp.float32)
        cnt = float(m_valid)
        if y.shape[1] == m_valid:                          # no column padding
            mean = jnp.sum(y, axis=1, keepdims=True) / cnt
            cent = y - mean
            cent_m = cent
        else:                                              # exclude padded columns
            valid = lax.broadcasted_iota(jnp.int32, y.shape, 1) < m_valid
            mean = jnp.sum(jnp.where(valid, y, 0.0), axis=1, keepdims=True) / cnt
            cent = y - mean
            cent_m = jnp.where(valid, cent, 0.0)
        var = jnp.sum(cent_m * cent_m, axis=1, keepdims=True) / cnt   # stable 2-pass
        out = cent * lax.rsqrt(var + BN_EPS) * g_ref[...] + b_ref[...]
        if has_residual:
            out = out + r_ref[0]
        if act == "relu":
            out = jnp.maximum(out, 0.0)
        o_ref[0] = out
    return kernel


def conv_bn(A, w, gamma, beta, stride, padding, residual=None, act="relu"):
    """A: (G, Cin, N, D, H, W) f32.  w: (Cout, Cin, kd, kh, kw) (torch layout).
    ONE pallas_call per conv: im2col matmul + per-stream train-mode BN
    (+ residual) (+ ReLU), grid over the 3 difference streams."""
    G, Cin, N, D, H, W = A.shape
    Cout, _, kd, kh, kw = w.shape
    sd, sh, sw = stride
    pd, ph, pw = padding
    Do = (D + 2 * pd - kd) // sd + 1
    Ho = (H + 2 * ph - kh) // sh + 1
    Wo = (W + 2 * pw - kw) // sw + 1
    Mg = N * Do * Ho * Wo
    Mp = _round_up(Mg, LANE)
    K = Cin * kd * kh * kw

    Ap = jnp.pad(A, ((0, 0), (0, 0), (0, 0), (pd, pd), (ph, ph), (pw, pw)))
    # explicit channel-major (Cin, kd, kh, kw) patch ordering -> matches
    # w.reshape(Cout, K) exactly.
    # TODO(synk): patches are still materialized in HBM (k^3 amplification); a
    # tap-accumulating in-VMEM conv kernel would remove this at large video sizes.
    taps = []
    for td in range(kd):
        for th in range(kh):
            for tw in range(kw):
                taps.append(lax.slice(
                    Ap,
                    (0, 0, 0, td, th, tw),
                    (G, Cin, N,
                     td + sd * (Do - 1) + 1,
                     th + sh * (Ho - 1) + 1,
                     tw + sw * (Wo - 1) + 1),
                    (1, 1, 1, sd, sh, sw)))
    P = jnp.stack(taps, axis=2).reshape(G, K, Mg)
    if Mp != Mg:
        P = jnp.pad(P, ((0, 0), (0, 0), (0, Mp - Mg)))
    P = P.astype(MATMUL_DTYPE)
    W2 = w.reshape(Cout, K).astype(MATMUL_DTYPE)

    args = [P, W2,
            gamma.reshape(Cout, 1).astype(jnp.float32),
            beta.reshape(Cout, 1).astype(jnp.float32)]
    in_specs = [
        pl.BlockSpec((1, K, Mp), lambda g: (g, 0, 0)),
        pl.BlockSpec((Cout, K), lambda g: (0, 0)),
        pl.BlockSpec((Cout, 1), lambda g: (0, 0)),
        pl.BlockSpec((Cout, 1), lambda g: (0, 0)),
    ]
    if residual is not None:
        R = residual.reshape(G, Cout, Mg).astype(jnp.float32)
        if Mp != Mg:
            R = jnp.pad(R, ((0, 0), (0, 0), (0, Mp - Mg)))
        args.append(R)
        in_specs.append(pl.BlockSpec((1, Cout, Mp), lambda g: (g, 0, 0)))

    out = pl.pallas_call(
        _conv_bn_kernel(act, residual is not None, Mg),
        out_shape=jax.ShapeDtypeStruct((G, Cout, Mp), jnp.float32),
        grid=(G,),
        in_specs=in_specs,
        out_specs=pl.BlockSpec((1, Cout, Mp), lambda g: (g, 0, 0)),
        compiler_params=pltpu.CompilerParams(
            dimension_semantics=("parallel",),
            vmem_limit_bytes=32 * 1024 * 1024),
    )(*args)
    # TODO(synk): at realistic video sizes, switch to partial-stats epilogue +
    # tiled BN apply instead of one whole-stream tile per grid step.
    return out[:, :, :Mg].reshape(G, Cout, N, Do, Ho, Wo)


# ---------------------------------------------------------------------------
# pooling (cheap XLA glue, per perf review)
# ---------------------------------------------------------------------------
def maxpool3d_k3s2p1(A):
    G, C, N, D, H, W = A.shape
    Do, Ho, Wo = (D - 1) // 2 + 1, (H - 1) // 2 + 1, (W - 1) // 2 + 1
    Ap = jnp.pad(A, ((0, 0), (0, 0), (0, 0), (1, 1), (1, 1), (1, 1)),
                 constant_values=-jnp.inf)
    out = None
    for td in range(3):
        for th in range(3):
            for tw in range(3):
                s = lax.slice(Ap,
                              (0, 0, 0, td, th, tw),
                              (G, C, N,
                               td + 2 * (Do - 1) + 1,
                               th + 2 * (Ho - 1) + 1,
                               tw + 2 * (Wo - 1) + 1),
                              (1, 1, 1, 2, 2, 2))
                out = s if out is None else jnp.maximum(out, s)
    return out


# ---------------------------------------------------------------------------
# residual basic block (standard 3D BasicBlock, expansion = 1)
# ---------------------------------------------------------------------------
def basic_block(A, bp, stride):
    # TODO(synk): the `block` class was not provided; standard 3D BasicBlock
    # (expansion=1) is assumed and the `frames` ctor argument is ignored.
    out1 = conv_bn(A, bp["conv1_w"], *bp["bn1"],
                   stride=(stride,) * 3, padding=(1, 1, 1), act="relu")
    if "down_conv_w" in bp:                               # shortcut_type='B'
        res = conv_bn(A, bp["down_conv_w"], *bp["down_bn"],
                      stride=(stride,) * 3, padding=(0, 0, 0), act="none")
    else:
        res = A
    out2 = conv_bn(out1, bp["conv2_w"], *bp["bn2"],
                   stride=(1, 1, 1), padding=(1, 1, 1), residual=res, act="relu")
    return out2


# ---------------------------------------------------------------------------
# clinical branch: ONE fused Pallas kernel
# ---------------------------------------------------------------------------
def _make_agg_big(n):
    """Block-diagonal token aggregation (8n, 27n): row t*n+i aggregates sample i."""
    segs = [None, (0, 1), (1, 7), (7, 12), (12, 15), (15, 20), (20, 25), (25, 27)]
    a = np.zeros((8 * n, 27 * n), np.float32)
    for t, seg in enumerate(segs):
        if seg is None:
            continue
        lo, hi = seg
        for i in range(n):
            a[t * n + i, i * 27 + lo:i * 27 + hi] = 1.0
    return jnp.asarray(a)


def _make_attn_mask(n):
    r = np.arange(8 * n)
    return jnp.asarray(((r[:, None] % n) == (r[None, :] % n)).astype(np.float32))


def _clinical_kernel(n):
    scale = 1.0 / math.sqrt(HIDDEN)

    def attn_layer(e, mask, posi, qw, qb, kw, kb, vw, vb):
        e = e + posi
        q = jnp.dot(e, qw, preferred_element_type=jnp.float32) + qb
        k = jnp.dot(e, kw, preferred_element_type=jnp.float32) + kb
        v = jnp.dot(e, vw, preferred_element_type=jnp.float32) + vb
        s = lax.dot_general(q, k, (((1,), (1,)), ((), ())),
                            preferred_element_type=jnp.float32) * scale   # (8n,8n)
        s = jnp.where(mask > 0.5, s, -1e30)                # per-sample attention
        s = s - jnp.max(s, axis=-1, keepdims=True)
        p = jnp.exp(s)
        p = p / jnp.sum(p, axis=-1, keepdims=True)
        return jnp.dot(p, v, preferred_element_type=jnp.float32) + e

    def kernel(y2_ref, agg_ref, mask_ref, emb_w, emb_b, tok_ref,
               posi1, q1w, q1b, k1w, k1b, v1w, v1b,
               posi2, q2w, q2b, k2w, k2b, v2w, v2b,
               cw_ref, cb_ref, cg_ref, cbe_ref, o_ref):
        emb2 = jnp.dot(y2_ref[...], emb_w[...],
                       preferred_element_type=jnp.float32) + emb_b[...]   # (27n,24)
        e = jnp.dot(agg_ref[...], emb2,
                    preferred_element_type=jnp.float32) + tok_ref[...]    # (8n,24)
        mask = mask_ref[...]
        a = attn_layer(e, mask, posi1[...], q1w[...], q1b[...],
                       k1w[...], k1b[...], v1w[...], v1b[...])
        a = attn_layer(a, mask, posi2[...], q2w[...], q2b[...],
                       k2w[...], k2b[...], v2w[...], v2b[...])
        cw = cw_ref[...]                                    # (8, HIDDEN, 4H)
        acc = jnp.zeros((n, 4 * HIDDEN), jnp.float32)
        for t in range(8):                                  # clinical_fc without reshape
            acc = acc + jnp.dot(a[t * n:(t + 1) * n, :], cw[t],
                                preferred_element_type=jnp.float32)
        out = acc + cb_ref[...]
        mean = jnp.mean(out, axis=0, keepdims=True)         # train-mode BatchNorm1d
        cent = out - mean
        var = jnp.mean(cent * cent, axis=0, keepdims=True)
        out = cent * lax.rsqrt(var + BN_EPS) * cg_ref[...] + cbe_ref[...]
        o_ref[...] = jnp.maximum(out, 0.0)
    return kernel


def clinical_branch(y, p):
    n = y.shape[0]
    y2 = y.reshape(n * 27, 27)
    agg = _make_agg_big(n)
    maskf = _make_attn_mask(n)
    tok_rows = jnp.zeros((8 * n, HIDDEN), jnp.float32).at[:n, :].set(
        jnp.broadcast_to(p["clinical_token"], (n, HIDDEN)))

    def r2(v):
        return v.reshape(1, -1)

    a1, a2 = p["attn1"], p["attn2"]
    args = [y2, agg, maskf, p["clinical_emb"][0], r2(p["clinical_emb"][1]), tok_rows,
            a1["posi"].reshape(1, HIDDEN), a1["q"][0], r2(a1["q"][1]),
            a1["k"][0], r2(a1["k"][1]), a1["v"][0], r2(a1["v"][1]),
            a2["posi"].reshape(1, HIDDEN), a2["q"][0], r2(a2["q"][1]),
            a2["k"][0], r2(a2["k"][1]), a2["v"][0], r2(a2["v"][1]),
            p["clinical_fc_lin"][0].reshape(8, HIDDEN, 4 * HIDDEN),
            r2(p["clinical_fc_lin"][1]),
            r2(p["clinical_fc_bn"][0]), r2(p["clinical_fc_bn"][1])]
    return pl.pallas_call(
        _clinical_kernel(n),
        out_shape=jax.ShapeDtypeStruct((n, 4 * HIDDEN), jnp.float32),
        in_specs=[_VMEM] * len(args),
        out_specs=_VMEM,
    )(*args)


# ---------------------------------------------------------------------------
# fc1 + fc3/fc4 heads + sigmoid + stream mixing: ONE fused Pallas kernel
# ---------------------------------------------------------------------------
def _heads_kernel(w_mix):
    def bn_relu(h, g, b):
        mean = jnp.mean(h, axis=0, keepdims=True)
        cent = h - mean
        var = jnp.mean(cent * cent, axis=0, keepdims=True)
        return jnp.maximum(cent * lax.rsqrt(var + BN_EPS) * g + b, 0.0)

    def kernel(feat_ref, clin_ref, fc1w, fc1b,
               f3wa, f3wb, f3b1, f3g, f3be, f3w2, f3b2,
               f4wa, f4wb, f4b1, f4g, f4be, f4w2, f4b2,
               o12_ref, o1_ref, o2_ref):
        clin = clin_ref[...]
        clin3 = jnp.dot(clin, f3wb[...], preferred_element_type=jnp.float32)
        clin4 = jnp.dot(clin, f4wb[...], preferred_element_type=jnp.float32)
        z1s, z2s = [], []
        for g in range(3):                                  # the three streams
            xf = jnp.maximum(
                jnp.dot(feat_ref[g], fc1w[...],
                        preferred_element_type=jnp.float32) + fc1b[...], 0.0)
            h3 = jnp.dot(xf, f3wa[...], preferred_element_type=jnp.float32) + clin3 + f3b1[...]
            h3 = bn_relu(h3, f3g[...], f3be[...])
            z1 = jax.nn.sigmoid(
                jnp.dot(h3, f3w2[...], preferred_element_type=jnp.float32) + f3b2[...])
            h4 = jnp.dot(xf, f4wa[...], preferred_element_type=jnp.float32) + clin4 + f4b1[...]
            h4 = bn_relu(h4, f4g[...], f4be[...])
            z2 = jax.nn.sigmoid(
                jnp.dot(h4, f4w2[...], preferred_element_type=jnp.float32) + f4b2[...])
            z1s.append(z1)
            z2s.append(z2)
        p12 = [a * b for a, b in zip(z1s, z2s)]
        o12_ref[...] = w_mix * p12[0] + (1.0 - w_mix) * (p12[1] + p12[2]) * 0.5
        o1_ref[...] = w_mix * z1s[0] + (1.0 - w_mix) * (z1s[1] + z1s[2]) * 0.5
        o2_ref[...] = w_mix * z2s[0] + (1.0 - w_mix) * (z2s[1] + z2s[2]) * 0.5
    return kernel


def heads(feat, clin, p, w_mix):
    n = clin.shape[0]

    def r2(v):
        return v.reshape(1, -1)

    f3w1, f3b1 = p["fc3_lin1"]; f3g, f3be = p["fc3_bn"]; f3w2, f3b2 = p["fc3_lin2"]
    f4w1, f4b1 = p["fc4_lin1"]; f4g, f4be = p["fc4_bn"]; f4w2, f4b2 = p["fc4_lin2"]
    args = [feat, clin, p["fc1"][0], r2(p["fc1"][1]),
            f3w1[:25], f3w1[25:], r2(f3b1), r2(f3g), r2(f3be), f3w2, r2(f3b2),
            f4w1[:25], f4w1[25:], r2(f4b1), r2(f4g), r2(f4be), f4w2, r2(f4b2)]
    return pl.pallas_call(
        _heads_kernel(float(w_mix)),
        out_shape=(jax.ShapeDtypeStruct((n, 1), jnp.float32),) * 3,
        in_specs=[_VMEM] * len(args),
        out_specs=(_VMEM,) * 3,
    )(*args)


# ---------------------------------------------------------------------------
# full forward (the three difference streams are batched into one pass)
# ---------------------------------------------------------------------------
def forward(x, y, p, w=0.4):
    d1 = x[:, :, 1:] - x[:, :, :-1]
    d1 = jnp.pad(d1, ((0, 0), (0, 0), (1, 0), (0, 0), (0, 0)))
    d2 = x[:, :, :-1] - x[:, :, 1:]
    d2 = jnp.pad(d2, ((0, 0), (0, 0), (0, 1), (0, 0), (0, 0)))
    X = jnp.stack([x, d1, d2], axis=0)                 # (3, N, C, D, H, W)
    A = jnp.transpose(X, (0, 2, 1, 3, 4, 5))           # (3, C, N, D, H, W)

    A = conv_bn(A, p["conv1_w"], *p["bn1"],
                stride=(1, 2, 2), padding=(3, 3, 3), act="relu")   # conv1+bn1+relu
    A = maxpool3d_k3s2p1(A)                                         # maxpool
    for li, stride in enumerate(LAYER_STRIDES):                     # layer1..layer4
        for bi, bp in enumerate(p[f"layer{li + 1}"]):
            A = basic_block(A, bp, stride if bi == 0 else 1)
    feat = jnp.transpose(jnp.mean(A, axis=(3, 4, 5)), (0, 2, 1))    # adaptive avg pool -> (3,N,C)

    clin = clinical_branch(y, p)                                    # (N, 4*HIDDEN), stream-invariant
    return heads(feat, clin, p, w)


# --------------------------- deterministic init -----------------------------
def _kaiming_conv(key, cout, cin, kd, kh, kw):
    fan_out = cout * kd * kh * kw
    std = math.sqrt(2.0 / fan_out)
    return std * jax.random.normal(key, (cout, cin, kd, kh, kw), jnp.float32)


def _linear(key, fan_in, fan_out):
    kw_, kb = jax.random.split(key)
    bound = 1.0 / math.sqrt(fan_in)
    w = jax.random.uniform(kw_, (fan_in, fan_out), jnp.float32, -bound, bound)
    b = jax.random.uniform(kb, (fan_out,), jnp.float32, -bound, bound)
    return w, b


def _bn(c):
    return (jnp.ones((c,), jnp.float32), jnp.zeros((c,), jnp.float32))


def _block(key, in_planes, planes, stride):
    k1, k2, k3 = jax.random.split(key, 3)
    bp = {"conv1_w": _kaiming_conv(k1, planes, in_planes, 3, 3, 3),
          "bn1": _bn(planes),
          "conv2_w": _kaiming_conv(k2, planes, planes, 3, 3, 3),
          "bn2": _bn(planes)}
    if stride != 1 or in_planes != planes:
        bp["down_conv_w"] = _kaiming_conv(k3, planes, in_planes, 1, 1, 1)
        bp["down_bn"] = _bn(planes)
    return bp


def _attn(key):
    kq, kk, kv = jax.random.split(key, 3)
    return {"posi": jnp.zeros((1, 1, HIDDEN), jnp.float32),
            "q": _linear(kq, HIDDEN, HIDDEN),
            "k": _linear(kk, HIDDEN, HIDDEN),
            "v": _linear(kv, HIDDEN, HIDDEN)}


def init_params(key):
    keys = iter(jax.random.split(key, 32))
    p = {}
    p["conv1_w"] = _kaiming_conv(next(keys), BLOCK_INPLANES[0], N_INPUT_CHANNELS, 7, 7, 7)
    p["bn1"] = _bn(BLOCK_INPLANES[0])
    in_planes = BLOCK_INPLANES[0]
    for li, (planes, stride, nblocks) in enumerate(
            zip(BLOCK_INPLANES, LAYER_STRIDES, LAYERS)):
        blocks = []
        for bi in range(nblocks):
            blocks.append(_block(next(keys), in_planes, planes, stride if bi == 0 else 1))
            in_planes = planes
        p[f"layer{li + 1}"] = blocks
    feat_dim = BLOCK_INPLANES[3]
    p["fc1"] = _linear(next(keys), feat_dim, 25)
    p["clinical_emb"] = _linear(next(keys), 27, HIDDEN)
    p["attn1"] = _attn(next(keys))
    p["attn2"] = _attn(next(keys))
    p["clinical_token"] = jnp.zeros((1, HIDDEN), jnp.float32)
    p["clinical_fc_lin"] = _linear(next(keys), HIDDEN * 8, HIDDEN * 4)
    p["clinical_fc_bn"] = _bn(HIDDEN * 4)
    for name in ("fc3", "fc4"):
        p[name + "_lin1"] = _linear(next(keys), 25 + HIDDEN * 4, HIDDEN)
        p[name + "_bn"] = _bn(HIDDEN)
        p[name + "_lin2"] = _linear(next(keys), HIDDEN, 1)
    return p


if __name__ == "__main__":
    root = jax.random.PRNGKey(0)
    kx, ky, kp = jax.random.split(root, 3)
    x = jax.random.normal(kx, (2, N_INPUT_CHANNELS, 8, 16, 16), jnp.float32)  # NCDHW
    y = jax.random.normal(ky, (2, 27, 27), jnp.float32)                       # clinical
    params = init_params(kp)
    out = jax.jit(forward)(x, y, params)
    jax.block_until_ready(out)
    print("KERNEL_OK")
</pallas_src>

<mosaic_0001>
module attributes {stable_mosaic.version = 11 : i64} {
  func.func @kernel(%arg0: i32, %arg1: memref<1x1029x1024xbf16, #tpu.memory_space<vmem>>, %arg2: memref<8x1029xbf16, #tpu.memory_space<vmem>>, %arg3: memref<8x1xf32, #tpu.memory_space<vmem>>, %arg4: memref<8x1xf32, #tpu.memory_space<vmem>>, %arg5: memref<1x8x1024xf32, #tpu.memory_space<vmem>>) attributes {dimension_semantics = [#tpu.dimension_semantics<parallel>], iteration_bounds = array<i64: 3>, scalar_prefetch = 0 : i64, scratch_operands = 0 : i64, tpu.core_type = #tpu.core_type<tc>, window_params = [{transform_indices = @transform_0, window_bounds = array<i64: 1, 1029, 1024>}, {pipeline_mode = #tpu.pipeline_mode<synchronous>, transform_indices = @transform_1, window_bounds = array<i64: 8, 1029>}, {pipeline_mode = #tpu.pipeline_mode<synchronous>, transform_indices = @transform_2, window_bounds = array<i64: 8, 1>}, {pipeline_mode = #tpu.pipeline_mode<synchronous>, transform_indices = @transform_3, window_bounds = array<i64: 8, 1>}, {transform_indices = @transform_4, window_bounds = array<i64: 1, 8, 1024>}]} {
    %c0 = arith.constant 0 : index
    %c0_0 = arith.constant 0 : index
    %c0_1 = arith.constant 0 : index
    %0 = vector.load %arg1[%c0, %c0_0, %c0_1] : memref<1x1029x1024xbf16, #tpu.memory_space<vmem>>, vector<1x1029x1024xbf16>
    %1 = vector.shape_cast %0 : vector<1x1029x1024xbf16> to vector<1029x1024xbf16>
    %c0_2 = arith.constant 0 : index
    %c0_3 = arith.constant 0 : index
    %2 = vector.load %arg2[%c0_2, %c0_3] : memref<8x1029xbf16, #tpu.memory_space<vmem>>, vector<8x1029xbf16>
    %cst = arith.constant dense<0.000000e+00> : vector<8x1024xf32>
    %3 = tpu.matmul %2, %1, %cst {dimension_numbers = #tpu.dot_dimension_numbers<[1], [0], [0], [1], [0, 0, 1, 1], [], []>} : vector<8x1029xbf16>, vector<1029x1024xbf16>, vector<8x1024xf32> -> vector<8x1024xf32>
    %cst_4 = arith.constant dense<0.000000e+00> : vector<8xf32>
    %4 = vector.multi_reduction <add>, %3, %cst_4 [1] : vector<8x1024xf32> to vector<8xf32>
    %5 = vector.shape_cast %4 : vector<8xf32> to vector<8x1xf32>
    %cst_5 = arith.constant 1.024000e+03 : f32
    %6 = vector.broadcast %cst_5 : f32 to vector<8x1xf32>
    %7 = arith.divf %5, %6 : vector<8x1xf32>
    %8 = vector.broadcast %7 : vector<8x1xf32> to vector<8x1024xf32>
    %9 = arith.subf %3, %8 : vector<8x1024xf32>
    %10 = arith.mulf %9, %9 : vector<8x1024xf32>
    %cst_6 = arith.constant dense<0.000000e+00> : vector<8xf32>
    %11 = vector.multi_reduction <add>, %10, %cst_6 [1] : vector<8x1024xf32> to vector<8xf32>
    %12 = vector.shape_cast %11 : vector<8xf32> to vector<8x1xf32>
    %cst_7 = arith.constant 1.024000e+03 : f32
    %13 = vector.broadcast %cst_7 : f32 to vector<8x1xf32>
    %14 = arith.divf %12, %13 : vector<8x1xf32>
    %cst_8 = arith.constant 9.99999974E-6 : f32
    %15 = vector.broadcast %cst_8 : f32 to vector<8x1xf32>
    %16 = arith.addf %14, %15 : vector<8x1xf32>
    %17 = math.rsqrt %16 : vector<8x1xf32>
    %18 = vector.broadcast %17 : vector<8x1xf32> to vector<8x1024xf32>
    %19 = arith.mulf %9, %18 : vector<8x1024xf32>
    %c0_9 = arith.constant 0 : index
    %c0_10 = arith.constant 0 : index
    %20 = vector.load %arg3[%c0_9, %c0_10] : memref<8x1xf32, #tpu.memory_space<vmem>>, vector<8x1xf32>
    %21 = vector.broadcast %20 : vector<8x1xf32> to vector<8x1024xf32>
    %22 = arith.mulf %19, %21 : vector<8x1024xf32>
    %c0_11 = arith.constant 0 : index
    %c0_12 = arith.constant 0 : index
    %23 = vector.load %arg4[%c0_11, %c0_12] : memref<8x1xf32, #tpu.memory_space<vmem>>, vector<8x1xf32>
    %24 = vector.broadcast %23 : vector<8x1xf32> to vector<8x1024xf32>
    %25 = arith.addf %22, %24 : vector<8x1024xf32>
    %cst_13 = arith.constant 0.000000e+00 : f32
    %26 = vector.broadcast %cst_13 : f32 to vector<8x1024xf32>
    %27 = arith.maximumf %25, %26 : vector<8x1024xf32>
    %c0_14 = arith.constant 0 : index
    %c0_15 = arith.constant 0 : index
    %c0_16 = arith.constant 0 : index
    %28 = vector.load %arg5[%c0_14, %c0_15, %c0_16] : memref<1x8x1024xf32, #tpu.memory_space<vmem>>, vector<1x8x1024xf32>
    %29 = vector.shape_cast %28 : vector<1x8x1024xf32> to vector<8x1024xf32>
    %30 = vector.shape_cast %27 : vector<8x1024xf32> to vector<1x8x1024xf32>
    tpu.vector_store %arg5[%c0_14, %c0_15, %c0_16], %30 {strides = array<i32>} : memref<1x8x1024xf32, #tpu.memory_space<vmem>>, vector<1x8x1024xf32>,
    return
  }
  func.func @transform_0(%arg0: i32) -> (i32, i32, i32) {
    %c0_i32 = arith.constant 0 : i32
    %c0_i32_0 = arith.constant 0 : i32
    %c0_i32_1 = arith.constant 0 : i32
    return %arg0, %c0_i32, %c0_i32_0 : i32, i32, i32
  }
  func.func @transform_1(%arg0: i32) -> (i32, i32) {
    %c0_i32 = arith.constant 0 : i32
    %c0_i32_0 = arith.constant 0 : i32
    %c0_i32_1 = arith.constant 0 : i32
    return %c0_i32, %c0_i32_0 : i32, i32
  }
  func.func @transform_2(%arg0: i32) -> (i32, i32) {
    %c0_i32 = arith.constant 0 : i32
    %c0_i32_0 = arith.constant 0 : i32
    %c0_i32_1 = arith.constant 0 : i32
    return %c0_i32, %c0_i32_0 : i32, i32
  }
  func.func @transform_3(%arg0: i32) -> (i32, i32) {
    %c0_i32 = arith.constant 0 : i32
    %c0_i32_0 = arith.constant 0 : i32
    %c0_i32_1 = arith.constant 0 : i32
    return %c0_i32, %c0_i32_0 : i32, i32
  }
  func.func @transform_4(%arg0: i32) -> (i32, i32, i32) {
    %c0_i32 = arith.constant 0 : i32
    %c0_i32_0 = arith.constant 0 : i32
    %c0_i32_1 = arith.constant 0 : i32
    return %arg0, %c0_i32, %c0_i32_0 : i32, i32, i32
  }
}

module attributes {stable_mosaic.version = 11 : i64} {
  func.func @kernel(%arg0: i32, %arg1: memref<1x216x128xbf16, #tpu.memory_space<vmem>>, %arg2: memref<8x216xbf16, #tpu.memory_space<vmem>>, %arg3: memref<8x1xf32, #tpu.memory_space<vmem>>, %arg4: memref<8x1xf32, #tpu.memory_space<vmem>>, %arg5: memref<1x8x128xf32, #tpu.memory_space<vmem>>) attributes {dimension_semantics = [#tpu.dimension_semantics<parallel>], iteration_bounds = array<i64: 3>, scalar_prefetch = 0 : i64, scratch_operands = 0 : i64, tpu.core_type = #tpu.core_type<tc>, window_params = [{transform_indices = @transform_0, window_bounds = array<i64: 1, 216, 128>}, {pipeline_mode = #tpu.pipeline_mode<synchronous>, transform_indices = @transform_1, window_bounds = array<i64: 8, 216>}, {pipeline_mode = #tpu.pipeline_mode<synchronous>, transform_indices = @transform_2, window_bounds = array<i64: 8, 1>}, {pipeline_mode = #tpu.pipeline_mode<synchronous>, transform_indices = @transform_3, window_bounds = array<i64: 8, 1>}, {transform_indices = @transform_4, window_bounds = array<i64: 1, 8, 128>}]} {
    %c0 = arith.constant 0 : index
    %c0_0 = arith.constant 0 : index
    %c0_1 = arith.constant 0 : index
    %0 = vector.load %arg1[%c0, %c0_0, %c0_1] : memref<1x216x128xbf16, #tpu.memory_space<vmem>>, vector<1x216x128xbf16>
    %1 = vector.shape_cast %0 : vector<1x216x128xbf16> to vector<216x128xbf16>
    %c0_2 = arith.constant 0 : index
    %c0_3 = arith.constant 0 : index
    %2 = vector.load %arg2[%c0_2, %c0_3] : memref<8x216xbf16, #tpu.memory_space<vmem>>, vector<8x216xbf16>
    %cst = arith.constant dense<0.000000e+00> : vector<8x128xf32>
    %3 = tpu.matmul %2, %1, %cst {dimension_numbers = #tpu.dot_dimension_numbers<[1], [0], [0], [1], [0, 0, 1, 1], [], []>} : vector<8x216xbf16>, vector<216x128xbf16>, vector<8x128xf32> -> vector<8x128xf32>
    %cst_4 = arith.constant dense<0.000000e+00> : vector<8xf32>
    %4 = vector.multi_reduction <add>, %3, %cst_4 [1] : vector<8x128xf32> to vector<8xf32>
    %5 = vector.shape_cast %4 : vector<8xf32> to vector<8x1xf32>
    %cst_5 = arith.constant 1.280000e+02 : f32
    %6 = vector.broadcast %cst_5 : f32 to vector<8x1xf32>
    %7 = arith.divf %5, %6 : vector<8x1xf32>
    %8 = vector.broadcast %7 : vector<8x1xf32> to vector<8x128xf32>
    %9 = arith.subf %3, %8 : vector<8x128xf32>
    %10 = arith.mulf %9, %9 : vector<8x128xf32>
    %cst_6 = arith.constant dense<0.000000e+00> : vector<8xf32>
    %11 = vector.multi_reduction <add>, %10, %cst_6 [1] : vector<8x128xf32> to vector<8xf32>
    %12 = vector.shape_cast %11 : vector<8xf32> to vector<8x1xf32>
    %cst_7 = arith.constant 1.280000e+02 : f32
    %13 = vector.broadcast %cst_7 : f32 to vector<8x1xf32>
    %14 = arith.divf %12, %13 : vector<8x1xf32>
    %cst_8 = arith.constant 9.99999974E-6 : f32
    %15 = vector.broadcast %cst_8 : f32 to vector<8x1xf32>
    %16 = arith.addf %14, %15 : vector<8x1xf32>
    %17 = math.rsqrt %16 : vector<8x1xf32>
    %18 = vector.broadcast %17 : vector<8x1xf32> to vector<8x128xf32>
    %19 = arith.mulf %9, %18 : vector<8x128xf32>
    %c0_9 = arith.constant 0 : index
    %c0_10 = arith.constant 0 : index
    %20 = vector.load %arg3[%c0_9, %c0_10] : memref<8x1xf32, #tpu.memory_space<vmem>>, vector<8x1xf32>
    %21 = vector.broadcast %20 : vector<8x1xf32> to vector<8x128xf32>
    %22 = arith.mulf %19, %21 : vector<8x128xf32>
    %c0_11 = arith.constant 0 : index
    %c0_12 = arith.constant 0 : index
    %23 = vector.load %arg4[%c0_11, %c0_12] : memref<8x1xf32, #tpu.memory_space<vmem>>, vector<8x1xf32>
    %24 = vector.broadcast %23 : vector<8x1xf32> to vector<8x128xf32>
    %25 = arith.addf %22, %24 : vector<8x128xf32>
    %cst_13 = arith.constant 0.000000e+00 : f32
    %26 = vector.broadcast %cst_13 : f32 to vector<8x128xf32>
    %27 = arith.maximumf %25, %26 : vector<8x128xf32>
    %c0_14 = arith.constant 0 : index
    %c0_15 = arith.constant 0 : index
    %c0_16 = arith.constant 0 : index
    %28 = vector.load %arg5[%c0_14, %c0_15, %c0_16] : memref<1x8x128xf32, #tpu.memory_space<vmem>>, vector<1x8x128xf32>
    %29 = vector.shape_cast %28 : vector<1x8x128xf32> to vector<8x128xf32>
    %30 = vector.shape_cast %27 : vector<8x128xf32> to vector<1x8x128xf32>
    tpu.vector_store %arg5[%c0_14, %c0_15, %c0_16], %30 {strides = array<i32>} : memref<1x8x128xf32, #tpu.memory_space<vmem>>, vector<1x8x128xf32>,
    return
  }
  func.func @transform_0(%arg0: i32) -> (i32, i32, i32) {
    %c0_i32 = arith.constant 0 : i32
    %c0_i32_0 = arith.constant 0 : i32
    %c0_i32_1 = arith.constant 0 : i32
    return %arg0, %c0_i32, %c0_i32_0 : i32, i32, i32
  }
  func.func @transform_1(%arg0: i32) -> (i32, i32) {
    %c0_i32 = arith.constant 0 : i32
    %c0_i32_0 = arith.constant 0 : i32
    %c0_i32_1 = arith.constant 0 : i32
    return %c0_i32, %c0_i32_0 : i32, i32
  }
  func.func @transform_2(%arg0: i32) -> (i32, i32) {
    %c0_i32 = arith.constant 0 : i32
    %c0_i32_0 = arith.constant 0 : i32
    %c0_i32_1 = arith.constant 0 : i32
    return %c0_i32, %c0_i32_0 : i32, i32
  }
  func.func @transform_3(%arg0: i32) -> (i32, i32) {
    %c0_i32 = arith.constant 0 : i32
    %c0_i32_0 = arith.constant 0 : i32
    %c0_i32_1 = arith.constant 0 : i32
    return %c0_i32, %c0_i32_0 : i32, i32
  }
  func.func @transform_4(%arg0: i32) -> (i32, i32, i32) {
    %c0_i32 = arith.constant 0 : i32
    %c0_i32_0 = arith.constant 0 : i32
    %c0_i32_1 = arith.constant 0 : i32
    return %arg0, %c0_i32, %c0_i32_0 : i32, i32, i32
  }
}

module attributes {stable_mosaic.version = 11 : i64} {
  func.func @kernel(%arg0: i32, %arg1: memref<1x216x128xbf16, #tpu.memory_space<vmem>>, %arg2: memref<8x216xbf16, #tpu.memory_space<vmem>>, %arg3: memref<8x1xf32, #tpu.memory_space<vmem>>, %arg4: memref<8x1xf32, #tpu.memory_space<vmem>>, %arg5: memref<1x8x128xf32, #tpu.memory_space<vmem>>, %arg6: memref<1x8x128xf32, #tpu.memory_space<vmem>>) attributes {dimension_semantics = [#tpu.dimension_semantics<parallel>], iteration_bounds = array<i64: 3>, scalar_prefetch = 0 : i64, scratch_operands = 0 : i64, tpu.core_type = #tpu.core_type<tc>, window_params = [{transform_indices = @transform_0, window_bounds = array<i64: 1, 216, 128>}, {pipeline_mode = #tpu.pipeline_mode<synchronous>, transform_indices = @transform_1, window_bounds = array<i64: 8, 216>}, {pipeline_mode = #tpu.pipeline_mode<synchronous>, transform_indices = @transform_2, window_bounds = array<i64: 8, 1>}, {pipeline_mode = #tpu.pipeline_mode<synchronous>, transform_indices = @transform_3, window_bounds = array<i64: 8, 1>}, {transform_indices = @transform_4, window_bounds = array<i64: 1, 8, 128>}, {transform_indices = @transform_5, window_bounds = array<i64: 1, 8, 128>}]} {
    %c0 = arith.constant 0 : index
    %c0_0 = arith.constant 0 : index
    %c0_1 = arith.constant 0 : index
    %0 = vector.load %arg1[%c0, %c0_0, %c0_1] : memref<1x216x128xbf16, #tpu.memory_space<vmem>>, vector<1x216x128xbf16>
    %1 = vector.shape_cast %0 : vector<1x216x128xbf16> to vector<216x128xbf16>
    %c0_2 = arith.constant 0 : index
    %c0_3 = arith.constant 0 : index
    %2 = vector.load %arg2[%c0_2, %c0_3] : memref<8x216xbf16, #tpu.memory_space<vmem>>, vector<8x216xbf16>
    %cst = arith.constant dense<0.000000e+00> : vector<8x128xf32>
    %3 = tpu.matmul %2, %1, %cst {dimension_numbers = #tpu.dot_dimension_numbers<[1], [0], [0], [1], [0, 0, 1, 1], [], []>} : vector<8x216xbf16>, vector<216x128xbf16>, vector<8x128xf32> -> vector<8x128xf32>
    %cst_4 = arith.constant dense<0.000000e+00> : vector<8xf32>
    %4 = vector.multi_reduction <add>, %3, %cst_4 [1] : vector<8x128xf32> to vector<8xf32>
    %5 = vector.shape_cast %4 : vector<8xf32> to vector<8x1xf32>
    %cst_5 = arith.constant 1.280000e+02 : f32
    %6 = vector.broadcast %cst_5 : f32 to vector<8x1xf32>
    %7 = arith.divf %5, %6 : vector<8x1xf32>
    %8 = vector.broadcast %7 : vector<8x1xf32> to vector<8x128xf32>
    %9 = arith.subf %3, %8 : vector<8x128xf32>
    %10 = arith.mulf %9, %9 : vector<8x128xf32>
    %cst_6 = arith.constant dense<0.000000e+00> : vector<8xf32>
    %11 = vector.multi_reduction <add>, %10, %cst_6 [1] : vector<8x128xf32> to vector<8xf32>
    %12 = vector.shape_cast %11 : vector<8xf32> to vector<8x1xf32>
    %cst_7 = arith.constant 1.280000e+02 : f32
    %13 = vector.broadcast %cst_7 : f32 to vector<8x1xf32>
    %14 = arith.divf %12, %13 : vector<8x1xf32>
    %cst_8 = arith.constant 9.99999974E-6 : f32
    %15 = vector.broadcast %cst_8 : f32 to vector<8x1xf32>
    %16 = arith.addf %14, %15 : vector<8x1xf32>
    %17 = math.rsqrt %16 : vector<8x1xf32>
    %18 = vector.broadcast %17 : vector<8x1xf32> to vector<8x128xf32>
    %19 = arith.mulf %9, %18 : vector<8x128xf32>
    %c0_9 = arith.constant 0 : index
    %c0_10 = arith.constant 0 : index
    %20 = vector.load %arg3[%c0_9, %c0_10] : memref<8x1xf32, #tpu.memory_space<vmem>>, vector<8x1xf32>
    %21 = vector.broadcast %20 : vector<8x1xf32> to vector<8x128xf32>
    %22 = arith.mulf %19, %21 : vector<8x128xf32>
    %c0_11 = arith.constant 0 : index
    %c0_12 = arith.constant 0 : index
    %23 = vector.load %arg4[%c0_11, %c0_12] : memref<8x1xf32, #tpu.memory_space<vmem>>, vector<8x1xf32>
    %24 = vector.broadcast %23 : vector<8x1xf32> to vector<8x128xf32>
    %25 = arith.addf %22, %24 : vector<8x128xf32>
    %c0_13 = arith.constant 0 : index
    %c0_14 = arith.constant 0 : index
    %c0_15 = arith.constant 0 : index
    %26 = vector.load %arg5[%c0_13, %c0_14, %c0_15] : memref<1x8x128xf32, #tpu.memory_space<vmem>>, vector<1x8x128xf32>
    %27 = vector.shape_cast %26 : vector<1x8x128xf32> to vector<8x128xf32>
    %28 = arith.addf %25, %27 : vector<8x128xf32>
    %cst_16 = arith.constant 0.000000e+00 : f32
    %29 = vector.broadcast %cst_16 : f32 to vector<8x128xf32>
    %30 = arith.maximumf %28, %29 : vector<8x128xf32>
    %c0_17 = arith.constant 0 : index
    %c0_18 = arith.constant 0 : index
    %c0_19 = arith.constant 0 : index
    %31 = vector.load %arg6[%c0_17, %c0_18, %c0_19] : memref<1x8x128xf32, #tpu.memory_space<vmem>>, vector<1x8x128xf32>
    %32 = vector.shape_cast %31 : vector<1x8x128xf32> to vector<8x128xf32>
    %33 = vector.shape_cast %30 : vector<8x128xf32> to vector<1x8x128xf32>
    tpu.vector_store %arg6[%c0_17, %c0_18, %c0_19], %33 {strides = array<i32>} : memref<1x8x128xf32, #tpu.memory_space<vmem>>, vector<1x8x128xf32>,
    return
  }
  func.func @transform_0(%arg0: i32) -> (i32, i32, i32) {
    %c0_i32 = arith.constant 0 : i32
    %c0_i32_0 = arith.constant 0 : i32
    %c0_i32_1 = arith.constant 0 : i32
    return %arg0, %c0_i32, %c0_i32_0 : i32, i32, i32
  }
  func.func @transform_1(%arg0: i32) -> (i32, i32) {
    %c0_i32 = arith.constant 0 : i32
    %c0_i32_0 = arith.constant 0 : i32
    %c0_i32_1 = arith.constant 0 : i32
    return %c0_i32, %c0_i32_0 : i32, i32
  }
  func.func @transform_2(%arg0: i32) -> (i32, i32) {
    %c0_i32 = arith.constant 0 : i32
    %c0_i32_0 = arith.constant 0 : i32
    %c0_i32_1 = arith.constant 0 : i32
    return %c0_i32, %c0_i32_0 : i32, i32
  }
  func.func @transform_3(%arg0: i32) -> (i32, i32) {
    %c0_i32 = arith.constant 0 : i32
    %c0_i32_0 = arith.constant 0 : i32
    %c0_i32_1 = arith.constant 0 : i32
    return %c0_i32, %c0_i32_0 : i32, i32
  }
  func.func @transform_4(%arg0: i32) -> (i32, i32, i32) {
    %c0_i32 = arith.constant 0 : i32
    %c0_i32_0 = arith.constant 0 : i32
    %c0_i32_1 = arith.constant 0 : i32
    return %arg0, %c0_i32, %c0_i32_0 : i32, i32, i32
  }
  func.func @transform_5(%arg0: i32) -> (i32, i32, i32) {
    %c0_i32 = arith.constant 0 : i32
    %c0_i32_0 = arith.constant 0 : i32
    %c0_i32_1 = arith.constant 0 : i32
    return %arg0, %c0_i32, %c0_i32_0 : i32, i32, i32
  }
}

module attributes {stable_mosaic.version = 11 : i64} {
  func.func @kernel(%arg0: i32, %arg1: memref<1x216x128xbf16, #tpu.memory_space<vmem>>, %arg2: memref<16x216xbf16, #tpu.memory_space<vmem>>, %arg3: memref<16x1xf32, #tpu.memory_space<vmem>>, %arg4: memref<16x1xf32, #tpu.memory_space<vmem>>, %arg5: memref<1x16x128xf32, #tpu.memory_space<vmem>>) attributes {dimension_semantics = [#tpu.dimension_semantics<parallel>], iteration_bounds = array<i64: 3>, scalar_prefetch = 0 : i64, scratch_operands = 0 : i64, tpu.core_type = #tpu.core_type<tc>, window_params = [{transform_indices = @transform_0, window_bounds = array<i64: 1, 216, 128>}, {pipeline_mode = #tpu.pipeline_mode<synchronous>, transform_indices = @transform_1, window_bounds = array<i64: 16, 216>}, {pipeline_mode = #tpu.pipeline_mode<synchronous>, transform_indices = @transform_2, window_bounds = array<i64: 16, 1>}, {pipeline_mode = #tpu.pipeline_mode<synchronous>, transform_indices = @transform_3, window_bounds = array<i64: 16, 1>}, {transform_indices = @transform_4, window_bounds = array<i64: 1, 16, 128>}]} {
    %c0 = arith.constant 0 : index
    %c0_0 = arith.constant 0 : index
    %c0_1 = arith.constant 0 : index
    %0 = vector.load %arg1[%c0, %c0_0, %c0_1] : memref<1x216x128xbf16, #tpu.memory_space<vmem>>, vector<1x216x128xbf16>
    %1 = vector.shape_cast %0 : vector<1x216x128xbf16> to vector<216x128xbf16>
    %c0_2 = arith.constant 0 : index
    %c0_3 = arith.constant 0 : index
    %2 = vector.load %arg2[%c0_2, %c0_3] : memref<16x216xbf16, #tpu.memory_space<vmem>>, vector<16x216xbf16>
    %cst = arith.constant dense<0.000000e+00> : vector<16x128xf32>
    %3 = tpu.matmul %2, %1, %cst {dimension_numbers = #tpu.dot_dimension_numbers<[1], [0], [0], [1], [0, 0, 1, 1], [], []>} : vector<16x216xbf16>, vector<216x128xbf16>, vector<16x128xf32> -> vector<16x128xf32>
    %4 = tpu.iota {dimensions = array<i32: 1>} : vector<16x128xi32>
    %c16_i32 = arith.constant 16 : i32
    %5 = vector.broadcast %c16_i32 : i32 to vector<16x128xi32>
    %6 = arith.cmpi slt, %4, %5 : vector<16x128xi32>
    %cst_4 = arith.constant 0.000000e+00 : f32
    %7 = vector.broadcast %cst_4 : f32 to vector<16x128xf32>
    %8 = arith.select %6, %3, %7 : vector<16x128xi1>, vector<16x128xf32>
    %cst_5 = arith.constant dense<0.000000e+00> : vector<16xf32>
    %9 = vector.multi_reduction <add>, %8, %cst_5 [1] : vector<16x128xf32> to vector<16xf32>
    %10 = vector.shape_cast %9 : vector<16xf32> to vector<16x1xf32>
    %cst_6 = arith.constant 1.600000e+01 : f32
    %11 = vector.broadcast %cst_6 : f32 to vector<16x1xf32>
    %12 = arith.divf %10, %11 : vector<16x1xf32>
    %13 = vector.broadcast %12 : vector<16x1xf32> to vector<16x128xf32>
    %14 = arith.subf %3, %13 : vector<16x128xf32>
    %cst_7 = arith.constant 0.000000e+00 : f32
    %15 = vector.broadcast %cst_7 : f32 to vector<16x128xf32>
    %16 = arith.select %6, %14, %15 : vector<16x128xi1>, vector<16x128xf32>
    %17 = arith.mulf %16, %16 : vector<16x128xf32>
    %cst_8 = arith.constant dense<0.000000e+00> : vector<16xf32>
    %18 = vector.multi_reduction <add>, %17, %cst_8 [1] : vector<16x128xf32> to vector<16xf32>
    %19 = vector.shape_cast %18 : vector<16xf32> to vector<16x1xf32>
    %cst_9 = arith.constant 1.600000e+01 : f32
    %20 = vector.broadcast %cst_9 : f32 to vector<16x1xf32>
    %21 = arith.divf %19, %20 : vector<16x1xf32>
    %cst_10 = arith.constant 9.99999974E-6 : f32
    %22 = vector.broadcast %cst_10 : f32 to vector<16x1xf32>
    %23 = arith.addf %21, %22 : vector<16x1xf32>
    %24 = math.rsqrt %23 : vector<16x1xf32>
    %25 = vector.broadcast %24 : vector<16x1xf32> to vector<16x128xf32>
    %26 = arith.mulf %14, %25 : vector<16x128xf32>
    %c0_11 = arith.constant 0 : index
    %c0_12 = arith.constant 0 : index
    %27 = vector.load %arg3[%c0_11, %c0_12] : memref<16x1xf32, #tpu.memory_space<vmem>>, vector<16x1xf32>
    %28 = vector.broadcast %27 : vector<16x1xf32> to vector<16x128xf32>
    %29 = arith.mulf %26, %28 : vector<16x128xf32>
    %c0_13 = arith.constant 0 : index
    %c0_14 = arith.constant 0 : index
    %30 = vector.load %arg4[%c0_13, %c0_14] : memref<16x1xf32, #tpu.memory_space<vmem>>, vector<16x1xf32>
    %31 = vector.broadcast %30 : vector<16x1xf32> to vector<16x128xf32>
    %32 = arith.addf %29, %31 : vector<16x128xf32>
    %cst_15 = arith.constant 0.000000e+00 : f32
    %33 = vector.broadcast %cst_15 : f32 to vector<16x128xf32>
    %34 = arith.maximumf %32, %33 : vector<16x128xf32>
    %c0_16 = arith.constant 0 : index
    %c0_17 = arith.constant 0 : index
    %c0_18 = arith.constant 0 : index
    %35 = vector.load %arg5[%c0_16, %c0_17, %c0_18] : memref<1x16x128xf32, #tpu.memory_space<vmem>>, vector<1x16x128xf32>
    %36 = vector.shape_cast %35 : vector<1x16x128xf32> to vector<16x128xf32>
    %37 = vector.shape_cast %34 : vector<16x128xf32> to vector<1x16x128xf32>
    tpu.vector_store %arg5[%c0_16, %c0_17, %c0_18], %37 {strides = array<i32>} : memref<1x16x128xf32, #tpu.memory_space<vmem>>, vector<1x16x128xf32>,
    return
  }
  func.func @transform_0(%arg0: i32) -> (i32, i32, i32) {
    %c0_i32 = arith.constant 0 : i32
    %c0_i32_0 = arith.constant 0 : i32
    %c0_i32_1 = arith.constant 0 : i32
    return %arg0, %c0_i32, %c0_i32_0 : i32, i32, i32
  }
  func.func @transform_1(%arg0: i32) -> (i32, i32) {
    %c0_i32 = arith.constant 0 : i32
    %c0_i32_0 = arith.constant 0 : i32
    %c0_i32_1 = arith.constant 0 : i32
    return %c0_i32, %c0_i32_0 : i32, i32
  }
  func.func @transform_2(%arg0: i32) -> (i32, i32) {
    %c0_i32 = arith.constant 0 : i32
    %c0_i32_0 = arith.constant 0 : i32
    %c0_i32_1 = arith.constant 0 : i32
    return %c0_i32, %c0_i32_0 : i32, i32
  }
  func.func @transform_3(%arg0: i32) -> (i32, i32) {
    %c0_i32 = arith.constant 0 : i32
    %c0_i32_0 = arith.constant 0 : i32
    %c0_i32_1 = arith.constant 0 : i32
    return %c0_i32, %c0_i32_0 : i32, i32
  }
  func.func @transform_4(%arg0: i32) -> (i32, i32, i32) {
    %c0_i32 = arith.constant 0 : i32
    %c0_i32_0 = arith.constant 0 : i32
    %c0_i32_1 = arith.constant 0 : i32
    return %arg0, %c0_i32, %c0_i32_0 : i32, i32, i32
  }
}

module attributes {stable_mosaic.version = 11 : i64} {
  func.func @kernel(%arg0: i32, %arg1: memref<1x8x128xbf16, #tpu.memory_space<vmem>>, %arg2: memref<16x8xbf16, #tpu.memory_space<vmem>>, %arg3: memref<16x1xf32, #tpu.memory_space<vmem>>, %arg4: memref<16x1xf32, #tpu.memory_space<vmem>>, %arg5: memref<1x16x128xf32, #tpu.memory_space<vmem>>) attributes {dimension_semantics = [#tpu.dimension_semantics<parallel>], iteration_bounds = array<i64: 3>, scalar_prefetch = 0 : i64, scratch_operands = 0 : i64, tpu.core_type = #tpu.core_type<tc>, window_params = [{transform_indices = @transform_0, window_bounds = array<i64: 1, 8, 128>}, {pipeline_mode = #tpu.pipeline_mode<synchronous>, transform_indices = @transform_1, window_bounds = array<i64: 16, 8>}, {pipeline_mode = #tpu.pipeline_mode<synchronous>, transform_indices = @transform_2, window_bounds = array<i64: 16, 1>}, {pipeline_mode = #tpu.pipeline_mode<synchronous>, transform_indices = @transform_3, window_bounds = array<i64: 16, 1>}, {transform_indices = @transform_4, window_bounds = array<i64: 1, 16, 128>}]} {
    %c0 = arith.constant 0 : index
    %c0_0 = arith.constant 0 : index
    %c0_1 = arith.constant 0 : index
    %0 = vector.load %arg1[%c0, %c0_0, %c0_1] : memref<1x8x128xbf16, #tpu.memory_space<vmem>>, vector<1x8x128xbf16>
    %1 = vector.shape_cast %0 : vector<1x8x128xbf16> to vector<8x128xbf16>
    %c0_2 = arith.constant 0 : index
    %c0_3 = arith.constant 0 : index
    %2 = vector.load %arg2[%c0_2, %c0_3] : memref<16x8xbf16, #tpu.memory_space<vmem>>, vector<16x8xbf16>
    %cst = arith.constant dense<0.000000e+00> : vector<16x128xf32>
    %3 = tpu.matmul %2, %1, %cst {dimension_numbers = #tpu.dot_dimension_numbers<[1], [0], [0], [1], [0, 0, 1, 1], [], []>} : vector<16x8xbf16>, vector<8x128xbf16>, vector<16x128xf32> -> vector<16x128xf32>
    %4 = tpu.iota {dimensions = array<i32: 1>} : vector<16x128xi32>
    %c16_i32 = arith.constant 16 : i32
    %5 = vector.broadcast %c16_i32 : i32 to vector<16x128xi32>
    %6 = arith.cmpi slt, %4, %5 : vector<16x128xi32>
    %cst_4 = arith.constant 0.000000e+00 : f32
    %7 = vector.broadcast %cst_4 : f32 to vector<16x128xf32>
    %8 = arith.select %6, %3, %7 : vector<16x128xi1>, vector<16x128xf32>
    %cst_5 = arith.constant dense<0.000000e+00> : vector<16xf32>
    %9 = vector.multi_reduction <add>, %8, %cst_5 [1] : vector<16x128xf32> to vector<16xf32>
    %10 = vector.shape_cast %9 : vector<16xf32> to vector<16x1xf32>
    %cst_6 = arith.constant 1.600000e+01 : f32
    %11 = vector.broadcast %cst_6 : f32 to vector<16x1xf32>
    %12 = arith.divf %10, %11 : vector<16x1xf32>
    %13 = vector.broadcast %12 : vector<16x1xf32> to vector<16x128xf32>
    %14 = arith.subf %3, %13 : vector<16x128xf32>
    %cst_7 = arith.constant 0.000000e+00 : f32
    %15 = vector.broadcast %cst_7 : f32 to vector<16x128xf32>
    %16 = arith.select %6, %14, %15 : vector<16x128xi1>, vector<16x128xf32>
    %17 = arith.mulf %16, %16 : vector<16x128xf32>
    %cst_8 = arith.constant dense<0.000000e+00> : vector<16xf32>
    %18 = vector.multi_reduction <add>, %17, %cst_8 [1] : vector<16x128xf32> to vector<16xf32>
    %19 = vector.shape_cast %18 : vector<16xf32> to vector<16x1xf32>
    %cst_9 = arith.constant 1.600000e+01 : f32
    %20 = vector.broadcast %cst_9 : f32 to vector<16x1xf32>
    %21 = arith.divf %19, %20 : vector<16x1xf32>
    %cst_10 = arith.constant 9.99999974E-6 : f32
    %22 = vector.broadcast %cst_10 : f32 to vector<16x1xf32>
    %23 = arith.addf %21, %22 : vector<16x1xf32>
    %24 = math.rsqrt %23 : vector<16x1xf32>
    %25 = vector.broadcast %24 : vector<16x1xf32> to vector<16x128xf32>
    %26 = arith.mulf %14, %25 : vector<16x128xf32>
    %c0_11 = arith.constant 0 : index
    %c0_12 = arith.constant 0 : index
    %27 = vector.load %arg3[%c0_11, %c0_12] : memref<16x1xf32, #tpu.memory_space<vmem>>, vector<16x1xf32>
    %28 = vector.broadcast %27 : vector<16x1xf32> to vector<16x128xf32>
    %29 = arith.mulf %26, %28 : vector<16x128xf32>
    %c0_13 = arith.constant 0 : index
    %c0_14 = arith.constant 0 : index
    %30 = vector.load %arg4[%c0_13, %c0_14] : memref<16x1xf32, #tpu.memory_space<vmem>>, vector<16x1xf32>
    %31 = vector.broadcast %30 : vector<16x1xf32> to vector<16x128xf32>
    %32 = arith.addf %29, %31 : vector<16x128xf32>
    %c0_15 = arith.constant 0 : index
    %c0_16 = arith.constant 0 : index
    %c0_17 = arith.constant 0 : index
    %33 = vector.load %arg5[%c0_15, %c0_16, %c0_17] : memref<1x16x128xf32, #tpu.memory_space<vmem>>, vector<1x16x128xf32>
    %34 = vector.shape_cast %33 : vector<1x16x128xf32> to vector<16x128xf32>
    %35 = vector.shape_cast %32 : vector<16x128xf32> to vector<1x16x128xf32>
    tpu.vector_store %arg5[%c0_15, %c0_16, %c0_17], %35 {strides = array<i32>} : memref<1x16x128xf32, #tpu.memory_space<vmem>>, vector<1x16x128xf32>,
    return
  }
  func.func @transform_0(%arg0: i32) -> (i32, i32, i32) {
    %c0_i32 = arith.constant 0 : i32
    %c0_i32_0 = arith.constant 0 : i32
    %c0_i32_1 = arith.constant 0 : i32
    return %arg0, %c0_i32, %c0_i32_0 : i32, i32, i32
  }
  func.func @transform_1(%arg0: i32) -> (i32, i32) {
    %c0_i32 = arith.constant 0 : i32
    %c0_i32_0 = arith.constant 0 : i32
    %c0_i32_1 = arith.constant 0 : i32
    return %c0_i32, %c0_i32_0 : i32, i32
  }
  func.func @transform_2(%arg0: i32) -> (i32, i32) {
    %c0_i32 = arith.constant 0 : i32
    %c0_i32_0 = arith.constant 0 : i32
    %c0_i32_1 = arith.constant 0 : i32
    return %c0_i32, %c0_i32_0 : i32, i32
  }
  func.func @transform_3(%arg0: i32) -> (i32, i32) {
    %c0_i32 = arith.constant 0 : i32
    %c0_i32_0 = arith.constant 0 : i32
    %c0_i32_1 = arith.constant 0 : i32
    return %c0_i32, %c0_i32_0 : i32, i32
  }
  func.func @transform_4(%arg0: i32) -> (i32, i32, i32) {
    %c0_i32 = arith.constant 0 : i32
    %c0_i32_0 = arith.constant 0 : i32
    %c0_i32_1 = arith.constant 0 : i32
    return %arg0, %c0_i32, %c0_i32_0 : i32, i32, i32
  }
}

module attributes {stable_mosaic.version = 11 : i64} {
  func.func @kernel(%arg0: i32, %arg1: memref<1x432x128xbf16, #tpu.memory_space<vmem>>, %arg2: memref<16x432xbf16, #tpu.memory_space<vmem>>, %arg3: memref<16x1xf32, #tpu.memory_space<vmem>>, %arg4: memref<16x1xf32, #tpu.memory_space<vmem>>, %arg5: memref<1x16x128xf32, #tpu.memory_space<vmem>>, %arg6: memref<1x16x128xf32, #tpu.memory_space<vmem>>) attributes {dimension_semantics = [#tpu.dimension_semantics<parallel>], iteration_bounds = array<i64: 3>, scalar_prefetch = 0 : i64, scratch_operands = 0 : i64, tpu.core_type = #tpu.core_type<tc>, window_params = [{transform_indices = @transform_0, window_bounds = array<i64: 1, 432, 128>}, {pipeline_mode = #tpu.pipeline_mode<synchronous>, transform_indices = @transform_1, window_bounds = array<i64: 16, 432>}, {pipeline_mode = #tpu.pipeline_mode<synchronous>, transform_indices = @transform_2, window_bounds = array<i64: 16, 1>}, {pipeline_mode = #tpu.pipeline_mode<synchronous>, transform_indices = @transform_3, window_bounds = array<i64: 16, 1>}, {transform_indices = @transform_4, window_bounds = array<i64: 1, 16, 128>}, {transform_indices = @transform_5, window_bounds = array<i64: 1, 16, 128>}]} {
    %c0 = arith.constant 0 : index
    %c0_0 = arith.constant 0 : index
    %c0_1 = arith.constant 0 : index
    %0 = vector.load %arg1[%c0, %c0_0, %c0_1] : memref<1x432x128xbf16, #tpu.memory_space<vmem>>, vector<1x432x128xbf16>
    %1 = vector.shape_cast %0 : vector<1x432x128xbf16> to vector<432x128xbf16>
    %c0_2 = arith.constant 0 : index
    %c0_3 = arith.constant 0 : index
    %2 = vector.load %arg2[%c0_2, %c0_3] : memref<16x432xbf16, #tpu.memory_space<vmem>>, vector<16x432xbf16>
    %cst = arith.constant dense<0.000000e+00> : vector<16x128xf32>
    %3 = tpu.matmul %2, %1, %cst {dimension_numbers = #tpu.dot_dimension_numbers<[1], [0], [0], [1], [0, 0, 1, 1], [], []>} : vector<16x432xbf16>, vector<432x128xbf16>, vector<16x128xf32> -> vector<16x128xf32>
    %4 = tpu.iota {dimensions = array<i32: 1>} : vector<16x128xi32>
    %c16_i32 = arith.constant 16 : i32
    %5 = vector.broadcast %c16_i32 : i32 to vector<16x128xi32>
    %6 = arith.cmpi slt, %4, %5 : vector<16x128xi32>
    %cst_4 = arith.constant 0.000000e+00 : f32
    %7 = vector.broadcast %cst_4 : f32 to vector<16x128xf32>
    %8 = arith.select %6, %3, %7 : vector<16x128xi1>, vector<16x128xf32>
    %cst_5 = arith.constant dense<0.000000e+00> : vector<16xf32>
    %9 = vector.multi_reduction <add>, %8, %cst_5 [1] : vector<16x128xf32> to vector<16xf32>
    %10 = vector.shape_cast %9 : vector<16xf32> to vector<16x1xf32>
    %cst_6 = arith.constant 1.600000e+01 : f32
    %11 = vector.broadcast %cst_6 : f32 to vector<16x1xf32>
    %12 = arith.divf %10, %11 : vector<16x1xf32>
    %13 = vector.broadcast %12 : vector<16x1xf32> to vector<16x128xf32>
    %14 = arith.subf %3, %13 : vector<16x128xf32>
    %cst_7 = arith.constant 0.000000e+00 : f32
    %15 = vector.broadcast %cst_7 : f32 to vector<16x128xf32>
    %16 = arith.select %6, %14, %15 : vector<16x128xi1>, vector<16x128xf32>
    %17 = arith.mulf %16, %16 : vector<16x128xf32>
    %cst_8 = arith.constant dense<0.000000e+00> : vector<16xf32>
    %18 = vector.multi_reduction <add>, %17, %cst_8 [1] : vector<16x128xf32> to vector<16xf32>
    %19 = vector.shape_cast %18 : vector<16xf32> to vector<16x1xf32>
    %cst_9 = arith.constant 1.600000e+01 : f32
    %20 = vector.broadcast %cst_9 : f32 to vector<16x1xf32>
    %21 = arith.divf %19, %20 : vector<16x1xf32>
    %cst_10 = arith.constant 9.99999974E-6 : f32
    %22 = vector.broadcast %cst_10 : f32 to vector<16x1xf32>
    %23 = arith.addf %21, %22 : vector<16x1xf32>
    %24 = math.rsqrt %23 : vector<16x1xf32>
    %25 = vector.broadcast %24 : vector<16x1xf32> to vector<16x128xf32>
    %26 = arith.mulf %14, %25 : vector<16x128xf32>
    %c0_11 = arith.constant 0 : index
    %c0_12 = arith.constant 0 : index
    %27 = vector.load %arg3[%c0_11, %c0_12] : memref<16x1xf32, #tpu.memory_space<vmem>>, vector<16x1xf32>
    %28 = vector.broadcast %27 : vector<16x1xf32> to vector<16x128xf32>
    %29 = arith.mulf %26, %28 : vector<16x128xf32>
    %c0_13 = arith.constant 0 : index
    %c0_14 = arith.constant 0 : index
    %30 = vector.load %arg4[%c0_13, %c0_14] : memref<16x1xf32, #tpu.memory_space<vmem>>, vector<16x1xf32>
    %31 = vector.broadcast %30 : vector<16x1xf32> to vector<16x128xf32>
    %32 = arith.addf %29, %31 : vector<16x128xf32>
    %c0_15 = arith.constant 0 : index
    %c0_16 = arith.constant 0 : index
    %c0_17 = arith.constant 0 : index
    %33 = vector.load %arg5[%c0_15, %c0_16, %c0_17] : memref<1x16x128xf32, #tpu.memory_space<vmem>>, vector<1x16x128xf32>
    %34 = vector.shape_cast %33 : vector<1x16x128xf32> to vector<16x128xf32>
    %35 = arith.addf %32, %34 : vector<16x128xf32>
    %cst_18 = arith.constant 0.000000e+00 : f32
    %36 = vector.broadcast %cst_18 : f32 to vector<16x128xf32>
    %37 = arith.maximumf %35, %36 : vector<16x128xf32>
    %c0_19 = arith.constant 0 : index
    %c0_20 = arith.constant 0 : index
    %c0_21 = arith.constant 0 : index
    %38 = vector.load %arg6[%c0_19, %c0_20, %c0_21] : memref<1x16x128xf32, #tpu.memory_space<vmem>>, vector<1x16x128xf32>
    %39 = vector.shape_cast %38 : vector<1x16x128xf32> to vector<16x128xf32>
    %40 = vector.shape_cast %37 : vector<16x128xf32> to vector<1x16x128xf32>
    tpu.vector_store %arg6[%c0_19, %c0_20, %c0_21], %40 {strides = array<i32>} : memref<1x16x128xf32, #tpu.memory_space<vmem>>, vector<1x16x128xf32>,
    return
  }
  func.func @transform_0(%arg0: i32) -> (i32, i32, i32) {
    %c0_i32 = arith.constant 0 : i32
    %c0_i32_0 = arith.constant 0 : i32
    %c0_i32_1 = arith.constant 0 : i32
    return %arg0, %c0_i32, %c0_i32_0 : i32, i32, i32
  }
  func.func @transform_1(%arg0: i32) -> (i32, i32) {
    %c0_i32 = arith.constant 0 : i32
    %c0_i32_0 = arith.constant 0 : i32
    %c0_i32_1 = arith.constant 0 : i32
    return %c0_i32, %c0_i32_0 : i32, i32
  }
  func.func @transform_2(%arg0: i32) -> (i32, i32) {
    %c0_i32 = arith.constant 0 : i32
    %c0_i32_0 = arith.constant 0 : i32
    %c0_i32_1 = arith.constant 0 : i32
    return %c0_i32, %c0_i32_0 : i32, i32
  }
  func.func @transform_3(%arg0: i32) -> (i32, i32) {
    %c0_i32 = arith.constant 0 : i32
    %c0_i32_0 = arith.constant 0 : i32
    %c0_i32_1 = arith.constant 0 : i32
    return %c0_i32, %c0_i32_0 : i32, i32
  }
  func.func @transform_4(%arg0: i32) -> (i32, i32, i32) {
    %c0_i32 = arith.constant 0 : i32
    %c0_i32_0 = arith.constant 0 : i32
    %c0_i32_1 = arith.constant 0 : i32
    return %arg0, %c0_i32, %c0_i32_0 : i32, i32, i32
  }
  func.func @transform_5(%arg0: i32) -> (i32, i32, i32) {
    %c0_i32 = arith.constant 0 : i32
    %c0_i32_0 = arith.constant 0 : i32
    %c0_i32_1 = arith.constant 0 : i32
    return %arg0, %c0_i32, %c0_i32_0 : i32, i32, i32
  }
}

module attributes {stable_mosaic.version = 11 : i64} {
  func.func @kernel(%arg0: i32, %arg1: memref<1x432x128xbf16, #tpu.memory_space<vmem>>, %arg2: memref<24x432xbf16, #tpu.memory_space<vmem>>, %arg3: memref<24x1xf32, #tpu.memory_space<vmem>>, %arg4: memref<24x1xf32, #tpu.memory_space<vmem>>, %arg5: memref<1x24x128xf32, #tpu.memory_space<vmem>>) attributes {dimension_semantics = [#tpu.dimension_semantics<parallel>], iteration_bounds = array<i64: 3>, scalar_prefetch = 0 : i64, scratch_operands = 0 : i64, tpu.core_type = #tpu.core_type<tc>, window_params = [{transform_indices = @transform_0, window_bounds = array<i64: 1, 432, 128>}, {pipeline_mode = #tpu.pipeline_mode<synchronous>, transform_indices = @transform_1, window_bounds = array<i64: 24, 432>}, {pipeline_mode = #tpu.pipeline_mode<synchronous>, transform_indices = @transform_2, window_bounds = array<i64: 24, 1>}, {pipeline_mode = #tpu.pipeline_mode<synchronous>, transform_indices = @transform_3, window_bounds = array<i64: 24, 1>}, {transform_indices = @transform_4, window_bounds = array<i64: 1, 24, 128>}]} {
    %c0 = arith.constant 0 : index
    %c0_0 = arith.constant 0 : index
    %c0_1 = arith.constant 0 : index
    %0 = vector.load %arg1[%c0, %c0_0, %c0_1] : memref<1x432x128xbf16, #tpu.memory_space<vmem>>, vector<1x432x128xbf16>
    %1 = vector.shape_cast %0 : vector<1x432x128xbf16> to vector<432x128xbf16>
    %c0_2 = arith.constant 0 : index
    %c0_3 = arith.constant 0 : index
    %2 = vector.load %arg2[%c0_2, %c0_3] : memref<24x432xbf16, #tpu.memory_space<vmem>>, vector<24x432xbf16>
    %cst = arith.constant dense<0.000000e+00> : vector<24x128xf32>
    %3 = tpu.matmul %2, %1, %cst {dimension_numbers = #tpu.dot_dimension_numbers<[1], [0], [0], [1], [0, 0, 1, 1], [], []>} : vector<24x432xbf16>, vector<432x128xbf16>, vector<24x128xf32> -> vector<24x128xf32>
    %4 = tpu.iota {dimensions = array<i32: 1>} : vector<24x128xi32>
    %c2_i32 = arith.constant 2 : i32
    %5 = vector.broadcast %c2_i32 : i32 to vector<24x128xi32>
    %6 = arith.cmpi slt, %4, %5 : vector<24x128xi32>
    %cst_4 = arith.constant 0.000000e+00 : f32
    %7 = vector.broadcast %cst_4 : f32 to vector<24x128xf32>
    %8 = arith.select %6, %3, %7 : vector<24x128xi1>, vector<24x128xf32>
    %cst_5 = arith.constant dense<0.000000e+00> : vector<24xf32>
    %9 = vector.multi_reduction <add>, %8, %cst_5 [1] : vector<24x128xf32> to vector<24xf32>
    %10 = vector.shape_cast %9 : vector<24xf32> to vector<24x1xf32>
    %cst_6 = arith.constant 2.000000e+00 : f32
    %11 = vector.broadcast %cst_6 : f32 to vector<24x1xf32>
    %12 = arith.divf %10, %11 : vector<24x1xf32>
    %13 = vector.broadcast %12 : vector<24x1xf32> to vector<24x128xf32>
    %14 = arith.subf %3, %13 : vector<24x128xf32>
    %cst_7 = arith.constant 0.000000e+00 : f32
    %15 = vector.broadcast %cst_7 : f32 to vector<24x128xf32>
    %16 = arith.select %6, %14, %15 : vector<24x128xi1>, vector<24x128xf32>
    %17 = arith.mulf %16, %16 : vector<24x128xf32>
    %cst_8 = arith.constant dense<0.000000e+00> : vector<24xf32>
    %18 = vector.multi_reduction <add>, %17, %cst_8 [1] : vector<24x128xf32> to vector<24xf32>
    %19 = vector.shape_cast %18 : vector<24xf32> to vector<24x1xf32>
    %cst_9 = arith.constant 2.000000e+00 : f32
    %20 = vector.broadcast %cst_9 : f32 to vector<24x1xf32>
    %21 = arith.divf %19, %20 : vector<24x1xf32>
    %cst_10 = arith.constant 9.99999974E-6 : f32
    %22 = vector.broadcast %cst_10 : f32 to vector<24x1xf32>
    %23 = arith.addf %21, %22 : vector<24x1xf32>
    %24 = math.rsqrt %23 : vector<24x1xf32>
    %25 = vector.broadcast %24 : vector<24x1xf32> to vector<24x128xf32>
    %26 = arith.mulf %14, %25 : vector<24x128xf32>
    %c0_11 = arith.constant 0 : index
    %c0_12 = arith.constant 0 : index
    %27 = vector.load %arg3[%c0_11, %c0_12] : memref<24x1xf32, #tpu.memory_space<vmem>>, vector<24x1xf32>
    %28 = vector.broadcast %27 : vector<24x1xf32> to vector<24x128xf32>
    %29 = arith.mulf %26, %28 : vector<24x128xf32>
    %c0_13 = arith.constant 0 : index
    %c0_14 = arith.constant 0 : index
    %30 = vector.load %arg4[%c0_13, %c0_14] : memref<24x1xf32, #tpu.memory_space<vmem>>, vector<24x1xf32>
    %31 = vector.broadcast %30 : vector<24x1xf32> to vector<24x128xf32>
    %32 = arith.addf %29, %31 : vector<24x128xf32>
    %cst_15 = arith.constant 0.000000e+00 : f32
    %33 = vector.broadcast %cst_15 : f32 to vector<24x128xf32>
    %34 = arith.maximumf %32, %33 : vector<24x128xf32>
    %c0_16 = arith.constant 0 : index
    %c0_17 = arith.constant 0 : index
    %c0_18 = arith.constant 0 : index
    %35 = vector.load %arg5[%c0_16, %c0_17, %c0_18] : memref<1x24x128xf32, #tpu.memory_space<vmem>>, vector<1x24x128xf32>
    %36 = vector.shape_cast %35 : vector<1x24x128xf32> to vector<24x128xf32>
    %37 = vector.shape_cast %34 : vector<24x128xf32> to vector<1x24x128xf32>
    tpu.vector_store %arg5[%c0_16, %c0_17, %c0_18], %37 {strides = array<i32>} : memref<1x24x128xf32, #tpu.memory_space<vmem>>, vector<1x24x128xf32>,
    return
  }
  func.func @transform_0(%arg0: i32) -> (i32, i32, i32) {
    %c0_i32 = arith.constant 0 : i32
    %c0_i32_0 = arith.constant 0 : i32
    %c0_i32_1 = arith.constant 0 : i32
    return %arg0, %c0_i32, %c0_i32_0 : i32, i32, i32
  }
  func.func @transform_1(%arg0: i32) -> (i32, i32) {
    %c0_i32 = arith.constant 0 : i32
    %c0_i32_0 = arith.constant 0 : i32
    %c0_i32_1 = arith.constant 0 : i32
    return %c0_i32, %c0_i32_0 : i32, i32
  }
  func.func @transform_2(%arg0: i32) -> (i32, i32) {
    %c0_i32 = arith.constant 0 : i32
    %c0_i32_0 = arith.constant 0 : i32
    %c0_i32_1 = arith.constant 0 : i32
    return %c0_i32, %c0_i32_0 : i32, i32
  }
  func.func @transform_3(%arg0: i32) -> (i32, i32) {
    %c0_i32 = arith.constant 0 : i32
    %c0_i32_0 = arith.constant 0 : i32
    %c0_i32_1 = arith.constant 0 : i32
    return %c0_i32, %c0_i32_0 : i32, i32
  }
  func.func @transform_4(%arg0: i32) -> (i32, i32, i32) {
    %c0_i32 = arith.constant 0 : i32
    %c0_i32_0 = arith.constant 0 : i32
    %c0_i32_1 = arith.constant 0 : i32
    return %arg0, %c0_i32, %c0_i32_0 : i32, i32, i32
  }
}

module attributes {stable_mosaic.version = 11 : i64} {
  func.func @kernel(%arg0: i32, %arg1: memref<1x16x128xbf16, #tpu.memory_space<vmem>>, %arg2: memref<24x16xbf16, #tpu.memory_space<vmem>>, %arg3: memref<24x1xf32, #tpu.memory_space<vmem>>, %arg4: memref<24x1xf32, #tpu.memory_space<vmem>>, %arg5: memref<1x24x128xf32, #tpu.memory_space<vmem>>) attributes {dimension_semantics = [#tpu.dimension_semantics<parallel>], iteration_bounds = array<i64: 3>, scalar_prefetch = 0 : i64, scratch_operands = 0 : i64, tpu.core_type = #tpu.core_type<tc>, window_params = [{transform_indices = @transform_0, window_bounds = array<i64: 1, 16, 128>}, {pipeline_mode = #tpu.pipeline_mode<synchronous>, transform_indices = @transform_1, window_bounds = array<i64: 24, 16>}, {pipeline_mode = #tpu.pipeline_mode<synchronous>, transform_indices = @transform_2, window_bounds = array<i64: 24, 1>}, {pipeline_mode = #tpu.pipeline_mode<synchronous>, transform_indices = @transform_3, window_bounds = array<i64: 24, 1>}, {transform_indices = @transform_4, window_bounds = array<i64: 1, 24, 128>}]} {
    %c0 = arith.constant 0 : index
    %c0_0 = arith.constant 0 : index
    %c0_1 = arith.constant 0 : index
    %0 = vector.load %arg1[%c0, %c0_0, %c0_1] : memref<1x16x128xbf16, #tpu.memory_space<vmem>>, vector<1x16x128xbf16>
    %1 = vector.shape_cast %0 : vector<1x16x128xbf16> to vector<16x128xbf16>
    %c0_2 = arith.constant 0 : index
    %c0_3 = arith.constant 0 : index
    %2 = vector.load %arg2[%c0_2, %c0_3] : memref<24x16xbf16, #tpu.memory_space<vmem>>, vector<24x16xbf16>
    %cst = arith.constant dense<0.000000e+00> : vector<24x128xf32>
    %3 = tpu.matmul %2, %1, %cst {dimension_numbers = #tpu.dot_dimension_numbers<[1], [0], [0], [1], [0, 0, 1, 1], [], []>} : vector<24x16xbf16>, vector<16x128xbf16>, vector<24x128xf32> -> vector<24x128xf32>
    %4 = tpu.iota {dimensions = array<i32: 1>} : vector<24x128xi32>
    %c2_i32 = arith.constant 2 : i32
    %5 = vector.broadcast %c2_i32 : i32 to vector<24x128xi32>
    %6 = arith.cmpi slt, %4, %5 : vector<24x128xi32>
    %cst_4 = arith.constant 0.000000e+00 : f32
    %7 = vector.broadcast %cst_4 : f32 to vector<24x128xf32>
    %8 = arith.select %6, %3, %7 : vector<24x128xi1>, vector<24x128xf32>
    %cst_5 = arith.constant dense<0.000000e+00> : vector<24xf32>
    %9 = vector.multi_reduction <add>, %8, %cst_5 [1] : vector<24x128xf32> to vector<24xf32>
    %10 = vector.shape_cast %9 : vector<24xf32> to vector<24x1xf32>
    %cst_6 = arith.constant 2.000000e+00 : f32
    %11 = vector.broadcast %cst_6 : f32 to vector<24x1xf32>
    %12 = arith.divf %10, %11 : vector<24x1xf32>
    %13 = vector.broadcast %12 : vector<24x1xf32> to vector<24x128xf32>
    %14 = arith.subf %3, %13 : vector<24x128xf32>
    %cst_7 = arith.constant 0.000000e+00 : f32
    %15 = vector.broadcast %cst_7 : f32 to vector<24x128xf32>
    %16 = arith.select %6, %14, %15 : vector<24x128xi1>, vector<24x128xf32>
    %17 = arith.mulf %16, %16 : vector<24x128xf32>
    %cst_8 = arith.constant dense<0.000000e+00> : vector<24xf32>
    %18 = vector.multi_reduction <add>, %17, %cst_8 [1] : vector<24x128xf32> to vector<24xf32>
    %19 = vector.shape_cast %18 : vector<24xf32> to vector<24x1xf32>
    %cst_9 = arith.constant 2.000000e+00 : f32
    %20 = vector.broadcast %cst_9 : f32 to vector<24x1xf32>
    %21 = arith.divf %19, %20 : vector<24x1xf32>
    %cst_10 = arith.constant 9.99999974E-6 : f32
    %22 = vector.broadcast %cst_10 : f32 to vector<24x1xf32>
    %23 = arith.addf %21, %22 : vector<24x1xf32>
    %24 = math.rsqrt %23 : vector<24x1xf32>
    %25 = vector.broadcast %24 : vector<24x1xf32> to vector<24x128xf32>
    %26 = arith.mulf %14, %25 : vector<24x128xf32>
    %c0_11 = arith.constant 0 : index
    %c0_12 = arith.constant 0 : index
    %27 = vector.load %arg3[%c0_11, %c0_12] : memref<24x1xf32, #tpu.memory_space<vmem>>, vector<24x1xf32>
    %28 = vector.broadcast %27 : vector<24x1xf32> to vector<24x128xf32>
    %29 = arith.mulf %26, %28 : vector<24x128xf32>
    %c0_13 = arith.constant 0 : index
    %c0_14 = arith.constant 0 : index
    %30 = vector.load %arg4[%c0_13, %c0_14] : memref<24x1xf32, #tpu.memory_space<vmem>>, vector<24x1xf32>
    %31 = vector.broadcast %30 : vector<24x1xf32> to vector<24x128xf32>
    %32 = arith.addf %29, %31 : vector<24x128xf32>
    %c0_15 = arith.constant 0 : index
    %c0_16 = arith.constant 0 : index
    %c0_17 = arith.constant 0 : index
    %33 = vector.load %arg5[%c0_15, %c0_16, %c0_17] : memref<1x24x128xf32, #tpu.memory_space<vmem>>, vector<1x24x128xf32>
    %34 = vector.shape_cast %33 : vector<1x24x128xf32> to vector<24x128xf32>
    %35 = vector.shape_cast %32 : vector<24x128xf32> to vector<1x24x128xf32>
    tpu.vector_store %arg5[%c0_15, %c0_16, %c0_17], %35 {strides = array<i32>} : memref<1x24x128xf32, #tpu.memory_space<vmem>>, vector<1x24x128xf32>,
    return
  }
  func.func @transform_0(%arg0: i32) -> (i32, i32, i32) {
    %c0_i32 = arith.constant 0 : i32
    %c0_i32_0 = arith.constant 0 : i32
    %c0_i32_1 = arith.constant 0 : i32
    return %arg0, %c0_i32, %c0_i32_0 : i32, i32, i32
  }
  func.func @transform_1(%arg0: i32) -> (i32, i32) {
    %c0_i32 = arith.constant 0 : i32
    %c0_i32_0 = arith.constant 0 : i32
    %c0_i32_1 = arith.constant 0 : i32
    return %c0_i32, %c0_i32_0 : i32, i32
  }
  func.func @transform_2(%arg0: i32) -> (i32, i32) {
    %c0_i32 = arith.constant 0 : i32
    %c0_i32_0 = arith.constant 0 : i32
    %c0_i32_1 = arith.constant 0 : i32
    return %c0_i32, %c0_i32_0 : i32, i32
  }
  func.func @transform_3(%arg0: i32) -> (i32, i32) {
    %c0_i32 = arith.constant 0 : i32
    %c0_i32_0 = arith.constant 0 : i32
    %c0_i32_1 = arith.constant 0 : i32
    return %c0_i32, %c0_i32_0 : i32, i32
  }
  func.func @transform_4(%arg0: i32) -> (i32, i32, i32) {
    %c0_i32 = arith.constant 0 : i32
    %c0_i32_0 = arith.constant 0 : i32
    %c0_i32_1 = arith.constant 0 : i32
    return %arg0, %c0_i32, %c0_i32_0 : i32, i32, i32
  }
}

module attributes {stable_mosaic.version = 11 : i64} {
  func.func @kernel(%arg0: i32, %arg1: memref<1x648x128xbf16, #tpu.memory_space<vmem>>, %arg2: memref<24x648xbf16, #tpu.memory_space<vmem>>, %arg3: memref<24x1xf32, #tpu.memory_space<vmem>>, %arg4: memref<24x1xf32, #tpu.memory_space<vmem>>, %arg5: memref<1x24x128xf32, #tpu.memory_space<vmem>>, %arg6: memref<1x24x128xf32, #tpu.memory_space<vmem>>) attributes {dimension_semantics = [#tpu.dimension_semantics<parallel>], iteration_bounds = array<i64: 3>, scalar_prefetch = 0 : i64, scratch_operands = 0 : i64, tpu.core_type = #tpu.core_type<tc>, window_params = [{transform_indices = @transform_0, window_bounds = array<i64: 1, 648, 128>}, {pipeline_mode = #tpu.pipeline_mode<synchronous>, transform_indices = @transform_1, window_bounds = array<i64: 24, 648>}, {pipeline_mode = #tpu.pipeline_mode<synchronous>, transform_indices = @transform_2, window_bounds = array<i64: 24, 1>}, {pipeline_mode = #tpu.pipeline_mode<synchronous>, transform_indices = @transform_3, window_bounds = array<i64: 24, 1>}, {transform_indices = @transform_4, window_bounds = array<i64: 1, 24, 128>}, {transform_indices = @transform_5, window_bounds = array<i64: 1, 24, 128>}]} {
    %c0 = arith.constant 0 : index
    %c0_0 = arith.constant 0 : index
    %c0_1 = arith.constant 0 : index
    %0 = vector.load %arg1[%c0, %c0_0, %c0_1] : memref<1x648x128xbf16, #tpu.memory_space<vmem>>, vector<1x648x128xbf16>
    %1 = vector.shape_cast %0 : vector<1x648x128xbf16> to vector<648x128xbf16>
    %c0_2 = arith.constant 0 : index
    %c0_3 = arith.constant 0 : index
    %2 = vector.load %arg2[%c0_2, %c0_3] : memref<24x648xbf16, #tpu.memory_space<vmem>>, vector<24x648xbf16>
    %cst = arith.constant dense<0.000000e+00> : vector<24x128xf32>
    %3 = tpu.matmul %2, %1, %cst {dimension_numbers = #tpu.dot_dimension_numbers<[1], [0], [0], [1], [0, 0, 1, 1], [], []>} : vector<24x648xbf16>, vector<648x128xbf16>, vector<24x128xf32> -> vector<24x128xf32>
    %4 = tpu.iota {dimensions = array<i32: 1>} : vector<24x128xi32>
    %c2_i32 = arith.constant 2 : i32
    %5 = vector.broadcast %c2_i32 : i32 to vector<24x128xi32>
    %6 = arith.cmpi slt, %4, %5 : vector<24x128xi32>
    %cst_4 = arith.constant 0.000000e+00 : f32
    %7 = vector.broadcast %cst_4 : f32 to vector<24x128xf32>
    %8 = arith.select %6, %3, %7 : vector<24x128xi1>, vector<24x128xf32>
    %cst_5 = arith.constant dense<0.000000e+00> : vector<24xf32>
    %9 = vector.multi_reduction <add>, %8, %cst_5 [1] : vector<24x128xf32> to vector<24xf32>
    %10 = vector.shape_cast %9 : vector<24xf32> to vector<24x1xf32>
    %cst_6 = arith.constant 2.000000e+00 : f32
    %11 = vector.broadcast %cst_6 : f32 to vector<24x1xf32>
    %12 = arith.divf %10, %11 : vector<24x1xf32>
    %13 = vector.broadcast %12 : vector<24x1xf32> to vector<24x128xf32>
    %14 = arith.subf %3, %13 : vector<24x128xf32>
    %cst_7 = arith.constant 0.000000e+00 : f32
    %15 = vector.broadcast %cst_7 : f32 to vector<24x128xf32>
    %16 = arith.select %6, %14, %15 : vector<24x128xi1>, vector<24x128xf32>
    %17 = arith.mulf %16, %16 : vector<24x128xf32>
    %cst_8 = arith.constant dense<0.000000e+00> : vector<24xf32>
    %18 = vector.multi_reduction <add>, %17, %cst_8 [1] : vector<24x128xf32> to vector<24xf32>
    %19 = vector.shape_cast %18 : vector<24xf32> to vector<24x1xf32>
    %cst_9 = arith.constant 2.000000e+00 : f32
    %20 = vector.broadcast %cst_9 : f32 to vector<24x1xf32>
    %21 = arith.divf %19, %20 : vector<24x1xf32>
    %cst_10 = arith.constant 9.99999974E-6 : f32
    %22 = vector.broadcast %cst_10 : f32 to vector<24x1xf32>
    %23 = arith.addf %21, %22 : vector<24x1xf32>
    %24 = math.rsqrt %23 : vector<24x1xf32>
    %25 = vector.broadcast %24 : vector<24x1xf32> to vector<24x128xf32>
    %26 = arith.mulf %14, %25 : vector<24x128xf32>
    %c0_11 = arith.constant 0 : index
    %c0_12 = arith.constant 0 : index
    %27 = vector.load %arg3[%c0_11, %c0_12] : memref<24x1xf32, #tpu.memory_space<vmem>>, vector<24x1xf32>
    %28 = vector.broadcast %27 : vector<24x1xf32> to vector<24x128xf32>
    %29 = arith.mulf %26, %28 : vector<24x128xf32>
    %c0_13 = arith.constant 0 : index
    %c0_14 = arith.constant 0 : index
    %30 = vector.load %arg4[%c0_13, %c0_14] : memref<24x1xf32, #tpu.memory_space<vmem>>, vector<24x1xf32>
    %31 = vector.broadcast %30 : vector<24x1xf32> to vector<24x128xf32>
    %32 = arith.addf %29, %31 : vector<24x128xf32>
    %c0_15 = arith.constant 0 : index
    %c0_16 = arith.constant 0 : index
    %c0_17 = arith.constant 0 : index
    %33 = vector.load %arg5[%c0_15, %c0_16, %c0_17] : memref<1x24x128xf32, #tpu.memory_space<vmem>>, vector<1x24x128xf32>
    %34 = vector.shape_cast %33 : vector<1x24x128xf32> to vector<24x128xf32>
    %35 = arith.addf %32, %34 : vector<24x128xf32>
    %cst_18 = arith.constant 0.000000e+00 : f32
    %36 = vector.broadcast %cst_18 : f32 to vector<24x128xf32>
    %37 = arith.maximumf %35, %36 : vector<24x128xf32>
    %c0_19 = arith.constant 0 : index
    %c0_20 = arith.constant 0 : index
    %c0_21 = arith.constant 0 : index
    %38 = vector.load %arg6[%c0_19, %c0_20, %c0_21] : memref<1x24x128xf32, #tpu.memory_space<vmem>>, vector<1x24x128xf32>
    %39 = vector.shape_cast %38 : vector<1x24x128xf32> to vector<24x128xf32>
    %40 = vector.shape_cast %37 : vector<24x128xf32> to vector<1x24x128xf32>
    tpu.vector_store %arg6[%c0_19, %c0_20, %c0_21], %40 {strides = array<i32>} : memref<1x24x128xf32, #tpu.memory_space<vmem>>, vector<1x24x128xf32>,
    return
  }
  func.func @transform_0(%arg0: i32) -> (i32, i32, i32) {
    %c0_i32 = arith.constant 0 : i32
    %c0_i32_0 = arith.constant 0 : i32
    %c0_i32_1 = arith.constant 0 : i32
    return %arg0, %c0_i32, %c0_i32_0 : i32, i32, i32
  }
  func.func @transform_1(%arg0: i32) -> (i32, i32) {
    %c0_i32 = arith.constant 0 : i32
    %c0_i32_0 = arith.constant 0 : i32
    %c0_i32_1 = arith.constant 0 : i32
    return %c0_i32, %c0_i32_0 : i32, i32
  }
  func.func @transform_2(%arg0: i32) -> (i32, i32) {
    %c0_i32 = arith.constant 0 : i32
    %c0_i32_0 = arith.constant 0 : i32
    %c0_i32_1 = arith.constant 0 : i32
    return %c0_i32, %c0_i32_0 : i32, i32
  }
  func.func @transform_3(%arg0: i32) -> (i32, i32) {
    %c0_i32 = arith.constant 0 : i32
    %c0_i32_0 = arith.constant 0 : i32
    %c0_i32_1 = arith.constant 0 : i32
    return %c0_i32, %c0_i32_0 : i32, i32
  }
  func.func @transform_4(%arg0: i32) -> (i32, i32, i32) {
    %c0_i32 = arith.constant 0 : i32
    %c0_i32_0 = arith.constant 0 : i32
    %c0_i32_1 = arith.constant 0 : i32
    return %arg0, %c0_i32, %c0_i32_0 : i32, i32, i32
  }
  func.func @transform_5(%arg0: i32) -> (i32, i32, i32) {
    %c0_i32 = arith.constant 0 : i32
    %c0_i32_0 = arith.constant 0 : i32
    %c0_i32_1 = arith.constant 0 : i32
    return %arg0, %c0_i32, %c0_i32_0 : i32, i32, i32
  }
}

module attributes {stable_mosaic.version = 11 : i64} {
  func.func @kernel(%arg0: i32, %arg1: memref<1x648x128xbf16, #tpu.memory_space<vmem>>, %arg2: memref<32x648xbf16, #tpu.memory_space<vmem>>, %arg3: memref<32x1xf32, #tpu.memory_space<vmem>>, %arg4: memref<32x1xf32, #tpu.memory_space<vmem>>, %arg5: memref<1x32x128xf32, #tpu.memory_space<vmem>>) attributes {dimension_semantics = [#tpu.dimension_semantics<parallel>], iteration_bounds = array<i64: 3>, scalar_prefetch = 0 : i64, scratch_operands = 0 : i64, tpu.core_type = #tpu.core_type<tc>, window_params = [{transform_indices = @transform_0, window_bounds = array<i64: 1, 648, 128>}, {pipeline_mode = #tpu.pipeline_mode<synchronous>, transform_indices = @transform_1, window_bounds = array<i64: 32, 648>}, {pipeline_mode = #tpu.pipeline_mode<synchronous>, transform_indices = @transform_2, window_bounds = array<i64: 32, 1>}, {pipeline_mode = #tpu.pipeline_mode<synchronous>, transform_indices = @transform_3, window_bounds = array<i64: 32, 1>}, {transform_indices = @transform_4, window_bounds = array<i64: 1, 32, 128>}]} {
    %c0 = arith.constant 0 : index
    %c0_0 = arith.constant 0 : index
    %c0_1 = arith.constant 0 : index
    %0 = vector.load %arg1[%c0, %c0_0, %c0_1] : memref<1x648x128xbf16, #tpu.memory_space<vmem>>, vector<1x648x128xbf16>
    %1 = vector.shape_cast %0 : vector<1x648x128xbf16> to vector<648x128xbf16>
    %c0_2 = arith.constant 0 : index
    %c0_3 = arith.constant 0 : index
    %2 = vector.load %arg2[%c0_2, %c0_3] : memref<32x648xbf16, #tpu.memory_space<vmem>>, vector<32x648xbf16>
    %cst = arith.constant dense<0.000000e+00> : vector<32x128xf32>
    %3 = tpu.matmul %2, %1, %cst {dimension_numbers = #tpu.dot_dimension_numbers<[1], [0], [0], [1], [0, 0, 1, 1], [], []>} : vector<32x648xbf16>, vector<648x128xbf16>, vector<32x128xf32> -> vector<32x128xf32>
    %4 = tpu.iota {dimensions = array<i32: 1>} : vector<32x128xi32>
    %c2_i32 = arith.constant 2 : i32
    %5 = vector.broadcast %c2_i32 : i32 to vector<32x128xi32>
    %6 = arith.cmpi slt, %4, %5 : vector<32x128xi32>
    %cst_4 = arith.constant 0.000000e+00 : f32
    %7 = vector.broadcast %cst_4 : f32 to vector<32x128xf32>
    %8 = arith.select %6, %3, %7 : vector<32x128xi1>, vector<32x128xf32>
    %cst_5 = arith.constant dense<0.000000e+00> : vector<32xf32>
    %9 = vector.multi_reduction <add>, %8, %cst_5 [1] : vector<32x128xf32> to vector<32xf32>
    %10 = vector.shape_cast %9 : vector<32xf32> to vector<32x1xf32>
    %cst_6 = arith.constant 2.000000e+00 : f32
    %11 = vector.broadcast %cst_6 : f32 to vector<32x1xf32>
    %12 = arith.divf %10, %11 : vector<32x1xf32>
    %13 = vector.broadcast %12 : vector<32x1xf32> to vector<32x128xf32>
    %14 = arith.subf %3, %13 : vector<32x128xf32>
    %cst_7 = arith.constant 0.000000e+00 : f32
    %15 = vector.broadcast %cst_7 : f32 to vector<32x128xf32>
    %16 = arith.select %6, %14, %15 : vector<32x128xi1>, vector<32x128xf32>
    %17 = arith.mulf %16, %16 : vector<32x128xf32>
    %cst_8 = arith.constant dense<0.000000e+00> : vector<32xf32>
    %18 = vector.multi_reduction <add>, %17, %cst_8 [1] : vector<32x128xf32> to vector<32xf32>
    %19 = vector.shape_cast %18 : vector<32xf32> to vector<32x1xf32>
    %cst_9 = arith.constant 2.000000e+00 : f32
    %20 = vector.broadcast %cst_9 : f32 to vector<32x1xf32>
    %21 = arith.divf %19, %20 : vector<32x1xf32>
    %cst_10 = arith.constant 9.99999974E-6 : f32
    %22 = vector.broadcast %cst_10 : f32 to vector<32x1xf32>
    %23 = arith.addf %21, %22 : vector<32x1xf32>
    %24 = math.rsqrt %23 : vector<32x1xf32>
    %25 = vector.broadcast %24 : vector<32x1xf32> to vector<32x128xf32>
    %26 = arith.mulf %14, %25 : vector<32x128xf32>
    %c0_11 = arith.constant 0 : index
    %c0_12 = arith.constant 0 : index
    %27 = vector.load %arg3[%c0_11, %c0_12] : memref<32x1xf32, #tpu.memory_space<vmem>>, vector<32x1xf32>
    %28 = vector.broadcast %27 : vector<32x1xf32> to vector<32x128xf32>
    %29 = arith.mulf %26, %28 : vector<32x128xf32>
    %c0_13 = arith.constant 0 : index
    %c0_14 = arith.constant 0 : index
    %30 = vector.load %arg4[%c0_13, %c0_14] : memref<32x1xf32, #tpu.memory_space<vmem>>, vector<32x1xf32>
    %31 = vector.broadcast %30 : vector<32x1xf32> to vector<32x128xf32>
    %32 = arith.addf %29, %31 : vector<32x128xf32>
    %cst_15 = arith.constant 0.000000e+00 : f32
    %33 = vector.broadcast %cst_15 : f32 to vector<32x128xf32>
    %34 = arith.maximumf %32, %33 : vector<32x128xf32>
    %c0_16 = arith.constant 0 : index
    %c0_17 = arith.constant 0 : index
    %c0_18 = arith.constant 0 : index
    %35 = vector.load %arg5[%c0_16, %c0_17, %c0_18] : memref<1x32x128xf32, #tpu.memory_space<vmem>>, vector<1x32x128xf32>
    %36 = vector.shape_cast %35 : vector<1x32x128xf32> to vector<32x128xf32>
    %37 = vector.shape_cast %34 : vector<32x128xf32> to vector<1x32x128xf32>
    tpu.vector_store %arg5[%c0_16, %c0_17, %c0_18], %37 {strides = array<i32>} : memref<1x32x128xf32, #tpu.memory_space<vmem>>, vector<1x32x128xf32>,
    return
  }
  func.func @transform_0(%arg0: i32) -> (i32, i32, i32) {
    %c0_i32 = arith.constant 0 : i32
    %c0_i32_0 = arith.constant 0 : i32
    %c0_i32_1 = arith.constant 0 : i32
    return %arg0, %c0_i32, %c0_i32_0 : i32, i32, i32
  }
  func.func @transform_1(%arg0: i32) -> (i32, i32) {
    %c0_i32 = arith.constant 0 : i32
    %c0_i32_0 = arith.constant 0 : i32
    %c0_i32_1 = arith.constant 0 : i32
    return %c0_i32, %c0_i32_0 : i32, i32
  }
  func.func @transform_2(%arg0: i32) -> (i32, i32) {
    %c0_i32 = arith.constant 0 : i32
    %c0_i32_0 = arith.constant 0 : i32
    %c0_i32_1 = arith.constant 0 : i32
    return %c0_i32, %c0_i32_0 : i32, i32
  }
  func.func @transform_3(%arg0: i32) -> (i32, i32) {
    %c0_i32 = arith.constant 0 : i32
    %c0_i32_0 = arith.constant 0 : i32
    %c0_i32_1 = arith.constant 0 : i32
    return %c0_i32, %c0_i32_0 : i32, i32
  }
  func.func @transform_4(%arg0: i32) -> (i32, i32, i32) {
    %c0_i32 = arith.constant 0 : i32
    %c0_i32_0 = arith.constant 0 : i32
    %c0_i32_1 = arith.constant 0 : i32
    return %arg0, %c0_i32, %c0_i32_0 : i32, i32, i32
  }
}

module attributes {stable_mosaic.version = 11 : i64} {
  func.func @kernel(%arg0: i32, %arg1: memref<1x24x128xbf16, #tpu.memory_space<vmem>>, %arg2: memref<32x24xbf16, #tpu.memory_space<vmem>>, %arg3: memref<32x1xf32, #tpu.memory_space<vmem>>, %arg4: memref<32x1xf32, #tpu.memory_space<vmem>>, %arg5: memref<1x32x128xf32, #tpu.memory_space<vmem>>) attributes {dimension_semantics = [#tpu.dimension_semantics<parallel>], iteration_bounds = array<i64: 3>, scalar_prefetch = 0 : i64, scratch_operands = 0 : i64, tpu.core_type = #tpu.core_type<tc>, window_params = [{transform_indices = @transform_0, window_bounds = array<i64: 1, 24, 128>}, {pipeline_mode = #tpu.pipeline_mode<synchronous>, transform_indices = @transform_1, window_bounds = array<i64: 32, 24>}, {pipeline_mode = #tpu.pipeline_mode<synchronous>, transform_indices = @transform_2, window_bounds = array<i64: 32, 1>}, {pipeline_mode = #tpu.pipeline_mode<synchronous>, transform_indices = @transform_3, window_bounds = array<i64: 32, 1>}, {transform_indices = @transform_4, window_bounds = array<i64: 1, 32, 128>}]} {
    %c0 = arith.constant 0 : index
    %c0_0 = arith.constant 0 : index
    %c0_1 = arith.constant 0 : index
    %0 = vector.load %arg1[%c0, %c0_0, %c0_1] : memref<1x24x128xbf16, #tpu.memory_space<vmem>>, vector<1x24x128xbf16>
    %1 = vector.shape_cast %0 : vector<1x24x128xbf16> to vector<24x128xbf16>
    %c0_2 = arith.constant 0 : index
    %c0_3 = arith.constant 0 : index
    %2 = vector.load %arg2[%c0_2, %c0_3] : memref<32x24xbf16, #tpu.memory_space<vmem>>, vector<32x24xbf16>
    %cst = arith.constant dense<0.000000e+00> : vector<32x128xf32>
    %3 = tpu.matmul %2, %1, %cst {dimension_numbers = #tpu.dot_dimension_numbers<[1], [0], [0], [1], [0, 0, 1, 1], [], []>} : vector<32x24xbf16>, vector<24x128xbf16>, vector<32x128xf32> -> vector<32x128xf32>
    %4 = tpu.iota {dimensions = array<i32: 1>} : vector<32x128xi32>
    %c2_i32 = arith.constant 2 : i32
    %5 = vector.broadcast %c2_i32 : i32 to vector<32x128xi32>
    %6 = arith.cmpi slt, %4, %5 : vector<32x128xi32>
    %cst_4 = arith.constant 0.000000e+00 : f32
    %7 = vector.broadcast %cst_4 : f32 to vector<32x128xf32>
    %8 = arith.select %6, %3, %7 : vector<32x128xi1>, vector<32x128xf32>
    %cst_5 = arith.constant dense<0.000000e+00> : vector<32xf32>
    %9 = vector.multi_reduction <add>, %8, %cst_5 [1] : vector<32x128xf32> to vector<32xf32>
    %10 = vector.shape_cast %9 : vector<32xf32> to vector<32x1xf32>
    %cst_6 = arith.constant 2.000000e+00 : f32
    %11 = vector.broadcast %cst_6 : f32 to vector<32x1xf32>
    %12 = arith.divf %10, %11 : vector<32x1xf32>
    %13 = vector.broadcast %12 : vector<32x1xf32> to vector<32x128xf32>
    %14 = arith.subf %3, %13 : vector<32x128xf32>
    %cst_7 = arith.constant 0.000000e+00 : f32
    %15 = vector.broadcast %cst_7 : f32 to vector<32x128xf32>
    %16 = arith.select %6, %14, %15 : vector<32x128xi1>, vector<32x128xf32>
    %17 = arith.mulf %16, %16 : vector<32x128xf32>
    %cst_8 = arith.constant dense<0.000000e+00> : vector<32xf32>
    %18 = vector.multi_reduction <add>, %17, %cst_8 [1] : vector<32x128xf32> to vector<32xf32>
    %19 = vector.shape_cast %18 : vector<32xf32> to vector<32x1xf32>
    %cst_9 = arith.constant 2.000000e+00 : f32
    %20 = vector.broadcast %cst_9 : f32 to vector<32x1xf32>
    %21 = arith.divf %19, %20 : vector<32x1xf32>
    %cst_10 = arith.constant 9.99999974E-6 : f32
    %22 = vector.broadcast %cst_10 : f32 to vector<32x1xf32>
    %23 = arith.addf %21, %22 : vector<32x1xf32>
    %24 = math.rsqrt %23 : vector<32x1xf32>
    %25 = vector.broadcast %24 : vector<32x1xf32> to vector<32x128xf32>
    %26 = arith.mulf %14, %25 : vector<32x128xf32>
    %c0_11 = arith.constant 0 : index
    %c0_12 = arith.constant 0 : index
    %27 = vector.load %arg3[%c0_11, %c0_12] : memref<32x1xf32, #tpu.memory_space<vmem>>, vector<32x1xf32>
    %28 = vector.broadcast %27 : vector<32x1xf32> to vector<32x128xf32>
    %29 = arith.mulf %26, %28 : vector<32x128xf32>
    %c0_13 = arith.constant 0 : index
    %c0_14 = arith.constant 0 : index
    %30 = vector.load %arg4[%c0_13, %c0_14] : memref<32x1xf32, #tpu.memory_space<vmem>>, vector<32x1xf32>
    %31 = vector.broadcast %30 : vector<32x1xf32> to vector<32x128xf32>
    %32 = arith.addf %29, %31 : vector<32x128xf32>
    %c0_15 = arith.constant 0 : index
    %c0_16 = arith.constant 0 : index
    %c0_17 = arith.constant 0 : index
    %33 = vector.load %arg5[%c0_15, %c0_16, %c0_17] : memref<1x32x128xf32, #tpu.memory_space<vmem>>, vector<1x32x128xf32>
    %34 = vector.shape_cast %33 : vector<1x32x128xf32> to vector<32x128xf32>
    %35 = vector.shape_cast %32 : vector<32x128xf32> to vector<1x32x128xf32>
    tpu.vector_store %arg5[%c0_15, %c0_16, %c0_17], %35 {strides = array<i32>} : memref<1x32x128xf32, #tpu.memory_space<vmem>>, vector<1x32x128xf32>,
    return
  }
  func.func @transform_0(%arg0: i32) -> (i32, i32, i32) {
    %c0_i32 = arith.constant 0 : i32
    %c0_i32_0 = arith.constant 0 : i32
    %c0_i32_1 = arith.constant 0 : i32
    return %arg0, %c0_i32, %c0_i32_0 : i32, i32, i32
  }
  func.func @transform_1(%arg0: i32) -> (i32, i32) {
    %c0_i32 = arith.constant 0 : i32
    %c0_i32_0 = arith.constant 0 : i32
    %c0_i32_1 = arith.constant 0 : i32
    return %c0_i32, %c0_i32_0 : i32, i32
  }
  func.func @transform_2(%arg0: i32) -> (i32, i32) {
    %c0_i32 = arith.constant 0 : i32
    %c0_i32_0 = arith.constant 0 : i32
    %c0_i32_1 = arith.constant 0 : i32
    return %c0_i32, %c0_i32_0 : i32, i32
  }
  func.func @transform_3(%arg0: i32) -> (i32, i32) {
    %c0_i32 = arith.constant 0 : i32
    %c0_i32_0 = arith.constant 0 : i32
    %c0_i32_1 = arith.constant 0 : i32
    return %c0_i32, %c0_i32_0 : i32, i32
  }
  func.func @transform_4(%arg0: i32) -> (i32, i32, i32) {
    %c0_i32 = arith.constant 0 : i32
    %c0_i32_0 = arith.constant 0 : i32
    %c0_i32_1 = arith.constant 0 : i32
    return %arg0, %c0_i32, %c0_i32_0 : i32, i32, i32
  }
}

module attributes {stable_mosaic.version = 11 : i64} {
  func.func @kernel(%arg0: i32, %arg1: memref<1x864x128xbf16, #tpu.memory_space<vmem>>, %arg2: memref<32x864xbf16, #tpu.memory_space<vmem>>, %arg3: memref<32x1xf32, #tpu.memory_space<vmem>>, %arg4: memref<32x1xf32, #tpu.memory_space<vmem>>, %arg5: memref<1x32x128xf32, #tpu.memory_space<vmem>>, %arg6: memref<1x32x128xf32, #tpu.memory_space<vmem>>) attributes {dimension_semantics = [#tpu.dimension_semantics<parallel>], iteration_bounds = array<i64: 3>, scalar_prefetch = 0 : i64, scratch_operands = 0 : i64, tpu.core_type = #tpu.core_type<tc>, window_params = [{transform_indices = @transform_0, window_bounds = array<i64: 1, 864, 128>}, {pipeline_mode = #tpu.pipeline_mode<synchronous>, transform_indices = @transform_1, window_bounds = array<i64: 32, 864>}, {pipeline_mode = #tpu.pipeline_mode<synchronous>, transform_indices = @transform_2, window_bounds = array<i64: 32, 1>}, {pipeline_mode = #tpu.pipeline_mode<synchronous>, transform_indices = @transform_3, window_bounds = array<i64: 32, 1>}, {transform_indices = @transform_4, window_bounds = array<i64: 1, 32, 128>}, {transform_indices = @transform_5, window_bounds = array<i64: 1, 32, 128>}]} {
    %c0 = arith.constant 0 : index
    %c0_0 = arith.constant 0 : index
    %c0_1 = arith.constant 0 : index
    %0 = vector.load %arg1[%c0, %c0_0, %c0_1] : memref<1x864x128xbf16, #tpu.memory_space<vmem>>, vector<1x864x128xbf16>
    %1 = vector.shape_cast %0 : vector<1x864x128xbf16> to vector<864x128xbf16>
    %c0_2 = arith.constant 0 : index
    %c0_3 = arith.constant 0 : index
    %2 = vector.load %arg2[%c0_2, %c0_3] : memref<32x864xbf16, #tpu.memory_space<vmem>>, vector<32x864xbf16>
    %cst = arith.constant dense<0.000000e+00> : vector<32x128xf32>
    %3 = tpu.matmul %2, %1, %cst {dimension_numbers = #tpu.dot_dimension_numbers<[1], [0], [0], [1], [0, 0, 1, 1], [], []>} : vector<32x864xbf16>, vector<864x128xbf16>, vector<32x128xf32> -> vector<32x128xf32>
    %4 = tpu.iota {dimensions = array<i32: 1>} : vector<32x128xi32>
    %c2_i32 = arith.constant 2 : i32
    %5 = vector.broadcast %c2_i32 : i32 to vector<32x128xi32>
    %6 = arith.cmpi slt, %4, %5 : vector<32x128xi32>
    %cst_4 = arith.constant 0.000000e+00 : f32
    %7 = vector.broadcast %cst_4 : f32 to vector<32x128xf32>
    %8 = arith.select %6, %3, %7 : vector<32x128xi1>, vector<32x128xf32>
    %cst_5 = arith.constant dense<0.000000e+00> : vector<32xf32>
    %9 = vector.multi_reduction <add>, %8, %cst_5 [1] : vector<32x128xf32> to vector<32xf32>
    %10 = vector.shape_cast %9 : vector<32xf32> to vector<32x1xf32>
    %cst_6 = arith.constant 2.000000e+00 : f32
    %11 = vector.broadcast %cst_6 : f32 to vector<32x1xf32>
    %12 = arith.divf %10, %11 : vector<32x1xf32>
    %13 = vector.broadcast %12 : vector<32x1xf32> to vector<32x128xf32>
    %14 = arith.subf %3, %13 : vector<32x128xf32>
    %cst_7 = arith.constant 0.000000e+00 : f32
    %15 = vector.broadcast %cst_7 : f32 to vector<32x128xf32>
    %16 = arith.select %6, %14, %15 : vector<32x128xi1>, vector<32x128xf32>
    %17 = arith.mulf %16, %16 : vector<32x128xf32>
    %cst_8 = arith.constant dense<0.000000e+00> : vector<32xf32>
    %18 = vector.multi_reduction <add>, %17, %cst_8 [1] : vector<32x128xf32> to vector<32xf32>
    %19 = vector.shape_cast %18 : vector<32xf32> to vector<32x1xf32>
    %cst_9 = arith.constant 2.000000e+00 : f32
    %20 = vector.broadcast %cst_9 : f32 to vector<32x1xf32>
    %21 = arith.divf %19, %20 : vector<32x1xf32>
    %cst_10 = arith.constant 9.99999974E-6 : f32
    %22 = vector.broadcast %cst_10 : f32 to vector<32x1xf32>
    %23 = arith.addf %21, %22 : vector<32x1xf32>
    %24 = math.rsqrt %23 : vector<32x1xf32>
    %25 = vector.broadcast %24 : vector<32x1xf32> to vector<32x128xf32>
    %26 = arith.mulf %14, %25 : vector<32x128xf32>
    %c0_11 = arith.constant 0 : index
    %c0_12 = arith.constant 0 : index
    %27 = vector.load %arg3[%c0_11, %c0_12] : memref<32x1xf32, #tpu.memory_space<vmem>>, vector<32x1xf32>
    %28 = vector.broadcast %27 : vector<32x1xf32> to vector<32x128xf32>
    %29 = arith.mulf %26, %28 : vector<32x128xf32>
    %c0_13 = arith.constant 0 : index
    %c0_14 = arith.constant 0 : index
    %30 = vector.load %arg4[%c0_13, %c0_14] : memref<32x1xf32, #tpu.memory_space<vmem>>, vector<32x1xf32>
    %31 = vector.broadcast %30 : vector<32x1xf32> to vector<32x128xf32>
    %32 = arith.addf %29, %31 : vector<32x128xf32>
    %c0_15 = arith.constant 0 : index
    %c0_16 = arith.constant 0 : index
    %c0_17 = arith.constant 0 : index
    %33 = vector.load %arg5[%c0_15, %c0_16, %c0_17] : memref<1x32x128xf32, #tpu.memory_space<vmem>>, vector<1x32x128xf32>
    %34 = vector.shape_cast %33 : vector<1x32x128xf32> to vector<32x128xf32>
    %35 = arith.addf %32, %34 : vector<32x128xf32>
    %cst_18 = arith.constant 0.000000e+00 : f32
    %36 = vector.broadcast %cst_18 : f32 to vector<32x128xf32>
    %37 = arith.maximumf %35, %36 : vector<32x128xf32>
    %c0_19 = arith.constant 0 : index
    %c0_20 = arith.constant 0 : index
    %c0_21 = arith.constant 0 : index
    %38 = vector.load %arg6[%c0_19, %c0_20, %c0_21] : memref<1x32x128xf32, #tpu.memory_space<vmem>>, vector<1x32x128xf32>
    %39 = vector.shape_cast %38 : vector<1x32x128xf32> to vector<32x128xf32>
    %40 = vector.shape_cast %37 : vector<32x128xf32> to vector<1x32x128xf32>
    tpu.vector_store %arg6[%c0_19, %c0_20, %c0_21], %40 {strides = array<i32>} : memref<1x32x128xf32, #tpu.memory_space<vmem>>, vector<1x32x128xf32>,
    return
  }
  func.func @transform_0(%arg0: i32) -> (i32, i32, i32) {
    %c0_i32 = arith.constant 0 : i32
    %c0_i32_0 = arith.constant 0 : i32
    %c0_i32_1 = arith.constant 0 : i32
    return %arg0, %c0_i32, %c0_i32_0 : i32, i32, i32
  }
  func.func @transform_1(%arg0: i32) -> (i32, i32) {
    %c0_i32 = arith.constant 0 : i32
    %c0_i32_0 = arith.constant 0 : i32
    %c0_i32_1 = arith.constant 0 : i32
    return %c0_i32, %c0_i32_0 : i32, i32
  }
  func.func @transform_2(%arg0: i32) -> (i32, i32) {
    %c0_i32 = arith.constant 0 : i32
    %c0_i32_0 = arith.constant 0 : i32
    %c0_i32_1 = arith.constant 0 : i32
    return %c0_i32, %c0_i32_0 : i32, i32
  }
  func.func @transform_3(%arg0: i32) -> (i32, i32) {
    %c0_i32 = arith.constant 0 : i32
    %c0_i32_0 = arith.constant 0 : i32
    %c0_i32_1 = arith.constant 0 : i32
    return %c0_i32, %c0_i32_0 : i32, i32
  }
  func.func @transform_4(%arg0: i32) -> (i32, i32, i32) {
    %c0_i32 = arith.constant 0 : i32
    %c0_i32_0 = arith.constant 0 : i32
    %c0_i32_1 = arith.constant 0 : i32
    return %arg0, %c0_i32, %c0_i32_0 : i32, i32, i32
  }
  func.func @transform_5(%arg0: i32) -> (i32, i32, i32) {
    %c0_i32 = arith.constant 0 : i32
    %c0_i32_0 = arith.constant 0 : i32
    %c0_i32_1 = arith.constant 0 : i32
    return %arg0, %c0_i32, %c0_i32_0 : i32, i32, i32
  }
}

module attributes {stable_mosaic.version = 11 : i64} {
  func.func @kernel(%arg0: memref<54x27xf32, #tpu.memory_space<vmem>>, %arg1: memref<16x54xf32, #tpu.memory_space<vmem>>, %arg2: memref<16x16xf32, #tpu.memory_space<vmem>>, %arg3: memref<27x24xf32, #tpu.memory_space<vmem>>, %arg4: memref<1x24xf32, #tpu.memory_space<vmem>>, %arg5: memref<16x24xf32, #tpu.memory_space<vmem>>, %arg6: memref<1x24xf32, #tpu.memory_space<vmem>>, %arg7: memref<24x24xf32, #tpu.memory_space<vmem>>, %arg8: memref<1x24xf32, #tpu.memory_space<vmem>>, %arg9: memref<24x24xf32, #tpu.memory_space<vmem>>, %arg10: memref<1x24xf32, #tpu.memory_space<vmem>>, %arg11: memref<24x24xf32, #tpu.memory_space<vmem>>, %arg12: memref<1x24xf32, #tpu.memory_space<vmem>>, %arg13: memref<1x24xf32, #tpu.memory_space<vmem>>, %arg14: memref<24x24xf32, #tpu.memory_space<vmem>>, %arg15: memref<1x24xf32, #tpu.memory_space<vmem>>, %arg16: memref<24x24xf32, #tpu.memory_space<vmem>>, %arg17: memref<1x24xf32, #tpu.memory_space<vmem>>, %arg18: memref<24x24xf32, #tpu.memory_space<vmem>>, %arg19: memref<1x24xf32, #tpu.memory_space<vmem>>, %arg20: memref<8x24x96xf32, #tpu.memory_space<vmem>>, %arg21: memref<1x96xf32, #tpu.memory_space<vmem>>, %arg22: memref<1x96xf32, #tpu.memory_space<vmem>>, %arg23: memref<1x96xf32, #tpu.memory_space<vmem>>, %arg24: memref<2x96xf32, #tpu.memory_space<vmem>>) attributes {dimension_semantics = [], scalar_prefetch = 0 : i64, scratch_operands = 0 : i64, tpu.core_type = #tpu.core_type<tc>} {
    %c0 = arith.constant 0 : index
    %c0_0 = arith.constant 0 : index
    %0 = vector.load %arg0[%c0, %c0_0] : memref<54x27xf32, #tpu.memory_space<vmem>>, vector<54x27xf32>
    %c0_1 = arith.constant 0 : index
    %c0_2 = arith.constant 0 : index
    %1 = vector.load %arg3[%c0_1, %c0_2] : memref<27x24xf32, #tpu.memory_space<vmem>>, vector<27x24xf32>
    %cst = arith.constant dense<0.000000e+00> : vector<54x24xf32>
    %2 = tpu.matmul %0, %1, %cst {dimension_numbers = #tpu.dot_dimension_numbers<[1], [0], [0], [1], [0, 0, 1, 1], [], []>} : vector<54x27xf32>, vector<27x24xf32>, vector<54x24xf32> -> vector<54x24xf32>
    %c0_3 = arith.constant 0 : index
    %c0_4 = arith.constant 0 : index
    %3 = vector.load %arg4[%c0_3, %c0_4] : memref<1x24xf32, #tpu.memory_space<vmem>>, vector<1x24xf32>
    %4 = vector.broadcast %3 : vector<1x24xf32> to vector<54x24xf32>
    %5 = arith.addf %2, %4 : vector<54x24xf32>
    %c0_5 = arith.constant 0 : index
    %c0_6 = arith.constant 0 : index
    %6 = vector.load %arg1[%c0_5, %c0_6] : memref<16x54xf32, #tpu.memory_space<vmem>>, vector<16x54xf32>
    %cst_7 = arith.constant dense<0.000000e+00> : vector<16x24xf32>
    %7 = tpu.matmul %6, %5, %cst_7 {dimension_numbers = #tpu.dot_dimension_numbers<[1], [0], [0], [1], [0, 0, 1, 1], [], []>} : vector<16x54xf32>, vector<54x24xf32>, vector<16x24xf32> -> vector<16x24xf32>
    %c0_8 = arith.constant 0 : index
    %c0_9 = arith.constant 0 : index
    %8 = vector.load %arg5[%c0_8, %c0_9] : memref<16x24xf32, #tpu.memory_space<vmem>>, vector<16x24xf32>
    %9 = arith.addf %7, %8 : vector<16x24xf32>
    %c0_10 = arith.constant 0 : index
    %c0_11 = arith.constant 0 : index
    %10 = vector.load %arg2[%c0_10, %c0_11] : memref<16x16xf32, #tpu.memory_space<vmem>>, vector<16x16xf32>
    %c0_12 = arith.constant 0 : index
    %c0_13 = arith.constant 0 : index
    %11 = vector.load %arg6[%c0_12, %c0_13] : memref<1x24xf32, #tpu.memory_space<vmem>>, vector<1x24xf32>
    %c0_14 = arith.constant 0 : index
    %c0_15 = arith.constant 0 : index
    %12 = vector.load %arg7[%c0_14, %c0_15] : memref<24x24xf32, #tpu.memory_space<vmem>>, vector<24x24xf32>
    %c0_16 = arith.constant 0 : index
    %c0_17 = arith.constant 0 : index
    %13 = vector.load %arg8[%c0_16, %c0_17] : memref<1x24xf32, #tpu.memory_space<vmem>>, vector<1x24xf32>
    %c0_18 = arith.constant 0 : index
    %c0_19 = arith.constant 0 : index
    %14 = vector.load %arg9[%c0_18, %c0_19] : memref<24x24xf32, #tpu.memory_space<vmem>>, vector<24x24xf32>
    %c0_20 = arith.constant 0 : index
    %c0_21 = arith.constant 0 : index
    %15 = vector.load %arg10[%c0_20, %c0_21] : memref<1x24xf32, #tpu.memory_space<vmem>>, vector<1x24xf32>
    %c0_22 = arith.constant 0 : index
    %c0_23 = arith.constant 0 : index
    %16 = vector.load %arg11[%c0_22, %c0_23] : memref<24x24xf32, #tpu.memory_space<vmem>>, vector<24x24xf32>
    %c0_24 = arith.constant 0 : index
    %c0_25 = arith.constant 0 : index
    %17 = vector.load %arg12[%c0_24, %c0_25] : memref<1x24xf32, #tpu.memory_space<vmem>>, vector<1x24xf32>
    %18 = vector.broadcast %11 : vector<1x24xf32> to vector<16x24xf32>
    %19 = arith.addf %9, %18 : vector<16x24xf32>
    %cst_26 = arith.constant dense<0.000000e+00> : vector<16x24xf32>
    %20 = tpu.matmul %19, %12, %cst_26 {dimension_numbers = #tpu.dot_dimension_numbers<[1], [0], [0], [1], [0, 0, 1, 1], [], []>} : vector<16x24xf32>, vector<24x24xf32>, vector<16x24xf32> -> vector<16x24xf32>
    %21 = vector.broadcast %13 : vector<1x24xf32> to vector<16x24xf32>
    %22 = arith.addf %20, %21 : vector<16x24xf32>
    %cst_27 = arith.constant dense<0.000000e+00> : vector<16x24xf32>
    %23 = tpu.matmul %19, %14, %cst_27 {dimension_numbers = #tpu.dot_dimension_numbers<[1], [0], [0], [1], [0, 0, 1, 1], [], []>} : vector<16x24xf32>, vector<24x24xf32>, vector<16x24xf32> -> vector<16x24xf32>
    %24 = vector.broadcast %15 : vector<1x24xf32> to vector<16x24xf32>
    %25 = arith.addf %23, %24 : vector<16x24xf32>
    %cst_28 = arith.constant dense<0.000000e+00> : vector<16x24xf32>
    %26 = tpu.matmul %19, %16, %cst_28 {dimension_numbers = #tpu.dot_dimension_numbers<[1], [0], [0], [1], [0, 0, 1, 1], [], []>} : vector<16x24xf32>, vector<24x24xf32>, vector<16x24xf32> -> vector<16x24xf32>
    %27 = vector.broadcast %17 : vector<1x24xf32> to vector<16x24xf32>
    %28 = arith.addf %26, %27 : vector<16x24xf32>
    %cst_29 = arith.constant dense<0.000000e+00> : vector<16x16xf32>
    %29 = tpu.matmul %22, %25, %cst_29 {dimension_numbers = #tpu.dot_dimension_numbers<[1], [1], [0], [0], [0, 0, 1, 0], [], []>} : vector<16x24xf32>, vector<16x24xf32>, vector<16x16xf32> -> vector<16x16xf32>
    %cst_30 = arith.constant 0.204124153 : f32
    %30 = vector.broadcast %cst_30 : f32 to vector<16x16xf32>
    %31 = arith.mulf %29, %30 : vector<16x16xf32>
    %cst_31 = arith.constant 5.000000e-01 : f32
    %32 = vector.broadcast %cst_31 : f32 to vector<16x16xf32>
    %33 = arith.cmpf ogt, %10, %32 : vector<16x16xf32>
    %cst_32 = arith.constant -1.000000e+30 : f32
    %34 = vector.broadcast %cst_32 : f32 to vector<16x16xf32>
    %35 = arith.select %33, %31, %34 : vector<16x16xi1>, vector<16x16xf32>
    %cst_33 = arith.constant dense<0xFF800000> : vector<16xf32>
    %36 = vector.multi_reduction <maximumf>, %35, %cst_33 [1] : vector<16x16xf32> to vector<16xf32>
    %37 = vector.shape_cast %36 : vector<16xf32> to vector<16x1xf32>
    %38 = vector.broadcast %37 : vector<16x1xf32> to vector<16x16xf32>
    %39 = arith.subf %35, %38 : vector<16x16xf32>
    %40 = math.exp %39 : vector<16x16xf32>
    %cst_34 = arith.constant dense<0.000000e+00> : vector<16xf32>
    %41 = vector.multi_reduction <add>, %40, %cst_34 [1] : vector<16x16xf32> to vector<16xf32>
    %42 = vector.shape_cast %41 : vector<16xf32> to vector<16x1xf32>
    %43 = vector.broadcast %42 : vector<16x1xf32> to vector<16x16xf32>
    %44 = arith.divf %40, %43 : vector<16x16xf32>
    %cst_35 = arith.constant dense<0.000000e+00> : vector<16x24xf32>
    %45 = tpu.matmul %44, %28, %cst_35 {dimension_numbers = #tpu.dot_dimension_numbers<[1], [0], [0], [1], [0, 0, 1, 1], [], []>} : vector<16x16xf32>, vector<16x24xf32>, vector<16x24xf32> -> vector<16x24xf32>
    %46 = arith.addf %45, %19 : vector<16x24xf32>
    %c0_36 = arith.constant 0 : index
    %c0_37 = arith.constant 0 : index
    %47 = vector.load %arg13[%c0_36, %c0_37] : memref<1x24xf32, #tpu.memory_space<vmem>>, vector<1x24xf32>
    %c0_38 = arith.constant 0 : index
    %c0_39 = arith.constant 0 : index
    %48 = vector.load %arg14[%c0_38, %c0_39] : memref<24x24xf32, #tpu.memory_space<vmem>>, vector<24x24xf32>
    %c0_40 = arith.constant 0 : index
    %c0_41 = arith.constant 0 : index
    %49 = vector.load %arg15[%c0_40, %c0_41] : memref<1x24xf32, #tpu.memory_space<vmem>>, vector<1x24xf32>
    %c0_42 = arith.constant 0 : index
    %c0_43 = arith.constant 0 : index
    %50 = vector.load %arg16[%c0_42, %c0_43] : memref<24x24xf32, #tpu.memory_space<vmem>>, vector<24x24xf32>
    %c0_44 = arith.constant 0 : index
    %c0_45 = arith.constant 0 : index
    %51 = vector.load %arg17[%c0_44, %c0_45] : memref<1x24xf32, #tpu.memory_space<vmem>>, vector<1x24xf32>
    %c0_46 = arith.constant 0 : index
    %c0_47 = arith.constant 0 : index
    %52 = vector.load %arg18[%c0_46, %c0_47] : memref<24x24xf32, #tpu.memory_space<vmem>>, vector<24x24xf32>
    %c0_48 = arith.constant 0 : index
    %c0_49 = arith.constant 0 : index
    %53 = vector.load %arg19[%c0_48, %c0_49] : memref<1x24xf32, #tpu.memory_space<vmem>>, vector<1x24xf32>
    %54 = vector.broadcast %47 : vector<1x24xf32> to vector<16x24xf32>
    %55 = arith.addf %46, %54 : vector<16x24xf32>
    %cst_50 = arith.constant dense<0.000000e+00> : vector<16x24xf32>
    %56 = tpu.matmul %55, %48, %cst_50 {dimension_numbers = #tpu.dot_dimension_numbers<[1], [0], [0], [1], [0, 0, 1, 1], [], []>} : vector<16x24xf32>, vector<24x24xf32>, vector<16x24xf32> -> vector<16x24xf32>
    %57 = vector.broadcast %49 : vector<1x24xf32> to vector<16x24xf32>
    %58 = arith.addf %56, %57 : vector<16x24xf32>
    %cst_51 = arith.constant dense<0.000000e+00> : vector<16x24xf32>
    %59 = tpu.matmul %55, %50, %cst_51 {dimension_numbers = #tpu.dot_dimension_numbers<[1], [0], [0], [1], [0, 0, 1, 1], [], []>} : vector<16x24xf32>, vector<24x24xf32>, vector<16x24xf32> -> vector<16x24xf32>
    %60 = vector.broadcast %51 : vector<1x24xf32> to vector<16x24xf32>
    %61 = arith.addf %59, %60 : vector<16x24xf32>
    %cst_52 = arith.constant dense<0.000000e+00> : vector<16x24xf32>
    %62 = tpu.matmul %55, %52, %cst_52 {dimension_numbers = #tpu.dot_dimension_numbers<[1], [0], [0], [1], [0, 0, 1, 1], [], []>} : vector<16x24xf32>, vector<24x24xf32>, vector<16x24xf32> -> vector<16x24xf32>
    %63 = vector.broadcast %53 : vector<1x24xf32> to vector<16x24xf32>
    %64 = arith.addf %62, %63 : vector<16x24xf32>
    %cst_53 = arith.constant dense<0.000000e+00> : vector<16x16xf32>
    %65 = tpu.matmul %58, %61, %cst_53 {dimension_numbers = #tpu.dot_dimension_numbers<[1], [1], [0], [0], [0, 0, 1, 0], [], []>} : vector<16x24xf32>, vector<16x24xf32>, vector<16x16xf32> -> vector<16x16xf32>
    %cst_54 = arith.constant 0.204124153 : f32
    %66 = vector.broadcast %cst_54 : f32 to vector<16x16xf32>
    %67 = arith.mulf %65, %66 : vector<16x16xf32>
    %cst_55 = arith.constant 5.000000e-01 : f32
    %68 = vector.broadcast %cst_55 : f32 to vector<16x16xf32>
    %69 = arith.cmpf ogt, %10, %68 : vector<16x16xf32>
    %cst_56 = arith.constant -1.000000e+30 : f32
    %70 = vector.broadcast %cst_56 : f32 to vector<16x16xf32>
    %71 = arith.select %69, %67, %70 : vector<16x16xi1>, vector<16x16xf32>
    %cst_57 = arith.constant dense<0xFF800000> : vector<16xf32>
    %72 = vector.multi_reduction <maximumf>, %71, %cst_57 [1] : vector<16x16xf32> to vector<16xf32>
    %73 = vector.shape_cast %72 : vector<16xf32> to vector<16x1xf32>
    %74 = vector.broadcast %73 : vector<16x1xf32> to vector<16x16xf32>
    %75 = arith.subf %71, %74 : vector<16x16xf32>
    %76 = math.exp %75 : vector<16x16xf32>
    %cst_58 = arith.constant dense<0.000000e+00> : vector<16xf32>
    %77 = vector.multi_reduction <add>, %76, %cst_58 [1] : vector<16x16xf32> to vector<16xf32>
    %78 = vector.shape_cast %77 : vector<16xf32> to vector<16x1xf32>
    %79 = vector.broadcast %78 : vector<16x1xf32> to vector<16x16xf32>
    %80 = arith.divf %76, %79 : vector<16x16xf32>
    %cst_59 = arith.constant dense<0.000000e+00> : vector<16x24xf32>
    %81 = tpu.matmul %80, %64, %cst_59 {dimension_numbers = #tpu.dot_dimension_numbers<[1], [0], [0], [1], [0, 0, 1, 1], [], []>} : vector<16x16xf32>, vector<16x24xf32>, vector<16x24xf32> -> vector<16x24xf32>
    %82 = arith.addf %81, %55 : vector<16x24xf32>
    %c0_60 = arith.constant 0 : index
    %c0_61 = arith.constant 0 : index
    %c0_62 = arith.constant 0 : index
    %83 = vector.load %arg20[%c0_60, %c0_61, %c0_62] : memref<8x24x96xf32, #tpu.memory_space<vmem>>, vector<8x24x96xf32>
    %cst_63 = arith.constant 0.000000e+00 : f32
    %84 = vector.broadcast %cst_63 : f32 to vector<2x96xf32>
    %85 = vector.extract_strided_slice %82 {offsets = [0, 0], sizes = [2, 24], strides = [1, 1]} : vector<16x24xf32> to vector<2x24xf32>
    %86 = vector.extract_strided_slice %83 {offsets = [0, 0, 0], sizes = [1, 24, 96], strides = [1, 1, 1]} : vector<8x24x96xf32> to vector<1x24x96xf32>
    %87 = vector.shape_cast %86 : vector<1x24x96xf32> to vector<24x96xf32>
    %cst_64 = arith.constant dense<0.000000e+00> : vector<2x96xf32>
    %88 = tpu.matmul %85, %87, %cst_64 {dimension_numbers = #tpu.dot_dimension_numbers<[1], [0], [0], [1], [0, 0, 1, 1], [], []>} : vector<2x24xf32>, vector<24x96xf32>, vector<2x96xf32> -> vector<2x96xf32>
    %89 = arith.addf %84, %88 : vector<2x96xf32>
    %90 = vector.extract_strided_slice %82 {offsets = [2, 0], sizes = [2, 24], strides = [1, 1]} : vector<16x24xf32> to vector<2x24xf32>
    %91 = vector.extract_strided_slice %83 {offsets = [1, 0, 0], sizes = [1, 24, 96], strides = [1, 1, 1]} : vector<8x24x96xf32> to vector<1x24x96xf32>
    %92 = vector.shape_cast %91 : vector<1x24x96xf32> to vector<24x96xf32>
    %cst_65 = arith.constant dense<0.000000e+00> : vector<2x96xf32>
    %93 = tpu.matmul %90, %92, %cst_65 {dimension_numbers = #tpu.dot_dimension_numbers<[1], [0], [0], [1], [0, 0, 1, 1], [], []>} : vector<2x24xf32>, vector<24x96xf32>, vector<2x96xf32> -> vector<2x96xf32>
    %94 = arith.addf %89, %93 : vector<2x96xf32>
    %95 = vector.extract_strided_slice %82 {offsets = [4, 0], sizes = [2, 24], strides = [1, 1]} : vector<16x24xf32> to vector<2x24xf32>
    %96 = vector.extract_strided_slice %83 {offsets = [2, 0, 0], sizes = [1, 24, 96], strides = [1, 1, 1]} : vector<8x24x96xf32> to vector<1x24x96xf32>
    %97 = vector.shape_cast %96 : vector<1x24x96xf32> to vector<24x96xf32>
    %cst_66 = arith.constant dense<0.000000e+00> : vector<2x96xf32>
    %98 = tpu.matmul %95, %97, %cst_66 {dimension_numbers = #tpu.dot_dimension_numbers<[1], [0], [0], [1], [0, 0, 1, 1], [], []>} : vector<2x24xf32>, vector<24x96xf32>, vector<2x96xf32> -> vector<2x96xf32>
    %99 = arith.addf %94, %98 : vector<2x96xf32>
    %100 = vector.extract_strided_slice %82 {offsets = [6, 0], sizes = [2, 24], strides = [1, 1]} : vector<16x24xf32> to vector<2x24xf32>
    %101 = vector.extract_strided_slice %83 {offsets = [3, 0, 0], sizes = [1, 24, 96], strides = [1, 1, 1]} : vector<8x24x96xf32> to vector<1x24x96xf32>
    %102 = vector.shape_cast %101 : vector<1x24x96xf32> to vector<24x96xf32>
    %cst_67 = arith.constant dense<0.000000e+00> : vector<2x96xf32>
    %103 = tpu.matmul %100, %102, %cst_67 {dimension_numbers = #tpu.dot_dimension_numbers<[1], [0], [0], [1], [0, 0, 1, 1], [], []>} : vector<2x24xf32>, vector<24x96xf32>, vector<2x96xf32> -> vector<2x96xf32>
    %104 = arith.addf %99, %103 : vector<2x96xf32>
    %105 = vector.extract_strided_slice %82 {offsets = [8, 0], sizes = [2, 24], strides = [1, 1]} : vector<16x24xf32> to vector<2x24xf32>
    %106 = vector.extract_strided_slice %83 {offsets = [4, 0, 0], sizes = [1, 24, 96], strides = [1, 1, 1]} : vector<8x24x96xf32> to vector<1x24x96xf32>
    %107 = vector.shape_cast %106 : vector<1x24x96xf32> to vector<24x96xf32>
    %cst_68 = arith.constant dense<0.000000e+00> : vector<2x96xf32>
    %108 = tpu.matmul %105, %107, %cst_68 {dimension_numbers = #tpu.dot_dimension_numbers<[1], [0], [0], [1], [0, 0, 1, 1], [], []>} : vector<2x24xf32>, vector<24x96xf32>, vector<2x96xf32> -> vector<2x96xf32>
    %109 = arith.addf %104, %108 : vector<2x96xf32>
    %110 = vector.extract_strided_slice %82 {offsets = [10, 0], sizes = [2, 24], strides = [1, 1]} : vector<16x24xf32> to vector<2x24xf32>
    %111 = vector.extract_strided_slice %83 {offsets = [5, 0, 0], sizes = [1, 24, 96], strides = [1, 1, 1]} : vector<8x24x96xf32> to vector<1x24x96xf32>
    %112 = vector.shape_cast %111 : vector<1x24x96xf32> to vector<24x96xf32>
    %cst_69 = arith.constant dense<0.000000e+00> : vector<2x96xf32>
    %113 = tpu.matmul %110, %112, %cst_69 {dimension_numbers = #tpu.dot_dimension_numbers<[1], [0], [0], [1], [0, 0, 1, 1], [], []>} : vector<2x24xf32>, vector<24x96xf32>, vector<2x96xf32> -> vector<2x96xf32>
    %114 = arith.addf %109, %113 : vector<2x96xf32>
    %115 = vector.extract_strided_slice %82 {offsets = [12, 0], sizes = [2, 24], strides = [1, 1]} : vector<16x24xf32> to vector<2x24xf32>
    %116 = vector.extract_strided_slice %83 {offsets = [6, 0, 0], sizes = [1, 24, 96], strides = [1, 1, 1]} : vector<8x24x96xf32> to vector<1x24x96xf32>
    %117 = vector.shape_cast %116 : vector<1x24x96xf32> to vector<24x96xf32>
    %cst_70 = arith.constant dense<0.000000e+00> : vector<2x96xf32>
    %118 = tpu.matmul %115, %117, %cst_70 {dimension_numbers = #tpu.dot_dimension_numbers<[1], [0], [0], [1], [0, 0, 1, 1], [], []>} : vector<2x24xf32>, vector<24x96xf32>, vector<2x96xf32> -> vector<2x96xf32>
    %119 = arith.addf %114, %118 : vector<2x96xf32>
    %120 = vector.extract_strided_slice %82 {offsets = [14, 0], sizes = [2, 24], strides = [1, 1]} : vector<16x24xf32> to vector<2x24xf32>
    %121 = vector.extract_strided_slice %83 {offsets = [7, 0, 0], sizes = [1, 24, 96], strides = [1, 1, 1]} : vector<8x24x96xf32> to vector<1x24x96xf32>
    %122 = vector.shape_cast %121 : vector<1x24x96xf32> to vector<24x96xf32>
    %cst_71 = arith.constant dense<0.000000e+00> : vector<2x96xf32>
    %123 = tpu.matmul %120, %122, %cst_71 {dimension_numbers = #tpu.dot_dimension_numbers<[1], [0], [0], [1], [0, 0, 1, 1], [], []>} : vector<2x24xf32>, vector<24x96xf32>, vector<2x96xf32> -> vector<2x96xf32>
    %124 = arith.addf %119, %123 : vector<2x96xf32>
    %c0_72 = arith.constant 0 : index
    %c0_73 = arith.constant 0 : index
    %125 = vector.load %arg21[%c0_72, %c0_73] : memref<1x96xf32, #tpu.memory_space<vmem>>, vector<1x96xf32>
    %126 = vector.broadcast %125 : vector<1x96xf32> to vector<2x96xf32>
    %127 = arith.addf %124, %126 : vector<2x96xf32>
    %cst_74 = arith.constant dense<0.000000e+00> : vector<96xf32>
    %128 = vector.multi_reduction <add>, %127, %cst_74 [0] : vector<2x96xf32> to vector<96xf32>
    %129 = vector.shape_cast %128 : vector<96xf32> to vector<1x96xf32>
    %cst_75 = arith.constant 2.000000e+00 : f32
    %130 = vector.broadcast %cst_75 : f32 to vector<1x96xf32>
    %131 = arith.divf %129, %130 : vector<1x96xf32>
    %132 = vector.broadcast %131 : vector<1x96xf32> to vector<2x96xf32>
    %133 = arith.subf %127, %132 : vector<2x96xf32>
    %134 = arith.mulf %133, %133 : vector<2x96xf32>
    %cst_76 = arith.constant dense<0.000000e+00> : vector<96xf32>
    %135 = vector.multi_reduction <add>, %134, %cst_76 [0] : vector<2x96xf32> to vector<96xf32>
    %136 = vector.shape_cast %135 : vector<96xf32> to vector<1x96xf32>
    %cst_77 = arith.constant 2.000000e+00 : f32
    %137 = vector.broadcast %cst_77 : f32 to vector<1x96xf32>
    %138 = arith.divf %136, %137 : vector<1x96xf32>
    %cst_78 = arith.constant 9.99999974E-6 : f32
    %139 = vector.broadcast %cst_78 : f32 to vector<1x96xf32>
    %140 = arith.addf %138, %139 : vector<1x96xf32>
    %141 = math.rsqrt %140 : vector<1x96xf32>
    %142 = vector.broadcast %141 : vector<1x96xf32> to vector<2x96xf32>
    %143 = arith.mulf %133, %142 : vector<2x96xf32>
    %c0_79 = arith.constant 0 : index
    %c0_80 = arith.constant 0 : index
    %144 = vector.load %arg22[%c0_79, %c0_80] : memref<1x96xf32, #tpu.memory_space<vmem>>, vector<1x96xf32>
    %145 = vector.broadcast %144 : vector<1x96xf32> to vector<2x96xf32>
    %146 = arith.mulf %143, %145 : vector<2x96xf32>
    %c0_81 = arith.constant 0 : index
    %c0_82 = arith.constant 0 : index
    %147 = vector.load %arg23[%c0_81, %c0_82] : memref<1x96xf32, #tpu.memory_space<vmem>>, vector<1x96xf32>
    %148 = vector.broadcast %147 : vector<1x96xf32> to vector<2x96xf32>
    %149 = arith.addf %146, %148 : vector<2x96xf32>
    %cst_83 = arith.constant 0.000000e+00 : f32
    %150 = vector.broadcast %cst_83 : f32 to vector<2x96xf32>
    %151 = arith.maximumf %149, %150 : vector<2x96xf32>
    %c0_84 = arith.constant 0 : index
    %c0_85 = arith.constant 0 : index
    %152 = vector.load %arg24[%c0_84, %c0_85] : memref<2x96xf32, #tpu.memory_space<vmem>>, vector<2x96xf32>
    tpu.vector_store %arg24[%c0_84, %c0_85], %151 {strides = array<i32>} : memref<2x96xf32, #tpu.memory_space<vmem>>, vector<2x96xf32>,
    return
  }
}

module attributes {stable_mosaic.version = 11 : i64} {
  func.func @kernel(%arg0: memref<3x2x32xf32, #tpu.memory_space<vmem>>, %arg1: memref<2x96xf32, #tpu.memory_space<vmem>>, %arg2: memref<32x25xf32, #tpu.memory_space<vmem>>, %arg3: memref<1x25xf32, #tpu.memory_space<vmem>>, %arg4: memref<25x24xf32, #tpu.memory_space<vmem>>, %arg5: memref<96x24xf32, #tpu.memory_space<vmem>>, %arg6: memref<1x24xf32, #tpu.memory_space<vmem>>, %arg7: memref<1x24xf32, #tpu.memory_space<vmem>>, %arg8: memref<1x24xf32, #tpu.memory_space<vmem>>, %arg9: memref<24x1xf32, #tpu.memory_space<vmem>>, %arg10: memref<1x1xf32, #tpu.memory_space<vmem>>, %arg11: memref<25x24xf32, #tpu.memory_space<vmem>>, %arg12: memref<96x24xf32, #tpu.memory_space<vmem>>, %arg13: memref<1x24xf32, #tpu.memory_space<vmem>>, %arg14: memref<1x24xf32, #tpu.memory_space<vmem>>, %arg15: memref<1x24xf32, #tpu.memory_space<vmem>>, %arg16: memref<24x1xf32, #tpu.memory_space<vmem>>, %arg17: memref<1x1xf32, #tpu.memory_space<vmem>>, %arg18: memref<2x1xf32, #tpu.memory_space<vmem>>, %arg19: memref<2x1xf32, #tpu.memory_space<vmem>>, %arg20: memref<2x1xf32, #tpu.memory_space<vmem>>) attributes {dimension_semantics = [], scalar_prefetch = 0 : i64, scratch_operands = 0 : i64, tpu.core_type = #tpu.core_type<tc>} {
    %c0 = arith.constant 0 : index
    %c0_0 = arith.constant 0 : index
    %0 = vector.load %arg1[%c0, %c0_0] : memref<2x96xf32, #tpu.memory_space<vmem>>, vector<2x96xf32>
    %c0_1 = arith.constant 0 : index
    %c0_2 = arith.constant 0 : index
    %1 = vector.load %arg5[%c0_1, %c0_2] : memref<96x24xf32, #tpu.memory_space<vmem>>, vector<96x24xf32>
    %cst = arith.constant dense<0.000000e+00> : vector<2x24xf32>
    %2 = tpu.matmul %0, %1, %cst {dimension_numbers = #tpu.dot_dimension_numbers<[1], [0], [0], [1], [0, 0, 1, 1], [], []>} : vector<2x96xf32>, vector<96x24xf32>, vector<2x24xf32> -> vector<2x24xf32>
    %c0_3 = arith.constant 0 : index
    %c0_4 = arith.constant 0 : index
    %3 = vector.load %arg12[%c0_3, %c0_4] : memref<96x24xf32, #tpu.memory_space<vmem>>, vector<96x24xf32>
    %cst_5 = arith.constant dense<0.000000e+00> : vector<2x24xf32>
    %4 = tpu.matmul %0, %3, %cst_5 {dimension_numbers = #tpu.dot_dimension_numbers<[1], [0], [0], [1], [0, 0, 1, 1], [], []>} : vector<2x96xf32>, vector<96x24xf32>, vector<2x24xf32> -> vector<2x24xf32>
    %c0_6 = arith.constant 0 : index
    %c0_7 = arith.constant 0 : index
    %c0_8 = arith.constant 0 : index
    %5 = vector.load %arg0[%c0_6, %c0_7, %c0_8] : memref<3x2x32xf32, #tpu.memory_space<vmem>>, vector<1x2x32xf32>
    %6 = vector.shape_cast %5 : vector<1x2x32xf32> to vector<2x32xf32>
    %c0_9 = arith.constant 0 : index
    %c0_10 = arith.constant 0 : index
    %7 = vector.load %arg2[%c0_9, %c0_10] : memref<32x25xf32, #tpu.memory_space<vmem>>, vector<32x25xf32>
    %cst_11 = arith.constant dense<0.000000e+00> : vector<2x25xf32>
    %8 = tpu.matmul %6, %7, %cst_11 {dimension_numbers = #tpu.dot_dimension_numbers<[1], [0], [0], [1], [0, 0, 1, 1], [], []>} : vector<2x32xf32>, vector<32x25xf32>, vector<2x25xf32> -> vector<2x25xf32>
    %c0_12 = arith.constant 0 : index
    %c0_13 = arith.constant 0 : index
    %9 = vector.load %arg3[%c0_12, %c0_13] : memref<1x25xf32, #tpu.memory_space<vmem>>, vector<1x25xf32>
    %10 = vector.broadcast %9 : vector<1x25xf32> to vector<2x25xf32>
    %11 = arith.addf %8, %10 : vector<2x25xf32>
    %cst_14 = arith.constant 0.000000e+00 : f32
    %12 = vector.broadcast %cst_14 : f32 to vector<2x25xf32>
    %13 = arith.maximumf %11, %12 : vector<2x25xf32>
    %c0_15 = arith.constant 0 : index
    %c0_16 = arith.constant 0 : index
    %14 = vector.load %arg4[%c0_15, %c0_16] : memref<25x24xf32, #tpu.memory_space<vmem>>, vector<25x24xf32>
    %cst_17 = arith.constant dense<0.000000e+00> : vector<2x24xf32>
    %15 = tpu.matmul %13, %14, %cst_17 {dimension_numbers = #tpu.dot_dimension_numbers<[1], [0], [0], [1], [0, 0, 1, 1], [], []>} : vector<2x25xf32>, vector<25x24xf32>, vector<2x24xf32> -> vector<2x24xf32>
    %16 = arith.addf %15, %2 : vector<2x24xf32>
    %c0_18 = arith.constant 0 : index
    %c0_19 = arith.constant 0 : index
    %17 = vector.load %arg6[%c0_18, %c0_19] : memref<1x24xf32, #tpu.memory_space<vmem>>, vector<1x24xf32>
    %18 = vector.broadcast %17 : vector<1x24xf32> to vector<2x24xf32>
    %19 = arith.addf %16, %18 : vector<2x24xf32>
    %c0_20 = arith.constant 0 : index
    %c0_21 = arith.constant 0 : index
    %20 = vector.load %arg7[%c0_20, %c0_21] : memref<1x24xf32, #tpu.memory_space<vmem>>, vector<1x24xf32>
    %c0_22 = arith.constant 0 : index
    %c0_23 = arith.constant 0 : index
    %21 = vector.load %arg8[%c0_22, %c0_23] : memref<1x24xf32, #tpu.memory_space<vmem>>, vector<1x24xf32>
    %cst_24 = arith.constant dense<0.000000e+00> : vector<24xf32>
    %22 = vector.multi_reduction <add>, %19, %cst_24 [0] : vector<2x24xf32> to vector<24xf32>
    %23 = vector.shape_cast %22 : vector<24xf32> to vector<1x24xf32>
    %cst_25 = arith.constant 2.000000e+00 : f32
    %24 = vector.broadcast %cst_25 : f32 to vector<1x24xf32>
    %25 = arith.divf %23, %24 : vector<1x24xf32>
    %26 = vector.broadcast %25 : vector<1x24xf32> to vector<2x24xf32>
    %27 = arith.subf %19, %26 : vector<2x24xf32>
    %28 = arith.mulf %27, %27 : vector<2x24xf32>
    %cst_26 = arith.constant dense<0.000000e+00> : vector<24xf32>
    %29 = vector.multi_reduction <add>, %28, %cst_26 [0] : vector<2x24xf32> to vector<24xf32>
    %30 = vector.shape_cast %29 : vector<24xf32> to vector<1x24xf32>
    %cst_27 = arith.constant 2.000000e+00 : f32
    %31 = vector.broadcast %cst_27 : f32 to vector<1x24xf32>
    %32 = arith.divf %30, %31 : vector<1x24xf32>
    %cst_28 = arith.constant 9.99999974E-6 : f32
    %33 = vector.broadcast %cst_28 : f32 to vector<1x24xf32>
    %34 = arith.addf %32, %33 : vector<1x24xf32>
    %35 = math.rsqrt %34 : vector<1x24xf32>
    %36 = vector.broadcast %35 : vector<1x24xf32> to vector<2x24xf32>
    %37 = arith.mulf %27, %36 : vector<2x24xf32>
    %38 = vector.broadcast %20 : vector<1x24xf32> to vector<2x24xf32>
    %39 = arith.mulf %37, %38 : vector<2x24xf32>
    %40 = vector.broadcast %21 : vector<1x24xf32> to vector<2x24xf32>
    %41 = arith.addf %39, %40 : vector<2x24xf32>
    %cst_29 = arith.constant 0.000000e+00 : f32
    %42 = vector.broadcast %cst_29 : f32 to vector<2x24xf32>
    %43 = arith.maximumf %41, %42 : vector<2x24xf32>
    %c0_30 = arith.constant 0 : index
    %c0_31 = arith.constant 0 : index
    %44 = vector.load %arg9[%c0_30, %c0_31] : memref<24x1xf32, #tpu.memory_space<vmem>>, vector<24x1xf32>
    %cst_32 = arith.constant dense<0.000000e+00> : vector<2x1xf32>
    %45 = tpu.matmul %43, %44, %cst_32 {dimension_numbers = #tpu.dot_dimension_numbers<[1], [0], [0], [1], [0, 0, 1, 1], [], []>} : vector<2x24xf32>, vector<24x1xf32>, vector<2x1xf32> -> vector<2x1xf32>
    %c0_33 = arith.constant 0 : index
    %c0_34 = arith.constant 0 : index
    %46 = vector.load %arg10[%c0_33, %c0_34] : memref<1x1xf32, #tpu.memory_space<vmem>>, vector<1x1xf32>
    %47 = vector.broadcast %46 : vector<1x1xf32> to vector<2x1xf32>
    %48 = arith.addf %45, %47 : vector<2x1xf32>
    %49 = arith.negf %48 : vector<2x1xf32>
    %50 = math.exp %49 : vector<2x1xf32>
    %cst_35 = arith.constant 1.000000e+00 : f32
    %51 = vector.broadcast %cst_35 : f32 to vector<2x1xf32>
    %52 = arith.addf %51, %50 : vector<2x1xf32>
    %53 = arith.divf %51, %52 : vector<2x1xf32>
    %c0_36 = arith.constant 0 : index
    %c0_37 = arith.constant 0 : index
    %54 = vector.load %arg11[%c0_36, %c0_37] : memref<25x24xf32, #tpu.memory_space<vmem>>, vector<25x24xf32>
    %cst_38 = arith.constant dense<0.000000e+00> : vector<2x24xf32>
    %55 = tpu.matmul %13, %54, %cst_38 {dimension_numbers = #tpu.dot_dimension_numbers<[1], [0], [0], [1], [0, 0, 1, 1], [], []>} : vector<2x25xf32>, vector<25x24xf32>, vector<2x24xf32> -> vector<2x24xf32>
    %56 = arith.addf %55, %4 : vector<2x24xf32>
    %c0_39 = arith.constant 0 : index
    %c0_40 = arith.constant 0 : index
    %57 = vector.load %arg13[%c0_39, %c0_40] : memref<1x24xf32, #tpu.memory_space<vmem>>, vector<1x24xf32>
    %58 = vector.broadcast %57 : vector<1x24xf32> to vector<2x24xf32>
    %59 = arith.addf %56, %58 : vector<2x24xf32>
    %c0_41 = arith.constant 0 : index
    %c0_42 = arith.constant 0 : index
    %60 = vector.load %arg14[%c0_41, %c0_42] : memref<1x24xf32, #tpu.memory_space<vmem>>, vector<1x24xf32>
    %c0_43 = arith.constant 0 : index
    %c0_44 = arith.constant 0 : index
    %61 = vector.load %arg15[%c0_43, %c0_44] : memref<1x24xf32, #tpu.memory_space<vmem>>, vector<1x24xf32>
    %cst_45 = arith.constant dense<0.000000e+00> : vector<24xf32>
    %62 = vector.multi_reduction <add>, %59, %cst_45 [0] : vector<2x24xf32> to vector<24xf32>
    %63 = vector.shape_cast %62 : vector<24xf32> to vector<1x24xf32>
    %cst_46 = arith.constant 2.000000e+00 : f32
    %64 = vector.broadcast %cst_46 : f32 to vector<1x24xf32>
    %65 = arith.divf %63, %64 : vector<1x24xf32>
    %66 = vector.broadcast %65 : vector<1x24xf32> to vector<2x24xf32>
    %67 = arith.subf %59, %66 : vector<2x24xf32>
    %68 = arith.mulf %67, %67 : vector<2x24xf32>
    %cst_47 = arith.constant dense<0.000000e+00> : vector<24xf32>
    %69 = vector.multi_reduction <add>, %68, %cst_47 [0] : vector<2x24xf32> to vector<24xf32>
    %70 = vector.shape_cast %69 : vector<24xf32> to vector<1x24xf32>
    %cst_48 = arith.constant 2.000000e+00 : f32
    %71 = vector.broadcast %cst_48 : f32 to vector<1x24xf32>
    %72 = arith.divf %70, %71 : vector<1x24xf32>
    %cst_49 = arith.constant 9.99999974E-6 : f32
    %73 = vector.broadcast %cst_49 : f32 to vector<1x24xf32>
    %74 = arith.addf %72, %73 : vector<1x24xf32>
    %75 = math.rsqrt %74 : vector<1x24xf32>
    %76 = vector.broadcast %75 : vector<1x24xf32> to vector<2x24xf32>
    %77 = arith.mulf %67, %76 : vector<2x24xf32>
    %78 = vector.broadcast %60 : vector<1x24xf32> to vector<2x24xf32>
    %79 = arith.mulf %77, %78 : vector<2x24xf32>
    %80 = vector.broadcast %61 : vector<1x24xf32> to vector<2x24xf32>
    %81 = arith.addf %79, %80 : vector<2x24xf32>
    %cst_50 = arith.constant 0.000000e+00 : f32
    %82 = vector.broadcast %cst_50 : f32 to vector<2x24xf32>
    %83 = arith.maximumf %81, %82 : vector<2x24xf32>
    %c0_51 = arith.constant 0 : index
    %c0_52 = arith.constant 0 : index
    %84 = vector.load %arg16[%c0_51, %c0_52] : memref<24x1xf32, #tpu.memory_space<vmem>>, vector<24x1xf32>
    %cst_53 = arith.constant dense<0.000000e+00> : vector<2x1xf32>
    %85 = tpu.matmul %83, %84, %cst_53 {dimension_numbers = #tpu.dot_dimension_numbers<[1], [0], [0], [1], [0, 0, 1, 1], [], []>} : vector<2x24xf32>, vector<24x1xf32>, vector<2x1xf32> -> vector<2x1xf32>
    %c0_54 = arith.constant 0 : index
    %c0_55 = arith.constant 0 : index
    %86 = vector.load %arg17[%c0_54, %c0_55] : memref<1x1xf32, #tpu.memory_space<vmem>>, vector<1x1xf32>
    %87 = vector.broadcast %86 : vector<1x1xf32> to vector<2x1xf32>
    %88 = arith.addf %85, %87 : vector<2x1xf32>
    %89 = arith.negf %88 : vector<2x1xf32>
    %90 = math.exp %89 : vector<2x1xf32>
    %cst_56 = arith.constant 1.000000e+00 : f32
    %91 = vector.broadcast %cst_56 : f32 to vector<2x1xf32>
    %92 = arith.addf %91, %90 : vector<2x1xf32>
    %93 = arith.divf %91, %92 : vector<2x1xf32>
    %c1 = arith.constant 1 : index
    %c0_57 = arith.constant 0 : index
    %c0_58 = arith.constant 0 : index
    %94 = vector.load %arg0[%c1, %c0_57, %c0_58] : memref<3x2x32xf32, #tpu.memory_space<vmem>>, vector<1x2x32xf32>
    %95 = vector.shape_cast %94 : vector<1x2x32xf32> to vector<2x32xf32>
    %c0_59 = arith.constant 0 : index
    %c0_60 = arith.constant 0 : index
    %96 = vector.load %arg2[%c0_59, %c0_60] : memref<32x25xf32, #tpu.memory_space<vmem>>, vector<32x25xf32>
    %cst_61 = arith.constant dense<0.000000e+00> : vector<2x25xf32>
    %97 = tpu.matmul %95, %96, %cst_61 {dimension_numbers = #tpu.dot_dimension_numbers<[1], [0], [0], [1], [0, 0, 1, 1], [], []>} : vector<2x32xf32>, vector<32x25xf32>, vector<2x25xf32> -> vector<2x25xf32>
    %c0_62 = arith.constant 0 : index
    %c0_63 = arith.constant 0 : index
    %98 = vector.load %arg3[%c0_62, %c0_63] : memref<1x25xf32, #tpu.memory_space<vmem>>, vector<1x25xf32>
    %99 = vector.broadcast %98 : vector<1x25xf32> to vector<2x25xf32>
    %100 = arith.addf %97, %99 : vector<2x25xf32>
    %cst_64 = arith.constant 0.000000e+00 : f32
    %101 = vector.broadcast %cst_64 : f32 to vector<2x25xf32>
    %102 = arith.maximumf %100, %101 : vector<2x25xf32>
    %c0_65 = arith.constant 0 : index
    %c0_66 = arith.constant 0 : index
    %103 = vector.load %arg4[%c0_65, %c0_66] : memref<25x24xf32, #tpu.memory_space<vmem>>, vector<25x24xf32>
    %cst_67 = arith.constant dense<0.000000e+00> : vector<2x24xf32>
    %104 = tpu.matmul %102, %103, %cst_67 {dimension_numbers = #tpu.dot_dimension_numbers<[1], [0], [0], [1], [0, 0, 1, 1], [], []>} : vector<2x25xf32>, vector<25x24xf32>, vector<2x24xf32> -> vector<2x24xf32>
    %105 = arith.addf %104, %2 : vector<2x24xf32>
    %c0_68 = arith.constant 0 : index
    %c0_69 = arith.constant 0 : index
    %106 = vector.load %arg6[%c0_68, %c0_69] : memref<1x24xf32, #tpu.memory_space<vmem>>, vector<1x24xf32>
    %107 = vector.broadcast %106 : vector<1x24xf32> to vector<2x24xf32>
    %108 = arith.addf %105, %107 : vector<2x24xf32>
    %c0_70 = arith.constant 0 : index
    %c0_71 = arith.constant 0 : index
    %109 = vector.load %arg7[%c0_70, %c0_71] : memref<1x24xf32, #tpu.memory_space<vmem>>, vector<1x24xf32>
    %c0_72 = arith.constant 0 : index
    %c0_73 = arith.constant 0 : index
    %110 = vector.load %arg8[%c0_72, %c0_73] : memref<1x24xf32, #tpu.memory_space<vmem>>, vector<1x24xf32>
    %cst_74 = arith.constant dense<0.000000e+00> : vector<24xf32>
    %111 = vector.multi_reduction <add>, %108, %cst_74 [0] : vector<2x24xf32> to vector<24xf32>
    %112 = vector.shape_cast %111 : vector<24xf32> to vector<1x24xf32>
    %cst_75 = arith.constant 2.000000e+00 : f32
    %113 = vector.broadcast %cst_75 : f32 to vector<1x24xf32>
    %114 = arith.divf %112, %113 : vector<1x24xf32>
    %115 = vector.broadcast %114 : vector<1x24xf32> to vector<2x24xf32>
    %116 = arith.subf %108, %115 : vector<2x24xf32>
    %117 = arith.mulf %116, %116 : vector<2x24xf32>
    %cst_76 = arith.constant dense<0.000000e+00> : vector<24xf32>
    %118 = vector.multi_reduction <add>, %117, %cst_76 [0] : vector<2x24xf32> to vector<24xf32>
    %119 = vector.shape_cast %118 : vector<24xf32> to vector<1x24xf32>
    %cst_77 = arith.constant 2.000000e+00 : f32
    %120 = vector.broadcast %cst_77 : f32 to vector<1x24xf32>
    %121 = arith.divf %119, %120 : vector<1x24xf32>
    %cst_78 = arith.constant 9.99999974E-6 : f32
    %122 = vector.broadcast %cst_78 : f32 to vector<1x24xf32>
    %123 = arith.addf %121, %122 : vector<1x24xf32>
    %124 = math.rsqrt %123 : vector<1x24xf32>
    %125 = vector.broadcast %124 : vector<1x24xf32> to vector<2x24xf32>
    %126 = arith.mulf %116, %125 : vector<2x24xf32>
    %127 = vector.broadcast %109 : vector<1x24xf32> to vector<2x24xf32>
    %128 = arith.mulf %126, %127 : vector<2x24xf32>
    %129 = vector.broadcast %110 : vector<1x24xf32> to vector<2x24xf32>
    %130 = arith.addf %128, %129 : vector<2x24xf32>
    %cst_79 = arith.constant 0.000000e+00 : f32
    %131 = vector.broadcast %cst_79 : f32 to vector<2x24xf32>
    %132 = arith.maximumf %130, %131 : vector<2x24xf32>
    %c0_80 = arith.constant 0 : index
    %c0_81 = arith.constant 0 : index
    %133 = vector.load %arg9[%c0_80, %c0_81] : memref<24x1xf32, #tpu.memory_space<vmem>>, vector<24x1xf32>
    %cst_82 = arith.constant dense<0.000000e+00> : vector<2x1xf32>
    %134 = tpu.matmul %132, %133, %cst_82 {dimension_numbers = #tpu.dot_dimension_numbers<[1], [0], [0], [1], [0, 0, 1, 1], [], []>} : vector<2x24xf32>, vector<24x1xf32>, vector<2x1xf32> -> vector<2x1xf32>
    %c0_83 = arith.constant 0 : index
    %c0_84 = arith.constant 0 : index
    %135 = vector.load %arg10[%c0_83, %c0_84] : memref<1x1xf32, #tpu.memory_space<vmem>>, vector<1x1xf32>
    %136 = vector.broadcast %135 : vector<1x1xf32> to vector<2x1xf32>
    %137 = arith.addf %134, %136 : vector<2x1xf32>
    %138 = arith.negf %137 : vector<2x1xf32>
    %139 = math.exp %138 : vector<2x1xf32>
    %cst_85 = arith.constant 1.000000e+00 : f32
    %140 = vector.broadcast %cst_85 : f32 to vector<2x1xf32>
    %141 = arith.addf %140, %139 : vector<2x1xf32>
    %142 = arith.divf %140, %141 : vector<2x1xf32>
    %c0_86 = arith.constant 0 : index
    %c0_87 = arith.constant 0 : index
    %143 = vector.load %arg11[%c0_86, %c0_87] : memref<25x24xf32, #tpu.memory_space<vmem>>, vector<25x24xf32>
    %cst_88 = arith.constant dense<0.000000e+00> : vector<2x24xf32>
    %144 = tpu.matmul %102, %143, %cst_88 {dimension_numbers = #tpu.dot_dimension_numbers<[1], [0], [0], [1], [0, 0, 1, 1], [], []>} : vector<2x25xf32>, vector<25x24xf32>, vector<2x24xf32> -> vector<2x24xf32>
    %145 = arith.addf %144, %4 : vector<2x24xf32>
    %c0_89 = arith.constant 0 : index
    %c0_90 = arith.constant 0 : index
    %146 = vector.load %arg13[%c0_89, %c0_90] : memref<1x24xf32, #tpu.memory_space<vmem>>, vector<1x24xf32>
    %147 = vector.broadcast %146 : vector<1x24xf32> to vector<2x24xf32>
    %148 = arith.addf %145, %147 : vector<2x24xf32>
    %c0_91 = arith.constant 0 : index
    %c0_92 = arith.constant 0 : index
    %149 = vector.load %arg14[%c0_91, %c0_92] : memref<1x24xf32, #tpu.memory_space<vmem>>, vector<1x24xf32>
    %c0_93 = arith.constant 0 : index
    %c0_94 = arith.constant 0 : index
    %150 = vector.load %arg15[%c0_93, %c0_94] : memref<1x24xf32, #tpu.memory_space<vmem>>, vector<1x24xf32>
    %cst_95 = arith.constant dense<0.000000e+00> : vector<24xf32>
    %151 = vector.multi_reduction <add>, %148, %cst_95 [0] : vector<2x24xf32> to vector<24xf32>
    %152 = vector.shape_cast %151 : vector<24xf32> to vector<1x24xf32>
    %cst_96 = arith.constant 2.000000e+00 : f32
    %153 = vector.broadcast %cst_96 : f32 to vector<1x24xf32>
    %154 = arith.divf %152, %153 : vector<1x24xf32>
    %155 = vector.broadcast %154 : vector<1x24xf32> to vector<2x24xf32>
    %156 = arith.subf %148, %155 : vector<2x24xf32>
    %157 = arith.mulf %156, %156 : vector<2x24xf32>
    %cst_97 = arith.constant dense<0.000000e+00> : vector<24xf32>
    %158 = vector.multi_reduction <add>, %157, %cst_97 [0] : vector<2x24xf32> to vector<24xf32>
    %159 = vector.shape_cast %158 : vector<24xf32> to vector<1x24xf32>
    %cst_98 = arith.constant 2.000000e+00 : f32
    %160 = vector.broadcast %cst_98 : f32 to vector<1x24xf32>
    %161 = arith.divf %159, %160 : vector<1x24xf32>
    %cst_99 = arith.constant 9.99999974E-6 : f32
    %162 = vector.broadcast %cst_99 : f32 to vector<1x24xf32>
    %163 = arith.addf %161, %162 : vector<1x24xf32>
    %164 = math.rsqrt %163 : vector<1x24xf32>
    %165 = vector.broadcast %164 : vector<1x24xf32> to vector<2x24xf32>
    %166 = arith.mulf %156, %165 : vector<2x24xf32>
    %167 = vector.broadcast %149 : vector<1x24xf32> to vector<2x24xf32>
    %168 = arith.mulf %166, %167 : vector<2x24xf32>
    %169 = vector.broadcast %150 : vector<1x24xf32> to vector<2x24xf32>
    %170 = arith.addf %168, %169 : vector<2x24xf32>
    %cst_100 = arith.constant 0.000000e+00 : f32
    %171 = vector.broadcast %cst_100 : f32 to vector<2x24xf32>
    %172 = arith.maximumf %170, %171 : vector<2x24xf32>
    %c0_101 = arith.constant 0 : index
    %c0_102 = arith.constant 0 : index
    %173 = vector.load %arg16[%c0_101, %c0_102] : memref<24x1xf32, #tpu.memory_space<vmem>>, vector<24x1xf32>
    %cst_103 = arith.constant dense<0.000000e+00> : vector<2x1xf32>
    %174 = tpu.matmul %172, %173, %cst_103 {dimension_numbers = #tpu.dot_dimension_numbers<[1], [0], [0], [1], [0, 0, 1, 1], [], []>} : vector<2x24xf32>, vector<24x1xf32>, vector<2x1xf32> -> vector<2x1xf32>
    %c0_104 = arith.constant 0 : index
    %c0_105 = arith.constant 0 : index
    %175 = vector.load %arg17[%c0_104, %c0_105] : memref<1x1xf32, #tpu.memory_space<vmem>>, vector<1x1xf32>
    %176 = vector.broadcast %175 : vector<1x1xf32> to vector<2x1xf32>
    %177 = arith.addf %174, %176 : vector<2x1xf32>
    %178 = arith.negf %177 : vector<2x1xf32>
    %179 = math.exp %178 : vector<2x1xf32>
    %cst_106 = arith.constant 1.000000e+00 : f32
    %180 = vector.broadcast %cst_106 : f32 to vector<2x1xf32>
    %181 = arith.addf %180, %179 : vector<2x1xf32>
    %182 = arith.divf %180, %181 : vector<2x1xf32>
    %c2 = arith.constant 2 : index
    %c0_107 = arith.constant 0 : index
    %c0_108 = arith.constant 0 : index
    %183 = vector.load %arg0[%c2, %c0_107, %c0_108] : memref<3x2x32xf32, #tpu.memory_space<vmem>>, vector<1x2x32xf32>
    %184 = vector.shape_cast %183 : vector<1x2x32xf32> to vector<2x32xf32>
    %c0_109 = arith.constant 0 : index
    %c0_110 = arith.constant 0 : index
    %185 = vector.load %arg2[%c0_109, %c0_110] : memref<32x25xf32, #tpu.memory_space<vmem>>, vector<32x25xf32>
    %cst_111 = arith.constant dense<0.000000e+00> : vector<2x25xf32>
    %186 = tpu.matmul %184, %185, %cst_111 {dimension_numbers = #tpu.dot_dimension_numbers<[1], [0], [0], [1], [0, 0, 1, 1], [], []>} : vector<2x32xf32>, vector<32x25xf32>, vector<2x25xf32> -> vector<2x25xf32>
    %c0_112 = arith.constant 0 : index
    %c0_113 = arith.constant 0 : index
    %187 = vector.load %arg3[%c0_112, %c0_113] : memref<1x25xf32, #tpu.memory_space<vmem>>, vector<1x25xf32>
    %188 = vector.broadcast %187 : vector<1x25xf32> to vector<2x25xf32>
    %189 = arith.addf %186, %188 : vector<2x25xf32>
    %cst_114 = arith.constant 0.000000e+00 : f32
    %190 = vector.broadcast %cst_114 : f32 to vector<2x25xf32>
    %191 = arith.maximumf %189, %190 : vector<2x25xf32>
    %c0_115 = arith.constant 0 : index
    %c0_116 = arith.constant 0 : index
    %192 = vector.load %arg4[%c0_115, %c0_116] : memref<25x24xf32, #tpu.memory_space<vmem>>, vector<25x24xf32>
    %cst_117 = arith.constant dense<0.000000e+00> : vector<2x24xf32>
    %193 = tpu.matmul %191, %192, %cst_117 {dimension_numbers = #tpu.dot_dimension_numbers<[1], [0], [0], [1], [0, 0, 1, 1], [], []>} : vector<2x25xf32>, vector<25x24xf32>, vector<2x24xf32> -> vector<2x24xf32>
    %194 = arith.addf %193, %2 : vector<2x24xf32>
    %c0_118 = arith.constant 0 : index
    %c0_119 = arith.constant 0 : index
    %195 = vector.load %arg6[%c0_118, %c0_119] : memref<1x24xf32, #tpu.memory_space<vmem>>, vector<1x24xf32>
    %196 = vector.broadcast %195 : vector<1x24xf32> to vector<2x24xf32>
    %197 = arith.addf %194, %196 : vector<2x24xf32>
    %c0_120 = arith.constant 0 : index
    %c0_121 = arith.constant 0 : index
    %198 = vector.load %arg7[%c0_120, %c0_121] : memref<1x24xf32, #tpu.memory_space<vmem>>, vector<1x24xf32>
    %c0_122 = arith.constant 0 : index
    %c0_123 = arith.constant 0 : index
    %199 = vector.load %arg8[%c0_122, %c0_123] : memref<1x24xf32, #tpu.memory_space<vmem>>, vector<1x24xf32>
    %cst_124 = arith.constant dense<0.000000e+00> : vector<24xf32>
    %200 = vector.multi_reduction <add>, %197, %cst_124 [0] : vector<2x24xf32> to vector<24xf32>
    %201 = vector.shape_cast %200 : vector<24xf32> to vector<1x24xf32>
    %cst_125 = arith.constant 2.000000e+00 : f32
    %202 = vector.broadcast %cst_125 : f32 to vector<1x24xf32>
    %203 = arith.divf %201, %202 : vector<1x24xf32>
    %204 = vector.broadcast %203 : vector<1x24xf32> to vector<2x24xf32>
    %205 = arith.subf %197, %204 : vector<2x24xf32>
    %206 = arith.mulf %205, %205 : vector<2x24xf32>
    %cst_126 = arith.constant dense<0.000000e+00> : vector<24xf32>
    %207 = vector.multi_reduction <add>, %206, %cst_126 [0] : vector<2x24xf32> to vector<24xf32>
    %208 = vector.shape_cast %207 : vector<24xf32> to vector<1x24xf32>
    %cst_127 = arith.constant 2.000000e+00 : f32
    %209 = vector.broadcast %cst_127 : f32 to vector<1x24xf32>
    %210 = arith.divf %208, %209 : vector<1x24xf32>
    %cst_128 = arith.constant 9.99999974E-6 : f32
    %211 = vector.broadcast %cst_128 : f32 to vector<1x24xf32>
    %212 = arith.addf %210, %211 : vector<1x24xf32>
    %213 = math.rsqrt %212 : vector<1x24xf32>
    %214 = vector.broadcast %213 : vector<1x24xf32> to vector<2x24xf32>
    %215 = arith.mulf %205, %214 : vector<2x24xf32>
    %216 = vector.broadcast %198 : vector<1x24xf32> to vector<2x24xf32>
    %217 = arith.mulf %215, %216 : vector<2x24xf32>
    %218 = vector.broadcast %199 : vector<1x24xf32> to vector<2x24xf32>
    %219 = arith.addf %217, %218 : vector<2x24xf32>
    %cst_129 = arith.constant 0.000000e+00 : f32
    %220 = vector.broadcast %cst_129 : f32 to vector<2x24xf32>
    %221 = arith.maximumf %219, %220 : vector<2x24xf32>
    %c0_130 = arith.constant 0 : index
    %c0_131 = arith.constant 0 : index
    %222 = vector.load %arg9[%c0_130, %c0_131] : memref<24x1xf32, #tpu.memory_space<vmem>>, vector<24x1xf32>
    %cst_132 = arith.constant dense<0.000000e+00> : vector<2x1xf32>
    %223 = tpu.matmul %221, %222, %cst_132 {dimension_numbers = #tpu.dot_dimension_numbers<[1], [0], [0], [1], [0, 0, 1, 1], [], []>} : vector<2x24xf32>, vector<24x1xf32>, vector<2x1xf32> -> vector<2x1xf32>
    %c0_133 = arith.constant 0 : index
    %c0_134 = arith.constant 0 : index
    %224 = vector.load %arg10[%c0_133, %c0_134] : memref<1x1xf32, #tpu.memory_space<vmem>>, vector<1x1xf32>
    %225 = vector.broadcast %224 : vector<1x1xf32> to vector<2x1xf32>
    %226 = arith.addf %223, %225 : vector<2x1xf32>
    %227 = arith.negf %226 : vector<2x1xf32>
    %228 = math.exp %227 : vector<2x1xf32>
    %cst_135 = arith.constant 1.000000e+00 : f32
    %229 = vector.broadcast %cst_135 : f32 to vector<2x1xf32>
    %230 = arith.addf %229, %228 : vector<2x1xf32>
    %231 = arith.divf %229, %230 : vector<2x1xf32>
    %c0_136 = arith.constant 0 : index
    %c0_137 = arith.constant 0 : index
    %232 = vector.load %arg11[%c0_136, %c0_137] : memref<25x24xf32, #tpu.memory_space<vmem>>, vector<25x24xf32>
    %cst_138 = arith.constant dense<0.000000e+00> : vector<2x24xf32>
    %233 = tpu.matmul %191, %232, %cst_138 {dimension_numbers = #tpu.dot_dimension_numbers<[1], [0], [0], [1], [0, 0, 1, 1], [], []>} : vector<2x25xf32>, vector<25x24xf32>, vector<2x24xf32> -> vector<2x24xf32>
    %234 = arith.addf %233, %4 : vector<2x24xf32>
    %c0_139 = arith.constant 0 : index
    %c0_140 = arith.constant 0 : index
    %235 = vector.load %arg13[%c0_139, %c0_140] : memref<1x24xf32, #tpu.memory_space<vmem>>, vector<1x24xf32>
    %236 = vector.broadcast %235 : vector<1x24xf32> to vector<2x24xf32>
    %237 = arith.addf %234, %236 : vector<2x24xf32>
    %c0_141 = arith.constant 0 : index
    %c0_142 = arith.constant 0 : index
    %238 = vector.load %arg14[%c0_141, %c0_142] : memref<1x24xf32, #tpu.memory_space<vmem>>, vector<1x24xf32>
    %c0_143 = arith.constant 0 : index
    %c0_144 = arith.constant 0 : index
    %239 = vector.load %arg15[%c0_143, %c0_144] : memref<1x24xf32, #tpu.memory_space<vmem>>, vector<1x24xf32>
    %cst_145 = arith.constant dense<0.000000e+00> : vector<24xf32>
    %240 = vector.multi_reduction <add>, %237, %cst_145 [0] : vector<2x24xf32> to vector<24xf32>
    %241 = vector.shape_cast %240 : vector<24xf32> to vector<1x24xf32>
    %cst_146 = arith.constant 2.000000e+00 : f32
    %242 = vector.broadcast %cst_146 : f32 to vector<1x24xf32>
    %243 = arith.divf %241, %242 : vector<1x24xf32>
    %244 = vector.broadcast %243 : vector<1x24xf32> to vector<2x24xf32>
    %245 = arith.subf %237, %244 : vector<2x24xf32>
    %246 = arith.mulf %245, %245 : vector<2x24xf32>
    %cst_147 = arith.constant dense<0.000000e+00> : vector<24xf32>
    %247 = vector.multi_reduction <add>, %246, %cst_147 [0] : vector<2x24xf32> to vector<24xf32>
    %248 = vector.shape_cast %247 : vector<24xf32> to vector<1x24xf32>
    %cst_148 = arith.constant 2.000000e+00 : f32
    %249 = vector.broadcast %cst_148 : f32 to vector<1x24xf32>
    %250 = arith.divf %248, %249 : vector<1x24xf32>
    %cst_149 = arith.constant 9.99999974E-6 : f32
    %251 = vector.broadcast %cst_149 : f32 to vector<1x24xf32>
    %252 = arith.addf %250, %251 : vector<1x24xf32>
    %253 = math.rsqrt %252 : vector<1x24xf32>
    %254 = vector.broadcast %253 : vector<1x24xf32> to vector<2x24xf32>
    %255 = arith.mulf %245, %254 : vector<2x24xf32>
    %256 = vector.broadcast %238 : vector<1x24xf32> to vector<2x24xf32>
    %257 = arith.mulf %255, %256 : vector<2x24xf32>
    %258 = vector.broadcast %239 : vector<1x24xf32> to vector<2x24xf32>
    %259 = arith.addf %257, %258 : vector<2x24xf32>
    %cst_150 = arith.constant 0.000000e+00 : f32
    %260 = vector.broadcast %cst_150 : f32 to vector<2x24xf32>
    %261 = arith.maximumf %259, %260 : vector<2x24xf32>
    %c0_151 = arith.constant 0 : index
    %c0_152 = arith.constant 0 : index
    %262 = vector.load %arg16[%c0_151, %c0_152] : memref<24x1xf32, #tpu.memory_space<vmem>>, vector<24x1xf32>
    %cst_153 = arith.constant dense<0.000000e+00> : vector<2x1xf32>
    %263 = tpu.matmul %261, %262, %cst_153 {dimension_numbers = #tpu.dot_dimension_numbers<[1], [0], [0], [1], [0, 0, 1, 1], [], []>} : vector<2x24xf32>, vector<24x1xf32>, vector<2x1xf32> -> vector<2x1xf32>
    %c0_154 = arith.constant 0 : index
    %c0_155 = arith.constant 0 : index
    %264 = vector.load %arg17[%c0_154, %c0_155] : memref<1x1xf32, #tpu.memory_space<vmem>>, vector<1x1xf32>
    %265 = vector.broadcast %264 : vector<1x1xf32> to vector<2x1xf32>
    %266 = arith.addf %263, %265 : vector<2x1xf32>
    %267 = arith.negf %266 : vector<2x1xf32>
    %268 = math.exp %267 : vector<2x1xf32>
    %cst_156 = arith.constant 1.000000e+00 : f32
    %269 = vector.broadcast %cst_156 : f32 to vector<2x1xf32>
    %270 = arith.addf %269, %268 : vector<2x1xf32>
    %271 = arith.divf %269, %270 : vector<2x1xf32>
    %272 = arith.mulf %53, %93 : vector<2x1xf32>
    %273 = arith.mulf %142, %182 : vector<2x1xf32>
    %274 = arith.mulf %231, %271 : vector<2x1xf32>
    %cst_157 = arith.constant 4.000000e-01 : f32
    %275 = vector.broadcast %cst_157 : f32 to vector<2x1xf32>
    %276 = arith.mulf %275, %272 : vector<2x1xf32>
    %277 = arith.addf %273, %274 : vector<2x1xf32>
    %cst_158 = arith.constant 6.000000e-01 : f32
    %278 = vector.broadcast %cst_158 : f32 to vector<2x1xf32>
    %279 = arith.mulf %278, %277 : vector<2x1xf32>
    %cst_159 = arith.constant 5.000000e-01 : f32
    %280 = vector.broadcast %cst_159 : f32 to vector<2x1xf32>
    %281 = arith.mulf %279, %280 : vector<2x1xf32>
    %282 = arith.addf %276, %281 : vector<2x1xf32>
    %c0_160 = arith.constant 0 : index
    %c0_161 = arith.constant 0 : index
    %283 = vector.load %arg18[%c0_160, %c0_161] : memref<2x1xf32, #tpu.memory_space<vmem>>, vector<2x1xf32>
    tpu.vector_store %arg18[%c0_160, %c0_161], %282 {strides = array<i32>} : memref<2x1xf32, #tpu.memory_space<vmem>>, vector<2x1xf32>,
    %cst_162 = arith.constant 4.000000e-01 : f32
    %284 = vector.broadcast %cst_162 : f32 to vector<2x1xf32>
    %285 = arith.mulf %284, %53 : vector<2x1xf32>
    %286 = arith.addf %142, %231 : vector<2x1xf32>
    %cst_163 = arith.constant 6.000000e-01 : f32
    %287 = vector.broadcast %cst_163 : f32 to vector<2x1xf32>
    %288 = arith.mulf %287, %286 : vector<2x1xf32>
    %cst_164 = arith.constant 5.000000e-01 : f32
    %289 = vector.broadcast %cst_164 : f32 to vector<2x1xf32>
    %290 = arith.mulf %288, %289 : vector<2x1xf32>
    %291 = arith.addf %285, %290 : vector<2x1xf32>
    %c0_165 = arith.constant 0 : index
    %c0_166 = arith.constant 0 : index
    %292 = vector.load %arg19[%c0_165, %c0_166] : memref<2x1xf32, #tpu.memory_space<vmem>>, vector<2x1xf32>
    tpu.vector_store %arg19[%c0_165, %c0_166], %291 {strides = array<i32>} : memref<2x1xf32, #tpu.memory_space<vmem>>, vector<2x1xf32>,
    %cst_167 = arith.constant 4.000000e-01 : f32
    %293 = vector.broadcast %cst_167 : f32 to vector<2x1xf32>
    %294 = arith.mulf %293, %93 : vector<2x1xf32>
    %295 = arith.addf %182, %271 : vector<2x1xf32>
    %cst_168 = arith.constant 6.000000e-01 : f32
    %296 = vector.broadcast %cst_168 : f32 to vector<2x1xf32>
    %297 = arith.mulf %296, %295 : vector<2x1xf32>
    %cst_169 = arith.constant 5.000000e-01 : f32
    %298 = vector.broadcast %cst_169 : f32 to vector<2x1xf32>
    %299 = arith.mulf %297, %298 : vector<2x1xf32>
    %300 = arith.addf %294, %299 : vector<2x1xf32>
    %c0_170 = arith.constant 0 : index
    %c0_171 = arith.constant 0 : index
    %301 = vector.load %arg20[%c0_170, %c0_171] : memref<2x1xf32, #tpu.memory_space<vmem>>, vector<2x1xf32>
    tpu.vector_store %arg20[%c0_170, %c0_171], %300 {strides = array<i32>} : memref<2x1xf32, #tpu.memory_space<vmem>>, vector<2x1xf32>,
    return
  }
}

</mosaic_0001>

<bundles_post_ra>
// kernel: forward.14
= control target key start
LH: loop header
LB: loop body
LE: loop exit
PB: predicated region body
PF: predicated region fallthrough
CT: control target
= control target key end

     0   :  { %s5005_s15 = smov 0   ;;  %s5679_s0 = inlined_call_operand.vmem [shape: bf16[3,1029,1024], index: 0, kind: input, shape index: {}]   ;;  %s5680_s1 = inlined_call_operand.vmem [shape: bf16[8,1029], index: 1, kind: input, shape index: {}]   ;;  %s5681_s2 = inlined_call_operand.vmem [shape: f32[8,1], index: 2, kind: input, shape index: {}]   ;;  %s5682_s3 = inlined_call_operand.vmem [shape: f32[8,1], index: 3, kind: input, shape index: {}]   ;;  %s5683_s4 = inlined_call_operand.vmem [shape: f32[3,8,1024], index: 4, kind: output, shape index: {}]  }
   0x1 LB: > { %s4329_s16 = sadd.s32 4294967295, %s4976_s15   ;;  %p4333_p0 = scmp.ge.s32.totalorder %s4976_s15, 1  ;;  %s4976_s15 = sphi %s5005_s15, %s14_s15  }
   0x2   : > { %p162_p1 = scmp.lt.s32.totalorder %s4976_s15, 4 }
   0x4   : > { %p163_p2 = pnand %p4333_p0, %p162_p1 }
   0x5   : > { %p188_p3 = scmp.lt.s32.totalorder (!%p163_p2), %s4329_s16, 2  ;;  %v5016_v0 = vld [vmem:[%s5680_s1] sm:$0xff] (!%p163_p2)  ;;  %vm3335_vm0 = vcmask (!%p163_p2), 1041408   ;;  %vm3336_vm1 = vcmask (!%p163_p2), 1042432   ;;  %vm3331_vm2 = vcmask (!%p163_p2), 39936  }
   0x6   : > { %166 = sbr.rel (%p163_p2) target bundleno = 1108 (0x454), region = 36  ;;  %v5020_v1 = vcombine.high (!%p163_p2), %v5016_v0, %v5016_v0 }
   0x8   : > { %3395 = vmatprep.mubr.bf16.mxu0 (!%p163_p2), %v5020_v1  ;;  %3600 = vmatprep.mubr.bf16.mxu1 (!%p163_p2), %v5020_v1 }
   0xd   : > { %s5685_s16 = smov (!%p188_p3, %s4329_s16), 2 }
   0xe   : > { %s4937_s19 = smul.u32 4128, %s5685_s16  ;;  %s4872_s11 = sshll.u32 %s5685_s16, 6 }
   0xf   : > { %s197_s14 = scalar_lea.vmem %s5683_s4, %s4872_s11 }
  0x10   : > { %s5030_s22 = scalar_lea.vmem %s5679_s0, %s4937_s19 }
  0x11   : > { %v199_v2 = vld [vmem:[%s5030_s22] sm:$0xff]  ;;  %v200_v4 = vld [vmem:[%s5030_s22 + $0x8] sm:$0xff] }
  0x12   : > { %v203_v3 = vld [vmem:[%s5030_s22 + $0x20] sm:$0xff]  ;;  %v204_v6 = vld [vmem:[%s5030_s22 + $0x28] sm:$0xff] }
  0x13   : > { %v4347_v5 = vcombine.high %v199_v2, %v203_v3  ;;  %v4346_v7 = vcombine.low %v199_v2, %v203_v3  ;;  %v207_v8 = vld [vmem:[%s5030_s22 + $0x40] sm:$0xff]  ;;  %v4349_v10 = vcombine.high %v200_v4, %v204_v6  ;;  %v4348_v11 = vcombine.low %v200_v4, %v204_v6  ;;  %v208_v13 = vld [vmem:[%s5030_s22 + $0x48] sm:$0xff] }
  0x14   : > { %v211_v9 = vld [vmem:[%s5030_s22 + $0x60] sm:$0xff]  ;;  %v212_v14 = vld [vmem:[%s5030_s22 + $0x68] sm:$0xff] }
  0x15   : > { %v4355_v12 = vcombine.high %v207_v8, %v211_v9  ;;  %v215_v15 = vld [vmem:[%s5030_s22 + $0x80] sm:$0xff]  ;;  %3363 = vmatprep.subr.bf16.mxu0 %v4347_v5  ;;  %v4357_v16 = vcombine.high %v208_v13, %v212_v14  ;;  %v216_v18 = vld [vmem:[%s5030_s22 + $0x88] sm:$0xff]  ;;  %3568 = vmatprep.subr.bf16.mxu1 %v4349_v10  ;;  %v4354_v20 = vcombine.low %v207_v8, %v211_v9 }
  0x16   : > { %v219_v17 = vld [vmem:[%s5030_s22 + $0xa0] sm:$0xff]  ;;  %v220_v19 = vld [vmem:[%s5030_s22 + $0xa8] sm:$0xff]  ;;  %3364 = vmatpush1.bf16.msra.mxu0 %v4346_v7  ;;  %3569 = vmatpush1.bf16.msra.mxu1 %v4348_v11  ;;  %v4356_v21 = vcombine.low %v208_v13, %v212_v14 }
  0x17   : > { %3365 = vmatprep.subr.bf16.mxu0 %v4355_v12  ;;  %v4363_v22 = vcombine.high %v215_v15, %v219_v17  ;;  %3570 = vmatprep.subr.bf16.mxu1 %v4357_v16  ;;  %v4365_v23 = vcombine.high %v216_v18, %v220_v19  ;;  %v223_v24 = vld [vmem:[%s5030_s22 + $0xc0] sm:$0xff]  ;;  %v224_v26 = vld [vmem:[%s5030_s22 + $0xc8] sm:$0xff]  ;;  %v4362_v28 = vcombine.low %v215_v15, %v219_v17 }
  0x18   : > { %v227_v25 = vld [vmem:[%s5030_s22 + $0xe0] sm:$0xff]  ;;  %v228_v27 = vld [vmem:[%s5030_s22 + $0xe8] sm:$0xff]  ;;  %v4364_v29 = vcombine.low %v216_v18, %v220_v19 }
  0x19   : > { %v4371_v30 = vcombine.high %v223_v24, %v227_v25  ;;  %v4373_v31 = vcombine.high %v224_v26, %v228_v27  ;;  %v231_v32 = vld [vmem:[%s5030_s22 + $0x100] sm:$0xff]  ;;  %v232_v34 = vld [vmem:[%s5030_s22 + $0x108] sm:$0xff]  ;;  %v4370_v36 = vcombine.low %v223_v24, %v227_v25  ;;  %v4372_v37 = vcombine.low %v224_v26, %v228_v27 }
  0x1a   : > { %3366 = vmatpush1.bf16.msra.mxu0 %v4354_v20  ;;  %3571 = vmatpush1.bf16.msra.mxu1 %v4356_v21  ;;  %v235_v33 = vld [vmem:[%s5030_s22 + $0x120] sm:$0xff]  ;;  %v236_v35 = vld [vmem:[%s5030_s22 + $0x128] sm:$0xff] }
  0x1b   : > { %3367 = vmatprep.subr.bf16.mxu0 %v4363_v22  ;;  %3572 = vmatprep.subr.bf16.mxu1 %v4365_v23  ;;  %v4379_v38 = vcombine.high %v231_v32, %v235_v33  ;;  %v4381_v39 = vcombine.high %v232_v34, %v236_v35  ;;  %v239_v40 = vld [vmem:[%s5030_s22 + $0x140] sm:$0xff]  ;;  %v240_v42 = vld [vmem:[%s5030_s22 + $0x148] sm:$0xff]  ;;  %v4378_v44 = vcombine.low %v231_v32, %v235_v33 }
  0x1c   : > { %v243_v41 = vld [vmem:[%s5030_s22 + $0x160] sm:$0xff]  ;;  %v244_v43 = vld [vmem:[%s5030_s22 + $0x168] sm:$0xff]  ;;  %v4380_v45 = vcombine.low %v232_v34, %v236_v35 }
  0x1d   : > { %v4387_v46 = vcombine.high %v239_v40, %v243_v41  ;;  %v4389_v47 = vcombine.high %v240_v42, %v244_v43  ;;  %v247_v48 = vld [vmem:[%s5030_s22 + $0x180] sm:$0xff]  ;;  %v248_v50 = vld [vmem:[%s5030_s22 + $0x188] sm:$0xff]  ;;  %v4386_v52 = vcombine.low %v239_v40, %v243_v41  ;;  %v4388_v53 = vcombine.low %v240_v42, %v244_v43 }
  0x1e   : > { %3368 = vmatpush1.bf16.msra.mxu0 %v4362_v28  ;;  %3573 = vmatpush1.bf16.msra.mxu1 %v4364_v29  ;;  %v251_v49 = vld [vmem:[%s5030_s22 + $0x1a0] sm:$0xff]  ;;  %v252_v51 = vld [vmem:[%s5030_s22 + $0x1a8] sm:$0xff] }
  0x1f   : > { %3369 = vmatprep.subr.bf16.mxu0 %v4371_v30  ;;  %3574 = vmatprep.subr.bf16.mxu1 %v4373_v31  ;;  %v4395_v54 = vcombine.high %v247_v48, %v251_v49  ;;  %v4397_v55 = vcombine.high %v248_v50, %v252_v51  ;;  %v255_v56 = vld [vmem:[%s5030_s22 + $0x1c0] sm:$0xff]  ;;  %v256_v58 = vld [vmem:[%s5030_s22 + $0x1c8] sm:$0xff]  ;;  %v4394_v60 = vcombine.low %v247_v48, %v251_v49 }
  0x20   : > { %v259_v57 = vld [vmem:[%s5030_s22 + $0x1e0] sm:$0xff]  ;;  %v260_v59 = vld [vmem:[%s5030_s22 + $0x1e8] sm:$0xff]  ;;  %v4396_v61 = vcombine.low %v248_v50, %v252_v51 }
  0x21   : > { %v4403_v62 = vcombine.high %v255_v56, %v259_v57  ;;  %v4405_v63 = vcombine.high %v256_v58, %v260_v59  ;;  %v263_v2 = vld [vmem:[%s5030_s22 + $0x200] sm:$0xff]  ;;  %v264_v4 = vld [vmem:[%s5030_s22 + $0x208] sm:$0xff]  ;;  %v4402_v6 = vcombine.low %v255_v56, %v259_v57  ;;  %v4404_v7 = vcombine.low %v256_v58, %v260_v59 }
  0x22   : > { %3370 = vmatpush1.bf16.msra.mxu0 %v4370_v36  ;;  %3575 = vmatpush1.bf16.msra.mxu1 %v4372_v37  ;;  %v267_v3 = vld [vmem:[%s5030_s22 + $0x220] sm:$0xff]  ;;  %v268_v5 = vld [vmem:[%s5030_s22 + $0x228] sm:$0xff] }
  0x23   : > { %3371 = vmatprep.subr.bf16.mxu0 %v4379_v38  ;;  %3576 = vmatprep.subr.bf16.mxu1 %v4381_v39  ;;  %v4411_v8 = vcombine.high %v263_v2, %v267_v3  ;;  %v4413_v9 = vcombine.high %v264_v4, %v268_v5  ;;  %v271_v10 = vld [vmem:[%s5030_s22 + $0x240] sm:$0xff]  ;;  %v272_v12 = vld [vmem:[%s5030_s22 + $0x248] sm:$0xff]  ;;  %v4410_v14 = vcombine.low %v263_v2, %v267_v3 }
  0x24   : > { %v275_v11 = vld [vmem:[%s5030_s22 + $0x260] sm:$0xff]  ;;  %v276_v13 = vld [vmem:[%s5030_s22 + $0x268] sm:$0xff]  ;;  %v4412_v15 = vcombine.low %v264_v4, %v268_v5 }
  0x25   : > { %v4419_v16 = vcombine.high %v271_v10, %v275_v11  ;;  %v4421_v17 = vcombine.high %v272_v12, %v276_v13  ;;  %v279_v18 = vld [vmem:[%s5030_s22 + $0x280] sm:$0xff]  ;;  %v280_v20 = vld [vmem:[%s5030_s22 + $0x288] sm:$0xff]  ;;  %v4418_v22 = vcombine.low %v271_v10, %v275_v11  ;;  %v4420_v23 = vcombine.low %v272_v12, %v276_v13 }
  0x26   : > { %3372 = vmatpush1.bf16.msra.mxu0 %v4378_v44  ;;  %3577 = vmatpush1.bf16.msra.mxu1 %v4380_v45  ;;  %v283_v19 = vld [vmem:[%s5030_s22 + $0x2a0] sm:$0xff]  ;;  %v284_v21 = vld [vmem:[%s5030_s22 + $0x2a8] sm:$0xff] }
  0x27   : > { %3373 = vmatprep.subr.bf16.mxu0 %v4387_v46  ;;  %3578 = vmatprep.subr.bf16.mxu1 %v4389_v47  ;;  %v4427_v24 = vcombine.high %v279_v18, %v283_v19  ;;  %v4429_v25 = vcombine.high %v280_v20, %v284_v21  ;;  %v287_v26 = vld [vmem:[%s5030_s22 + $0x2c0] sm:$0xff]  ;;  %v288_v28 = vld [vmem:[%s5030_s22 + $0x2c8] sm:$0xff]  ;;  %v4426_v30 = vcombine.low %v279_v18, %v283_v19 }
  0x28   : > { %v291_v27 = vld [vmem:[%s5030_s22 + $0x2e0] sm:$0xff]  ;;  %v292_v29 = vld [vmem:[%s5030_s22 + $0x2e8] sm:$0xff]  ;;  %v4428_v31 = vcombine.low %v280_v20, %v284_v21 }
  0x29   : > { %v4435_v32 = vcombine.high %v287_v26, %v291_v27  ;;  %v4437_v33 = vcombine.high %v288_v28, %v292_v29  ;;  %v295_v34 = vld [vmem:[%s5030_s22 + $0x300] sm:$0xff]  ;;  %v296_v36 = vld [vmem:[%s5030_s22 + $0x308] sm:$0xff]  ;;  %v4434_v38 = vcombine.low %v287_v26, %v291_v27  ;;  %v4436_v39 = vcombine.low %v288_v28, %v292_v29 }
  0x2a   : > { %3374 = vmatpush1.bf16.msra.mxu0 %v4386_v52  ;;  %3579 = vmatpush1.bf16.msra.mxu1 %v4388_v53  ;;  %v299_v35 = vld [vmem:[%s5030_s22 + $0x320] sm:$0xff]  ;;  %v300_v37 = vld [vmem:[%s5030_s22 + $0x328] sm:$0xff] }
  0x2b   : > { %3375 = vmatprep.subr.bf16.mxu0 %v4395_v54  ;;  %3580 = vmatprep.subr.bf16.mxu1 %v4397_v55  ;;  %v4443_v40 = vcombine.high %v295_v34, %v299_v35  ;;  %v4445_v41 = vcombine.high %v296_v36, %v300_v37  ;;  %v303_v42 = vld [vmem:[%s5030_s22 + $0x340] sm:$0xff]  ;;  %v304_v44 = vld [vmem:[%s5030_s22 + $0x348] sm:$0xff]  ;;  %v4442_v46 = vcombine.low %v295_v34, %v299_v35 }
  0x2c   : > { %v307_v43 = vld [vmem:[%s5030_s22 + $0x360] sm:$0xff]  ;;  %v308_v45 = vld [vmem:[%s5030_s22 + $0x368] sm:$0xff]  ;;  %v4444_v47 = vcombine.low %v296_v36, %v300_v37 }
  0x2d   : > { %v4451_v48 = vcombine.high %v303_v42, %v307_v43  ;;  %v4453_v49 = vcombine.high %v304_v44, %v308_v45  ;;  %v311_v50 = vld [vmem:[%s5030_s22 + $0x380] sm:$0xff]  ;;  %v312_v52 = vld [vmem:[%s5030_s22 + $0x388] sm:$0xff]  ;;  %v4450_v54 = vcombine.low %v303_v42, %v307_v43  ;;  %v4452_v55 = vcombine.low %v304_v44, %v308_v45 }
  0x2e   : > { %3376 = vmatpush1.bf16.msra.mxu0 %v4394_v60  ;;  %3581 = vmatpush1.bf16.msra.mxu1 %v4396_v61  ;;  %v315_v51 = vld [vmem:[%s5030_s22 + $0x3a0] sm:$0xff]  ;;  %v316_v53 = vld [vmem:[%s5030_s22 + $0x3a8] sm:$0xff] }
  0x2f   : > { %3377 = vmatprep.subr.bf16.mxu0 %v4403_v62  ;;  %3582 = vmatprep.subr.bf16.mxu1 %v4405_v63  ;;  %v4459_v56 = vcombine.high %v311_v50, %v315_v51  ;;  %v4461_v57 = vcombine.high %v312_v52, %v316_v53  ;;  %v319_v58 = vld [vmem:[%s5030_s22 + $0x3c0] sm:$0xff]  ;;  %v320_v60 = vld [vmem:[%s5030_s22 + $0x3c8] sm:$0xff]  ;;  %v4458_v62 = vcombine.low %v311_v50, %v315_v51 }
  0x30   : > { %v323_v59 = vld [vmem:[%s5030_s22 + $0x3e0] sm:$0xff]  ;;  %v324_v61 = vld [vmem:[%s5030_s22 + $0x3e8] sm:$0xff]  ;;  %v4460_v63 = vcombine.low %v312_v52, %v316_v53 }
  0x31   : > { %v4467_v2 = vcombine.high %v319_v58, %v323_v59  ;;  %v4469_v3 = vcombine.high %v320_v60, %v324_v61  ;;  %v327_v4 = vld [vmem:[%s5030_s22 + $0x400] sm:$0xff] }
  0x32   : > { %3378 = vmatpush1.bf16.msra.mxu0 %v4402_v6  ;;  %3583 = vmatpush1.bf16.msra.mxu1 %v4404_v7  ;;  %v331_v5 = vld [vmem:[%s5030_s22 + $0x420] sm:$0xff]  ;;  %v328_v6 = vld [vmem:[%s5030_s22 + $0x408] sm:$0xff] }
  0x33   : > { %3379 = vmatprep.subr.bf16.mxu0 %v4411_v8  ;;  %3584 = vmatprep.subr.bf16.mxu1 %v4413_v9  ;;  %v332_v7 = vld [vmem:[%s5030_s22 + $0x428] sm:$0xff]  ;;  %v4466_v8 = vcombine.low %v319_v58, %v323_v59  ;;  %v4468_v9 = vcombine.low %v320_v60, %v324_v61  ;;  %v4475_v10 = vcombine.high %v327_v4, %v331_v5  ;;  %v335_v12 = vld [vmem:[%s5030_s22 + $0x440] sm:$0xff] }
  0x34   : > { %v4477_v11 = vcombine.high %v328_v6, %v332_v7  ;;  %v339_v13 = vld [vmem:[%s5030_s22 + $0x460] sm:$0xff]  ;;  %v4474_v18 = vcombine.low %v327_v4, %v331_v5  ;;  %v4476_v19 = vcombine.low %v328_v6, %v332_v7 }
  0x35   : > { %v4483_v20 = vcombine.high %v335_v12, %v339_v13  ;;  %v4482_v26 = vcombine.low %v335_v12, %v339_v13 }
  0x36   : > { %3380 = vmatpush1.bf16.msra.mxu0 %v4410_v14  ;;  %3585 = vmatpush1.bf16.msra.mxu1 %v4412_v15  ;;  %v5104_v14 = vcombine.low %v5016_v0, %v5016_v0  ;;  %v336_v15 = vld [vmem:[%s5030_s22 + $0x448] sm:$0xff]  ;;  %v343_v0 = vld [vmem:[%s5030_s22 + $0x480] sm:$0xff] }
  0x37   : > { %3381 = vmatprep.subr.bf16.mxu0 %v4419_v16  ;;  %3586 = vmatprep.subr.bf16.mxu1 %v4421_v17  ;;  %v340_v16 = vld [vmem:[%s5030_s22 + $0x468] sm:$0xff] }
  0x38   : > { %v5111_v17 = vld [vmem:[%s5680_s1 + $0x8] sm:$0xff]  ;;  %v4485_v21 = vcombine.high %v336_v15, %v340_v16  ;;  %v4484_v27 = vcombine.low %v336_v15, %v340_v16 }
  0x3a   : > { %3382 = vmatpush1.bf16.msra.mxu0 %v4418_v22  ;;  %3587 = vmatpush1.bf16.msra.mxu1 %v4420_v23  ;;  %v347_v22 = vld [vmem:[%s5030_s22 + $0x4a0] sm:$0xff]  ;;  %v5117_v23 = vcombine.high %v5111_v17, %v5111_v17 }
  0x3b   : > { %3383 = vmatprep.subr.bf16.mxu0 %v4427_v24  ;;  %3588 = vmatprep.subr.bf16.mxu1 %v4429_v25  ;;  %v344_v24 = vld [vmem:[%s5030_s22 + $0x488] sm:$0xff]  ;;  %v4491_v28 = vcombine.high %v343_v0, %v347_v22  ;;  %v4490_v34 = vcombine.low %v343_v0, %v347_v22 }
  0x3c   : > { %v348_v25 = vld [vmem:[%s5030_s22 + $0x4a8] sm:$0xff] }
  0x3d   : > { %v4493_v29 = vcombine.high %v344_v24, %v348_v25  ;;  %v4492_v35 = vcombine.low %v344_v24, %v348_v25 }
  0x3e   : > { %3384 = vmatpush1.bf16.msra.mxu0 %v4426_v30  ;;  %3589 = vmatpush1.bf16.msra.mxu1 %v4428_v31  ;;  %v351_v30 = vld [vmem:[%s5030_s22 + $0x4c0] sm:$0xff] }
  0x3f   : > { %3385 = vmatprep.subr.bf16.mxu0 %v4435_v32  ;;  %3590 = vmatprep.subr.bf16.mxu1 %v4437_v33  ;;  %v355_v31 = vld [vmem:[%s5030_s22 + $0x4e0] sm:$0xff]  ;;  %v352_v32 = vld [vmem:[%s5030_s22 + $0x4c8] sm:$0xff] }
  0x40   : > { %v356_v33 = vld [vmem:[%s5030_s22 + $0x4e8] sm:$0xff]  ;;  %v4499_v36 = vcombine.high %v351_v30, %v355_v31  ;;  %v4498_v42 = vcombine.low %v351_v30, %v355_v31 }
  0x41   : > { %v4501_v37 = vcombine.high %v352_v32, %v356_v33  ;;  %v4500_v43 = vcombine.low %v352_v32, %v356_v33 }
  0x42   : > { %3386 = vmatpush1.bf16.msra.mxu0 %v4434_v38  ;;  %3591 = vmatpush1.bf16.msra.mxu1 %v4436_v39  ;;  %v359_v38 = vld [vmem:[%s5030_s22 + $0x500] sm:$0xff] }
  0x43   : > { %3387 = vmatprep.subr.bf16.mxu0 %v4443_v40  ;;  %3592 = vmatprep.subr.bf16.mxu1 %v4445_v41  ;;  %v363_v39 = vld [vmem:[%s5030_s22 + $0x520] sm:$0xff]  ;;  %v360_v40 = vld [vmem:[%s5030_s22 + $0x508] sm:$0xff] }
  0x44   : > { %v364_v41 = vld [vmem:[%s5030_s22 + $0x528] sm:$0xff]  ;;  %v4507_v44 = vcombine.high %v359_v38, %v363_v39  ;;  %v4506_v50 = vcombine.low %v359_v38, %v363_v39 }
  0x45   : > { %v4509_v45 = vcombine.high %v360_v40, %v364_v41  ;;  %v4508_v51 = vcombine.low %v360_v40, %v364_v41 }
  0x46   : > { %3388 = vmatpush1.bf16.msra.mxu0 %v4442_v46  ;;  %3593 = vmatpush1.bf16.msra.mxu1 %v4444_v47  ;;  %v367_v46 = vld [vmem:[%s5030_s22 + $0x540] sm:$0xff] }
  0x47   : > { %3389 = vmatprep.subr.bf16.mxu0 %v4451_v48  ;;  %3594 = vmatprep.subr.bf16.mxu1 %v4453_v49  ;;  %v371_v47 = vld [vmem:[%s5030_s22 + $0x560] sm:$0xff]  ;;  %v368_v48 = vld [vmem:[%s5030_s22 + $0x548] sm:$0xff] }
  0x48   : > { %v372_v49 = vld [vmem:[%s5030_s22 + $0x568] sm:$0xff]  ;;  %v4515_v52 = vcombine.high %v367_v46, %v371_v47  ;;  %v4514_v58 = vcombine.low %v367_v46, %v371_v47 }
  0x49   : > { %v4517_v53 = vcombine.high %v368_v48, %v372_v49  ;;  %v4516_v59 = vcombine.low %v368_v48, %v372_v49 }
  0x4a   : > { %3390 = vmatpush1.bf16.msra.mxu0 %v4450_v54  ;;  %3595 = vmatpush1.bf16.msra.mxu1 %v4452_v55  ;;  %v375_v54 = vld [vmem:[%s5030_s22 + $0x580] sm:$0xff] }
  0x4b   : > { %3391 = vmatprep.subr.bf16.mxu0 %v4459_v56  ;;  %3596 = vmatprep.subr.bf16.mxu1 %v4461_v57  ;;  %v379_v55 = vld [vmem:[%s5030_s22 + $0x5a0] sm:$0xff]  ;;  %v376_v56 = vld [vmem:[%s5030_s22 + $0x588] sm:$0xff] }
  0x4c   : > { %v380_v57 = vld [vmem:[%s5030_s22 + $0x5a8] sm:$0xff]  ;;  %v4523_v60 = vcombine.high %v375_v54, %v379_v55  ;;  %v4522_v4 = vcombine.low %v375_v54, %v379_v55 }
  0x4d   : > { %v4525_v61 = vcombine.high %v376_v56, %v380_v57  ;;  %v4524_v5 = vcombine.low %v376_v56, %v380_v57 }
  0x4e   : > { %3392 = vmatpush1.bf16.msra.mxu0 %v4458_v62  ;;  %3597 = vmatpush1.bf16.msra.mxu1 %v4460_v63  ;;  %v383_v62 = vld [vmem:[%s5030_s22 + $0x5c0] sm:$0xff] }
  0x4f   : > { %3393 = vmatprep.subr.bf16.mxu0 %v4467_v2  ;;  %3598 = vmatprep.subr.bf16.mxu1 %v4469_v3  ;;  %v387_v63 = vld [vmem:[%s5030_s22 + $0x5e0] sm:$0xff]  ;;  %v384_v2 = vld [vmem:[%s5030_s22 + $0x5c8] sm:$0xff] }
  0x50   : > { %v388_v3 = vld [vmem:[%s5030_s22 + $0x5e8] sm:$0xff]  ;;  %v4531_v6 = vcombine.high %v383_v62, %v387_v63  ;;  %v4530_v12 = vcombine.low %v383_v62, %v387_v63 }
  0x51   : > { %v4533_v7 = vcombine.high %v384_v2, %v388_v3  ;;  %v4532_v13 = vcombine.low %v384_v2, %v388_v3 }
  0x52   : > { %3394 = vmatpush1.bf16.msra.mxu0 %v4466_v8  ;;  %3599 = vmatpush1.bf16.msra.mxu1 %v4468_v9  ;;  %v391_v8 = vld [vmem:[%s5030_s22 + $0x600] sm:$0xff] }
  0x53   : > { %3404 = vmatprep.subr.bf16.mxu0 %v4475_v10  ;;  %3609 = vmatprep.subr.bf16.mxu1 %v4477_v11  ;;  %v395_v9 = vld [vmem:[%s5030_s22 + $0x620] sm:$0xff]  ;;  %v392_v10 = vld [vmem:[%s5030_s22 + $0x608] sm:$0xff] }
  0x54   : > { %v396_v11 = vld [vmem:[%s5030_s22 + $0x628] sm:$0xff]  ;;  %v4539_v15 = vcombine.high %v391_v8, %v395_v9  ;;  %v4538_v0 = vcombine.low %v391_v8, %v395_v9 }
  0x55   : > { %3396 = vmatmul.mubr.bf16.vlgmr.msra.gmra.mrb[0].mxu0 %v5104_v14  ;;  %3601 = vmatmul.mubr.bf16.vlgmr.msra.gmra.mrb[0].mxu1 %v5104_v14  ;;  %v4541_v16 = vcombine.high %v392_v10, %v396_v11  ;;  %v4540_v22 = vcombine.low %v392_v10, %v396_v11 }
  0x56   : > { %3405 = vmatpush1.bf16.msra.mxu0 %v4474_v18  ;;  %3610 = vmatpush1.bf16.msra.mxu1 %v4476_v19  ;;  %v399_v18 = vld [vmem:[%s5030_s22 + $0x640] sm:$0xff] }
  0x57   : > { %3406 = vmatprep.subr.bf16.mxu0 %v4483_v20  ;;  %3611 = vmatprep.subr.bf16.mxu1 %v4485_v21  ;;  %v403_v19 = vld [vmem:[%s5030_s22 + $0x660] sm:$0xff]  ;;  %v400_v20 = vld [vmem:[%s5030_s22 + $0x648] sm:$0xff] }
  0x58   : > { %3436 = vmatprep.mubr.bf16.mxu0 %v5117_v23  ;;  %3641 = vmatprep.mubr.bf16.mxu1 %v5117_v23  ;;  %v404_v21 = vld [vmem:[%s5030_s22 + $0x668] sm:$0xff]  ;;  %v4547_v24 = vcombine.high %v399_v18, %v403_v19  ;;  %v4546_v30 = vcombine.low %v399_v18, %v403_v19 }
  0x59   : > { %v4549_v25 = vcombine.high %v400_v20, %v404_v21  ;;  %v4548_v31 = vcombine.low %v400_v20, %v404_v21 }
  0x5a   : > { %3407 = vmatpush1.bf16.msra.mxu0 %v4482_v26  ;;  %3612 = vmatpush1.bf16.msra.mxu1 %v4484_v27  ;;  %v407_v26 = vld [vmem:[%s5030_s22 + $0x680] sm:$0xff] }
  0x5b   : > { %3408 = vmatprep.subr.bf16.mxu0 %v4491_v28  ;;  %3613 = vmatprep.subr.bf16.mxu1 %v4493_v29  ;;  %v411_v27 = vld [vmem:[%s5030_s22 + $0x6a0] sm:$0xff]  ;;  %v408_v28 = vld [vmem:[%s5030_s22 + $0x688] sm:$0xff] }
  0x5c   : > { %v412_v29 = vld [vmem:[%s5030_s22 + $0x6a8] sm:$0xff]  ;;  %v4555_v32 = vcombine.high %v407_v26, %v411_v27  ;;  %v4554_v38 = vcombine.low %v407_v26, %v411_v27  ;;  %v5192_v27 = vld [vmem:[%s5680_s1 + $0x10] sm:$0xff] }
  0x5d   : > { %v4557_v33 = vcombine.high %v408_v28, %v412_v29  ;;  %v4556_v39 = vcombine.low %v408_v28, %v412_v29  ;;  %v468_v26 = vld [vmem:[%s5030_s22 + $0x868] sm:$0xff] }
  0x5e   : > { %3409 = vmatpush1.bf16.msra.mxu0 %v4490_v34  ;;  %3614 = vmatpush1.bf16.msra.mxu1 %v4492_v35  ;;  %v415_v34 = vld [vmem:[%s5030_s22 + $0x6c0] sm:$0xff] }
  0x5f   : > { %3410 = vmatprep.subr.bf16.mxu0 %v4499_v36  ;;  %3615 = vmatprep.subr.bf16.mxu1 %v4501_v37  ;;  %v419_v35 = vld [vmem:[%s5030_s22 + $0x6e0] sm:$0xff]  ;;  %v416_v36 = vld [vmem:[%s5030_s22 + $0x6c8] sm:$0xff] }
  0x60   : > { %v420_v37 = vld [vmem:[%s5030_s22 + $0x6e8] sm:$0xff]  ;;  %v4563_v40 = vcombine.high %v415_v34, %v419_v35  ;;  %v4562_v46 = vcombine.low %v415_v34, %v419_v35 }
  0x61   : > { %v4565_v41 = vcombine.high %v416_v36, %v420_v37  ;;  %v4564_v47 = vcombine.low %v416_v36, %v420_v37  ;;  %v472_v34 = vld [vmem:[%s5030_s22 + $0x888] sm:$0xff] }
  0x62   : > { %3411 = vmatpush1.bf16.msra.mxu0 %v4498_v42  ;;  %3616 = vmatpush1.bf16.msra.mxu1 %v4500_v43  ;;  %v423_v42 = vld [vmem:[%s5030_s22 + $0x700] sm:$0xff]  ;;  %v476_v35 = vld [vmem:[%s5030_s22 + $0x8a8] sm:$0xff] }
  0x63   : > { %3412 = vmatprep.subr.bf16.mxu0 %v4507_v44  ;;  %3617 = vmatprep.subr.bf16.mxu1 %v4509_v45  ;;  %v427_v43 = vld [vmem:[%s5030_s22 + $0x720] sm:$0xff]  ;;  %v424_v44 = vld [vmem:[%s5030_s22 + $0x708] sm:$0xff] }
  0x64   : > { %v428_v45 = vld [vmem:[%s5030_s22 + $0x728] sm:$0xff]  ;;  %v4571_v48 = vcombine.high %v423_v42, %v427_v43  ;;  %v4570_v54 = vcombine.low %v423_v42, %v427_v43 }
  0x65   : > { %v4573_v49 = vcombine.high %v424_v44, %v428_v45  ;;  %v4572_v55 = vcombine.low %v424_v44, %v428_v45  ;;  %v480_v42 = vld [vmem:[%s5030_s22 + $0x8c8] sm:$0xff]  ;;  %v4978_v45 = vmov 0  }
  0x66   : > { %3413 = vmatpush1.bf16.msra.mxu0 %v4506_v50  ;;  %3618 = vmatpush1.bf16.msra.mxu1 %v4508_v51  ;;  %v431_v50 = vld [vmem:[%s5030_s22 + $0x740] sm:$0xff]  ;;  %v484_v43 = vld [vmem:[%s5030_s22 + $0x8e8] sm:$0xff] }
  0x67   : > { %3414 = vmatprep.subr.bf16.mxu0 %v4515_v52  ;;  %3619 = vmatprep.subr.bf16.mxu1 %v4517_v53  ;;  %v435_v51 = vld [vmem:[%s5030_s22 + $0x760] sm:$0xff]  ;;  %v432_v52 = vld [vmem:[%s5030_s22 + $0x748] sm:$0xff] }
  0x68   : > { %v436_v53 = vld [vmem:[%s5030_s22 + $0x768] sm:$0xff]  ;;  %v4579_v56 = vcombine.high %v431_v50, %v435_v51  ;;  %v4578_v62 = vcombine.low %v431_v50, %v435_v51  ;;  %4948 = vset.pattern.permute.xlu1 %v4978_v45  ;;  %v491_v50 = vld [vmem:[%s5030_s22 + $0x920] sm:$0xff]  ;;  %4949 = vset.pattern.permute.xlu0 %v4978_v45 }
  0x69   : > { %v4581_v57 = vcombine.high %v432_v52, %v436_v53  ;;  %v4580_v63 = vcombine.low %v432_v52, %v436_v53  ;;  %v488_v51 = vld [vmem:[%s5030_s22 + $0x908] sm:$0xff] }
  0x6a   : > { %3415 = vmatpush1.bf16.msra.mxu0 %v4514_v58  ;;  %3620 = vmatpush1.bf16.msra.mxu1 %v4516_v59  ;;  %v439_v58 = vld [vmem:[%s5030_s22 + $0x780] sm:$0xff]  ;;  %v492_v52 = vld [vmem:[%s5030_s22 + $0x928] sm:$0xff] }
  0x6b   : > { %3416 = vmatprep.subr.bf16.mxu0 %v4523_v60  ;;  %3621 = vmatprep.subr.bf16.mxu1 %v4525_v61  ;;  %v443_v59 = vld [vmem:[%s5030_s22 + $0x7a0] sm:$0xff]  ;;  %v440_v60 = vld [vmem:[%s5030_s22 + $0x788] sm:$0xff] }
  0x6c   : > { %v444_v61 = vld [vmem:[%s5030_s22 + $0x7a8] sm:$0xff]  ;;  %v4587_v2 = vcombine.high %v439_v58, %v443_v59  ;;  %v4586_v8 = vcombine.low %v439_v58, %v443_v59  ;;  %v499_v58 = vld [vmem:[%s5030_s22 + $0x960] sm:$0xff] }
  0x6d   : > { %v4589_v3 = vcombine.high %v440_v60, %v444_v61  ;;  %v4588_v9 = vcombine.low %v440_v60, %v444_v61  ;;  %v496_v59 = vld [vmem:[%s5030_s22 + $0x948] sm:$0xff] }
  0x6e   : > { %3417 = vmatpush1.bf16.msra.mxu0 %v4522_v4  ;;  %3622 = vmatpush1.bf16.msra.mxu1 %v4524_v5  ;;  %v447_v4 = vld [vmem:[%s5030_s22 + $0x7c0] sm:$0xff]  ;;  %v500_v60 = vld [vmem:[%s5030_s22 + $0x968] sm:$0xff] }
  0x6f   : > { %3418 = vmatprep.subr.bf16.mxu0 %v4531_v6  ;;  %3623 = vmatprep.subr.bf16.mxu1 %v4533_v7  ;;  %v451_v5 = vld [vmem:[%s5030_s22 + $0x7e0] sm:$0xff]  ;;  %v448_v6 = vld [vmem:[%s5030_s22 + $0x7c8] sm:$0xff] }
  0x70   : > { %v452_v7 = vld [vmem:[%s5030_s22 + $0x7e8] sm:$0xff]  ;;  %v4595_v10 = vcombine.high %v447_v4, %v451_v5  ;;  %v4594_v18 = vcombine.low %v447_v4, %v451_v5  ;;  %v507_v4 = vld [vmem:[%s5030_s22 + $0x9a0] sm:$0xff] }
  0x71   : > { %v4597_v11 = vcombine.high %v448_v6, %v452_v7  ;;  %v4596_v19 = vcombine.low %v448_v6, %v452_v7  ;;  %v504_v5 = vld [vmem:[%s5030_s22 + $0x988] sm:$0xff] }
  0x72   : > { %3419 = vmatpush1.bf16.msra.mxu0 %v4530_v12  ;;  %3624 = vmatpush1.bf16.msra.mxu1 %v4532_v13  ;;  %v455_v12 = vld [vmem:[%s5030_s22 + $0x800] sm:$0xff]  ;;  %v508_v6 = vld [vmem:[%s5030_s22 + $0x9a8] sm:$0xff] }
  0x73   : > { %3420 = vmatprep.subr.bf16.mxu0 %v4539_v15  ;;  %3625 = vmatprep.subr.bf16.mxu1 %v4541_v16  ;;  %v459_v13 = vld [vmem:[%s5030_s22 + $0x820] sm:$0xff]  ;;  %v456_v15 = vld [vmem:[%s5030_s22 + $0x808] sm:$0xff] }
  0x74   : > { %v460_v16 = vld [vmem:[%s5030_s22 + $0x828] sm:$0xff]  ;;  %v4603_v20 = vcombine.high %v455_v12, %v459_v13  ;;  %v4602_v28 = vcombine.low %v455_v12, %v459_v13  ;;  %v515_v12 = vld [vmem:[%s5030_s22 + $0x9e0] sm:$0xff] }
  0x75   : > { %v4605_v21 = vcombine.high %v456_v15, %v460_v16  ;;  %v4604_v29 = vcombine.low %v456_v15, %v460_v16  ;;  %v512_v13 = vld [vmem:[%s5030_s22 + $0x9c8] sm:$0xff] }
  0x76   : > { %3421 = vmatpush1.bf16.msra.mxu0 %v4538_v0  ;;  %3626 = vmatpush1.bf16.msra.mxu1 %v4540_v22  ;;  %v463_v0 = vld [vmem:[%s5030_s22 + $0x840] sm:$0xff]  ;;  %v516_v15 = vld [vmem:[%s5030_s22 + $0x9e8] sm:$0xff] }
  0x77   : > { %3422 = vmatprep.subr.bf16.mxu0 %v4547_v24  ;;  %3627 = vmatprep.subr.bf16.mxu1 %v4549_v25  ;;  %v467_v22 = vld [vmem:[%s5030_s22 + $0x860] sm:$0xff]  ;;  %v5185_v24 = vcombine.low %v5111_v17, %v5111_v17  ;;  %v464_v25 = vld [vmem:[%s5030_s22 + $0x848] sm:$0xff] }
  0x78   : > { %v471_v17 = vld [vmem:[%s5030_s22 + $0x880] sm:$0xff]  ;;  %v4610_v36 = vcombine.low %v463_v0, %v467_v22  ;;  %v4612_v37 = vcombine.low %v464_v25, %v468_v26 }
  0x7a   : > { %3423 = vmatpush1.bf16.msra.mxu0 %v4546_v30  ;;  %3628 = vmatpush1.bf16.msra.mxu1 %v4548_v31  ;;  %v4611_v30 = vcombine.high %v463_v0, %v467_v22  ;;  %v4613_v31 = vcombine.high %v464_v25, %v468_v26  ;;  %v523_v0 = vld [vmem:[%s5030_s22 + $0xa20] sm:$0xff]  ;;  %v520_v22 = vld [vmem:[%s5030_s22 + $0xa08] sm:$0xff] }
  0x7b   : > { %3424 = vmatprep.subr.bf16.mxu0 %v4555_v32  ;;  %3629 = vmatprep.subr.bf16.mxu1 %v4557_v33  ;;  %v475_v32 = vld [vmem:[%s5030_s22 + $0x8a0] sm:$0xff]  ;;  %v5198_v33 = vcombine.high %v5192_v27, %v5192_v27  ;;  %v524_v25 = vld [vmem:[%s5030_s22 + $0xa28] sm:$0xff] }
  0x7c   : > { %v4618_v44 = vcombine.low %v471_v17, %v475_v32 }
  0x7e   : > { %3425 = vmatpush1.bf16.msra.mxu0 %v4554_v38  ;;  %3630 = vmatpush1.bf16.msra.mxu1 %v4556_v39  ;;  %v4619_v38 = vcombine.high %v471_v17, %v475_v32  ;;  %v4621_v39 = vcombine.high %v472_v34, %v476_v35  ;;  %v531_v17 = vld [vmem:[%s5030_s22 + $0xa60] sm:$0xff]  ;;  %v528_v32 = vld [vmem:[%s5030_s22 + $0xa48] sm:$0xff] }
  0x7f   : > { %3426 = vmatprep.subr.bf16.mxu0 %v4563_v40  ;;  %3631 = vmatprep.subr.bf16.mxu1 %v4565_v41  ;;  %v479_v40 = vld [vmem:[%s5030_s22 + $0x8c0] sm:$0xff] }
  0x80   : > { %v483_v41 = vld [vmem:[%s5030_s22 + $0x8e0] sm:$0xff] }
  0x81   : > { %v4626_v53 = vcombine.low %v479_v40, %v483_v41 }
  0x82   : > { %3427 = vmatpush1.bf16.msra.mxu0 %v4562_v46  ;;  %3632 = vmatpush1.bf16.msra.mxu1 %v4564_v47  ;;  %v4620_v46 = vcombine.low %v472_v34, %v476_v35  ;;  %v4627_v47 = vcombine.high %v479_v40, %v483_v41  ;;  %v532_v34 = vld [vmem:[%s5030_s22 + $0xa68] sm:$0xff]  ;;  %v539_v40 = vld [vmem:[%s5030_s22 + $0xaa0] sm:$0xff] }
  0x83   : > { %3428 = vmatprep.subr.bf16.mxu0 %v4571_v48  ;;  %3633 = vmatprep.subr.bf16.mxu1 %v4573_v49  ;;  %v4629_v48 = vcombine.high %v480_v42, %v484_v43  ;;  %v487_v49 = vld [vmem:[%s5030_s22 + $0x900] sm:$0xff]  ;;  %v536_v41 = vld [vmem:[%s5030_s22 + $0xa88] sm:$0xff] }
  0x84   : > { %v4634_v61 = vcombine.low %v487_v49, %v491_v50 }
  0x86   : > { %3429 = vmatpush1.bf16.msra.mxu0 %v4570_v54  ;;  %3634 = vmatpush1.bf16.msra.mxu1 %v4572_v55  ;;  %v4628_v54 = vcombine.low %v480_v42, %v484_v43  ;;  %v4635_v55 = vcombine.high %v487_v49, %v491_v50  ;;  %v540_v42 = vld [vmem:[%s5030_s22 + $0xaa8] sm:$0xff]  ;;  %v547_v49 = vld [vmem:[%s5030_s22 + $0xae0] sm:$0xff] }
  0x87   : > { %3430 = vmatprep.subr.bf16.mxu0 %v4579_v56  ;;  %3635 = vmatprep.subr.bf16.mxu1 %v4581_v57  ;;  %v4637_v56 = vcombine.high %v488_v51, %v492_v52  ;;  %v495_v57 = vld [vmem:[%s5030_s22 + $0x940] sm:$0xff]  ;;  %v544_v50 = vld [vmem:[%s5030_s22 + $0xac8] sm:$0xff] }
  0x88   : > { %v4642_v7 = vcombine.low %v495_v57, %v499_v58 }
  0x8a   : > { %3431 = vmatpush1.bf16.msra.mxu0 %v4578_v62  ;;  %3636 = vmatpush1.bf16.msra.mxu1 %v4580_v63  ;;  %v4636_v62 = vcombine.low %v488_v51, %v492_v52  ;;  %v4643_v63 = vcombine.high %v495_v57, %v499_v58  ;;  %v548_v51 = vld [vmem:[%s5030_s22 + $0xae8] sm:$0xff]  ;;  %v555_v57 = vld [vmem:[%s5030_s22 + $0xb20] sm:$0xff] }
  0x8b   : > { %3432 = vmatprep.subr.bf16.mxu0 %v4587_v2  ;;  %3637 = vmatprep.subr.bf16.mxu1 %v4589_v3  ;;  %v4645_v2 = vcombine.high %v496_v59, %v500_v60  ;;  %v503_v3 = vld [vmem:[%s5030_s22 + $0x980] sm:$0xff]  ;;  %v552_v58 = vld [vmem:[%s5030_s22 + $0xb08] sm:$0xff] }
  0x8c   : > { %v4650_v16 = vcombine.low %v503_v3, %v507_v4 }
  0x8e   : > { %3433 = vmatpush1.bf16.msra.mxu0 %v4586_v8  ;;  %3638 = vmatpush1.bf16.msra.mxu1 %v4588_v9  ;;  %v4644_v8 = vcombine.low %v496_v59, %v500_v60  ;;  %v4651_v9 = vcombine.high %v503_v3, %v507_v4  ;;  %v556_v59 = vld [vmem:[%s5030_s22 + $0xb28] sm:$0xff]  ;;  %v563_v3 = vld [vmem:[%s5030_s22 + $0xb60] sm:$0xff] }
  0x8f   : > { %3434 = vmatprep.subr.bf16.mxu0 %v4595_v10  ;;  %3639 = vmatprep.subr.bf16.mxu1 %v4597_v11  ;;  %v4653_v10 = vcombine.high %v504_v5, %v508_v6  ;;  %v511_v11 = vld [vmem:[%s5030_s22 + $0x9c0] sm:$0xff]  ;;  %v560_v4 = vld [vmem:[%s5030_s22 + $0xb48] sm:$0xff] }
  0x90   : > { %v4658_v26 = vcombine.low %v511_v11, %v515_v12 }
  0x92   : > { %3435 = vmatpush1.bf16.msra.mxu0 %v4594_v18  ;;  %3640 = vmatpush1.bf16.msra.mxu1 %v4596_v19  ;;  %v4652_v18 = vcombine.low %v504_v5, %v508_v6  ;;  %v4659_v19 = vcombine.high %v511_v11, %v515_v12  ;;  %v564_v5 = vld [vmem:[%s5030_s22 + $0xb68] sm:$0xff]  ;;  %v571_v11 = vld [vmem:[%s5030_s22 + $0xba0] sm:$0xff] }
  0x93   : > { %3445 = vmatprep.subr.bf16.mxu0 %v4603_v20  ;;  %3650 = vmatprep.subr.bf16.mxu1 %v4605_v21  ;;  %v4661_v20 = vcombine.high %v512_v13, %v516_v15  ;;  %v519_v21 = vld [vmem:[%s5030_s22 + $0xa00] sm:$0xff]  ;;  %v568_v12 = vld [vmem:[%s5030_s22 + $0xb88] sm:$0xff] }
  0x94   : > { %v4666_v35 = vcombine.low %v519_v21, %v523_v0 }
  0x95   : > { %3437 = vmatmul.mubr.bf16.vlgmr.msra.gmra.mrb[0].mxu0 %v5185_v24  ;;  %3642 = vmatmul.mubr.bf16.vlgmr.msra.gmra.mrb[0].mxu1 %v5185_v24 }
  0x96   : > { %3446 = vmatpush1.bf16.msra.mxu0 %v4602_v28  ;;  %3651 = vmatpush1.bf16.msra.mxu1 %v4604_v29  ;;  %v4660_v28 = vcombine.low %v512_v13, %v516_v15  ;;  %v4667_v29 = vcombine.high %v519_v21, %v523_v0  ;;  %v572_v13 = vld [vmem:[%s5030_s22 + $0xba8] sm:$0xff]  ;;  %v579_v21 = vld [vmem:[%s5030_s22 + $0xbe0] sm:$0xff] }
  0x97   : > { %3447 = vmatprep.subr.bf16.mxu0 %v4611_v30  ;;  %3652 = vmatprep.subr.bf16.mxu1 %v4613_v31  ;;  %v4669_v30 = vcombine.high %v520_v22, %v524_v25  ;;  %v527_v31 = vld [vmem:[%s5030_s22 + $0xa40] sm:$0xff]  ;;  %v576_v0 = vld [vmem:[%s5030_s22 + $0xbc8] sm:$0xff] }
  0x98   : > { %3477 = vmatprep.mubr.bf16.mxu0 %v5198_v33  ;;  %3682 = vmatprep.mubr.bf16.mxu1 %v5198_v33  ;;  %v4674_v43 = vcombine.low %v527_v31, %v531_v17 }
  0x9a   : > { %3448 = vmatpush1.bf16.msra.mxu0 %v4610_v36  ;;  %3653 = vmatpush1.bf16.msra.mxu1 %v4612_v37  ;;  %v4668_v36 = vcombine.low %v520_v22, %v524_v25  ;;  %v4675_v37 = vcombine.high %v527_v31, %v531_v17  ;;  %v580_v22 = vld [vmem:[%s5030_s22 + $0xbe8] sm:$0xff]  ;;  %v587_v31 = vld [vmem:[%s5030_s22 + $0xc20] sm:$0xff] }
  0x9b   : > { %3449 = vmatprep.subr.bf16.mxu0 %v4619_v38  ;;  %3654 = vmatprep.subr.bf16.mxu1 %v4621_v39  ;;  %v4677_v38 = vcombine.high %v528_v32, %v532_v34  ;;  %v535_v39 = vld [vmem:[%s5030_s22 + $0xa80] sm:$0xff]  ;;  %v584_v17 = vld [vmem:[%s5030_s22 + $0xc08] sm:$0xff] }
  0x9c   : > { %v4682_v52 = vcombine.low %v535_v39, %v539_v40 }
  0x9e   : > { %3450 = vmatpush1.bf16.msra.mxu0 %v4618_v44  ;;  %3655 = vmatpush1.bf16.msra.mxu1 %v4620_v46  ;;  %v4676_v44 = vcombine.low %v528_v32, %v532_v34  ;;  %v4683_v46 = vcombine.high %v535_v39, %v539_v40  ;;  %v588_v32 = vld [vmem:[%s5030_s22 + $0xc28] sm:$0xff]  ;;  %v595_v39 = vld [vmem:[%s5030_s22 + $0xc60] sm:$0xff]  ;;  %v5268_v40 = vcombine.low %v5192_v27, %v5192_v27 }
  0x9f   : > { %3451 = vmatprep.subr.bf16.mxu0 %v4627_v47  ;;  %3656 = vmatprep.subr.bf16.mxu1 %v4629_v48  ;;  %v4685_v47 = vcombine.high %v536_v41, %v540_v42  ;;  %v543_v48 = vld [vmem:[%s5030_s22 + $0xac0] sm:$0xff] }
  0xa0   : > { %v4690_v60 = vcombine.low %v543_v48, %v547_v49  ;;  %v599_v27 = vld [vmem:[%s5030_s22 + $0xc80] sm:$0xff] }
  0xa2   : > { %3452 = vmatpush1.bf16.msra.mxu0 %v4626_v53  ;;  %3657 = vmatpush1.bf16.msra.mxu1 %v4628_v54  ;;  %v4684_v53 = vcombine.low %v536_v41, %v540_v42  ;;  %v4691_v54 = vcombine.high %v543_v48, %v547_v49  ;;  %v592_v41 = vld [vmem:[%s5030_s22 + $0xc48] sm:$0xff]  ;;  %v603_v49 = vld [vmem:[%s5030_s22 + $0xca0] sm:$0xff] }
  0xa3   : > { %3453 = vmatprep.subr.bf16.mxu0 %v4635_v55  ;;  %3658 = vmatprep.subr.bf16.mxu1 %v4637_v56  ;;  %v4693_v55 = vcombine.high %v544_v50, %v548_v51  ;;  %v551_v56 = vld [vmem:[%s5030_s22 + $0xb00] sm:$0xff]  ;;  %v596_v42 = vld [vmem:[%s5030_s22 + $0xc68] sm:$0xff] }
  0xa4   : > { %v4698_v6 = vcombine.low %v551_v56, %v555_v57  ;;  %v4741_v48 = vcombine.high %v592_v41, %v596_v42 }
  0xa6   : > { %3454 = vmatpush1.bf16.msra.mxu0 %v4634_v61  ;;  %3659 = vmatpush1.bf16.msra.mxu1 %v4636_v62  ;;  %v4692_v61 = vcombine.low %v544_v50, %v548_v51  ;;  %v4699_v62 = vcombine.high %v551_v56, %v555_v57  ;;  %v600_v51 = vld [vmem:[%s5030_s22 + $0xc88] sm:$0xff]  ;;  %v607_v57 = vld [vmem:[%s5030_s22 + $0xcc0] sm:$0xff] }
  0xa7   : > { %3455 = vmatprep.subr.bf16.mxu0 %v4643_v63  ;;  %3660 = vmatprep.subr.bf16.mxu1 %v4645_v2  ;;  %v4701_v63 = vcombine.high %v552_v58, %v556_v59  ;;  %v559_v2 = vld [vmem:[%s5030_s22 + $0xb40] sm:$0xff] }
  0xa8   : > { %v4706_v15 = vcombine.low %v559_v2, %v563_v3 }
  0xaa   : > { %3456 = vmatpush1.bf16.msra.mxu0 %v4642_v7  ;;  %3661 = vmatpush1.bf16.msra.mxu1 %v4644_v8  ;;  %v4700_v7 = vcombine.low %v552_v58, %v556_v59  ;;  %v4707_v8 = vcombine.high %v559_v2, %v563_v3  ;;  %v611_v58 = vld [vmem:[%s5030_s22 + $0xce0] sm:$0xff]  ;;  %v608_v59 = vld [vmem:[%s5030_s22 + $0xcc8] sm:$0xff] }
  0xab   : > { %3457 = vmatprep.subr.bf16.mxu0 %v4651_v9  ;;  %3662 = vmatprep.subr.bf16.mxu1 %v4653_v10  ;;  %v4709_v9 = vcombine.high %v560_v4, %v564_v5  ;;  %v567_v10 = vld [vmem:[%s5030_s22 + $0xb80] sm:$0xff] }
  0xac   : > { %v4714_v25 = vcombine.low %v567_v10, %v571_v11  ;;  %v615_v3 = vld [vmem:[%s5030_s22 + $0xd00] sm:$0xff] }
  0xae   : > { %3458 = vmatpush1.bf16.msra.mxu0 %v4650_v16  ;;  %3663 = vmatpush1.bf16.msra.mxu1 %v4652_v18  ;;  %v4708_v16 = vcombine.low %v560_v4, %v564_v5  ;;  %v4715_v18 = vcombine.high %v567_v10, %v571_v11  ;;  %v619_v4 = vld [vmem:[%s5030_s22 + $0xd20] sm:$0xff]  ;;  %v616_v5 = vld [vmem:[%s5030_s22 + $0xd08] sm:$0xff] }
  0xaf   : > { %3459 = vmatprep.subr.bf16.mxu0 %v4659_v19  ;;  %3664 = vmatprep.subr.bf16.mxu1 %v4661_v20  ;;  %v4717_v19 = vcombine.high %v568_v12, %v572_v13  ;;  %v575_v20 = vld [vmem:[%s5030_s22 + $0xbc0] sm:$0xff] }
  0xb0   : > { %v4722_v34 = vcombine.low %v575_v20, %v579_v21  ;;  %v623_v11 = vld [vmem:[%s5030_s22 + $0xd40] sm:$0xff] }
  0xb2   : > { %3460 = vmatpush1.bf16.msra.mxu0 %v4658_v26  ;;  %3665 = vmatpush1.bf16.msra.mxu1 %v4660_v28  ;;  %v4716_v26 = vcombine.low %v568_v12, %v572_v13  ;;  %v4723_v28 = vcombine.high %v575_v20, %v579_v21  ;;  %v627_v12 = vld [vmem:[%s5030_s22 + $0xd60] sm:$0xff]  ;;  %v624_v13 = vld [vmem:[%s5030_s22 + $0xd48] sm:$0xff] }
  0xb3   : > { %3461 = vmatprep.subr.bf16.mxu0 %v4667_v29  ;;  %3666 = vmatprep.subr.bf16.mxu1 %v4669_v30  ;;  %v4725_v29 = vcombine.high %v576_v0, %v580_v22  ;;  %v583_v30 = vld [vmem:[%s5030_s22 + $0xc00] sm:$0xff] }
  0xb4   : > { %v631_v21 = vld [vmem:[%s5030_s22 + $0xd80] sm:$0xff] }
  0xb6   : > { %3462 = vmatpush1.bf16.msra.mxu0 %v4666_v35  ;;  %3667 = vmatpush1.bf16.msra.mxu1 %v4668_v36  ;;  %v4724_v35 = vcombine.low %v576_v0, %v580_v22  ;;  %v4731_v36 = vcombine.high %v583_v30, %v587_v31  ;;  %v635_v0 = vld [vmem:[%s5030_s22 + $0xda0] sm:$0xff]  ;;  %v632_v22 = vld [vmem:[%s5030_s22 + $0xd88] sm:$0xff] }
  0xb7   : > { %3463 = vmatprep.subr.bf16.mxu0 %v4675_v37  ;;  %3668 = vmatprep.subr.bf16.mxu1 %v4677_v38  ;;  %v4733_v37 = vcombine.high %v584_v17, %v588_v32  ;;  %v591_v38 = vld [vmem:[%s5030_s22 + $0xc40] sm:$0xff] }
  0xba   : > { %3464 = vmatpush1.bf16.msra.mxu0 %v4674_v43  ;;  %3669 = vmatpush1.bf16.msra.mxu1 %v4676_v44  ;;  %v5275_v43 = vld [vmem:[%s5680_s1 + $0x18] sm:$0xff]  ;;  %v4730_v44 = vcombine.low %v583_v30, %v587_v31  ;;  %v639_v31 = vld [vmem:[%s5030_s22 + $0xdc0] sm:$0xff] }
  0xbb   : > { %3465 = vmatprep.subr.bf16.mxu0 %v4683_v46  ;;  %3670 = vmatprep.subr.bf16.mxu1 %v4685_v47  ;;  %v4732_v46 = vcombine.low %v584_v17, %v588_v32  ;;  %v4739_v47 = vcombine.high %v591_v38, %v595_v39  ;;  %v5281_v50 = vcombine.high %v5275_v43, %v5275_v43  ;;  %v643_v17 = vld [vmem:[%s5030_s22 + $0xde0] sm:$0xff]  ;;  %v640_v32 = vld [vmem:[%s5030_s22 + $0xdc8] sm:$0xff] }
  0xbe   : > { %3466 = vmatpush1.bf16.msra.mxu0 %v4682_v52  ;;  %3671 = vmatpush1.bf16.msra.mxu1 %v4684_v53  ;;  %v604_v52 = vld [vmem:[%s5030_s22 + $0xca8] sm:$0xff]  ;;  %v4738_v53 = vcombine.low %v591_v38, %v595_v39  ;;  %v647_v39 = vld [vmem:[%s5030_s22 + $0xe00] sm:$0xff] }
  0xbf   : > { %3467 = vmatprep.subr.bf16.mxu0 %v4691_v54  ;;  %3672 = vmatprep.subr.bf16.mxu1 %v4693_v55  ;;  %v4740_v54 = vcombine.low %v592_v41, %v596_v42  ;;  %v4747_v55 = vcombine.high %v599_v27, %v603_v49  ;;  %v4749_v56 = vcombine.high %v600_v51, %v604_v52  ;;  %v651_v41 = vld [vmem:[%s5030_s22 + $0xe20] sm:$0xff]  ;;  %v648_v42 = vld [vmem:[%s5030_s22 + $0xe08] sm:$0xff] }
  0xc2   : > { %3468 = vmatpush1.bf16.msra.mxu0 %v4690_v60  ;;  %3673 = vmatpush1.bf16.msra.mxu1 %v4692_v61  ;;  %v612_v60 = vld [vmem:[%s5030_s22 + $0xce8] sm:$0xff]  ;;  %v4746_v61 = vcombine.low %v599_v27, %v603_v49  ;;  %v655_v49 = vld [vmem:[%s5030_s22 + $0xe40] sm:$0xff] }
  0xc3   : > { %3469 = vmatprep.subr.bf16.mxu0 %v4699_v62  ;;  %3674 = vmatprep.subr.bf16.mxu1 %v4701_v63  ;;  %v4748_v62 = vcombine.low %v600_v51, %v604_v52  ;;  %v4755_v63 = vcombine.high %v607_v57, %v611_v58  ;;  %v4757_v2 = vcombine.high %v608_v59, %v612_v60  ;;  %v659_v51 = vld [vmem:[%s5030_s22 + $0xe60] sm:$0xff]  ;;  %v656_v52 = vld [vmem:[%s5030_s22 + $0xe48] sm:$0xff] }
  0xc6   : > { %3470 = vmatpush1.bf16.msra.mxu0 %v4698_v6  ;;  %3675 = vmatpush1.bf16.msra.mxu1 %v4700_v7  ;;  %v620_v6 = vld [vmem:[%s5030_s22 + $0xd28] sm:$0xff]  ;;  %v4754_v7 = vcombine.low %v607_v57, %v611_v58  ;;  %v663_v58 = vld [vmem:[%s5030_s22 + $0xe80] sm:$0xff] }
  0xc7   : > { %3471 = vmatprep.subr.bf16.mxu0 %v4707_v8  ;;  %3676 = vmatprep.subr.bf16.mxu1 %v4709_v9  ;;  %v4756_v8 = vcombine.low %v608_v59, %v612_v60  ;;  %v4763_v9 = vcombine.high %v615_v3, %v619_v4  ;;  %v4765_v10 = vcombine.high %v616_v5, %v620_v6  ;;  %v667_v59 = vld [vmem:[%s5030_s22 + $0xea0] sm:$0xff]  ;;  %v664_v60 = vld [vmem:[%s5030_s22 + $0xe88] sm:$0xff] }
  0xca   : > { %3472 = vmatpush1.bf16.msra.mxu0 %v4706_v15  ;;  %3677 = vmatpush1.bf16.msra.mxu1 %v4708_v16  ;;  %v628_v15 = vld [vmem:[%s5030_s22 + $0xd68] sm:$0xff]  ;;  %v4762_v16 = vcombine.low %v615_v3, %v619_v4  ;;  %v671_v4 = vld [vmem:[%s5030_s22 + $0xec0] sm:$0xff] }
  0xcb   : > { %3473 = vmatprep.subr.bf16.mxu0 %v4715_v18  ;;  %3678 = vmatprep.subr.bf16.mxu1 %v4717_v19  ;;  %v4764_v18 = vcombine.low %v616_v5, %v620_v6  ;;  %v4771_v19 = vcombine.high %v623_v11, %v627_v12  ;;  %v4773_v20 = vcombine.high %v624_v13, %v628_v15  ;;  %v675_v5 = vld [vmem:[%s5030_s22 + $0xee0] sm:$0xff]  ;;  %v672_v6 = vld [vmem:[%s5030_s22 + $0xec8] sm:$0xff] }
  0xce   : > { %3474 = vmatpush1.bf16.msra.mxu0 %v4714_v25  ;;  %3679 = vmatpush1.bf16.msra.mxu1 %v4716_v26  ;;  %v636_v25 = vld [vmem:[%s5030_s22 + $0xda8] sm:$0xff]  ;;  %v4770_v26 = vcombine.low %v623_v11, %v627_v12  ;;  %v679_v12 = vld [vmem:[%s5030_s22 + $0xf00] sm:$0xff] }
  0xcf   : > { %3475 = vmatprep.subr.bf16.mxu0 %v4723_v28  ;;  %3680 = vmatprep.subr.bf16.mxu1 %v4725_v29  ;;  %v4772_v28 = vcombine.low %v624_v13, %v628_v15  ;;  %v4779_v29 = vcombine.high %v631_v21, %v635_v0  ;;  %v4781_v30 = vcombine.high %v632_v22, %v636_v25  ;;  %v683_v13 = vld [vmem:[%s5030_s22 + $0xf20] sm:$0xff]  ;;  %v680_v15 = vld [vmem:[%s5030_s22 + $0xf08] sm:$0xff] }
  0xd2   : > { %3476 = vmatpush1.bf16.msra.mxu0 %v4722_v34  ;;  %3681 = vmatpush1.bf16.msra.mxu1 %v4724_v35  ;;  %v644_v34 = vld [vmem:[%s5030_s22 + $0xde8] sm:$0xff]  ;;  %v4778_v35 = vcombine.low %v631_v21, %v635_v0  ;;  %v687_v0 = vld [vmem:[%s5030_s22 + $0xf40] sm:$0xff] }
  0xd3   : > { %3486 = vmatprep.subr.bf16.mxu0 %v4731_v36  ;;  %3691 = vmatprep.subr.bf16.mxu1 %v4733_v37  ;;  %v4780_v36 = vcombine.low %v632_v22, %v636_v25  ;;  %v4787_v37 = vcombine.high %v639_v31, %v643_v17  ;;  %v4789_v38 = vcombine.high %v640_v32, %v644_v34  ;;  %v691_v22 = vld [vmem:[%s5030_s22 + $0xf60] sm:$0xff]  ;;  %v688_v25 = vld [vmem:[%s5030_s22 + $0xf48] sm:$0xff] }
  0xd5   : > { %3478 = vmatmul.mubr.bf16.vlgmr.msra.gmra.mrb[0].mxu0 %v5268_v40  ;;  %3683 = vmatmul.mubr.bf16.vlgmr.msra.gmra.mrb[0].mxu1 %v5268_v40 }
  0xd6   : > { %3487 = vmatpush1.bf16.msra.mxu0 %v4730_v44  ;;  %3692 = vmatpush1.bf16.msra.mxu1 %v4732_v46  ;;  %v652_v44 = vld [vmem:[%s5030_s22 + $0xe28] sm:$0xff]  ;;  %v4786_v46 = vcombine.low %v639_v31, %v643_v17  ;;  %v695_v17 = vld [vmem:[%s5030_s22 + $0xf80] sm:$0xff] }
  0xd7   : > { %3488 = vmatprep.subr.bf16.mxu0 %v4739_v47  ;;  %3693 = vmatprep.subr.bf16.mxu1 %v4741_v48  ;;  %v4788_v47 = vcombine.low %v640_v32, %v644_v34  ;;  %v4795_v48 = vcombine.high %v647_v39, %v651_v41  ;;  %v4797_v27 = vcombine.high %v648_v42, %v652_v44  ;;  %v699_v32 = vld [vmem:[%s5030_s22 + $0xfa0] sm:$0xff]  ;;  %v696_v34 = vld [vmem:[%s5030_s22 + $0xf88] sm:$0xff] }
  0xd8   : > { %3518 = vmatprep.mubr.bf16.mxu0 %v5281_v50  ;;  %3723 = vmatprep.mubr.bf16.mxu1 %v5281_v50 }
  0xda   : > { %3489 = vmatpush1.bf16.msra.mxu0 %v4738_v53  ;;  %3694 = vmatpush1.bf16.msra.mxu1 %v4740_v54  ;;  %v660_v53 = vld [vmem:[%s5030_s22 + $0xe68] sm:$0xff]  ;;  %v4794_v54 = vcombine.low %v647_v39, %v651_v41  ;;  %v703_v41 = vld [vmem:[%s5030_s22 + $0xfc0] sm:$0xff] }
  0xdb   : > { %3490 = vmatprep.subr.bf16.mxu0 %v4747_v55  ;;  %3695 = vmatprep.subr.bf16.mxu1 %v4749_v56  ;;  %v4796_v55 = vcombine.low %v648_v42, %v652_v44  ;;  %v4803_v56 = vcombine.high %v655_v49, %v659_v51  ;;  %v4805_v57 = vcombine.high %v656_v52, %v660_v53  ;;  %v707_v42 = vld [vmem:[%s5030_s22 + $0xfe0] sm:$0xff] }
  0xdc   : > { %v711_v44 = vld [vmem:[%s5030_s22 + $0x1000] sm:$0x77] }
  0xde   : > { %3491 = vmatpush1.bf16.msra.mxu0 %v4746_v61  ;;  %3696 = vmatpush1.bf16.msra.mxu1 %v4748_v62  ;;  %v668_v61 = vld [vmem:[%s5030_s22 + $0xea8] sm:$0xff]  ;;  %v4802_v62 = vcombine.low %v655_v49, %v659_v51  ;;  %v4842_v51 = vcombine.low %v695_v17, %v699_v32 }
  0xdf   : > { %3492 = vmatprep.subr.bf16.mxu0 %v4755_v63  ;;  %3697 = vmatprep.subr.bf16.mxu1 %v4757_v2  ;;  %v4804_v63 = vcombine.low %v656_v52, %v660_v53  ;;  %v4811_v2 = vcombine.high %v663_v58, %v667_v59  ;;  %v4813_v3 = vcombine.high %v664_v60, %v668_v61  ;;  %v712_v49 = vld [vmem:[%s5030_s22 + $0x1008] sm:$0x77] }
  0xe0   : > { %v4851_v53 = vcombine.high %v703_v41, %v707_v42 }
  0xe2   : > { %3493 = vmatpush1.bf16.msra.mxu0 %v4754_v7  ;;  %3698 = vmatpush1.bf16.msra.mxu1 %v4756_v8  ;;  %v676_v7 = vld [vmem:[%s5030_s22 + $0xee8] sm:$0xff]  ;;  %v4810_v8 = vcombine.low %v663_v58, %v667_v59  ;;  %v4850_v58 = vcombine.low %v703_v41, %v707_v42  ;;  %v4858_v59 = vcombine.low %v711_v44, %v711_v44  ;;  %v237_v41 = vld [vmem:[%s5030_s22 + $0x130] sm:$0xff]  ;;  %v234_v42 = vld [vmem:[%s5030_s22 + $0x118] sm:$0xff] }
  0xe3   : > { %3494 = vmatprep.subr.bf16.mxu0 %v4763_v9  ;;  %3699 = vmatprep.subr.bf16.mxu1 %v4765_v10  ;;  %v4812_v9 = vcombine.low %v664_v60, %v668_v61  ;;  %v4819_v10 = vcombine.high %v671_v4, %v675_v5  ;;  %v4821_v11 = vcombine.high %v672_v6, %v676_v7 }
  0xe6   : > { %3495 = vmatpush1.bf16.msra.mxu0 %v4762_v16  ;;  %3700 = vmatpush1.bf16.msra.mxu1 %v4764_v18  ;;  %v684_v16 = vld [vmem:[%s5030_s22 + $0xf28] sm:$0xff]  ;;  %v4818_v18 = vcombine.low %v671_v4, %v675_v5  ;;  %v205_v4 = vld [vmem:[%s5030_s22 + $0x30] sm:$0xff] }
  0xe7   : > { %3496 = vmatprep.subr.bf16.mxu0 %v4771_v19  ;;  %3701 = vmatprep.subr.bf16.mxu1 %v4773_v20  ;;  %v4820_v19 = vcombine.low %v672_v6, %v676_v7  ;;  %v4827_v20 = vcombine.high %v679_v12, %v683_v13  ;;  %v4829_v21 = vcombine.high %v680_v15, %v684_v16  ;;  %v202_v6 = vld [vmem:[%s5030_s22 + $0x18] sm:$0xff] }
  0xe8   : > { %v206_v7 = vld [vmem:[%s5030_s22 + $0x38] sm:$0xff] }
  0xea   : > { %3497 = vmatpush1.bf16.msra.mxu0 %v4770_v26  ;;  %3702 = vmatpush1.bf16.msra.mxu1 %v4772_v28  ;;  %v692_v26 = vld [vmem:[%s5030_s22 + $0xf68] sm:$0xff]  ;;  %v4826_v28 = vcombine.low %v679_v12, %v683_v13  ;;  %v4962_v12 = vld [vmem:[%s5680_s1 + $0x20] ss:$0 sps:$4 sm:$0xff]   ;;  %v210_v13 = vld [vmem:[%s5030_s22 + $0x58] sm:$0xff] }
  0xeb   : > { %3498 = vmatprep.subr.bf16.mxu0 %v4779_v29  ;;  %3703 = vmatprep.subr.bf16.mxu1 %v4781_v30  ;;  %v4828_v29 = vcombine.low %v680_v15, %v684_v16  ;;  %v4835_v30 = vcombine.high %v687_v0, %v691_v22  ;;  %v4837_v31 = vcombine.high %v688_v25, %v692_v26  ;;  %v214_v15 = vld [vmem:[%s5030_s22 + $0x78] sm:$0xff] }
  0xee   : > { %3499 = vmatpush1.bf16.msra.mxu0 %v4778_v35  ;;  %3704 = vmatpush1.bf16.msra.mxu1 %v4780_v36  ;;  %v700_v35 = vld [vmem:[%s5030_s22 + $0xfa8] sm:$0xff]  ;;  %v4834_v36 = vcombine.low %v687_v0, %v691_v22  ;;  %v221_v0 = vld [vmem:[%s5030_s22 + $0xb0] sm:$0xff]  ;;  %v218_v22 = vld [vmem:[%s5030_s22 + $0x98] sm:$0xff] }
  0xef   : > { %3500 = vmatprep.subr.bf16.mxu0 %v4787_v37  ;;  %3705 = vmatprep.subr.bf16.mxu1 %v4789_v38  ;;  %v4836_v37 = vcombine.low %v688_v25, %v692_v26  ;;  %v4843_v38 = vcombine.high %v695_v17, %v699_v32  ;;  %v4845_v39 = vcombine.high %v696_v34, %v700_v35  ;;  %v222_v25 = vld [vmem:[%s5030_s22 + $0xb8] sm:$0xff]  ;;  %v229_v17 = vld [vmem:[%s5030_s22 + $0xf0] sm:$0xff] }
  0xf0   : > { %v4844_v52 = vcombine.low %v696_v34, %v700_v35  ;;  %v226_v32 = vld [vmem:[%s5030_s22 + $0xd8] sm:$0xff] }
  0xf1   : > { %v230_v34 = vld [vmem:[%s5030_s22 + $0xf8] sm:$0xff] }
  0xf2   : > { %3501 = vmatpush1.bf16.msra.mxu0 %v4786_v46  ;;  %3706 = vmatpush1.bf16.msra.mxu1 %v4788_v47  ;;  %v704_v46 = vld [vmem:[%s5030_s22 + $0xfc8] sm:$0xff] }
  0xf3   : > { %3502 = vmatprep.subr.bf16.mxu0 %v4795_v48  ;;  %3707 = vmatprep.subr.bf16.mxu1 %v4797_v27  ;;  %v708_v47 = vld [vmem:[%s5030_s22 + $0xfe8] sm:$0xff]  ;;  %v4979_v48 = vmov 65535  }
  0xf4   : > { %v3337_v27 = vsel %vm3335_vm0, 4294967295, %v4979_v48  ;;  %v4852_v60 = vcombine.low %v704_v46, %v708_v47 }
  0xf6   : > { %3503 = vmatpush1.bf16.msra.mxu0 %v4794_v54  ;;  %3708 = vmatpush1.bf16.msra.mxu1 %v4796_v55  ;;  %v4859_v54 = vcombine.high %v711_v44, %v711_v44  ;;  %v4853_v55 = vcombine.high %v704_v46, %v708_v47  ;;  %v238_v44 = vld [vmem:[%s5030_s22 + $0x138] sm:$0xff] }
  0xf7   : > { %3504 = vmatprep.subr.bf16.mxu0 %v4803_v56  ;;  %3709 = vmatprep.subr.bf16.mxu1 %v4805_v57  ;;  %v5343_v56 = vsel %vm3336_vm1, %v3337_v27, 0  ;;  %v4861_v57 = vcombine.high %v712_v49, %v712_v49  ;;  %v4385_v48 = vcombine.high %v234_v42, %v238_v44  ;;  %v241_v27 = vld [vmem:[%s5030_s22 + $0x150] sm:$0xff] }
  0xf8   : > { %v3343_v61 = vand.u32 %v4859_v54, %v5343_v56  ;;  %v3340_v5 = vand.u32 %v4858_v59, %v5343_v56  ;;  %v4384_v54 = vcombine.low %v234_v42, %v238_v44  ;;  %v253_v59 = vld [vmem:[%s5030_s22 + $0x1b0] sm:$0xff]  ;;  %v290_v44 = vld [vmem:[%s5030_s22 + $0x2d8] sm:$0xff] }
  0xf9   : > { %v293_v42 = vld [vmem:[%s5030_s22 + $0x2f0] sm:$0xff] }
  0xfa   : > { %3505 = vmatpush1.bf16.msra.mxu0 %v4802_v62  ;;  %3710 = vmatpush1.bf16.msra.mxu1 %v4804_v63  ;;  %v4860_v62 = vcombine.low %v712_v49, %v712_v49  ;;  %v3349_v63 = vand.u32 %v4861_v57, %v5343_v56  ;;  %v245_v49 = vld [vmem:[%s5030_s22 + $0x170] sm:$0xff] }
  0xfb   : > { %3506 = vmatprep.subr.bf16.mxu0 %v4811_v2  ;;  %3711 = vmatprep.subr.bf16.mxu1 %v4813_v3  ;;  %v5349_v2 = vcombine.low %v5275_v43, %v5275_v43  ;;  %v201_v3 = vld [vmem:[%s5030_s22 + $0x10] sm:$0xff]  ;;  %v4353_v43 = vcombine.high %v202_v6, %v206_v7 }
  0xfc   : > { %v4350_v16 = vcombine.low %v201_v3, %v205_v4 }
  0xfe   : > { %3507 = vmatpush1.bf16.msra.mxu0 %v4810_v8  ;;  %3712 = vmatpush1.bf16.msra.mxu1 %v4812_v9  ;;  %v3346_v8 = vand.u32 %v4860_v62, %v5343_v56  ;;  %v4351_v9 = vcombine.high %v201_v3, %v205_v4  ;;  %v4390_v62 = vcombine.low %v241_v27, %v245_v49 }
  0xff   : > { %3508 = vmatprep.subr.bf16.mxu0 %v4819_v10  ;;  %3713 = vmatprep.subr.bf16.mxu1 %v4821_v11  ;;  %v209_v10 = vld [vmem:[%s5030_s22 + $0x50] sm:$0xff] }
 0x100   : > { %v213_v11 = vld [vmem:[%s5030_s22 + $0x70] sm:$0xff] }
 0x101   : > { %v4358_v26 = vcombine.low %v209_v10, %v213_v11 }
 0x102   : > { %3509 = vmatpush1.bf16.msra.mxu0 %v4818_v18  ;;  %3714 = vmatpush1.bf16.msra.mxu1 %v4820_v19  ;;  %v4352_v18 = vcombine.low %v202_v6, %v206_v7  ;;  %v4359_v19 = vcombine.high %v209_v10, %v213_v11  ;;  %v261_v6 = vld [vmem:[%s5030_s22 + $0x1f0] sm:$0xff]  ;;  %v258_v7 = vld [vmem:[%s5030_s22 + $0x1d8] sm:$0xff] }
 0x103   : > { %3510 = vmatprep.subr.bf16.mxu0 %v4827_v20  ;;  %3715 = vmatprep.subr.bf16.mxu1 %v4829_v21  ;;  %v4361_v20 = vcombine.high %v210_v13, %v214_v15  ;;  %v217_v21 = vld [vmem:[%s5030_s22 + $0x90] sm:$0xff] }
 0x104   : > { %v4366_v35 = vcombine.low %v217_v21, %v221_v0 }
 0x106   : > { %3511 = vmatpush1.bf16.msra.mxu0 %v4826_v28  ;;  %3716 = vmatpush1.bf16.msra.mxu1 %v4828_v29  ;;  %v4360_v28 = vcombine.low %v210_v13, %v214_v15  ;;  %v4367_v29 = vcombine.high %v217_v21, %v221_v0  ;;  %v269_v13 = vld [vmem:[%s5030_s22 + $0x230] sm:$0xff]  ;;  %v266_v15 = vld [vmem:[%s5030_s22 + $0x218] sm:$0xff] }
 0x107   : > { %3512 = vmatprep.subr.bf16.mxu0 %v4835_v30  ;;  %3717 = vmatprep.subr.bf16.mxu1 %v4837_v31  ;;  %v4369_v30 = vcombine.high %v218_v22, %v222_v25  ;;  %v225_v31 = vld [vmem:[%s5030_s22 + $0xd0] sm:$0xff] }
 0x108   : > { %v4374_v46 = vcombine.low %v225_v31, %v229_v17  ;;  %v273_v0 = vld [vmem:[%s5030_s22 + $0x250] sm:$0xff] }
 0x10a   : > { %3513 = vmatpush1.bf16.msra.mxu0 %v4834_v36  ;;  %3718 = vmatpush1.bf16.msra.mxu1 %v4836_v37  ;;  %v4368_v36 = vcombine.low %v218_v22, %v222_v25  ;;  %v4375_v37 = vcombine.high %v225_v31, %v229_v17  ;;  %v277_v22 = vld [vmem:[%s5030_s22 + $0x270] sm:$0xff]  ;;  %v274_v25 = vld [vmem:[%s5030_s22 + $0x258] sm:$0xff] }
 0x10b   : > { %3514 = vmatprep.subr.bf16.mxu0 %v4843_v38  ;;  %3719 = vmatprep.subr.bf16.mxu1 %v4845_v39  ;;  %v4377_v38 = vcombine.high %v226_v32, %v230_v34  ;;  %v233_v39 = vld [vmem:[%s5030_s22 + $0x110] sm:$0xff] }
 0x10c   : > { %v4383_v47 = vcombine.high %v233_v39, %v237_v41  ;;  %v281_v17 = vld [vmem:[%s5030_s22 + $0x290] sm:$0xff] }
 0x10e   : > { %3515 = vmatpush1.bf16.msra.mxu0 %v4842_v51  ;;  %3720 = vmatpush1.bf16.msra.mxu1 %v4844_v52  ;;  %v242_v51 = vld [vmem:[%s5030_s22 + $0x158] sm:$0xff] }
 0x10f   : > { %3516 = vmatprep.subr.bf16.mxu0 %v4851_v53  ;;  %3721 = vmatprep.subr.bf16.mxu1 %v4853_v55  ;;  %v246_v52 = vld [vmem:[%s5030_s22 + $0x178] sm:$0xff]  ;;  %v4382_v53 = vcombine.low %v233_v39, %v237_v41  ;;  %v4391_v55 = vcombine.high %v241_v27, %v245_v49  ;;  %v289_v41 = vld [vmem:[%s5030_s22 + $0x2d0] sm:$0xff] }
 0x110   : > { %v4393_v57 = vcombine.high %v242_v51, %v246_v52  ;;  %v297_v49 = vld [vmem:[%s5030_s22 + $0x310] sm:$0xff] }
 0x112   : > { %3517 = vmatpush1.bf16.msra.mxu0 %v4850_v58  ;;  %3722 = vmatpush1.bf16.msra.mxu1 %v4852_v60  ;;  %v249_v58 = vld [vmem:[%s5030_s22 + $0x190] sm:$0xff]  ;;  %v250_v60 = vld [vmem:[%s5030_s22 + $0x198] sm:$0xff] }
 0x113   : > { %3527 = vmatprep.subr.bf16.mxu0 %v3343_v61  ;;  %3732 = vmatprep.subr.bf16.mxu1 %v3349_v63  ;;  %v254_v61 = vld [vmem:[%s5030_s22 + $0x1b8] sm:$0xff]  ;;  %v4392_v63 = vcombine.low %v242_v51, %v246_v52  ;;  %v4399_v3 = vcombine.high %v249_v58, %v253_v59  ;;  %v301_v51 = vld [vmem:[%s5030_s22 + $0x330] sm:$0xff] }
 0x114   : > { %v4401_v4 = vcombine.high %v250_v60, %v254_v61  ;;  %v298_v52 = vld [vmem:[%s5030_s22 + $0x318] sm:$0xff] }
 0x115   : > { %3519 = vmatmul.mubr.bf16.vlgmr.msra.gmra.mrb[0].mxu0 %v5349_v2  ;;  %3724 = vmatmul.mubr.bf16.vlgmr.msra.gmra.mrb[0].mxu1 %v5349_v2 }
 0x116   : > { %3528 = vmatpush1.bf16.msra.mxu0 %v3340_v5  ;;  %3733 = vmatpush1.bf16.msra.mxu1 %v3346_v8  ;;  %v257_v5 = vld [vmem:[%s5030_s22 + $0x1d0] sm:$0xff]  ;;  %v262_v8 = vld [vmem:[%s5030_s22 + $0x1f8] sm:$0xff] }
 0x117   : > { %3559 = vmatprep.mubr.bf16.mxu0 %v4978_v45  ;;  %3764 = vmatprep.mubr.bf16.mxu1 %v4978_v45  ;;  %v4407_v10 = vcombine.high %v257_v5, %v261_v6  ;;  %v4409_v11 = vcombine.high %v258_v7, %v262_v8 }
 0x118   : > { %3773 = vmatprep.subr.bf16.mxu0 %v4351_v9  ;;  %3978 = vmatprep.subr.bf16.mxu1 %v4353_v43  ;;  %v4398_v9 = vcombine.low %v249_v58, %v253_v59  ;;  %v4400_v43 = vcombine.low %v250_v60, %v254_v61  ;;  %v305_v59 = vld [vmem:[%s5030_s22 + $0x350] sm:$0xff]  ;;  %v306_v61 = vld [vmem:[%s5030_s22 + $0x358] sm:$0xff] }
 0x119   : > { %v309_v60 = vld [vmem:[%s5030_s22 + $0x370] sm:$0xff] }
 0x121   : > { %4866 = vmatmul.mubr.msk.bf16.vlgmr.msra.gmra.mrb[0].mxu0 %vm3331_vm2, %v4962_v12  ;;  %4867 = vmatmul.mubr.msk.bf16.vlgmr.msra.gmra.mrb[0].mxu1 %vm3331_vm2, %v4962_v12  ;;  %v265_v12 = vld [vmem:[%s5030_s22 + $0x210] sm:$0xff] }
 0x122   : > { %3774 = vmatpush1.bf16.msra.mxu0 %v4350_v16  ;;  %3979 = vmatpush1.bf16.msra.mxu1 %v4352_v18  ;;  %v270_v16 = vld [vmem:[%s5030_s22 + $0x238] sm:$0xff]  ;;  %v4406_v18 = vcombine.low %v257_v5, %v261_v6  ;;  %v313_v6 = vld [vmem:[%s5030_s22 + $0x390] sm:$0xff] }
 0x123   : > { %3775 = vmatprep.subr.bf16.mxu0 %v4359_v19  ;;  %3980 = vmatprep.subr.bf16.mxu1 %v4361_v20  ;;  %v4408_v19 = vcombine.low %v258_v7, %v262_v8  ;;  %v4415_v20 = vcombine.high %v265_v12, %v269_v13  ;;  %v4417_v21 = vcombine.high %v266_v15, %v270_v16  ;;  %v317_v7 = vld [vmem:[%s5030_s22 + $0x3b0] sm:$0xff]  ;;  %v314_v8 = vld [vmem:[%s5030_s22 + $0x398] sm:$0xff] }
 0x124   : > { %3805 = vmatprep.mubr.bf16.mxu0 %v5020_v1  ;;  %4010 = vmatprep.mubr.bf16.mxu1 %v5020_v1  ;;  %v4376_v1 = vcombine.low %v226_v32, %v230_v34  ;;  %v285_v32 = vld [vmem:[%s5030_s22 + $0x2b0] sm:$0xff]  ;;  %v282_v34 = vld [vmem:[%s5030_s22 + $0x298] sm:$0xff] }
 0x126   : > { %3776 = vmatpush1.bf16.msra.mxu0 %v4358_v26  ;;  %3981 = vmatpush1.bf16.msra.mxu1 %v4360_v28  ;;  %v278_v26 = vld [vmem:[%s5030_s22 + $0x278] sm:$0xff]  ;;  %v4414_v28 = vcombine.low %v265_v12, %v269_v13  ;;  %v321_v13 = vld [vmem:[%s5030_s22 + $0x3d0] sm:$0xff] }
 0x127   : > { %3777 = vmatprep.subr.bf16.mxu0 %v4367_v29  ;;  %3982 = vmatprep.subr.bf16.mxu1 %v4369_v30  ;;  %v4416_v29 = vcombine.low %v266_v15, %v270_v16  ;;  %v4423_v30 = vcombine.high %v273_v0, %v277_v22  ;;  %v4425_v31 = vcombine.high %v274_v25, %v278_v26  ;;  %v325_v15 = vld [vmem:[%s5030_s22 + $0x3f0] sm:$0xff]  ;;  %v322_v16 = vld [vmem:[%s5030_s22 + $0x3d8] sm:$0xff] }
 0x12a   : > { %3778 = vmatpush1.bf16.msra.mxu0 %v4366_v35  ;;  %3983 = vmatpush1.bf16.msra.mxu1 %v4368_v36  ;;  %v286_v35 = vld [vmem:[%s5030_s22 + $0x2b8] sm:$0xff]  ;;  %v4422_v36 = vcombine.low %v273_v0, %v277_v22  ;;  %v329_v22 = vld [vmem:[%s5030_s22 + $0x410] sm:$0xff] }
 0x12b   : > { %3779 = vmatprep.subr.bf16.mxu0 %v4375_v37  ;;  %3984 = vmatprep.subr.bf16.mxu1 %v4377_v38  ;;  %v4424_v37 = vcombine.low %v274_v25, %v278_v26  ;;  %v4431_v38 = vcombine.high %v281_v17, %v285_v32  ;;  %v4433_v39 = vcombine.high %v282_v34, %v286_v35  ;;  %v333_v25 = vld [vmem:[%s5030_s22 + $0x430] sm:$0xff]  ;;  %v330_v26 = vld [vmem:[%s5030_s22 + $0x418] sm:$0xff] }
 0x12e   : > { %3780 = vmatpush1.bf16.msra.mxu0 %v4374_v46  ;;  %3985 = vmatpush1.bf16.msra.mxu1 %v4376_v1  ;;  %v294_v46 = vld [vmem:[%s5030_s22 + $0x2f8] sm:$0xff]  ;;  %v4430_v1 = vcombine.low %v281_v17, %v285_v32  ;;  %v337_v32 = vld [vmem:[%s5030_s22 + $0x450] sm:$0xff] }
 0x12f   : > { %3781 = vmatprep.subr.bf16.mxu0 %v4383_v47  ;;  %3986 = vmatprep.subr.bf16.mxu1 %v4385_v48  ;;  %v4432_v47 = vcombine.low %v282_v34, %v286_v35  ;;  %v4439_v48 = vcombine.high %v289_v41, %v293_v42  ;;  %v4441_v27 = vcombine.high %v290_v44, %v294_v46  ;;  %v341_v34 = vld [vmem:[%s5030_s22 + $0x470] sm:$0xff]  ;;  %v338_v35 = vld [vmem:[%s5030_s22 + $0x458] sm:$0xff] }
 0x132   : > { %3782 = vmatpush1.bf16.msra.mxu0 %v4382_v53  ;;  %3987 = vmatpush1.bf16.msra.mxu1 %v4384_v54  ;;  %v302_v53 = vld [vmem:[%s5030_s22 + $0x338] sm:$0xff]  ;;  %v4438_v54 = vcombine.low %v289_v41, %v293_v42  ;;  %v345_v42 = vld [vmem:[%s5030_s22 + $0x490] sm:$0xff] }
 0x133   : > { %3783 = vmatprep.subr.bf16.mxu0 %v4391_v55  ;;  %3988 = vmatprep.subr.bf16.mxu1 %v4393_v57  ;;  %v4440_v55 = vcombine.low %v290_v44, %v294_v46  ;;  %v4447_v57 = vcombine.high %v297_v49, %v301_v51  ;;  %v4449_v58 = vcombine.high %v298_v52, %v302_v53  ;;  %v349_v44 = vld [vmem:[%s5030_s22 + $0x4b0] sm:$0xff]  ;;  %v346_v46 = vld [vmem:[%s5030_s22 + $0x498] sm:$0xff] }
 0x136   : > { %3784 = vmatpush1.bf16.msra.mxu0 %v4390_v62  ;;  %3989 = vmatpush1.bf16.msra.mxu1 %v4392_v63  ;;  %v310_v62 = vld [vmem:[%s5030_s22 + $0x378] sm:$0xff]  ;;  %v4446_v63 = vcombine.low %v297_v49, %v301_v51  ;;  %v353_v51 = vld [vmem:[%s5030_s22 + $0x4d0] sm:$0xff] }
 0x137   : > { %3785 = vmatprep.subr.bf16.mxu0 %v4399_v3  ;;  %3990 = vmatprep.subr.bf16.mxu1 %v4401_v4  ;;  %v4448_v3 = vcombine.low %v298_v52, %v302_v53  ;;  %v4455_v4 = vcombine.high %v305_v59, %v309_v60  ;;  %v4457_v5 = vcombine.high %v306_v61, %v310_v62  ;;  %v357_v52 = vld [vmem:[%s5030_s22 + $0x4f0] sm:$0xff]  ;;  %v354_v53 = vld [vmem:[%s5030_s22 + $0x4d8] sm:$0xff] }
 0x13a   : > { %3786 = vmatpush1.bf16.msra.mxu0 %v4398_v9  ;;  %3991 = vmatpush1.bf16.msra.mxu1 %v4400_v43  ;;  %v318_v9 = vld [vmem:[%s5030_s22 + $0x3b8] sm:$0xff]  ;;  %v4454_v43 = vcombine.low %v305_v59, %v309_v60  ;;  %v361_v59 = vld [vmem:[%s5030_s22 + $0x510] sm:$0xff] }
 0x13b   : > { %3787 = vmatprep.subr.bf16.mxu0 %v4407_v10  ;;  %3992 = vmatprep.subr.bf16.mxu1 %v4409_v11  ;;  %v4456_v10 = vcombine.low %v306_v61, %v310_v62  ;;  %v4463_v11 = vcombine.high %v313_v6, %v317_v7  ;;  %v4465_v12 = vcombine.high %v314_v8, %v318_v9  ;;  %v365_v60 = vld [vmem:[%s5030_s22 + $0x530] sm:$0xff]  ;;  %v362_v61 = vld [vmem:[%s5030_s22 + $0x518] sm:$0xff] }
 0x13c   : > { %v366_v62 = vld [vmem:[%s5030_s22 + $0x538] sm:$0xff] }
 0x13e   : > { %3788 = vmatpush1.bf16.msra.mxu0 %v4406_v18  ;;  %3993 = vmatpush1.bf16.msra.mxu1 %v4408_v19  ;;  %v326_v18 = vld [vmem:[%s5030_s22 + $0x3f8] sm:$0xff]  ;;  %v4462_v19 = vcombine.low %v313_v6, %v317_v7  ;;  %v373_v6 = vld [vmem:[%s5030_s22 + $0x570] sm:$0xff] }
 0x13f   : > { %3789 = vmatprep.subr.bf16.mxu0 %v4415_v20  ;;  %3994 = vmatprep.subr.bf16.mxu1 %v4417_v21  ;;  %v4464_v20 = vcombine.low %v314_v8, %v318_v9  ;;  %v4471_v21 = vcombine.high %v321_v13, %v325_v15  ;;  %v4473_v0 = vcombine.high %v322_v16, %v326_v18  ;;  %v370_v7 = vld [vmem:[%s5030_s22 + $0x558] sm:$0xff] }
 0x140   : > { %v374_v8 = vld [vmem:[%s5030_s22 + $0x578] sm:$0xff]  ;;  %v4510_v9 = vcombine.low %v361_v59, %v365_v60 }
 0x142   : > { %3790 = vmatpush1.bf16.msra.mxu0 %v4414_v28  ;;  %3995 = vmatpush1.bf16.msra.mxu1 %v4416_v29  ;;  %v334_v28 = vld [vmem:[%s5030_s22 + $0x438] sm:$0xff]  ;;  %v4470_v29 = vcombine.low %v321_v13, %v325_v15  ;;  %v381_v13 = vld [vmem:[%s5030_s22 + $0x5b0] sm:$0xff] }
 0x143   : > { %3791 = vmatprep.subr.bf16.mxu0 %v4423_v30  ;;  %3996 = vmatprep.subr.bf16.mxu1 %v4425_v31  ;;  %v4472_v30 = vcombine.low %v322_v16, %v326_v18  ;;  %v4479_v31 = vcombine.high %v329_v22, %v333_v25  ;;  %v4481_v17 = vcombine.high %v330_v26, %v334_v28  ;;  %v378_v15 = vld [vmem:[%s5030_s22 + $0x598] sm:$0xff] }
 0x144   : > { %v382_v16 = vld [vmem:[%s5030_s22 + $0x5b8] sm:$0xff] }
 0x146   : > { %3792 = vmatpush1.bf16.msra.mxu0 %v4422_v36  ;;  %3997 = vmatpush1.bf16.msra.mxu1 %v4424_v37  ;;  %v342_v36 = vld [vmem:[%s5030_s22 + $0x478] sm:$0xff]  ;;  %v4478_v37 = vcombine.low %v329_v22, %v333_v25  ;;  %v389_v22 = vld [vmem:[%s5030_s22 + $0x5f0] sm:$0xff] }
 0x147   : > { %3793 = vmatprep.subr.bf16.mxu0 %v4431_v38  ;;  %3998 = vmatprep.subr.bf16.mxu1 %v4433_v39  ;;  %v4480_v38 = vcombine.low %v330_v26, %v334_v28  ;;  %v4487_v39 = vcombine.high %v337_v32, %v341_v34  ;;  %v4489_v41 = vcombine.high %v338_v35, %v342_v36  ;;  %v386_v25 = vld [vmem:[%s5030_s22 + $0x5d8] sm:$0xff] }
 0x148   : > { %v390_v26 = vld [vmem:[%s5030_s22 + $0x5f8] sm:$0xff] }
 0x14a   : > { %3794 = vmatpush1.bf16.msra.mxu0 %v4430_v1  ;;  %3999 = vmatpush1.bf16.msra.mxu1 %v4432_v47  ;;  %v350_v1 = vld [vmem:[%s5030_s22 + $0x4b8] sm:$0xff]  ;;  %v4486_v47 = vcombine.low %v337_v32, %v341_v34  ;;  %v397_v32 = vld [vmem:[%s5030_s22 + $0x630] sm:$0xff] }
 0x14b   : > { %3795 = vmatprep.subr.bf16.mxu0 %v4439_v48  ;;  %4000 = vmatprep.subr.bf16.mxu1 %v4441_v27  ;;  %v4488_v48 = vcombine.low %v338_v35, %v342_v36  ;;  %v4495_v27 = vcombine.high %v345_v42, %v349_v44  ;;  %v4497_v49 = vcombine.high %v346_v46, %v350_v1  ;;  %v394_v34 = vld [vmem:[%s5030_s22 + $0x618] sm:$0xff] }
 0x14c   : > { %v398_v35 = vld [vmem:[%s5030_s22 + $0x638] sm:$0xff] }
 0x14e   : > { %3796 = vmatpush1.bf16.msra.mxu0 %v4438_v54  ;;  %4001 = vmatpush1.bf16.msra.mxu1 %v4440_v55  ;;  %v358_v54 = vld [vmem:[%s5030_s22 + $0x4f8] sm:$0xff]  ;;  %v4496_v55 = vcombine.low %v346_v46, %v350_v1 }
 0x14f   : > { %3797 = vmatprep.subr.bf16.mxu0 %v4447_v57  ;;  %4002 = vmatprep.subr.bf16.mxu1 %v4449_v58  ;;  %v4503_v57 = vcombine.high %v353_v51, %v357_v52  ;;  %v4505_v58 = vcombine.high %v354_v53, %v358_v54  ;;  %v406_v46 = vld [vmem:[%s5030_s22 + $0x678] sm:$0xff] }
 0x152   : > { %3798 = vmatpush1.bf16.msra.mxu0 %v4446_v63  ;;  %4003 = vmatpush1.bf16.msra.mxu1 %v4448_v3  ;;  %v4502_v63 = vcombine.low %v353_v51, %v357_v52  ;;  %v4511_v3 = vcombine.high %v361_v59, %v365_v60  ;;  %v413_v51 = vld [vmem:[%s5030_s22 + $0x6b0] sm:$0xff]  ;;  %v410_v52 = vld [vmem:[%s5030_s22 + $0x698] sm:$0xff] }
 0x153   : > { %3799 = vmatprep.subr.bf16.mxu0 %v4455_v4  ;;  %4004 = vmatprep.subr.bf16.mxu1 %v4457_v5  ;;  %v4513_v4 = vcombine.high %v362_v61, %v366_v62  ;;  %v369_v5 = vld [vmem:[%s5030_s22 + $0x550] sm:$0xff]  ;;  %v418_v60 = vld [vmem:[%s5030_s22 + $0x6d8] sm:$0xff] }
 0x154   : > { %v4518_v18 = vcombine.low %v369_v5, %v373_v6  ;;  %v421_v59 = vld [vmem:[%s5030_s22 + $0x6f0] sm:$0xff] }
 0x156   : > { %3800 = vmatpush1.bf16.msra.mxu0 %v4454_v43  ;;  %4005 = vmatpush1.bf16.msra.mxu1 %v4456_v10  ;;  %v4512_v43 = vcombine.low %v362_v61, %v366_v62  ;;  %v4519_v10 = vcombine.high %v369_v5, %v373_v6  ;;  %v422_v61 = vld [vmem:[%s5030_s22 + $0x6f8] sm:$0xff]  ;;  %v429_v5 = vld [vmem:[%s5030_s22 + $0x730] sm:$0xff] }
 0x157   : > { %3801 = vmatprep.subr.bf16.mxu0 %v4463_v11  ;;  %4006 = vmatprep.subr.bf16.mxu1 %v4465_v12  ;;  %v4521_v11 = vcombine.high %v370_v7, %v374_v8  ;;  %v377_v12 = vld [vmem:[%s5030_s22 + $0x590] sm:$0xff]  ;;  %v426_v6 = vld [vmem:[%s5030_s22 + $0x718] sm:$0xff] }
 0x158   : > { %v4526_v28 = vcombine.low %v377_v12, %v381_v13 }
 0x15a   : > { %3802 = vmatpush1.bf16.msra.mxu0 %v4462_v19  ;;  %4007 = vmatpush1.bf16.msra.mxu1 %v4464_v20  ;;  %v4520_v19 = vcombine.low %v370_v7, %v374_v8  ;;  %v4527_v20 = vcombine.high %v377_v12, %v381_v13  ;;  %v430_v7 = vld [vmem:[%s5030_s22 + $0x738] sm:$0xff]  ;;  %v437_v12 = vld [vmem:[%s5030_s22 + $0x770] sm:$0xff] }
 0x15b   : > { %3803 = vmatprep.subr.bf16.mxu0 %v4471_v21  ;;  %4008 = vmatprep.subr.bf16.mxu1 %v4473_v0  ;;  %v4529_v21 = vcombine.high %v378_v15, %v382_v16  ;;  %v385_v0 = vld [vmem:[%s5030_s22 + $0x5d0] sm:$0xff]  ;;  %v434_v13 = vld [vmem:[%s5030_s22 + $0x758] sm:$0xff] }
 0x15c   : > { %v4534_v36 = vcombine.low %v385_v0, %v389_v22 }
 0x15e   : > { %3804 = vmatpush1.bf16.msra.mxu0 %v4470_v29  ;;  %4009 = vmatpush1.bf16.msra.mxu1 %v4472_v30  ;;  %v4528_v29 = vcombine.low %v378_v15, %v382_v16  ;;  %v4535_v30 = vcombine.high %v385_v0, %v389_v22  ;;  %v438_v15 = vld [vmem:[%s5030_s22 + $0x778] sm:$0xff]  ;;  %v445_v0 = vld [vmem:[%s5030_s22 + $0x7b0] sm:$0xff] }
 0x15f   : > { %3814 = vmatprep.subr.bf16.mxu0 %v4479_v31  ;;  %4019 = vmatprep.subr.bf16.mxu1 %v4481_v17  ;;  %v4537_v31 = vcombine.high %v386_v25, %v390_v26  ;;  %v393_v17 = vld [vmem:[%s5030_s22 + $0x610] sm:$0xff]  ;;  %v442_v22 = vld [vmem:[%s5030_s22 + $0x798] sm:$0xff] }
 0x160   : > { %v4542_v1 = vcombine.low %v393_v17, %v397_v32 }
 0x161   : > { %3806 = vmatmul.mubr.bf16.vlgmr.msra.gmra.mrb[4].mxu0 %v5104_v14  ;;  %4011 = vmatmul.mubr.bf16.vlgmr.msra.gmra.mrb[4].mxu1 %v5104_v14  ;;  %v4494_v14 = vcombine.low %v345_v42, %v349_v44  ;;  %v405_v42 = vld [vmem:[%s5030_s22 + $0x670] sm:$0xff]  ;;  %v402_v44 = vld [vmem:[%s5030_s22 + $0x658] sm:$0xff] }
 0x162   : > { %3815 = vmatpush1.bf16.msra.mxu0 %v4478_v37  ;;  %4020 = vmatpush1.bf16.msra.mxu1 %v4480_v38  ;;  %v4536_v37 = vcombine.low %v386_v25, %v390_v26  ;;  %v4543_v38 = vcombine.high %v393_v17, %v397_v32  ;;  %v446_v25 = vld [vmem:[%s5030_s22 + $0x7b8] sm:$0xff]  ;;  %v453_v17 = vld [vmem:[%s5030_s22 + $0x7f0] sm:$0xff] }
 0x163   : > { %3816 = vmatprep.subr.bf16.mxu0 %v4487_v39  ;;  %4021 = vmatprep.subr.bf16.mxu1 %v4489_v41  ;;  %v4545_v39 = vcombine.high %v394_v34, %v398_v35  ;;  %v401_v41 = vld [vmem:[%s5030_s22 + $0x650] sm:$0xff]  ;;  %v450_v32 = vld [vmem:[%s5030_s22 + $0x7d8] sm:$0xff] }
 0x164   : > { %3846 = vmatprep.mubr.bf16.mxu0 %v5117_v23  ;;  %4051 = vmatprep.mubr.bf16.mxu1 %v5117_v23  ;;  %v4504_v23 = vcombine.low %v354_v53, %v358_v54  ;;  %v414_v53 = vld [vmem:[%s5030_s22 + $0x6b8] sm:$0xff]  ;;  %v4550_v54 = vcombine.low %v401_v41, %v405_v42 }
 0x166   : > { %3817 = vmatpush1.bf16.msra.mxu0 %v4486_v47  ;;  %4022 = vmatpush1.bf16.msra.mxu1 %v4488_v48  ;;  %v4544_v47 = vcombine.low %v394_v34, %v398_v35  ;;  %v4551_v48 = vcombine.high %v401_v41, %v405_v42  ;;  %v454_v34 = vld [vmem:[%s5030_s22 + $0x7f8] sm:$0xff]  ;;  %v461_v41 = vld [vmem:[%s5030_s22 + $0x830] sm:$0xff] }
 0x167   : > { %3818 = vmatprep.subr.bf16.mxu0 %v4495_v27  ;;  %4023 = vmatprep.subr.bf16.mxu1 %v4497_v49  ;;  %v4553_v27 = vcombine.high %v402_v44, %v406_v46  ;;  %v409_v49 = vld [vmem:[%s5030_s22 + $0x690] sm:$0xff]  ;;  %v458_v42 = vld [vmem:[%s5030_s22 + $0x818] sm:$0xff] }
 0x168   : > { %v4558_v62 = vcombine.low %v409_v49, %v413_v51 }
 0x16a   : > { %3819 = vmatpush1.bf16.msra.mxu0 %v4494_v14  ;;  %4024 = vmatpush1.bf16.msra.mxu1 %v4496_v55  ;;  %v4552_v14 = vcombine.low %v402_v44, %v406_v46  ;;  %v4559_v55 = vcombine.high %v409_v49, %v413_v51  ;;  %v462_v44 = vld [vmem:[%s5030_s22 + $0x838] sm:$0xff]  ;;  %v469_v49 = vld [vmem:[%s5030_s22 + $0x870] sm:$0xff] }
 0x16b   : > { %3820 = vmatprep.subr.bf16.mxu0 %v4503_v57  ;;  %4025 = vmatprep.subr.bf16.mxu1 %v4505_v58  ;;  %v4561_v57 = vcombine.high %v410_v52, %v414_v53  ;;  %v417_v58 = vld [vmem:[%s5030_s22 + $0x6d0] sm:$0xff]  ;;  %v466_v51 = vld [vmem:[%s5030_s22 + $0x858] sm:$0xff] }
 0x16c   : > { %v4566_v8 = vcombine.low %v417_v58, %v421_v59 }
 0x16e   : > { %3821 = vmatpush1.bf16.msra.mxu0 %v4502_v63  ;;  %4026 = vmatpush1.bf16.msra.mxu1 %v4504_v23  ;;  %v4560_v63 = vcombine.low %v410_v52, %v414_v53  ;;  %v4567_v23 = vcombine.high %v417_v58, %v421_v59  ;;  %v470_v52 = vld [vmem:[%s5030_s22 + $0x878] sm:$0xff]  ;;  %v477_v58 = vld [vmem:[%s5030_s22 + $0x8b0] sm:$0xff] }
 0x16f   : > { %3822 = vmatprep.subr.bf16.mxu0 %v4511_v3  ;;  %4027 = vmatprep.subr.bf16.mxu1 %v4513_v4  ;;  %v4569_v3 = vcombine.high %v418_v60, %v422_v61  ;;  %v425_v4 = vld [vmem:[%s5030_s22 + $0x710] sm:$0xff]  ;;  %v474_v59 = vld [vmem:[%s5030_s22 + $0x898] sm:$0xff] }
 0x170   : > { %v4574_v16 = vcombine.low %v425_v4, %v429_v5 }
 0x172   : > { %3823 = vmatpush1.bf16.msra.mxu0 %v4510_v9  ;;  %4028 = vmatpush1.bf16.msra.mxu1 %v4512_v43  ;;  %v4568_v9 = vcombine.low %v418_v60, %v422_v61  ;;  %v4575_v43 = vcombine.high %v425_v4, %v429_v5  ;;  %v478_v60 = vld [vmem:[%s5030_s22 + $0x8b8] sm:$0xff]  ;;  %v485_v4 = vld [vmem:[%s5030_s22 + $0x8f0] sm:$0xff] }
 0x173   : > { %3824 = vmatprep.subr.bf16.mxu0 %v4519_v10  ;;  %4029 = vmatprep.subr.bf16.mxu1 %v4521_v11  ;;  %v4577_v10 = vcombine.high %v426_v6, %v430_v7  ;;  %v433_v11 = vld [vmem:[%s5030_s22 + $0x750] sm:$0xff]  ;;  %v482_v5 = vld [vmem:[%s5030_s22 + $0x8d8] sm:$0xff] }
 0x174   : > { %v4582_v26 = vcombine.low %v433_v11, %v437_v12 }
 0x176   : > { %3825 = vmatpush1.bf16.msra.mxu0 %v4518_v18  ;;  %4030 = vmatpush1.bf16.msra.mxu1 %v4520_v19  ;;  %v4576_v18 = vcombine.low %v426_v6, %v430_v7  ;;  %v4583_v19 = vcombine.high %v433_v11, %v437_v12  ;;  %v486_v6 = vld [vmem:[%s5030_s22 + $0x8f8] sm:$0xff]  ;;  %v4624_v7 = vcombine.low %v474_v59, %v478_v60 }
 0x177   : > { %3826 = vmatprep.subr.bf16.mxu0 %v4527_v20  ;;  %4031 = vmatprep.subr.bf16.mxu1 %v4529_v21  ;;  %v4585_v20 = vcombine.high %v434_v13, %v438_v15  ;;  %v441_v21 = vld [vmem:[%s5030_s22 + $0x790] sm:$0xff]  ;;  %v490_v11 = vld [vmem:[%s5030_s22 + $0x918] sm:$0xff] }
 0x178   : > { %v4590_v35 = vcombine.low %v441_v21, %v445_v0  ;;  %v494_v12 = vld [vmem:[%s5030_s22 + $0x938] sm:$0xff] }
 0x17a   : > { %3827 = vmatpush1.bf16.msra.mxu0 %v4526_v28  ;;  %4032 = vmatpush1.bf16.msra.mxu1 %v4528_v29  ;;  %v4584_v28 = vcombine.low %v434_v13, %v438_v15  ;;  %v4591_v29 = vcombine.high %v441_v21, %v445_v0  ;;  %v502_v21 = vld [vmem:[%s5030_s22 + $0x978] sm:$0xff] }
 0x17b   : > { %3828 = vmatprep.subr.bf16.mxu0 %v4535_v30  ;;  %4033 = vmatprep.subr.bf16.mxu1 %v4537_v31  ;;  %v4593_v30 = vcombine.high %v442_v22, %v446_v25  ;;  %v449_v31 = vld [vmem:[%s5030_s22 + $0x7d0] sm:$0xff] }
 0x17c   : > { %v4598_v46 = vcombine.low %v449_v31, %v453_v17 }
 0x17e   : > { %3829 = vmatpush1.bf16.msra.mxu0 %v4534_v36  ;;  %4034 = vmatpush1.bf16.msra.mxu1 %v4536_v37  ;;  %v4592_v36 = vcombine.low %v442_v22, %v446_v25  ;;  %v4599_v37 = vcombine.high %v449_v31, %v453_v17  ;;  %v4640_v22 = vcombine.low %v490_v11, %v494_v12  ;;  %v510_v31 = vld [vmem:[%s5030_s22 + $0x9b8] sm:$0xff] }
 0x17f   : > { %3830 = vmatprep.subr.bf16.mxu0 %v4543_v38  ;;  %4035 = vmatprep.subr.bf16.mxu1 %v4545_v39  ;;  %v4601_v38 = vcombine.high %v450_v32, %v454_v34  ;;  %v457_v39 = vld [vmem:[%s5030_s22 + $0x810] sm:$0xff] }
 0x180   : > { %v4606_v53 = vcombine.low %v457_v39, %v461_v41 }
 0x182   : > { %3831 = vmatpush1.bf16.msra.mxu0 %v4542_v1  ;;  %4036 = vmatpush1.bf16.msra.mxu1 %v4544_v47  ;;  %v4600_v1 = vcombine.low %v450_v32, %v454_v34  ;;  %v4607_v47 = vcombine.high %v457_v39, %v461_v41  ;;  %v518_v39 = vld [vmem:[%s5030_s22 + $0x9f8] sm:$0xff] }
 0x183   : > { %3832 = vmatprep.subr.bf16.mxu0 %v4551_v48  ;;  %4037 = vmatprep.subr.bf16.mxu1 %v4553_v27  ;;  %v4609_v48 = vcombine.high %v458_v42, %v462_v44  ;;  %v465_v27 = vld [vmem:[%s5030_s22 + $0x850] sm:$0xff] }
 0x184   : > { %v4614_v61 = vcombine.low %v465_v27, %v469_v49 }
 0x186   : > { %3833 = vmatpush1.bf16.msra.mxu0 %v4550_v54  ;;  %4038 = vmatpush1.bf16.msra.mxu1 %v4552_v14  ;;  %v4608_v54 = vcombine.low %v458_v42, %v462_v44  ;;  %v4615_v14 = vcombine.high %v465_v27, %v469_v49  ;;  %v526_v27 = vld [vmem:[%s5030_s22 + $0xa38] sm:$0xff] }
 0x187   : > { %3834 = vmatprep.subr.bf16.mxu0 %v4559_v55  ;;  %4039 = vmatprep.subr.bf16.mxu1 %v4561_v57  ;;  %v4617_v55 = vcombine.high %v466_v51, %v470_v52  ;;  %v473_v57 = vld [vmem:[%s5030_s22 + $0x890] sm:$0xff] }
 0x18a   : > { %3835 = vmatpush1.bf16.msra.mxu0 %v4558_v62  ;;  %4040 = vmatpush1.bf16.msra.mxu1 %v4560_v63  ;;  %v4616_v62 = vcombine.low %v466_v51, %v470_v52  ;;  %v4623_v63 = vcombine.high %v473_v57, %v477_v58 }
 0x18b   : > { %3836 = vmatprep.subr.bf16.mxu0 %v4567_v23  ;;  %4041 = vmatprep.subr.bf16.mxu1 %v4569_v3  ;;  %v4625_v23 = vcombine.high %v474_v59, %v478_v60  ;;  %v481_v3 = vld [vmem:[%s5030_s22 + $0x8d0] sm:$0xff] }
 0x18c   : > { %v4630_v13 = vcombine.low %v481_v3, %v485_v4 }
 0x18e   : > { %3837 = vmatpush1.bf16.msra.mxu0 %v4566_v8  ;;  %4042 = vmatpush1.bf16.msra.mxu1 %v4568_v9  ;;  %v4631_v8 = vcombine.high %v481_v3, %v485_v4  ;;  %v4633_v9 = vcombine.high %v482_v5, %v486_v6  ;;  %v542_v3 = vld [vmem:[%s5030_s22 + $0xab8] sm:$0xff] }
 0x18f   : > { %3838 = vmatprep.subr.bf16.mxu0 %v4575_v43  ;;  %4043 = vmatprep.subr.bf16.mxu1 %v4577_v10  ;;  %v489_v43 = vld [vmem:[%s5030_s22 + $0x910] sm:$0xff] }
 0x190   : > { %v493_v10 = vld [vmem:[%s5030_s22 + $0x930] sm:$0xff] }
 0x191   : > { %v4639_v15 = vcombine.high %v489_v43, %v493_v10  ;;  %v4638_v0 = vcombine.low %v489_v43, %v493_v10  ;;  %v550_v43 = vld [vmem:[%s5030_s22 + $0xaf8] sm:$0xff] }
 0x192   : > { %3839 = vmatpush1.bf16.msra.mxu0 %v4574_v16  ;;  %4044 = vmatpush1.bf16.msra.mxu1 %v4576_v18  ;;  %v4641_v16 = vcombine.high %v490_v11, %v494_v12  ;;  %v497_v18 = vld [vmem:[%s5030_s22 + $0x950] sm:$0xff] }
 0x193   : > { %3840 = vmatprep.subr.bf16.mxu0 %v4583_v19  ;;  %4045 = vmatprep.subr.bf16.mxu1 %v4585_v20  ;;  %v501_v19 = vld [vmem:[%s5030_s22 + $0x970] sm:$0xff]  ;;  %v498_v20 = vld [vmem:[%s5030_s22 + $0x958] sm:$0xff] }
 0x194   : > { %v4647_v25 = vcombine.high %v497_v18, %v501_v19  ;;  %v4646_v17 = vcombine.low %v497_v18, %v501_v19  ;;  %v4648_v32 = vcombine.low %v498_v20, %v502_v21  ;;  %v558_v18 = vld [vmem:[%s5030_s22 + $0xb38] sm:$0xff] }
 0x196   : > { %3841 = vmatpush1.bf16.msra.mxu0 %v4582_v26  ;;  %4046 = vmatpush1.bf16.msra.mxu1 %v4584_v28  ;;  %v4649_v26 = vcombine.high %v498_v20, %v502_v21  ;;  %v505_v28 = vld [vmem:[%s5030_s22 + $0x990] sm:$0xff] }
 0x197   : > { %3842 = vmatprep.subr.bf16.mxu0 %v4591_v29  ;;  %4047 = vmatprep.subr.bf16.mxu1 %v4593_v30  ;;  %v509_v29 = vld [vmem:[%s5030_s22 + $0x9b0] sm:$0xff]  ;;  %v506_v30 = vld [vmem:[%s5030_s22 + $0x998] sm:$0xff] }
 0x198   : > { %v4655_v34 = vcombine.high %v505_v28, %v509_v29  ;;  %v4654_v41 = vcombine.low %v505_v28, %v509_v29  ;;  %v4656_v42 = vcombine.low %v506_v30, %v510_v31  ;;  %v566_v28 = vld [vmem:[%s5030_s22 + $0xb78] sm:$0xff] }
 0x19a   : > { %3843 = vmatpush1.bf16.msra.mxu0 %v4590_v35  ;;  %4048 = vmatpush1.bf16.msra.mxu1 %v4592_v36  ;;  %v4657_v35 = vcombine.high %v506_v30, %v510_v31  ;;  %v513_v36 = vld [vmem:[%s5030_s22 + $0x9d0] sm:$0xff] }
 0x19b   : > { %3844 = vmatprep.subr.bf16.mxu0 %v4599_v37  ;;  %4049 = vmatprep.subr.bf16.mxu1 %v4601_v38  ;;  %v517_v37 = vld [vmem:[%s5030_s22 + $0x9f0] sm:$0xff]  ;;  %v514_v38 = vld [vmem:[%s5030_s22 + $0x9d8] sm:$0xff] }
 0x19c   : > { %v4663_v44 = vcombine.high %v513_v36, %v517_v37  ;;  %v4662_v49 = vcombine.low %v513_v36, %v517_v37  ;;  %v4664_v51 = vcombine.low %v514_v38, %v518_v39  ;;  %v574_v36 = vld [vmem:[%s5030_s22 + $0xbb8] sm:$0xff] }
 0x19e   : > { %3845 = vmatpush1.bf16.msra.mxu0 %v4598_v46  ;;  %4050 = vmatpush1.bf16.msra.mxu1 %v4600_v1  ;;  %v4665_v46 = vcombine.high %v514_v38, %v518_v39  ;;  %v521_v1 = vld [vmem:[%s5030_s22 + $0xa10] sm:$0xff] }
 0x19f   : > { %3855 = vmatprep.subr.bf16.mxu0 %v4607_v47  ;;  %4060 = vmatprep.subr.bf16.mxu1 %v4609_v48  ;;  %v525_v47 = vld [vmem:[%s5030_s22 + $0xa30] sm:$0xff]  ;;  %v522_v48 = vld [vmem:[%s5030_s22 + $0xa18] sm:$0xff] }
 0x1a0   : > { %v4671_v52 = vcombine.high %v521_v1, %v525_v47  ;;  %v4672_v59 = vcombine.low %v522_v48, %v526_v27 }
 0x1a1   : > { %3847 = vmatmul.mubr.bf16.vlgmr.msra.gmra.mrb[4].mxu0 %v5185_v24  ;;  %4052 = vmatmul.mubr.bf16.vlgmr.msra.gmra.mrb[4].mxu1 %v5185_v24  ;;  %v4622_v24 = vcombine.low %v473_v57, %v477_v58  ;;  %v534_v57 = vld [vmem:[%s5030_s22 + $0xa78] sm:$0xff]  ;;  %v4670_v58 = vcombine.low %v521_v1, %v525_v47 }
 0x1a2   : > { %3856 = vmatpush1.bf16.msra.mxu0 %v4606_v53  ;;  %4061 = vmatpush1.bf16.msra.mxu1 %v4608_v54  ;;  %v4673_v53 = vcombine.high %v522_v48, %v526_v27  ;;  %v529_v54 = vld [vmem:[%s5030_s22 + $0xa50] sm:$0xff]  ;;  %v582_v1 = vld [vmem:[%s5030_s22 + $0xbf8] sm:$0xff] }
 0x1a3   : > { %3857 = vmatprep.subr.bf16.mxu0 %v4615_v14  ;;  %4062 = vmatprep.subr.bf16.mxu1 %v4617_v55  ;;  %v533_v14 = vld [vmem:[%s5030_s22 + $0xa70] sm:$0xff]  ;;  %v530_v55 = vld [vmem:[%s5030_s22 + $0xa58] sm:$0xff] }
 0x1a4   : > { %3887 = vmatprep.mubr.bf16.mxu0 %v5198_v33  ;;  %4092 = vmatprep.mubr.bf16.mxu1 %v5198_v33  ;;  %v4632_v33 = vcombine.low %v482_v5, %v486_v6  ;;  %v4679_v60 = vcombine.high %v529_v54, %v533_v14  ;;  %v4678_v4 = vcombine.low %v529_v54, %v533_v14  ;;  %v590_v54 = vld [vmem:[%s5030_s22 + $0xc38] sm:$0xff] }
 0x1a5   : > { %v4680_v5 = vcombine.low %v530_v55, %v534_v57 }
 0x1a6   : > { %3858 = vmatpush1.bf16.msra.mxu0 %v4614_v61  ;;  %4063 = vmatpush1.bf16.msra.mxu1 %v4616_v62  ;;  %v4681_v61 = vcombine.high %v530_v55, %v534_v57  ;;  %v537_v62 = vld [vmem:[%s5030_s22 + $0xa90] sm:$0xff] }
 0x1a7   : > { %3859 = vmatprep.subr.bf16.mxu0 %v4623_v63  ;;  %4064 = vmatprep.subr.bf16.mxu1 %v4625_v23  ;;  %v541_v63 = vld [vmem:[%s5030_s22 + $0xab0] sm:$0xff]  ;;  %v538_v23 = vld [vmem:[%s5030_s22 + $0xa98] sm:$0xff] }
 0x1a8   : > { %v4687_v6 = vcombine.high %v537_v62, %v541_v63  ;;  %v4686_v10 = vcombine.low %v537_v62, %v541_v63  ;;  %v4688_v11 = vcombine.low %v538_v23, %v542_v3  ;;  %v598_v62 = vld [vmem:[%s5030_s22 + $0xc78] sm:$0xff] }
 0x1aa   : > { %3860 = vmatpush1.bf16.msra.mxu0 %v4622_v24  ;;  %4065 = vmatpush1.bf16.msra.mxu1 %v4624_v7  ;;  %v4689_v24 = vcombine.high %v538_v23, %v542_v3  ;;  %v545_v7 = vld [vmem:[%s5030_s22 + $0xad0] sm:$0xff] }
 0x1ab   : > { %3861 = vmatprep.subr.bf16.mxu0 %v4631_v8  ;;  %4066 = vmatprep.subr.bf16.mxu1 %v4633_v9  ;;  %v549_v8 = vld [vmem:[%s5030_s22 + $0xaf0] sm:$0xff]  ;;  %v546_v9 = vld [vmem:[%s5030_s22 + $0xad8] sm:$0xff] }
 0x1ac   : > { %v4695_v12 = vcombine.high %v545_v7, %v549_v8  ;;  %v4694_v19 = vcombine.low %v545_v7, %v549_v8  ;;  %v4696_v20 = vcombine.low %v546_v9, %v550_v43  ;;  %v606_v7 = vld [vmem:[%s5030_s22 + $0xcb8] sm:$0xff] }
 0x1ae   : > { %3862 = vmatpush1.bf16.msra.mxu0 %v4630_v13  ;;  %4067 = vmatpush1.bf16.msra.mxu1 %v4632_v33  ;;  %v4697_v13 = vcombine.high %v546_v9, %v550_v43  ;;  %v553_v33 = vld [vmem:[%s5030_s22 + $0xb10] sm:$0xff] }
 0x1af   : > { %3863 = vmatprep.subr.bf16.mxu0 %v4639_v15  ;;  %4068 = vmatprep.subr.bf16.mxu1 %v4641_v16  ;;  %v557_v15 = vld [vmem:[%s5030_s22 + $0xb30] sm:$0xff]  ;;  %v554_v16 = vld [vmem:[%s5030_s22 + $0xb18] sm:$0xff] }
 0x1b0   : > { %v4703_v21 = vcombine.high %v553_v33, %v557_v15  ;;  %v4702_v29 = vcombine.low %v553_v33, %v557_v15  ;;  %v4704_v30 = vcombine.low %v554_v16, %v558_v18  ;;  %v614_v33 = vld [vmem:[%s5030_s22 + $0xcf8] sm:$0xff] }
 0x1b2   : > { %3864 = vmatpush1.bf16.msra.mxu0 %v4638_v0  ;;  %4069 = vmatpush1.bf16.msra.mxu1 %v4640_v22  ;;  %v4705_v0 = vcombine.high %v554_v16, %v558_v18  ;;  %v561_v22 = vld [vmem:[%s5030_s22 + $0xb50] sm:$0xff] }
 0x1b3   : > { %3865 = vmatprep.subr.bf16.mxu0 %v4647_v25  ;;  %4070 = vmatprep.subr.bf16.mxu1 %v4649_v26  ;;  %v565_v25 = vld [vmem:[%s5030_s22 + $0xb70] sm:$0xff]  ;;  %v562_v26 = vld [vmem:[%s5030_s22 + $0xb58] sm:$0xff] }
 0x1b4   : > { %v4711_v31 = vcombine.high %v561_v22, %v565_v25  ;;  %v4710_v37 = vcombine.low %v561_v22, %v565_v25  ;;  %v4712_v38 = vcombine.low %v562_v26, %v566_v28 }
 0x1b6   : > { %3866 = vmatpush1.bf16.msra.mxu0 %v4646_v17  ;;  %4071 = vmatpush1.bf16.msra.mxu1 %v4648_v32  ;;  %v4713_v17 = vcombine.high %v562_v26, %v566_v28  ;;  %v569_v32 = vld [vmem:[%s5030_s22 + $0xb90] sm:$0xff] }
 0x1b7   : > { %3867 = vmatprep.subr.bf16.mxu0 %v4655_v34  ;;  %4072 = vmatprep.subr.bf16.mxu1 %v4657_v35  ;;  %v573_v34 = vld [vmem:[%s5030_s22 + $0xbb0] sm:$0xff]  ;;  %v570_v35 = vld [vmem:[%s5030_s22 + $0xb98] sm:$0xff] }
 0x1b8   : > { %v4719_v39 = vcombine.high %v569_v32, %v573_v34  ;;  %v4718_v47 = vcombine.low %v569_v32, %v573_v34  ;;  %v4720_v48 = vcombine.low %v570_v35, %v574_v36  ;;  %v625_v28 = vld [vmem:[%s5030_s22 + $0xd50] sm:$0xff] }
 0x1ba   : > { %3868 = vmatpush1.bf16.msra.mxu0 %v4654_v41  ;;  %4073 = vmatpush1.bf16.msra.mxu1 %v4656_v42  ;;  %v4721_v41 = vcombine.high %v570_v35, %v574_v36  ;;  %v577_v42 = vld [vmem:[%s5030_s22 + $0xbd0] sm:$0xff] }
 0x1bb   : > { %3869 = vmatprep.subr.bf16.mxu0 %v4663_v44  ;;  %4074 = vmatprep.subr.bf16.mxu1 %v4665_v46  ;;  %v581_v44 = vld [vmem:[%s5030_s22 + $0xbf0] sm:$0xff]  ;;  %v578_v46 = vld [vmem:[%s5030_s22 + $0xbd8] sm:$0xff] }
 0x1bc   : > { %v4727_v27 = vcombine.high %v577_v42, %v581_v44  ;;  %v4726_v14 = vcombine.low %v577_v42, %v581_v44  ;;  %v4728_v55 = vcombine.low %v578_v46, %v582_v1  ;;  %v633_v36 = vld [vmem:[%s5030_s22 + $0xd90] sm:$0xff] }
 0x1be   : > { %3870 = vmatpush1.bf16.msra.mxu0 %v4662_v49  ;;  %4075 = vmatpush1.bf16.msra.mxu1 %v4664_v51  ;;  %v4729_v49 = vcombine.high %v578_v46, %v582_v1  ;;  %v585_v51 = vld [vmem:[%s5030_s22 + $0xc10] sm:$0xff] }
 0x1bf   : > { %3871 = vmatprep.subr.bf16.mxu0 %v4671_v52  ;;  %4076 = vmatprep.subr.bf16.mxu1 %v4673_v53  ;;  %v589_v52 = vld [vmem:[%s5030_s22 + $0xc30] sm:$0xff]  ;;  %v586_v53 = vld [vmem:[%s5030_s22 + $0xc18] sm:$0xff] }
 0x1c0   : > { %v4735_v57 = vcombine.high %v585_v51, %v589_v52  ;;  %v4734_v63 = vcombine.low %v585_v51, %v589_v52  ;;  %v4736_v23 = vcombine.low %v586_v53, %v590_v54  ;;  %v642_v51 = vld [vmem:[%s5030_s22 + $0xdd8] sm:$0xff] }
 0x1c1   : > { %v646_v52 = vld [vmem:[%s5030_s22 + $0xdf8] sm:$0xff] }
 0x1c2   : > { %3872 = vmatpush1.bf16.msra.mxu0 %v4670_v58  ;;  %4077 = vmatpush1.bf16.msra.mxu1 %v4672_v59  ;;  %v4737_v58 = vcombine.high %v586_v53, %v590_v54  ;;  %v593_v59 = vld [vmem:[%s5030_s22 + $0xc50] sm:$0xff] }
 0x1c3   : > { %3873 = vmatprep.subr.bf16.mxu0 %v4679_v60  ;;  %4078 = vmatprep.subr.bf16.mxu1 %v4681_v61  ;;  %v597_v60 = vld [vmem:[%s5030_s22 + $0xc70] sm:$0xff]  ;;  %v594_v61 = vld [vmem:[%s5030_s22 + $0xc58] sm:$0xff] }
 0x1c4   : > { %v4743_v3 = vcombine.high %v593_v59, %v597_v60  ;;  %v4742_v8 = vcombine.low %v593_v59, %v597_v60  ;;  %v4744_v9 = vcombine.low %v594_v61, %v598_v62 }
 0x1c6   : > { %3874 = vmatpush1.bf16.msra.mxu0 %v4678_v4  ;;  %4079 = vmatpush1.bf16.msra.mxu1 %v4680_v5  ;;  %v4745_v4 = vcombine.high %v594_v61, %v598_v62  ;;  %v601_v5 = vld [vmem:[%s5030_s22 + $0xc90] sm:$0xff] }
 0x1c7   : > { %3875 = vmatprep.subr.bf16.mxu0 %v4687_v6  ;;  %4080 = vmatprep.subr.bf16.mxu1 %v4689_v24  ;;  %v605_v6 = vld [vmem:[%s5030_s22 + $0xcb0] sm:$0xff]  ;;  %v602_v24 = vld [vmem:[%s5030_s22 + $0xc98] sm:$0xff] }
 0x1c8   : > { %v4751_v43 = vcombine.high %v601_v5, %v605_v6  ;;  %v4752_v15 = vcombine.low %v602_v24, %v606_v7 }
 0x1ca   : > { %3876 = vmatpush1.bf16.msra.mxu0 %v4686_v10  ;;  %4081 = vmatpush1.bf16.msra.mxu1 %v4688_v11  ;;  %v4753_v10 = vcombine.high %v602_v24, %v606_v7  ;;  %v609_v11 = vld [vmem:[%s5030_s22 + $0xcd0] sm:$0xff]  ;;  %v4792_v7 = vcombine.low %v642_v51, %v646_v52 }
 0x1cb   : > { %3877 = vmatprep.subr.bf16.mxu0 %v4695_v12  ;;  %4082 = vmatprep.subr.bf16.mxu1 %v4697_v13  ;;  %v613_v12 = vld [vmem:[%s5030_s22 + $0xcf0] sm:$0xff]  ;;  %v610_v13 = vld [vmem:[%s5030_s22 + $0xcd8] sm:$0xff] }
 0x1cc   : > { %v4759_v16 = vcombine.high %v609_v11, %v613_v12  ;;  %v4761_v18 = vcombine.high %v610_v13, %v614_v33  ;;  %v4758_v22 = vcombine.low %v609_v11, %v613_v12  ;;  %v658_v11 = vld [vmem:[%s5030_s22 + $0xe58] sm:$0xff] }
 0x1cd   : > { %v662_v12 = vld [vmem:[%s5030_s22 + $0xe78] sm:$0xff] }
 0x1ce   : > { %3878 = vmatpush1.bf16.msra.mxu0 %v4694_v19  ;;  %4083 = vmatpush1.bf16.msra.mxu1 %v4696_v20  ;;  %v617_v19 = vld [vmem:[%s5030_s22 + $0xd10] sm:$0xff] }
 0x1cf   : > { %3879 = vmatprep.subr.bf16.mxu0 %v4703_v21  ;;  %4084 = vmatprep.subr.bf16.mxu1 %v4705_v0  ;;  %v621_v20 = vld [vmem:[%s5030_s22 + $0xd30] sm:$0xff]  ;;  %v618_v21 = vld [vmem:[%s5030_s22 + $0xd18] sm:$0xff] }
 0x1d0   : > { %v622_v0 = vld [vmem:[%s5030_s22 + $0xd38] sm:$0xff]  ;;  %v4767_v25 = vcombine.high %v617_v19, %v621_v20 }
 0x1d1   : > { %v4769_v26 = vcombine.high %v618_v21, %v622_v0  ;;  %v4768_v32 = vcombine.low %v618_v21, %v622_v0  ;;  %v4808_v0 = vcombine.low %v658_v11, %v662_v12 }
 0x1d2   : > { %3880 = vmatpush1.bf16.msra.mxu0 %v4702_v29  ;;  %4085 = vmatpush1.bf16.msra.mxu1 %v4704_v30  ;;  %v629_v29 = vld [vmem:[%s5030_s22 + $0xd70] sm:$0xff]  ;;  %v626_v30 = vld [vmem:[%s5030_s22 + $0xd58] sm:$0xff] }
 0x1d3   : > { %3881 = vmatprep.subr.bf16.mxu0 %v4711_v31  ;;  %4086 = vmatprep.subr.bf16.mxu1 %v4713_v17  ;;  %v630_v31 = vld [vmem:[%s5030_s22 + $0xd78] sm:$0xff]  ;;  %v4766_v17 = vcombine.low %v617_v19, %v621_v20  ;;  %v4775_v34 = vcombine.high %v625_v28, %v629_v29 }
 0x1d4   : > { %v4777_v35 = vcombine.high %v626_v30, %v630_v31  ;;  %v4776_v42 = vcombine.low %v626_v30, %v630_v31  ;;  %v666_v19 = vld [vmem:[%s5030_s22 + $0xe98] sm:$0xff] }
 0x1d5   : > { %v670_v20 = vld [vmem:[%s5030_s22 + $0xeb8] sm:$0xff] }
 0x1d6   : > { %3882 = vmatpush1.bf16.msra.mxu0 %v4710_v37  ;;  %4087 = vmatpush1.bf16.msra.mxu1 %v4712_v38  ;;  %v637_v37 = vld [vmem:[%s5030_s22 + $0xdb0] sm:$0xff]  ;;  %v634_v38 = vld [vmem:[%s5030_s22 + $0xd98] sm:$0xff]  ;;  %v4816_v31 = vcombine.low %v666_v19, %v670_v20 }
 0x1d7   : > { %3883 = vmatprep.subr.bf16.mxu0 %v4719_v39  ;;  %4088 = vmatprep.subr.bf16.mxu1 %v4721_v41  ;;  %v638_v39 = vld [vmem:[%s5030_s22 + $0xdb8] sm:$0xff]  ;;  %v4774_v41 = vcombine.low %v625_v28, %v629_v29  ;;  %v4783_v44 = vcombine.high %v633_v36, %v637_v37 }
 0x1d8   : > { %v4785_v1 = vcombine.high %v634_v38, %v638_v39  ;;  %v4784_v59 = vcombine.low %v634_v38, %v638_v39  ;;  %v674_v28 = vld [vmem:[%s5030_s22 + $0xed8] sm:$0xff] }
 0x1d9   : > { %v678_v29 = vld [vmem:[%s5030_s22 + $0xef8] sm:$0xff] }
 0x1da   : > { %3884 = vmatpush1.bf16.msra.mxu0 %v4718_v47  ;;  %4089 = vmatpush1.bf16.msra.mxu1 %v4720_v48  ;;  %v641_v47 = vld [vmem:[%s5030_s22 + $0xdd0] sm:$0xff]  ;;  %v4824_v39 = vcombine.low %v674_v28, %v678_v29 }
 0x1db   : > { %3885 = vmatprep.subr.bf16.mxu0 %v4727_v27  ;;  %4090 = vmatprep.subr.bf16.mxu1 %v4729_v49  ;;  %v645_v48 = vld [vmem:[%s5030_s22 + $0xdf0] sm:$0xff] }
 0x1dc   : > { %v4791_v60 = vcombine.high %v641_v47, %v645_v48  ;;  %v4790_v24 = vcombine.low %v641_v47, %v645_v48  ;;  %v690_v47 = vld [vmem:[%s5030_s22 + $0xf58] sm:$0xff] }
 0x1dd   : > { %v694_v48 = vld [vmem:[%s5030_s22 + $0xf78] sm:$0xff] }
 0x1de   : > { %3886 = vmatpush1.bf16.msra.mxu0 %v4726_v14  ;;  %4091 = vmatpush1.bf16.msra.mxu1 %v4728_v55  ;;  %v4782_v55 = vcombine.low %v633_v36, %v637_v37  ;;  %v682_v36 = vld [vmem:[%s5030_s22 + $0xf18] sm:$0xff] }
 0x1df   : > { %3896 = vmatprep.subr.bf16.mxu0 %v4735_v57  ;;  %4101 = vmatprep.subr.bf16.mxu1 %v4737_v58  ;;  %v686_v37 = vld [vmem:[%s5030_s22 + $0xf38] sm:$0xff] }
 0x1e1   : > { %3888 = vmatmul.mubr.bf16.vlgmr.msra.gmra.mrb[4].mxu0 %v5268_v40  ;;  %4093 = vmatmul.mubr.bf16.vlgmr.msra.gmra.mrb[4].mxu1 %v5268_v40  ;;  %v4750_v40 = vcombine.low %v601_v5, %v605_v6  ;;  %v654_v5 = vld [vmem:[%s5030_s22 + $0xe38] sm:$0xff] }
 0x1e2   : > { %3897 = vmatpush1.bf16.msra.mxu0 %v4734_v63  ;;  %4102 = vmatpush1.bf16.msra.mxu1 %v4736_v23  ;;  %v4793_v63 = vcombine.high %v642_v51, %v646_v52  ;;  %v649_v23 = vld [vmem:[%s5030_s22 + $0xe10] sm:$0xff]  ;;  %v4832_v52 = vcombine.low %v682_v36, %v686_v37 }
 0x1e3   : > { %3898 = vmatprep.subr.bf16.mxu0 %v4743_v3  ;;  %4103 = vmatprep.subr.bf16.mxu1 %v4745_v4  ;;  %v653_v3 = vld [vmem:[%s5030_s22 + $0xe30] sm:$0xff]  ;;  %v650_v4 = vld [vmem:[%s5030_s22 + $0xe18] sm:$0xff] }
 0x1e4   : > { %3928 = vmatprep.mubr.bf16.mxu0 %v5281_v50  ;;  %4133 = vmatprep.mubr.bf16.mxu1 %v5281_v50  ;;  %v4760_v50 = vcombine.low %v610_v13, %v614_v33  ;;  %v4798_v13 = vcombine.low %v649_v23, %v653_v3  ;;  %v4800_v33 = vcombine.low %v650_v4, %v654_v5 }
 0x1e6   : > { %3899 = vmatpush1.bf16.msra.mxu0 %v4742_v8  ;;  %4104 = vmatpush1.bf16.msra.mxu1 %v4744_v9  ;;  %v4799_v8 = vcombine.high %v649_v23, %v653_v3  ;;  %v4801_v9 = vcombine.high %v650_v4, %v654_v5  ;;  %v705_v23 = vld [vmem:[%s5030_s22 + $0xfd0] sm:$0xff]  ;;  %v706_v5 = vld [vmem:[%s5030_s22 + $0xfd8] sm:$0xff] }
 0x1e7   : > { %3900 = vmatprep.subr.bf16.mxu0 %v4751_v43  ;;  %4105 = vmatprep.subr.bf16.mxu1 %v4753_v10  ;;  %v657_v43 = vld [vmem:[%s5030_s22 + $0xe50] sm:$0xff] }
 0x1e8   : > { %v661_v10 = vld [vmem:[%s5030_s22 + $0xe70] sm:$0xff] }
 0x1e9   : > { %v4806_v21 = vcombine.low %v657_v43, %v661_v10  ;;  %v709_v3 = vld [vmem:[%s5030_s22 + $0xff0] sm:$0xff] }
 0x1ea   : > { %3901 = vmatpush1.bf16.msra.mxu0 %v4750_v40  ;;  %4106 = vmatpush1.bf16.msra.mxu1 %v4752_v15  ;;  %v4807_v40 = vcombine.high %v657_v43, %v661_v10  ;;  %v4809_v15 = vcombine.high %v658_v11, %v662_v12  ;;  %v713_v4 = vld [vmem:[%s5030_s22 + $0x1010] sm:$0x77]  ;;  %v4855_v43 = vcombine.high %v705_v23, %v709_v3 }
 0x1eb   : > { %3902 = vmatprep.subr.bf16.mxu0 %v4759_v16  ;;  %4107 = vmatprep.subr.bf16.mxu1 %v4761_v18  ;;  %v665_v16 = vld [vmem:[%s5030_s22 + $0xe90] sm:$0xff]  ;;  %v4863_v10 = vcombine.high %v713_v4, %v713_v4 }
 0x1ec   : > { %v669_v18 = vld [vmem:[%s5030_s22 + $0xeb0] sm:$0xff] }
 0x1ed   : > { %v4814_v30 = vcombine.low %v665_v16, %v669_v18 }
 0x1ee   : > { %3903 = vmatpush1.bf16.msra.mxu0 %v4758_v22  ;;  %4108 = vmatpush1.bf16.msra.mxu1 %v4760_v50  ;;  %v4815_v22 = vcombine.high %v665_v16, %v669_v18  ;;  %v4817_v50 = vcombine.high %v666_v19, %v670_v20 }
 0x1ef   : > { %3904 = vmatprep.subr.bf16.mxu0 %v4767_v25  ;;  %4109 = vmatprep.subr.bf16.mxu1 %v4769_v26  ;;  %v673_v25 = vld [vmem:[%s5030_s22 + $0xed0] sm:$0xff] }
 0x1f0   : > { %v677_v26 = vld [vmem:[%s5030_s22 + $0xef0] sm:$0xff] }
 0x1f1   : > { %v4822_v38 = vcombine.low %v673_v25, %v677_v26 }
 0x1f2   : > { %3905 = vmatpush1.bf16.msra.mxu0 %v4766_v17  ;;  %4110 = vmatpush1.bf16.msra.mxu1 %v4768_v32  ;;  %v4823_v17 = vcombine.high %v673_v25, %v677_v26  ;;  %v4825_v32 = vcombine.high %v674_v28, %v678_v29 }
 0x1f3   : > { %3906 = vmatprep.subr.bf16.mxu0 %v4775_v34  ;;  %4111 = vmatprep.subr.bf16.mxu1 %v4777_v35  ;;  %v681_v34 = vld [vmem:[%s5030_s22 + $0xf10] sm:$0xff] }
 0x1f4   : > { %v5596_v46 = vpop.f32.mrb[0].mxu0  ;;  %v5600_v27 = vpop.f32.mrb[0].mxu1  ;;  %v685_v35 = vld [vmem:[%s5030_s22 + $0xf30] sm:$0xff] }
 0x1f5   : > { %v5602_v49 = vpop.f32.mrb[1].mxu0  ;;  %v5608_v54 = vpop.f32.mrb[1].mxu1  ;;  %v4830_v51 = vcombine.low %v681_v34, %v685_v35 }
 0x1f6   : > { %v4183_v53 = vadd.f32 %v5602_v49, %v5596_v46  ;;  %3907 = vmatpush1.bf16.msra.mxu0 %v4774_v41  ;;  %v3565_v14 = vpop.f32.mrb[2].mxu0  ;;  %4112 = vmatpush1.bf16.msra.mxu1 %v4776_v42  ;;  %v3770_v57 = vpop.f32.mrb[2].mxu1  ;;  %v4831_v41 = vcombine.high %v681_v34, %v685_v35  ;;  %v4833_v42 = vcombine.high %v682_v36, %v686_v37 }
 0x1f7   : > { %v3566_v58 = vpop.f32.mrb[3].mxu0  ;;  %3908 = vmatprep.subr.bf16.mxu0 %v4783_v44  ;;  %v3771_v62 = vpop.f32.mrb[3].mxu1  ;;  %4113 = vmatprep.subr.bf16.mxu1 %v4785_v1  ;;  %v689_v44 = vld [vmem:[%s5030_s22 + $0xf50] sm:$0xff]  ;;  %v4841_v14 = vcombine.high %v690_v47, %v694_v48 }
 0x1f8   : > { %v4184_v61 = vadd.f32 %v4183_v53, %v5600_v27  ;;  %v693_v1 = vld [vmem:[%s5030_s22 + $0xf70] sm:$0xff]  ;;  %v698_v58 = vld [vmem:[%s5030_s22 + $0xf98] sm:$0xff] }
 0x1f9   : > { %v4839_v53 = vcombine.high %v689_v44, %v693_v1  ;;  %v701_v57 = vld [vmem:[%s5030_s22 + $0xfb0] sm:$0xff] }
 0x1fa   : > { %v5616_v6 = vadd.f32 %v4184_v61, %v5608_v54  ;;  %3909 = vmatpush1.bf16.msra.mxu0 %v4782_v55  ;;  %4114 = vmatpush1.bf16.msra.mxu1 %v4784_v59  ;;  %v697_v55 = vld [vmem:[%s5030_s22 + $0xf90] sm:$0xff]  ;;  %v702_v59 = vld [vmem:[%s5030_s22 + $0xfb8] sm:$0xff]  ;;  %v4840_v61 = vcombine.low %v690_v47, %v694_v48 }
 0x1fb   : > { %3910 = vmatprep.subr.bf16.mxu0 %v4791_v60  ;;  %4115 = vmatprep.subr.bf16.mxu1 %v4793_v63  ;;  %v4838_v60 = vcombine.low %v689_v44, %v693_v1  ;;  %v4847_v62 = vcombine.high %v697_v55, %v701_v57  ;;  %v4849_v63 = vcombine.high %v698_v58, %v702_v59 }
 0x1fe   : > { %3911 = vmatpush1.bf16.msra.mxu0 %v4790_v24  ;;  %4116 = vmatpush1.bf16.msra.mxu1 %v4792_v7  ;;  %v710_v24 = vld [vmem:[%s5030_s22 + $0xff8] sm:$0xff] }
 0x1ff   : > { %3912 = vmatprep.subr.bf16.mxu0 %v4799_v8  ;;  %4117 = vmatprep.subr.bf16.mxu1 %v4801_v9  ;;  %v714_v7 = vld [vmem:[%s5030_s22 + $0x1018] sm:$0x77]  ;;  %v4846_v8 = vcombine.low %v697_v55, %v701_v57  ;;  %v4848_v9 = vcombine.low %v698_v58, %v702_v59  ;;  %v4857_v11 = vcombine.high %v706_v5, %v710_v24 }
 0x200   : > { %v4865_v12 = vcombine.high %v714_v7, %v714_v7  ;;  %v4864_v16 = vcombine.low %v714_v7, %v714_v7 }
 0x202   : > { %3913 = vmatpush1.bf16.msra.mxu0 %v4798_v13  ;;  %4118 = vmatpush1.bf16.msra.mxu1 %v4800_v33  ;;  %v4854_v13 = vcombine.low %v705_v23, %v709_v3  ;;  %v4862_v33 = vcombine.low %v713_v4, %v713_v4  ;;  %v3361_v18 = vand.u32 %v4865_v12, %v5343_v56 }
 0x203   : > { %3914 = vmatprep.subr.bf16.mxu0 %v4807_v40  ;;  %4119 = vmatprep.subr.bf16.mxu1 %v4809_v15  ;;  %v4856_v40 = vcombine.low %v706_v5, %v710_v24  ;;  %v3355_v15 = vand.u32 %v4863_v10, %v5343_v56  ;;  %v3358_v20 = vand.u32 %v4864_v16, %v5343_v56 }
 0x204   : > { %v3352_v19 = vand.u32 %v4862_v33, %v5343_v56 }
 0x206   : > { %3915 = vmatpush1.bf16.msra.mxu0 %v4806_v21  ;;  %4120 = vmatpush1.bf16.msra.mxu1 %v4808_v0  ;;  %v4969_v21 = vld [vmem:[%s5680_s1 + $0x20] ss:$0 sps:$4 sm:$0xff]  }
 0x207   : > { %3916 = vmatprep.subr.bf16.mxu0 %v4815_v22  ;;  %4121 = vmatprep.subr.bf16.mxu1 %v4817_v50 }
 0x20a   : > { %3917 = vmatpush1.bf16.msra.mxu0 %v4814_v30  ;;  %4122 = vmatpush1.bf16.msra.mxu1 %v4816_v31 }
 0x20b   : > { %3918 = vmatprep.subr.bf16.mxu0 %v4823_v17  ;;  %4123 = vmatprep.subr.bf16.mxu1 %v4825_v32  ;;  %v4230_v17 = vld [vmem:[%s5681_s2] sm:$0xff] }
 0x20c   : > { %4233 = vperm.xlu1 %4948, %v4230_v17  }
 0x20e   : > { %3919 = vmatpush1.bf16.msra.mxu0 %v4822_v38  ;;  %4124 = vmatpush1.bf16.msra.mxu1 %v4824_v39 }
 0x20f   : > { %3920 = vmatprep.subr.bf16.mxu0 %v4831_v41  ;;  %4125 = vmatprep.subr.bf16.mxu1 %v4833_v42 }
 0x212   : > { %3921 = vmatpush1.bf16.msra.mxu0 %v4830_v51  ;;  %4126 = vmatpush1.bf16.msra.mxu1 %v4832_v52 }
 0x213   : > { %3922 = vmatprep.subr.bf16.mxu0 %v4839_v53  ;;  %4127 = vmatprep.subr.bf16.mxu1 %v4841_v14 }
 0x216   : > { %3923 = vmatpush1.bf16.msra.mxu0 %v4838_v60  ;;  %4128 = vmatpush1.bf16.msra.mxu1 %v4840_v61 }
 0x217   : > { %3924 = vmatprep.subr.bf16.mxu0 %v4847_v62  ;;  %4129 = vmatprep.subr.bf16.mxu1 %v4849_v63 }
 0x21a   : > { %3925 = vmatpush1.bf16.msra.mxu0 %v4846_v8  ;;  %4130 = vmatpush1.bf16.msra.mxu1 %v4848_v9 }
 0x21b   : > { %3926 = vmatprep.subr.bf16.mxu0 %v4855_v43  ;;  %4131 = vmatprep.subr.bf16.mxu1 %v4857_v11 }
 0x21e   : > { %3927 = vmatpush1.bf16.msra.mxu0 %v4854_v13  ;;  %4132 = vmatpush1.bf16.msra.mxu1 %v4856_v40 }
 0x21f   : > { %3937 = vmatprep.subr.bf16.mxu0 %v3355_v15  ;;  %4142 = vmatprep.subr.bf16.mxu1 %v3361_v18 }
 0x221   : > { %3929 = vmatmul.mubr.bf16.vlgmr.msra.gmra.mrb[4].mxu0 %v5349_v2  ;;  %4134 = vmatmul.mubr.bf16.vlgmr.msra.gmra.mrb[4].mxu1 %v5349_v2 }
 0x222   : > { %3938 = vmatpush1.bf16.msra.mxu0 %v3352_v19  ;;  %4143 = vmatpush1.bf16.msra.mxu1 %v3358_v20 }
 0x223   : > { %3969 = vmatprep.mubr.bf16.mxu0 %v4978_v45  ;;  %4174 = vmatprep.mubr.bf16.mxu1 %v4978_v45 }
 0x22d   : > { %4868 = vmatmul.mubr.msk.bf16.vlgmr.msra.gmra.mrb[4].mxu0 %vm3331_vm2, %v4969_v21  ;;  %4869 = vmatmul.mubr.msk.bf16.vlgmr.msra.gmra.mrb[4].mxu1 %vm3331_vm2, %v4969_v21 }
 0x28b   : > { %v4234_v63 = vpop.permute.xlu1 %4233 }
 0x300   : > { %v3971_v56 = vpop.f32.mrb[4].mxu0  ;;  %v4176_v22 = vpop.f32.mrb[4].mxu1 }
 0x301   : > { %v4186_v0 = vadd.f32 %v5616_v6, %v3971_v56  ;;  %v3973_v50 = vpop.f32.mrb[5].mxu0  ;;  %v4178_v2 = vpop.f32.mrb[5].mxu1  ;;  %v4244_v6 = vld [vmem:[%s5682_s3] sm:$0xff] }
 0x302   : > { %v3975_v25 = vpop.f32.mrb[6].mxu0  ;;  %v4180_v28 = vpop.f32.mrb[6].mxu1  ;;  %4247 = vperm.xlu1 %4948, %v4244_v6  }
 0x303   : > { %v4187_v26 = vadd.f32 %v4186_v0, %v3973_v50  ;;  %v3976_v29 = vpop.f32.mrb[7].mxu0  ;;  %v4181_v30 = vpop.f32.mrb[7].mxu1 }
 0x305   : > { %v4188_v45 = vadd.f32 %v4187_v26, %v4176_v22 }
 0x307   : > { %v4189_v31 = vadd.f32 %v4188_v45, %v4178_v2 }
 0x309   : > { %4190 = vadd.xlane.f32.xlu0 %v4189_v31 }
 0x381   : > { %v4248_v33 = vpop.permute.xlu1 %4247 }
 0x396   : > { %v4191_v32 = vpop.xlane.xlu0 %4190 }
 0x397   : > { %v4193_v34 = vmul.f32 0.0009765625, %v4191_v32 }
 0x399   : > { %v4194_v35 = vsub.f32 %v5596_v46, %v4193_v34  ;;  %v4195_v36 = vsub.f32 %v5602_v49, %v4193_v34  ;;  %v4196_v37 = vsub.f32 %v5600_v27, %v4193_v34  ;;  %v4197_v38 = vsub.f32 %v5608_v54, %v4193_v34 }
 0x39a   : > { %v4198_v42 = vsub.f32 %v3971_v56, %v4193_v34  ;;  %v4199_v47 = vsub.f32 %v3973_v50, %v4193_v34  ;;  %v4200_v52 = vsub.f32 %v4176_v22, %v4193_v34  ;;  %v4201_v55 = vsub.f32 %v4178_v2, %v4193_v34 }
 0x39b   : > { %v4202_v39 = vmul.f32 %v4194_v35, %v4194_v35  ;;  %v4203_v41 = vmul.f32 %v4195_v36, %v4195_v36  ;;  %v4204_v44 = vmul.f32 %v4196_v37, %v4196_v37  ;;  %v4205_v48 = vmul.f32 %v4197_v38, %v4197_v38 }
 0x39c   : > { %v4206_v53 = vmul.f32 %v4198_v42, %v4198_v42  ;;  %v4207_v57 = vmul.f32 %v4199_v47, %v4199_v47  ;;  %v4208_v58 = vmul.f32 %v4200_v52, %v4200_v52  ;;  %v4209_v59 = vmul.f32 %v4201_v55, %v4201_v55 }
 0x39d   : > { %v4210_v1 = vadd.f32 %v4203_v41, %v4202_v39 }
 0x39f   : > { %v4211_v51 = vadd.f32 %v4210_v1, %v4204_v44 }
 0x3a1   : > { %v4212_v14 = vadd.f32 %v4211_v51, %v4205_v48 }
 0x3a3   : > { %v4213_v46 = vadd.f32 %v4212_v14, %v4206_v53 }
 0x3a5   : > { %v4214_v49 = vadd.f32 %v4213_v46, %v4207_v57 }
 0x3a7   : > { %v4215_v27 = vadd.f32 %v4214_v49, %v4208_v58 }
 0x3a9   : > { %v4216_v60 = vadd.f32 %v4215_v27, %v4209_v59 }
 0x3ab   : > { %4217 = vadd.xlane.f32.xlu0 %v4216_v60 }
 0x438   : > { %v4218_v54 = vpop.xlane.xlu0 %4217 }
 0x439   : > { %v4219_v61 = vmul.f32 0.0009765625, %v4218_v54 }
 0x43b   : > { %v4220_v62 = vadd.f32 1e-05, %v4219_v61 }
 0x43d   : > { %4967 = vrsqrt.f32 %v4220_v62 }
 0x447   : > { %v4968_v23 = vpop.eup %4967 }
 0x448   : > { %v4222_v3 = vmul.f32 %v4968_v23, %v4194_v35  ;;  %v4223_v4 = vmul.f32 %v4968_v23, %v4195_v36  ;;  %v4224_v5 = vmul.f32 %v4968_v23, %v4196_v37  ;;  %v4225_v24 = vmul.f32 %v4968_v23, %v4197_v38 }
 0x449   : > { %v4226_v7 = vmul.f32 %v4968_v23, %v4198_v42  ;;  %v4227_v8 = vmul.f32 %v4968_v23, %v4199_v47  ;;  %v4228_v9 = vmul.f32 %v4968_v23, %v4200_v52  ;;  %v4229_v43 = vmul.f32 %v4968_v23, %v4201_v55 }
 0x44a   : > { %v4236_v10 = vmul.f32 %v4234_v63, %v4222_v3  ;;  %v4237_v11 = vmul.f32 %v4234_v63, %v4223_v4  ;;  %v4238_v12 = vmul.f32 %v4234_v63, %v4224_v5  ;;  %v4239_v13 = vmul.f32 %v4234_v63, %v4225_v24 }
 0x44b   : > { %v4240_v40 = vmul.f32 %v4234_v63, %v4226_v7  ;;  %v4241_v15 = vmul.f32 %v4234_v63, %v4227_v8  ;;  %v4242_v16 = vmul.f32 %v4234_v63, %v4228_v9  ;;  %v4243_v18 = vmul.f32 %v4234_v63, %v4229_v43 }
 0x44c   : > { %v4250_v19 = vadd.f32 %v4248_v33, %v4236_v10  ;;  %v4251_v20 = vadd.f32 %v4248_v33, %v4237_v11  ;;  %v4252_v21 = vadd.f32 %v4248_v33, %v4238_v12  ;;  %v4253_v56 = vadd.f32 %v4248_v33, %v4239_v13 }
 0x44d   : > { %v4254_v0 = vadd.f32 %v4248_v33, %v4240_v40  ;;  %v4255_v22 = vadd.f32 %v4248_v33, %v4241_v15  ;;  %v4256_v50 = vadd.f32 %v4248_v33, %v4242_v16  ;;  %v4257_v2 = vadd.f32 %v4248_v33, %v4243_v18 }
 0x44e   : > { %v4258_v25 = vmax.f32 %v4250_v19, 0.0  ;;  %v4259_v26 = vmax.f32 %v4251_v20, 0.0  ;;  %v4260_v28 = vmax.f32 %v4252_v21, 0.0  ;;  %v4261_v29 = vmax.f32 %v4253_v56, 0.0 }
 0x44f   : > { %v4262_v30 = vmax.f32 %v4254_v0, 0.0  ;;  %v4263_v45 = vmax.f32 %v4255_v22, 0.0  ;;  %v4264_v31 = vmax.f32 %v4256_v50, 0.0  ;;  %v4265_v17 = vmax.f32 %v4257_v2, 0.0 }
 0x450   : > { %4266 = vst [vmem:[%s197_s14] sm:$0xff] %v4258_v25  ;;  %4267 = vst [vmem:[%s197_s14 + $0x8] sm:$0xff] %v4259_v26 }
 0x451   : > { %4268 = vst [vmem:[%s197_s14 + $0x10] sm:$0xff] %v4260_v28  ;;  %4269 = vst [vmem:[%s197_s14 + $0x18] sm:$0xff] %v4261_v29 }
 0x452   : > { %4270 = vst [vmem:[%s197_s14 + $0x20] sm:$0xff] %v4262_v30  ;;  %4271 = vst [vmem:[%s197_s14 + $0x28] sm:$0xff] %v4263_v45 }
 0x453   : > { %4272 = vst [vmem:[%s197_s14 + $0x30] sm:$0xff] %v4264_v31  ;;  %4273 = vst [vmem:[%s197_s14 + $0x38] sm:$0xff] %v4265_v17 }
 0x454 PF: > { %s14_s15 = sadd.s32 1, %s4976_s15  }
 0x455   : > { %p11_p4 = scmp.ge.s32.totalorder %s14_s15, 5  }
 0x457   :  { %13 = sbr.rel (!%p11_p4) target bundleno = 1 (0x1), region = 66 }

// kernel: forward.15
= control target key start
LH: loop header
LB: loop body
LE: loop exit
PB: predicated region body
PF: predicated region fallthrough
CT: control target
= control target key end

     0   :  { %s531_s15 = smov 0   ;;  %s577_s0 = inlined_call_operand.vmem [shape: bf16[3,216,128], index: 0, kind: input, shape index: {}]   ;;  %s578_s1 = inlined_call_operand.vmem [shape: bf16[8,216], index: 1, kind: input, shape index: {}]   ;;  %s579_s2 = inlined_call_operand.vmem [shape: f32[8,1], index: 2, kind: input, shape index: {}]   ;;  %s580_s3 = inlined_call_operand.vmem [shape: f32[8,1], index: 3, kind: input, shape index: {}]   ;;  %s581_s4 = inlined_call_operand.vmem [shape: f32[3,8,128], index: 4, kind: output, shape index: {}]  }
   0x1 LB: > { %s441_s16 = sadd.s32 4294967295, %s503_s15   ;;  %p445_p0 = scmp.ge.s32.totalorder %s503_s15, 1  ;;  %s503_s15 = sphi %s531_s15, %s14_s15  }
   0x2   : > { %p162_p1 = scmp.lt.s32.totalorder %s503_s15, 4 }
   0x4   : > { %p163_p2 = pnand %p445_p0, %p162_p1 }
   0x5   : > { %p187_p3 = scmp.lt.s32.totalorder (!%p163_p2), %s441_s16, 2  ;;  %v224_v0 = vld [vmem:[%s578_s1] sm:$0xff] (!%p163_p2)  ;;  %vm312_vm0 = vcmask (!%p163_p2), 719872   ;;  %v505_v1 = vmov (!%p163_p2), 0   ;;  %vm316_vm1 = vcmask (!%p163_p2), 1043456  }
   0x6   : > { %166 = sbr.rel (%p163_p2) target bundleno = 599 (0x257), region = 36  ;;  %320 = vmatprep.subr.bf16.mxu0 (!%p163_p2), %v505_v1  ;;  %v449_v2 = vcombine.high (!%p163_p2), %v224_v0, %v224_v0  ;;  %477 = vset.pattern.permute.xlu1 (!%p163_p2), %v505_v1  ;;  %v448_v18 = vcombine.low (!%p163_p2), %v224_v0, %v224_v0  ;;  %v372_v23 = vld [vmem:[%s579_s2] sm:$0xff] (!%p163_p2) }
   0x7   : > { %478 = vset.pattern.permute.xlu0 (!%p163_p2), %v505_v1  ;;  %375 = vperm.xlu1 (!%p163_p2), %477, %v372_v23   ;;  %v379_v24 = vld [vmem:[%s580_s3] sm:$0xff] (!%p163_p2) }
   0x8   : > { %464 = vmatprep.mubr.msk.bf16.mxu0 (!%p163_p2), %vm312_vm0, %v449_v2 }
   0xb   : > { %382 = vperm.xlu1 (!%p163_p2), %477, %v379_v24  }
   0xd   : > { %s583_s16 = smov (!%p187_p3, %s441_s16), 2 }
   0xe   : > { %s467_s19 = smul.u32 108, %s583_s16  ;;  %s447_s27 = sshll.u32 %s583_s16, 3 }
   0xf   : > { %s195_s30 = scalar_lea.vmem %s581_s4, %s447_s27 }
  0x10   : > { %s548_s22 = scalar_lea.vmem %s577_s0, %s467_s19 }
  0x11   : > { %v479_v3 = vld [vmem:[%s548_s22] sm:$0xff]   ;;  %v480_v4 = vld [vmem:[%s548_s22 + $0x8] sm:$0xff]   ;;  %v481_v5 = vld [vmem:[%s548_s22 + $0x10] sm:$0xff]  }
  0x12   : > { %321 = vmatpush1.bf16.msra.mxu0 %v479_v3  ;;  %v482_v6 = vld [vmem:[%s548_s22 + $0x18] sm:$0xff]   ;;  %v483_v7 = vld [vmem:[%s548_s22 + $0x20] sm:$0xff]   ;;  %v484_v8 = vld [vmem:[%s548_s22 + $0x28] sm:$0xff]  }
  0x13   : > { %322 = vmatprep.subr.bf16.mxu0 %v505_v1  ;;  %v485_v9 = vld [vmem:[%s548_s22 + $0x30] sm:$0xff]   ;;  %v486_v10 = vld [vmem:[%s548_s22 + $0x38] sm:$0xff]   ;;  %v487_v11 = vld [vmem:[%s548_s22 + $0x40] sm:$0xff]  }
  0x14   : > { %v488_v12 = vld [vmem:[%s548_s22 + $0x48] sm:$0xff]   ;;  %v489_v13 = vld [vmem:[%s548_s22 + $0x50] sm:$0xff]   ;;  %v490_v14 = vld [vmem:[%s548_s22 + $0x58] sm:$0xff]  }
  0x15   : > { %v491_v15 = vld [vmem:[%s548_s22 + $0x60] sm:$0xff]   ;;  %v492_v16 = vld [vmem:[%s548_s22 + $0x68] ss:$0 sps:$4 sm:$0xff]  }
  0x16   : > { %323 = vmatpush1.bf16.msra.mxu0 %v480_v4  ;;  %v318_v17 = vsel %vm316_vm1, %v492_v16, 0 }
  0x17   : > { %324 = vmatprep.subr.bf16.mxu0 %v505_v1 }
  0x1a   : > { %325 = vmatpush1.bf16.msra.mxu0 %v481_v5 }
  0x1b   : > { %326 = vmatprep.subr.bf16.mxu0 %v505_v1 }
  0x1e   : > { %327 = vmatpush1.bf16.msra.mxu0 %v482_v6 }
  0x1f   : > { %328 = vmatprep.subr.bf16.mxu0 %v505_v1 }
  0x22   : > { %329 = vmatpush1.bf16.msra.mxu0 %v483_v7 }
  0x23   : > { %330 = vmatprep.subr.bf16.mxu0 %v505_v1 }
  0x26   : > { %331 = vmatpush1.bf16.msra.mxu0 %v484_v8 }
  0x27   : > { %332 = vmatprep.subr.bf16.mxu0 %v505_v1 }
  0x2a   : > { %333 = vmatpush1.bf16.msra.mxu0 %v485_v9 }
  0x2b   : > { %334 = vmatprep.subr.bf16.mxu0 %v505_v1 }
  0x2e   : > { %335 = vmatpush1.bf16.msra.mxu0 %v486_v10 }
  0x2f   : > { %336 = vmatprep.subr.bf16.mxu0 %v505_v1 }
  0x32   : > { %337 = vmatpush1.bf16.msra.mxu0 %v487_v11 }
  0x33   : > { %338 = vmatprep.subr.bf16.mxu0 %v505_v1 }
  0x36   : > { %339 = vmatpush1.bf16.msra.mxu0 %v488_v12 }
  0x37   : > { %340 = vmatprep.subr.bf16.mxu0 %v505_v1 }
  0x3a   : > { %341 = vmatpush1.bf16.msra.mxu0 %v489_v13 }
  0x3b   : > { %342 = vmatprep.subr.bf16.mxu0 %v505_v1 }
  0x3e   : > { %343 = vmatpush1.bf16.msra.mxu0 %v490_v14 }
  0x3f   : > { %344 = vmatprep.subr.bf16.mxu0 %v505_v1 }
  0x42   : > { %345 = vmatpush1.bf16.msra.mxu0 %v491_v15 }
  0x43   : > { %346 = vmatprep.subr.bf16.mxu0 %v505_v1 }
  0x46   : > { %347 = vmatpush1.bf16.msra.mxu0 %v318_v17 }
  0x49   : > { %353 = vmatmul.mubr.bf16.vlgmr.msra.gmra.mrb[0].mxu0 %v448_v18 }
  0x86   : > { %v376_v32 = vpop.permute.xlu1 %375 }
  0x8a   : > { %v383_v36 = vpop.permute.xlu1 %382 }
 0x11c   : > { %v354_v19 = vpop.f32.mrb[0].mxu0 }
 0x11d   : > { %360 = vadd.xlane.f32.xlu0 %v354_v19  ;;  %v356_v20 = vpop.f32.mrb[1].mxu0 }
 0x11e   : > { %v357_v21 = vpop.f32.mrb[2].mxu0 }
 0x11f   : > { %v358_v22 = vpop.f32.mrb[3].mxu0 }
 0x1aa   : > { %v361_v25 = vpop.xlane.xlu0 %360 }
 0x1ab   : > { %v363_v26 = vmul.f32 0.0078125, %v361_v25 }
 0x1ad   : > { %v364_v27 = vsub.f32 %v354_v19, %v363_v26 }
 0x1af   : > { %v365_v28 = vmul.f32 %v364_v27, %v364_v27 }
 0x1b1   : > { %366 = vadd.xlane.f32.xlu0 %v365_v28 }
 0x23e   : > { %v367_v29 = vpop.xlane.xlu0 %366 }
 0x23f   : > { %v368_v30 = vmul.f32 0.0078125, %v367_v29 }
 0x241   : > { %v369_v31 = vadd.f32 1e-05, %v368_v30 }
 0x243   : > { %495 = vrsqrt.f32 %v369_v31 }
 0x24d   : > { %v496_v33 = vpop.eup %495 }
 0x24e   : > { %v371_v34 = vmul.f32 %v496_v33, %v364_v27 }
 0x250   : > { %v378_v35 = vmul.f32 %v376_v32, %v371_v34 }
 0x252   : > { %v385_v37 = vadd.f32 %v383_v36, %v378_v35 }
 0x254   : > { %v386_v38 = vmax.f32 %v385_v37, 0.0 }
 0x256   : > { %387 = vst [vmem:[%s195_s30] sm:$0xff] %v386_v38 }
 0x257 PF: > { %s14_s15 = sadd.s32 1, %s503_s15  }
 0x258   : > { %p11_p4 = scmp.ge.s32.totalorder %s14_s15, 5  }
 0x25a   :  { %13 = sbr.rel (!%p11_p4) target bundleno = 1 (0x1), region = 66 }

// kernel: forward.16
= control target key start
LH: loop header
LB: loop body
LE: loop exit
PB: predicated region body
PF: predicated region fallthrough
CT: control target
= control target key end

     0   :  { %s595_s18 = smov 0   ;;  %s644_s0 = inlined_call_operand.vmem [shape: bf16[3,216,128], index: 0, kind: input, shape index: {}]   ;;  %s645_s1 = inlined_call_operand.vmem [shape: bf16[8,216], index: 1, kind: input, shape index: {}]   ;;  %s646_s2 = inlined_call_operand.vmem [shape: f32[8,1], index: 2, kind: input, shape index: {}]   ;;  %s647_s3 = inlined_call_operand.vmem [shape: f32[8,1], index: 3, kind: input, shape index: {}]   ;;  %s648_s4 = inlined_call_operand.vmem [shape: f32[3,8,128], index: 4, kind: input, shape index: {}]   ;;  %s649_s5 = inlined_call_operand.vmem [shape: f32[3,8,128], index: 5, kind: output, shape index: {}]  }
   0x1 LB: > { %s499_s19 = sadd.s32 4294967295, %s562_s18   ;;  %p503_p0 = scmp.ge.s32.totalorder %s562_s18, 1  ;;  %s562_s18 = sphi %s595_s18, %s15_s18  }
   0x2   : > { %p196_p1 = scmp.lt.s32.totalorder %s562_s18, 4 }
   0x4   : > { %p197_p2 = pnand %p503_p0, %p196_p1 }
   0x5   : > { %p227_p3 = scmp.lt.s32.totalorder (!%p197_p2), %s499_s19, 2  ;;  %v268_v0 = vld [vmem:[%s645_s1] sm:$0xff] (!%p197_p2)  ;;  %vm356_vm0 = vcmask (!%p197_p2), 719872   ;;  %v564_v1 = vmov (!%p197_p2), 0   ;;  %vm360_vm1 = vcmask (!%p197_p2), 1043456  }
   0x6   : > { %200 = sbr.rel (%p197_p2) target bundleno = 601 (0x259), region = 40  ;;  %364 = vmatprep.subr.bf16.mxu0 (!%p197_p2), %v564_v1  ;;  %v508_v2 = vcombine.high (!%p197_p2), %v268_v0, %v268_v0  ;;  %536 = vset.pattern.permute.xlu1 (!%p197_p2), %v564_v1  ;;  %v507_v18 = vcombine.low (!%p197_p2), %v268_v0, %v268_v0  ;;  %v416_v23 = vld [vmem:[%s646_s2] sm:$0xff] (!%p197_p2) }
   0x7   : > { %537 = vset.pattern.permute.xlu0 (!%p197_p2), %v564_v1  ;;  %419 = vperm.xlu1 (!%p197_p2), %536, %v416_v23   ;;  %v423_v24 = vld [vmem:[%s647_s3] sm:$0xff] (!%p197_p2) }
   0x8   : > { %523 = vmatprep.mubr.msk.bf16.mxu0 (!%p197_p2), %vm356_vm0, %v508_v2 }
   0xb   : > { %426 = vperm.xlu1 (!%p197_p2), %536, %v423_v24  }
   0xd   : > { %s651_s19 = smov (!%p227_p3, %s499_s19), 2 }
   0xe   : > { %s526_s22 = smul.u32 108, %s651_s19  ;;  %s505_s30 = sshll.u32 %s651_s19, 3 }
   0xf   : > { %s235_s8 = scalar_lea.vmem %s648_s4, %s505_s30  ;;  %s239_s11 = scalar_lea.vmem %s649_s5, %s505_s30 }
  0x10   : > { %s612_s25 = scalar_lea.vmem %s644_s0, %s526_s22  ;;  %v430_v37 = vld [vmem:[%s235_s8] sm:$0xff] }
  0x11   : > { %v538_v3 = vld [vmem:[%s612_s25] sm:$0xff]   ;;  %v539_v4 = vld [vmem:[%s612_s25 + $0x8] sm:$0xff]   ;;  %v540_v5 = vld [vmem:[%s612_s25 + $0x10] sm:$0xff]  }
  0x12   : > { %365 = vmatpush1.bf16.msra.mxu0 %v538_v3  ;;  %v541_v6 = vld [vmem:[%s612_s25 + $0x18] sm:$0xff]   ;;  %v542_v7 = vld [vmem:[%s612_s25 + $0x20] sm:$0xff]   ;;  %v543_v8 = vld [vmem:[%s612_s25 + $0x28] sm:$0xff]  }
  0x13   : > { %366 = vmatprep.subr.bf16.mxu0 %v564_v1  ;;  %v544_v9 = vld [vmem:[%s612_s25 + $0x30] sm:$0xff]   ;;  %v545_v10 = vld [vmem:[%s612_s25 + $0x38] sm:$0xff]   ;;  %v546_v11 = vld [vmem:[%s612_s25 + $0x40] sm:$0xff]  }
  0x14   : > { %v547_v12 = vld [vmem:[%s612_s25 + $0x48] sm:$0xff]   ;;  %v548_v13 = vld [vmem:[%s612_s25 + $0x50] sm:$0xff]   ;;  %v549_v14 = vld [vmem:[%s612_s25 + $0x58] sm:$0xff]  }
  0x15   : > { %v550_v15 = vld [vmem:[%s612_s25 + $0x60] sm:$0xff]   ;;  %v551_v16 = vld [vmem:[%s612_s25 + $0x68] ss:$0 sps:$4 sm:$0xff]  }
  0x16   : > { %367 = vmatpush1.bf16.msra.mxu0 %v539_v4  ;;  %v362_v17 = vsel %vm360_vm1, %v551_v16, 0 }
  0x17   : > { %368 = vmatprep.subr.bf16.mxu0 %v564_v1 }
  0x1a   : > { %369 = vmatpush1.bf16.msra.mxu0 %v540_v5 }
  0x1b   : > { %370 = vmatprep.subr.bf16.mxu0 %v564_v1 }
  0x1e   : > { %371 = vmatpush1.bf16.msra.mxu0 %v541_v6 }
  0x1f   : > { %372 = vmatprep.subr.bf16.mxu0 %v564_v1 }
  0x22   : > { %373 = vmatpush1.bf16.msra.mxu0 %v542_v7 }
  0x23   : > { %374 = vmatprep.subr.bf16.mxu0 %v564_v1 }
  0x26   : > { %375 = vmatpush1.bf16.msra.mxu0 %v543_v8 }
  0x27   : > { %376 = vmatprep.subr.bf16.mxu0 %v564_v1 }
  0x2a   : > { %377 = vmatpush1.bf16.msra.mxu0 %v544_v9 }
  0x2b   : > { %378 = vmatprep.subr.bf16.mxu0 %v564_v1 }
  0x2e   : > { %379 = vmatpush1.bf16.msra.mxu0 %v545_v10 }
  0x2f   : > { %380 = vmatprep.subr.bf16.mxu0 %v564_v1 }
  0x32   : > { %381 = vmatpush1.bf16.msra.mxu0 %v546_v11 }
  0x33   : > { %382 = vmatprep.subr.bf16.mxu0 %v564_v1 }
  0x36   : > { %383 = vmatpush1.bf16.msra.mxu0 %v547_v12 }
  0x37   : > { %384 = vmatprep.subr.bf16.mxu0 %v564_v1 }
  0x3a   : > { %385 = vmatpush1.bf16.msra.mxu0 %v548_v13 }
  0x3b   : > { %386 = vmatprep.subr.bf16.mxu0 %v564_v1 }
  0x3e   : > { %387 = vmatpush1.bf16.msra.mxu0 %v549_v14 }
  0x3f   : > { %388 = vmatprep.subr.bf16.mxu0 %v564_v1 }
  0x42   : > { %389 = vmatpush1.bf16.msra.mxu0 %v550_v15 }
  0x43   : > { %390 = vmatprep.subr.bf16.mxu0 %v564_v1 }
  0x46   : > { %391 = vmatpush1.bf16.msra.mxu0 %v362_v17 }
  0x49   : > { %397 = vmatmul.mubr.bf16.vlgmr.msra.gmra.mrb[0].mxu0 %v507_v18 }
  0x86   : > { %v420_v32 = vpop.permute.xlu1 %419 }
  0x8a   : > { %v427_v36 = vpop.permute.xlu1 %426 }
 0x11c   : > { %v398_v19 = vpop.f32.mrb[0].mxu0 }
 0x11d   : > { %404 = vadd.xlane.f32.xlu0 %v398_v19  ;;  %v400_v20 = vpop.f32.mrb[1].mxu0 }
 0x11e   : > { %v401_v21 = vpop.f32.mrb[2].mxu0 }
 0x11f   : > { %v402_v22 = vpop.f32.mrb[3].mxu0 }
 0x1aa   : > { %v405_v25 = vpop.xlane.xlu0 %404 }
 0x1ab   : > { %v407_v26 = vmul.f32 0.0078125, %v405_v25 }
 0x1ad   : > { %v408_v27 = vsub.f32 %v398_v19, %v407_v26 }
 0x1af   : > { %v409_v28 = vmul.f32 %v408_v27, %v408_v27 }
 0x1b1   : > { %410 = vadd.xlane.f32.xlu0 %v409_v28 }
 0x23e   : > { %v411_v29 = vpop.xlane.xlu0 %410 }
 0x23f   : > { %v412_v30 = vmul.f32 0.0078125, %v411_v29 }
 0x241   : > { %v413_v31 = vadd.f32 1e-05, %v412_v30 }
 0x243   : > { %554 = vrsqrt.f32 %v413_v31 }
 0x24d   : > { %v555_v33 = vpop.eup %554 }
 0x24e   : > { %v415_v34 = vmul.f32 %v555_v33, %v408_v27 }
 0x250   : > { %v422_v35 = vmul.f32 %v420_v32, %v415_v34 }
 0x252   : > { %v429_v38 = vadd.f32 %v427_v36, %v422_v35 }
 0x254   : > { %v431_v39 = vadd.f32 %v430_v37, %v429_v38 }
 0x256   : > { %v432_v40 = vmax.f32 %v431_v39, 0.0 }
 0x258   : > { %433 = vst [vmem:[%s239_s11] sm:$0xff] %v432_v40 }
 0x259 PF: > { %s15_s18 = sadd.s32 1, %s562_s18  }
 0x25a   : > { %p12_p4 = scmp.ge.s32.totalorder %s15_s18, 5  }
 0x25c   :  { %14 = sbr.rel (!%p12_p4) target bundleno = 1 (0x1), region = 73 }

// kernel: forward.17
= control target key start
LH: loop header
LB: loop body
LE: loop exit
PB: predicated region body
PF: predicated region fallthrough
CT: control target
= control target key end

     0   :  { %s579_s15 = smov 0   ;;  %s638_s0 = inlined_call_operand.vmem [shape: bf16[3,216,128], index: 0, kind: input, shape index: {}]   ;;  %s639_s1 = inlined_call_operand.vmem [shape: bf16[16,216], index: 1, kind: input, shape index: {}]   ;;  %s640_s2 = inlined_call_operand.vmem [shape: f32[16,1], index: 2, kind: input, shape index: {}]   ;;  %s641_s3 = inlined_call_operand.vmem [shape: f32[16,1], index: 3, kind: input, shape index: {}]   ;;  %s642_s4 = inlined_call_operand.vmem [shape: f32[3,16,128], index: 4, kind: output, shape index: {}]  }
   0x1 LB: > { %s484_s16 = sadd.s32 4294967295, %s551_s15   ;;  %p488_p0 = scmp.ge.s32.totalorder %s551_s15, 1  ;;  %s551_s15 = sphi %s579_s15, %s14_s15  }
   0x2   : > { %p162_p1 = scmp.lt.s32.totalorder %s551_s15, 4 }
   0x4   : > { %p163_p2 = pnand %p488_p0, %p162_p1 }
   0x5   : > { %p188_p3 = scmp.lt.s32.totalorder (!%p163_p2), %s484_s16, 2  ;;  %vm318_vm0 = vcmask (!%p163_p2), 719872   ;;  %v553_v0 = vmov (!%p163_p2), 0   ;;  %v540_v1 = vld [vmem:[%s639_s1 + $0x4] ss:$8 sps:$4 sm:$0xff] (!%p163_p2)   ;;  %vm322_vm1 = vcmask (!%p163_p2), 1043456   ;;  %v367_v20 = vlaneseq (!%p163_p2) }
   0x6   : > { %166 = sbr.rel (%p163_p2) target bundleno = 605 (0x25d), region = 36  ;;  %326 = vmatprep.subr.bf16.mxu0 (!%p163_p2), %v553_v0  ;;  %523 = vset.pattern.permute.xlu1 (!%p163_p2), %v553_v0  ;;  %v538_v17 = vld [vmem:[%s639_s1] ss:$8 sps:$4 sm:$0xff] (!%p163_p2)  }
   0x7   : > { %522 = vset.pattern.permute.xlu0 (!%p163_p2), %v553_v0  ;;  %508 = vmatprep.mubr.msk.bf16.mxu0 (!%p163_p2), %vm318_vm0, %v540_v1  ;;  %v398_v18 = vld [vmem:[%s640_s2 + $0x8] sm:$0xff] (!%p163_p2)  ;;  %v411_v19 = vld [vmem:[%s641_s3] sm:$0xff] (!%p163_p2)  ;;  %v368_v21 = vand.u32 (!%p163_p2), 127, %v367_v20 }
   0x8   : > { %406 = vperm.xlu1 (!%p163_p2), %523, %v398_v18   ;;  %v397_v28 = vld [vmem:[%s640_s2] sm:$0xff] (!%p163_p2)  ;;  %v412_v39 = vld [vmem:[%s641_s3 + $0x8] sm:$0xff] (!%p163_p2) }
   0x9   : > { %vm369_vm2 = vcmp.lt.s32.totalorder (!%p163_p2), %v368_v21, 16 }
   0xc   : > { %415 = vperm.xlu1 (!%p163_p2), %523, %v411_v19  }
   0xd   : > { %s644_s16 = smov (!%p188_p3, %s484_s16), 2 }
   0xe   : > { %s512_s19 = smul.u32 108, %s644_s16  ;;  %s511_s7 = sshll.u32 %s644_s16, 4 }
   0xf   : > { %s197_s10 = scalar_lea.vmem %s642_s4, %s511_s7 }
  0x10   : > { %s596_s22 = scalar_lea.vmem %s638_s0, %s512_s19 }
  0x11   : > { %v524_v2 = vld [vmem:[%s596_s22] sm:$0xff]   ;;  %v525_v3 = vld [vmem:[%s596_s22 + $0x8] sm:$0xff]   ;;  %v526_v4 = vld [vmem:[%s596_s22 + $0x10] sm:$0xff]  }
  0x12   : > { %327 = vmatpush1.bf16.msra.mxu0 %v524_v2  ;;  %v527_v5 = vld [vmem:[%s596_s22 + $0x18] sm:$0xff]   ;;  %v528_v6 = vld [vmem:[%s596_s22 + $0x20] sm:$0xff]   ;;  %v529_v7 = vld [vmem:[%s596_s22 + $0x28] sm:$0xff]  }
  0x13   : > { %328 = vmatprep.subr.bf16.mxu0 %v553_v0  ;;  %v530_v8 = vld [vmem:[%s596_s22 + $0x30] sm:$0xff]   ;;  %v531_v9 = vld [vmem:[%s596_s22 + $0x38] sm:$0xff]   ;;  %v532_v10 = vld [vmem:[%s596_s22 + $0x40] sm:$0xff]  }
  0x14   : > { %v533_v11 = vld [vmem:[%s596_s22 + $0x48] sm:$0xff]   ;;  %v534_v12 = vld [vmem:[%s596_s22 + $0x50] sm:$0xff]   ;;  %v535_v13 = vld [vmem:[%s596_s22 + $0x58] sm:$0xff]  }
  0x15   : > { %v536_v14 = vld [vmem:[%s596_s22 + $0x60] sm:$0xff]   ;;  %v537_v15 = vld [vmem:[%s596_s22 + $0x68] ss:$0 sps:$4 sm:$0xff]  }
  0x16   : > { %329 = vmatpush1.bf16.msra.mxu0 %v525_v3  ;;  %v324_v16 = vsel %vm322_vm1, %v537_v15, 0 }
  0x17   : > { %330 = vmatprep.subr.bf16.mxu0 %v553_v0 }
  0x1a   : > { %331 = vmatpush1.bf16.msra.mxu0 %v526_v4 }
  0x1b   : > { %332 = vmatprep.subr.bf16.mxu0 %v553_v0 }
  0x1e   : > { %333 = vmatpush1.bf16.msra.mxu0 %v527_v5 }
  0x1f   : > { %334 = vmatprep.subr.bf16.mxu0 %v553_v0 }
  0x22   : > { %335 = vmatpush1.bf16.msra.mxu0 %v528_v6 }
  0x23   : > { %336 = vmatprep.subr.bf16.mxu0 %v553_v0 }
  0x26   : > { %337 = vmatpush1.bf16.msra.mxu0 %v529_v7 }
  0x27   : > { %338 = vmatprep.subr.bf16.mxu0 %v553_v0 }
  0x2a   : > { %339 = vmatpush1.bf16.msra.mxu0 %v530_v8 }
  0x2b   : > { %340 = vmatprep.subr.bf16.mxu0 %v553_v0 }
  0x2e   : > { %341 = vmatpush1.bf16.msra.mxu0 %v531_v9 }
  0x2f   : > { %342 = vmatprep.subr.bf16.mxu0 %v553_v0 }
  0x32   : > { %343 = vmatpush1.bf16.msra.mxu0 %v532_v10 }
  0x33   : > { %344 = vmatprep.subr.bf16.mxu0 %v553_v0 }
  0x36   : > { %345 = vmatpush1.bf16.msra.mxu0 %v533_v11 }
  0x37   : > { %346 = vmatprep.subr.bf16.mxu0 %v553_v0 }
  0x3a   : > { %347 = vmatpush1.bf16.msra.mxu0 %v534_v12 }
  0x3b   : > { %348 = vmatprep.subr.bf16.mxu0 %v553_v0 }
  0x3e   : > { %349 = vmatpush1.bf16.msra.mxu0 %v535_v13 }
  0x3f   : > { %350 = vmatprep.subr.bf16.mxu0 %v553_v0 }
  0x42   : > { %351 = vmatpush1.bf16.msra.mxu0 %v536_v14 }
  0x43   : > { %352 = vmatprep.subr.bf16.mxu0 %v553_v0 }
  0x46   : > { %353 = vmatpush1.bf16.msra.mxu0 %v324_v16 }
  0x49   : > { %359 = vmatmul.mubr.bf16.vlgmr.msra.gmra.mrb[0].mxu0 %v538_v17 }
  0x87   : > { %v407_v40 = vpop.permute.xlu1 %406 }
  0x8b   : > { %v416_v41 = vpop.permute.xlu1 %415 }
 0x11c   : > { %v360_v22 = vpop.f32.mrb[0].mxu0 }
 0x11d   : > { %v362_v23 = vpop.f32.mrb[1].mxu0  ;;  %v370_v24 = vsel %vm369_vm2, %v360_v22, 0.0 }
 0x11e   : > { %372 = vadd.xlane.f32.xlu0 %v370_v24  ;;  %v363_v25 = vpop.f32.mrb[2].mxu0 }
 0x11f   : > { %v365_v26 = vpop.f32.mrb[3].mxu0  ;;  %v371_v27 = vsel %vm369_vm2, %v363_v25, 0.0 }
 0x122   : > { %374 = vadd.xlane.f32.xlu0 %v371_v27 }
 0x138   : > { %401 = vperm.xlu0 %522, %v397_v28  }
 0x1ab   : > { %v373_v29 = vpop.xlane.xlu0 %372 }
 0x1ac   : > { %v377_v30 = vmul.f32 0.0625, %v373_v29 }
 0x1ae   : > { %v379_v31 = vsub.f32 %v360_v22, %v377_v30 }
 0x1af   : > { %v375_v32 = vpop.xlane.xlu0 %374 }
 0x1b0   : > { %v378_v33 = vmul.f32 0.0625, %v375_v32  ;;  %v381_v34 = vsel %vm369_vm2, %v379_v31, 0.0 }
 0x1b1   : > { %v383_v35 = vmul.f32 %v381_v34, %v381_v34 }
 0x1b2   : > { %v380_v36 = vsub.f32 %v363_v25, %v378_v33 }
 0x1b3   : > { %385 = vadd.xlane.f32.xlu1 %v383_v35 }
 0x1b4   : > { %v382_v37 = vsel %vm369_vm2, %v380_v36, 0.0 }
 0x1b5   : > { %v384_v38 = vmul.f32 %v382_v37, %v382_v37 }
 0x1b7   : > { %387 = vadd.xlane.f32.xlu1 %v384_v38  ;;  %v402_v49 = vpop.permute.xlu0 %401 }
 0x1c8   : > { %420 = vperm.xlu1 %523, %v412_v39  }
 0x240   : > { %v386_v42 = vpop.xlane.xlu1 %385 }
 0x241   : > { %v389_v43 = vmul.f32 0.0625, %v386_v42 }
 0x243   : > { %v391_v44 = vadd.f32 1e-05, %v389_v43 }
 0x244   : > { %v388_v45 = vpop.xlane.xlu1 %387 }
 0x245   : > { %541 = vrsqrt.f32 %v391_v44  ;;  %v390_v46 = vmul.f32 0.0625, %v388_v45 }
 0x247   : > { %v392_v47 = vadd.f32 1e-05, %v390_v46 }
 0x248   : > { %v421_v57 = vpop.permute.xlu1 %420 }
 0x249   : > { %543 = vrsqrt.f32 %v392_v47 }
 0x24f   : > { %v542_v48 = vpop.eup %541 }
 0x250   : > { %v395_v50 = vmul.f32 %v542_v48, %v379_v31 }
 0x252   : > { %v409_v51 = vmul.f32 %v402_v49, %v395_v50 }
 0x253   : > { %v544_v52 = vpop.eup %543 }
 0x254   : > { %v396_v53 = vmul.f32 %v544_v52, %v380_v36  ;;  %v423_v54 = vadd.f32 %v416_v41, %v409_v51 }
 0x256   : > { %v410_v55 = vmul.f32 %v407_v40, %v396_v53  ;;  %v425_v56 = vmax.f32 %v423_v54, 0.0 }
 0x258   : > { %v424_v58 = vadd.f32 %v421_v57, %v410_v55  ;;  %427 = vst [vmem:[%s197_s10] sm:$0xff] %v425_v56 }
 0x25a   : > { %v426_v59 = vmax.f32 %v424_v58, 0.0 }
 0x25c   : > { %428 = vst [vmem:[%s197_s10 + $0x8] sm:$0xff] %v426_v59 }
 0x25d PF: > { %s14_s15 = sadd.s32 1, %s551_s15  }
 0x25e   : > { %p11_p4 = scmp.ge.s32.totalorder %s14_s15, 5  }
 0x260   :  { %13 = sbr.rel (!%p11_p4) target bundleno = 1 (0x1), region = 66 }

// kernel: forward.18
= control target key start
LH: loop header
LB: loop body
LE: loop exit
PB: predicated region body
PF: predicated region fallthrough
CT: control target
= control target key end

     0   :  { %s443_s15 = smov 0   ;;  %s483_s0 = inlined_call_operand.vmem [shape: bf16[3,8,128], index: 0, kind: input, shape index: {}]   ;;  %s484_s1 = inlined_call_operand.vmem [shape: bf16[16,8], index: 1, kind: input, shape index: {}]   ;;  %s485_s2 = inlined_call_operand.vmem [shape: f32[16,1], index: 2, kind: input, shape index: {}]   ;;  %s486_s3 = inlined_call_operand.vmem [shape: f32[16,1], index: 3, kind: input, shape index: {}]   ;;  %s487_s4 = inlined_call_operand.vmem [shape: f32[3,16,128], index: 4, kind: output, shape index: {}]  }
   0x1 LB: > { %s368_s16 = sadd.s32 4294967295, %s413_s15   ;;  %p372_p0 = scmp.ge.s32.totalorder %s413_s15, 1  ;;  %s413_s15 = sphi %s443_s15, %s14_s15  }
   0x2   : > { %p161_p1 = scmp.lt.s32.totalorder %s413_s15, 4 }
   0x4   : > { %p162_p2 = pnand %p372_p0, %p161_p1 }
   0x5   : > { %p186_p3 = scmp.lt.s32.totalorder (!%p162_p2), %s368_s16, 2  ;;  %v415_v0 = vmov (!%p162_p2), 0.0   ;;  %vm416_vm0 = vmmov (!%p162_p2), 0   ;;  %vm208_vm1 = vcmask (!%p162_p2), 1043456   ;;  %v402_v3 = vld [vmem:[%s484_s1] sm:$0xff] (!%p162_p2)   ;;  %vm204_vm2 = vcmask (!%p162_p2), 64512  }
   0x6   : > { %165 = sbr.rel (%p162_p2) target bundleno = 551 (0x227), region = 36  ;;  %383 = vmatprep.subr.bf16.mxu0 (!%p162_p2), %v415_v0  ;;  %385 = vmatprep.mubr.msk.bf16.mxu0 (!%p162_p2), %vm416_vm0, %v415_v0  ;;  %v284_v4 = vld [vmem:[%s485_s2 + $0x8] sm:$0xff] (!%p162_p2)  ;;  %v417_v5 = vmov (!%p162_p2), 0   ;;  %v297_v6 = vld [vmem:[%s486_s3] sm:$0xff] (!%p162_p2)  ;;  %v253_v7 = vlaneseq (!%p162_p2) }
   0x7   : > { %401 = vset.pattern.permute.xlu1 (!%p162_p2), %v417_v5  ;;  %400 = vset.pattern.permute.xlu0 (!%p162_p2), %v417_v5  ;;  %v283_v15 = vld [vmem:[%s485_s2] sm:$0xff] (!%p162_p2)  ;;  %v298_v26 = vld [vmem:[%s486_s3 + $0x8] sm:$0xff] (!%p162_p2) }
   0x8   : > { %292 = vperm.xlu1 (!%p162_p2), %401, %v284_v4   ;;  %v254_v8 = vand.u32 (!%p162_p2), 127, %v253_v7 }
   0xa   : > { %vm255_vm3 = vcmp.lt.s32.totalorder (!%p162_p2), %v254_v8, 16 }
   0xc   : > { %301 = vperm.xlu1 (!%p162_p2), %401, %v297_v6  }
   0xd   : > { %s489_s16 = smov (!%p186_p3, %s368_s16), 2 }
   0xe   : > { %s373_s17 = sshll.u32 %s489_s16, 2  ;;  %s380_s5 = sshll.u32 %s489_s16, 4 }
   0xf   : > { %s189_s20 = scalar_lea.vmem %s483_s0, %s373_s17  ;;  %s194_s8 = scalar_lea.vmem %s487_s4, %s380_s5 }
  0x10   : > { %v196_v1 = vld [vmem:[%s189_s20] sm:$0xf] }
  0x11   : > { %v210_v2 = vsel %vm208_vm1, %v196_v1, 0 }
  0x12   : > { %384 = vmatpush3.bf16.msra.mxu0 %v210_v2 }
  0x15   : > { %386 = vmatmul.mubr.msk.bf16.vlgmr.msra.gmra.mrb[0].mxu0 %vm204_vm2, %v402_v3 }
  0x87   : > { %v293_v27 = vpop.permute.xlu1 %292 }
  0x8b   : > { %v302_v28 = vpop.permute.xlu1 %301 }
  0xe8   : > { %v246_v9 = vpop.f32.mrb[0].mxu0 }
  0xe9   : > { %v387_v10 = vpop.f32.mrb[1].mxu0  ;;  %v256_v11 = vsel %vm255_vm3, %v246_v9, 0.0 }
  0xea   : > { %258 = vadd.xlane.f32.xlu0 %v256_v11  ;;  %v249_v12 = vpop.f32.mrb[2].mxu0 }
  0xeb   : > { %v388_v13 = vpop.f32.mrb[3].mxu0  ;;  %v257_v14 = vsel %vm255_vm3, %v249_v12, 0.0 }
  0xee   : > { %260 = vadd.xlane.f32.xlu0 %v257_v14 }
 0x104   : > { %287 = vperm.xlu0 %400, %v283_v15  }
 0x177   : > { %v259_v16 = vpop.xlane.xlu0 %258 }
 0x178   : > { %v263_v17 = vmul.f32 0.0625, %v259_v16 }
 0x17a   : > { %v265_v18 = vsub.f32 %v246_v9, %v263_v17 }
 0x17b   : > { %v261_v19 = vpop.xlane.xlu0 %260 }
 0x17c   : > { %v264_v20 = vmul.f32 0.0625, %v261_v19  ;;  %v267_v21 = vsel %vm255_vm3, %v265_v18, 0.0 }
 0x17d   : > { %v269_v22 = vmul.f32 %v267_v21, %v267_v21 }
 0x17e   : > { %v266_v23 = vsub.f32 %v249_v12, %v264_v20 }
 0x17f   : > { %271 = vadd.xlane.f32.xlu1 %v269_v22 }
 0x180   : > { %v268_v24 = vsel %vm255_vm3, %v266_v23, 0.0 }
 0x181   : > { %v270_v25 = vmul.f32 %v268_v24, %v268_v24 }
 0x183   : > { %273 = vadd.xlane.f32.xlu1 %v270_v25  ;;  %v288_v36 = vpop.permute.xlu0 %287 }
 0x194   : > { %306 = vperm.xlu1 %401, %v298_v26  }
 0x20c   : > { %v272_v29 = vpop.xlane.xlu1 %271 }
 0x20d   : > { %v275_v30 = vmul.f32 0.0625, %v272_v29 }
 0x20f   : > { %v277_v31 = vadd.f32 1e-05, %v275_v30 }
 0x210   : > { %v274_v32 = vpop.xlane.xlu1 %273 }
 0x211   : > { %403 = vrsqrt.f32 %v277_v31  ;;  %v276_v33 = vmul.f32 0.0625, %v274_v32 }
 0x213   : > { %v278_v34 = vadd.f32 1e-05, %v276_v33 }
 0x214   : > { %v307_v43 = vpop.permute.xlu1 %306 }
 0x215   : > { %405 = vrsqrt.f32 %v278_v34 }
 0x21b   : > { %v404_v35 = vpop.eup %403 }
 0x21c   : > { %v281_v37 = vmul.f32 %v404_v35, %v265_v18 }
 0x21e   : > { %v295_v38 = vmul.f32 %v288_v36, %v281_v37 }
 0x21f   : > { %v406_v39 = vpop.eup %405 }
 0x220   : > { %v282_v40 = vmul.f32 %v406_v39, %v266_v23  ;;  %v309_v41 = vadd.f32 %v302_v28, %v295_v38 }
 0x222   : > { %v296_v42 = vmul.f32 %v293_v27, %v282_v40  ;;  %311 = vst [vmem:[%s194_s8] sm:$0xff] %v309_v41 }
 0x224   : > { %v310_v44 = vadd.f32 %v307_v43, %v296_v42 }
 0x226   : > { %312 = vst [vmem:[%s194_s8 + $0x8] sm:$0xff] %v310_v44 }
 0x227 PF: > { %s14_s15 = sadd.s32 1, %s413_s15  }
 0x228   : > { %p11_p4 = scmp.ge.s32.totalorder %s14_s15, 5  }
 0x22a   :  { %13 = sbr.rel (!%p11_p4) target bundleno = 1 (0x1), region = 66 }

// kernel: forward.19
= control target key start
LH: loop header
LB: loop body
LE: loop exit
PB: predicated region body
PF: predicated region fallthrough
CT: control target
= control target key end

     0   :  { %s860_s18 = smov 0   ;;  %s954_s0 = inlined_call_operand.vmem [shape: bf16[3,432,128], index: 0, kind: input, shape index: {}]   ;;  %s955_s1 = inlined_call_operand.vmem [shape: bf16[16,432], index: 1, kind: input, shape index: {}]   ;;  %s956_s2 = inlined_call_operand.vmem [shape: f32[16,1], index: 2, kind: input, shape index: {}]   ;;  %s957_s3 = inlined_call_operand.vmem [shape: f32[16,1], index: 3, kind: input, shape index: {}]   ;;  %s958_s4 = inlined_call_operand.vmem [shape: f32[3,16,128], index: 4, kind: input, shape index: {}]   ;;  %s959_s5 = inlined_call_operand.vmem [shape: f32[3,16,128], index: 5, kind: output, shape index: {}]  }
   0x1 LB: > { %s704_s19 = sadd.s32 4294967295, %s827_s18   ;;  %p708_p0 = scmp.ge.s32.totalorder %s827_s18, 1  ;;  %s827_s18 = sphi %s860_s18, %s15_s18  }
   0x2   : > { %p197_p1 = scmp.lt.s32.totalorder %s827_s18, 4 }
   0x4   : > { %p198_p2 = pnand %p708_p0, %p197_p1 }
   0x5   : > { %p230_p3 = scmp.lt.s32.totalorder (!%p198_p2), %s704_s19, 2  ;;  %v829_v0 = vmov (!%p198_p2), 0   ;;  %v811_v1 = vld [vmem:[%s955_s1 + $0x4] ss:$16 sps:$4 sm:$0xff] (!%p198_p2)   ;;  %vm485_vm0 = vcmask (!%p198_p2), 392192   ;;  %v602_v32 = vld [vmem:[%s956_s2 + $0x8] sm:$0xff] (!%p198_p2)  ;;  %v571_v36 = vlaneseq (!%p198_p2) }
   0x6   : > { %201 = sbr.rel (%p198_p2) target bundleno = 597 (0x255), region = 40  ;;  %530 = vmatprep.subr.bf16.mxu1 (!%p198_p2), %v829_v0  ;;  %783 = vset.pattern.permute.xlu1 (!%p198_p2), %v829_v0  ;;  %v816_v2 = vld [vmem:[%s955_s1 + $0xc] ss:$16 sps:$4 sm:$0xff] (!%p198_p2)   ;;  %v809_v28 = vld [vmem:[%s955_s1] ss:$16 sps:$4 sm:$0xff] (!%p198_p2)  }
   0x7   : > { %782 = vset.pattern.permute.xlu0 (!%p198_p2), %v829_v0  ;;  %521 = vmatprep.mubr.bf16.mxu0 (!%p198_p2), %v811_v1  ;;  %v814_v31 = vld [vmem:[%s955_s1 + $0x8] ss:$16 sps:$4 sm:$0xff] (!%p198_p2)   ;;  %v615_v33 = vld [vmem:[%s957_s3] sm:$0xff] (!%p198_p2)  ;;  %v572_v41 = vand.u32 (!%p198_p2), 127, %v571_v36 }
   0x8   : > { %745 = vmatprep.mubr.msk.bf16.mxu1 (!%p198_p2), %vm485_vm0, %v816_v2  ;;  %610 = vperm.xlu1 (!%p198_p2), %783, %v602_v32   ;;  %v601_v50 = vld [vmem:[%s956_s2] sm:$0xff] (!%p198_p2)  ;;  %v616_v61 = vld [vmem:[%s957_s3 + $0x8] sm:$0xff] (!%p198_p2) }
   0x9   : > { %vm573_vm1 = vcmp.lt.s32.totalorder (!%p198_p2), %v572_v41, 16 }
   0xc   : > { %619 = vperm.xlu1 (!%p198_p2), %783, %v615_v33  }
   0xd   : > { %s961_s19 = smov (!%p230_p3, %s704_s19), 2 }
   0xe   : > { %s772_s24 = smul.u32 216, %s961_s19  ;;  %s748_s15 = sshll.u32 %s961_s19, 4 }
   0xf   : > { %s239_s20 = scalar_lea.vmem %s958_s4, %s748_s15  ;;  %s244_s23 = scalar_lea.vmem %s959_s5, %s748_s15 }
  0x10   : > { %s883_s27 = scalar_lea.vmem %s954_s0, %s772_s24 }
  0x11   : > { %v784_v3 = vld [vmem:[%s883_s27 + $0x80] sm:$0xff]   ;;  %v785_v4 = vld [vmem:[%s883_s27 + $0x88] sm:$0xff]   ;;  %v788_v7 = vld [vmem:[%s883_s27 + $0x90] sm:$0xff]  }
  0x12   : > { %531 = vmatpush1.bf16.msra.mxu1 %v784_v3  ;;  %v786_v5 = vld [vmem:[%s883_s27 + $0x40] sm:$0xff]   ;;  %v789_v8 = vld [vmem:[%s883_s27 + $0x48] sm:$0xff]   ;;  %v792_v10 = vld [vmem:[%s883_s27 + $0x50] sm:$0xff]  }
  0x13   : > { %532 = vmatprep.subr.bf16.mxu1 %v829_v0  ;;  %v787_v6 = vld [vmem:[%s883_s27] sm:$0xff]   ;;  %750 = vmatprep.subr.bf16.mxu0 %v786_v5  ;;  %v790_v9 = vld [vmem:[%s883_s27 + $0x8] sm:$0xff]   ;;  %v793_v11 = vld [vmem:[%s883_s27 + $0x10] sm:$0xff]  }
  0x14   : > { %751 = vmatpush3.bf16.msra.mxu0 %v787_v6  ;;  %v791_v12 = vld [vmem:[%s883_s27 + $0x98] sm:$0xff]   ;;  %v794_v14 = vld [vmem:[%s883_s27 + $0xa0] sm:$0xff]   ;;  %v797_v17 = vld [vmem:[%s883_s27 + $0xa8] sm:$0xff]  }
  0x15   : > { %752 = vmatprep.subr.bf16.mxu0 %v789_v8  ;;  %v795_v13 = vld [vmem:[%s883_s27 + $0x58] sm:$0xff]   ;;  %v798_v16 = vld [vmem:[%s883_s27 + $0x60] sm:$0xff]   ;;  %v801_v19 = vld [vmem:[%s883_s27 + $0x68] sm:$0xff]  }
  0x16   : > { %533 = vmatpush1.bf16.msra.mxu1 %v785_v4  ;;  %v796_v15 = vld [vmem:[%s883_s27 + $0x18] sm:$0xff]   ;;  %v799_v18 = vld [vmem:[%s883_s27 + $0x20] sm:$0xff]   ;;  %v800_v20 = vld [vmem:[%s883_s27 + $0xb0] sm:$0xff]  }
  0x17   : > { %534 = vmatprep.subr.bf16.mxu1 %v829_v0  ;;  %v802_v21 = vld [vmem:[%s883_s27 + $0x28] sm:$0xff]   ;;  %v804_v22 = vld [vmem:[%s883_s27 + $0x70] sm:$0xff]   ;;  %v803_v23 = vld [vmem:[%s883_s27 + $0xb8] sm:$0xff]  }
  0x18   : > { %753 = vmatpush3.bf16.msra.mxu0 %v790_v9  ;;  %v805_v24 = vld [vmem:[%s883_s27 + $0x30] sm:$0xff]   ;;  %v807_v25 = vld [vmem:[%s883_s27 + $0x78] sm:$0xff]   ;;  %v806_v27 = vld [vmem:[%s883_s27 + $0xc0] sm:$0xff]  }
  0x19   : > { %754 = vmatprep.subr.bf16.mxu0 %v792_v10  ;;  %v808_v26 = vld [vmem:[%s883_s27 + $0x38] sm:$0xff]   ;;  %v812_v29 = vld [vmem:[%s883_s27 + $0xc8] sm:$0xff]   ;;  %v813_v30 = vld [vmem:[%s883_s27 + $0xd0] sm:$0xff]  }
  0x1a   : > { %535 = vmatpush1.bf16.msra.mxu1 %v788_v7 }
  0x1b   : > { %536 = vmatprep.subr.bf16.mxu1 %v829_v0 }
  0x1c   : > { %755 = vmatpush3.bf16.msra.mxu0 %v793_v11  ;;  %v629_v11 = vld [vmem:[%s239_s20] sm:$0xff] }
  0x1d   : > { %756 = vmatprep.subr.bf16.mxu0 %v795_v13 }
  0x1e   : > { %537 = vmatpush1.bf16.msra.mxu1 %v791_v12 }
  0x1f   : > { %538 = vmatprep.subr.bf16.mxu1 %v829_v0 }
  0x20   : > { %757 = vmatpush3.bf16.msra.mxu0 %v796_v15 }
  0x21   : > { %758 = vmatprep.subr.bf16.mxu0 %v798_v16  ;;  %v630_v16 = vld [vmem:[%s239_s20 + $0x8] sm:$0xff] }
  0x22   : > { %539 = vmatpush1.bf16.msra.mxu1 %v794_v14 }
  0x23   : > { %540 = vmatprep.subr.bf16.mxu1 %v829_v0 }
  0x24   : > { %759 = vmatpush3.bf16.msra.mxu0 %v799_v18 }
  0x25   : > { %760 = vmatprep.subr.bf16.mxu0 %v801_v19 }
  0x26   : > { %541 = vmatpush1.bf16.msra.mxu1 %v797_v17 }
  0x27   : > { %542 = vmatprep.subr.bf16.mxu1 %v829_v0 }
  0x28   : > { %761 = vmatpush3.bf16.msra.mxu0 %v802_v21 }
  0x29   : > { %762 = vmatprep.subr.bf16.mxu0 %v804_v22 }
  0x2a   : > { %543 = vmatpush1.bf16.msra.mxu1 %v800_v20 }
  0x2b   : > { %544 = vmatprep.subr.bf16.mxu1 %v829_v0 }
  0x2c   : > { %763 = vmatpush3.bf16.msra.mxu0 %v805_v24 }
  0x2d   : > { %764 = vmatprep.subr.bf16.mxu0 %v807_v25 }
  0x2e   : > { %545 = vmatpush1.bf16.msra.mxu1 %v803_v23 }
  0x2f   : > { %546 = vmatprep.subr.bf16.mxu1 %v829_v0 }
  0x30   : > { %765 = vmatpush3.bf16.msra.mxu0 %v808_v26 }
  0x32   : > { %547 = vmatpush1.bf16.msra.mxu1 %v806_v27 }
  0x33   : > { %548 = vmatprep.subr.bf16.mxu1 %v829_v0  ;;  %522 = vmatmul.mubr.bf16.vlgmr.msra.gmra.mrb[0].mxu0 %v809_v28 }
  0x36   : > { %549 = vmatpush1.bf16.msra.mxu1 %v812_v29 }
  0x37   : > { %550 = vmatprep.subr.bf16.mxu1 %v829_v0 }
  0x3a   : > { %551 = vmatpush1.bf16.msra.mxu1 %v813_v30 }
  0x3d   : > { %563 = vmatmul.mubr.bf16.vlgmr.msra.gmra.mrb[0].mxu1 %v814_v31 }
  0x87   : > { %v611_v62 = vpop.permute.xlu1 %610 }
  0x8b   : > { %v620_v63 = vpop.permute.xlu1 %619 }
 0x106   : > { %v766_v34 = vpop.f32.mrb[0].mxu0 }
 0x107   : > { %v767_v35 = vpop.f32.mrb[1].mxu0 }
 0x108   : > { %v768_v37 = vadd.f32 %v767_v35, %v766_v34  ;;  %v769_v38 = vpop.f32.mrb[2].mxu0 }
 0x109   : > { %v770_v39 = vpop.f32.mrb[3].mxu0 }
 0x10a   : > { %v771_v40 = vadd.f32 %v770_v39, %v769_v38 }
 0x110   : > { %v564_v42 = vpop.f32.mrb[0].mxu1 }
 0x111   : > { %v565_v43 = vadd.f32 %v768_v37, %v564_v42  ;;  %v566_v44 = vpop.f32.mrb[1].mxu1 }
 0x112   : > { %v567_v45 = vpop.f32.mrb[2].mxu1 }
 0x113   : > { %v568_v46 = vadd.f32 %v771_v40, %v567_v45  ;;  %v569_v47 = vpop.f32.mrb[3].mxu1  ;;  %v574_v48 = vsel %vm573_vm1, %v565_v43, 0.0 }
 0x114   : > { %576 = vadd.xlane.f32.xlu0 %v574_v48 }
 0x115   : > { %v575_v49 = vsel %vm573_vm1, %v568_v46, 0.0 }
 0x118   : > { %578 = vadd.xlane.f32.xlu0 %v575_v49 }
 0x12e   : > { %605 = vperm.xlu0 %782, %v601_v50  }
 0x1a1   : > { %v577_v51 = vpop.xlane.xlu0 %576 }
 0x1a2   : > { %v581_v52 = vmul.f32 0.0625, %v577_v51 }
 0x1a4   : > { %v583_v53 = vsub.f32 %v565_v43, %v581_v52 }
 0x1a5   : > { %v579_v54 = vpop.xlane.xlu0 %578 }
 0x1a6   : > { %v582_v55 = vmul.f32 0.0625, %v579_v54  ;;  %v585_v56 = vsel %vm573_vm1, %v583_v53, 0.0 }
 0x1a7   : > { %v587_v57 = vmul.f32 %v585_v56, %v585_v56 }
 0x1a8   : > { %v584_v58 = vsub.f32 %v568_v46, %v582_v55 }
 0x1a9   : > { %589 = vadd.xlane.f32.xlu1 %v587_v57 }
 0x1aa   : > { %v586_v59 = vsel %vm573_vm1, %v584_v58, 0.0 }
 0x1ab   : > { %v588_v60 = vmul.f32 %v586_v59, %v586_v59 }
 0x1ad   : > { %591 = vadd.xlane.f32.xlu1 %v588_v60  ;;  %v606_v7 = vpop.permute.xlu0 %605 }
 0x1be   : > { %624 = vperm.xlu1 %783, %v616_v61  }
 0x236   : > { %v590_v0 = vpop.xlane.xlu1 %589 }
 0x237   : > { %v593_v1 = vmul.f32 0.0625, %v590_v0 }
 0x239   : > { %v595_v2 = vadd.f32 1e-05, %v593_v1 }
 0x23a   : > { %v592_v3 = vpop.xlane.xlu1 %591 }
 0x23b   : > { %817 = vrsqrt.f32 %v595_v2  ;;  %v594_v4 = vmul.f32 0.0625, %v592_v3 }
 0x23d   : > { %v596_v5 = vadd.f32 1e-05, %v594_v4 }
 0x23e   : > { %v625_v17 = vpop.permute.xlu1 %624 }
 0x23f   : > { %819 = vrsqrt.f32 %v596_v5 }
 0x245   : > { %v818_v6 = vpop.eup %817 }
 0x246   : > { %v599_v8 = vmul.f32 %v818_v6, %v583_v53 }
 0x248   : > { %v613_v9 = vmul.f32 %v606_v7, %v599_v8 }
 0x249   : > { %v820_v10 = vpop.eup %819 }
 0x24a   : > { %v600_v12 = vmul.f32 %v820_v10, %v584_v58  ;;  %v627_v13 = vadd.f32 %v620_v63, %v613_v9 }
 0x24c   : > { %v614_v14 = vmul.f32 %v611_v62, %v600_v12  ;;  %v631_v15 = vadd.f32 %v629_v11, %v627_v13 }
 0x24e   : > { %v628_v18 = vadd.f32 %v625_v17, %v614_v14  ;;  %v633_v19 = vmax.f32 %v631_v15, 0.0 }
 0x250   : > { %v632_v20 = vadd.f32 %v630_v16, %v628_v18  ;;  %635 = vst [vmem:[%s244_s23] sm:$0xff] %v633_v19 }
 0x252   : > { %v634_v21 = vmax.f32 %v632_v20, 0.0 }
 0x254   : > { %636 = vst [vmem:[%s244_s23 + $0x8] sm:$0xff] %v634_v21 }
 0x255 PF: > { %s15_s18 = sadd.s32 1, %s827_s18  }
 0x256   : > { %p12_p4 = scmp.ge.s32.totalorder %s15_s18, 5  }
 0x258   :  { %14 = sbr.rel (!%p12_p4) target bundleno = 1 (0x1), region = 73 }

// kernel: forward.20
= control target key start
LH: loop header
LB: loop body
LE: loop exit
PB: predicated region body
PF: predicated region fallthrough
CT: control target
= control target key end

     0   :  { %s866_s15 = smov 0   ;;  %s973_s0 = inlined_call_operand.vmem [shape: bf16[3,432,128], index: 0, kind: input, shape index: {}]   ;;  %s974_s1 = inlined_call_operand.vmem [shape: bf16[24,432], index: 1, kind: input, shape index: {}]   ;;  %s975_s2 = inlined_call_operand.vmem [shape: f32[24,1], index: 2, kind: input, shape index: {}]   ;;  %s976_s3 = inlined_call_operand.vmem [shape: f32[24,1], index: 3, kind: input, shape index: {}]   ;;  %s977_s4 = inlined_call_operand.vmem [shape: f32[3,24,128], index: 4, kind: output, shape index: {}]  }
   0x1 LB: > { %s702_s16 = sadd.s32 4294967295, %s838_s15   ;;  %p706_p0 = scmp.ge.s32.totalorder %s838_s15, 1  ;;  %s838_s15 = sphi %s866_s15, %s14_s15  }
   0x2   : > { %p162_p1 = scmp.lt.s32.totalorder %s838_s15, 4 }
   0x4   : > { %p163_p2 = pnand %p706_p0, %p162_p1 }
   0x5   : > { %p188_p3 = scmp.lt.s32.totalorder (!%p163_p2), %s702_s16, 2  ;;  %v840_v0 = vmov (!%p163_p2), 0   ;;  %v816_v1 = vld [vmem:[%s974_s1 + $0x4] ss:$16 sps:$4 sm:$0xff] (!%p163_p2)   ;;  %vm453_vm0 = vcmask (!%p163_p2), 392192   ;;  %v258_v33 = vld [vmem:[%s974_s1 + $0x28] sm:$0xff] (!%p163_p2)  ;;  %v556_v40 = vlaneseq (!%p163_p2) }
   0x6   : > { %166 = sbr.rel (%p163_p2) target bundleno = 656 (0x290), region = 36  ;;  %508 = vmatprep.subr.bf16.mxu1 (!%p163_p2), %v840_v0  ;;  %788 = vset.pattern.permute.xlu1 (!%p163_p2), %v840_v0  ;;  %v821_v2 = vld [vmem:[%s974_s1 + $0xc] ss:$16 sps:$4 sm:$0xff] (!%p163_p2)   ;;  %v257_v28 = vld [vmem:[%s974_s1 + $0x20] sm:$0xff] (!%p163_p2)  ;;  %v819_v35 = vld [vmem:[%s974_s1 + $0x8] ss:$16 sps:$4 sm:$0xff] (!%p163_p2)   ;;  %v716_v36 = vcombine.high (!%p163_p2), %v258_v33, %v258_v33  ;;  %v715_v37 = vcombine.low (!%p163_p2), %v258_v33, %v258_v33 }
   0x7   : > { %787 = vset.pattern.permute.xlu0 (!%p163_p2), %v840_v0  ;;  %492 = vmatprep.mubr.bf16.mxu0 (!%p163_p2), %v816_v1  ;;  %v814_v29 = vld [vmem:[%s974_s1] ss:$16 sps:$4 sm:$0xff] (!%p163_p2)   ;;  %v714_v30 = vcombine.high (!%p163_p2), %v257_v28, %v257_v28  ;;  %v713_v34 = vcombine.low (!%p163_p2), %v257_v28, %v257_v28  ;;  %v557_v45 = vand.u32 (!%p163_p2), 127, %v556_v40 }
   0x8   : > { %744 = vmatprep.mubr.msk.bf16.mxu1 (!%p163_p2), %vm453_vm0, %v821_v2 }
   0x9   : > { %vm558_vm1 = vcmp.lt.s32.totalorder (!%p163_p2), %v557_v45, 2 }
   0xd   : > { %s979_s16 = smov (!%p188_p3, %s702_s16), 2 }
   0xe   : > { %s776_s21 = smul.u32 216, %s979_s16 }
  0x10   : > { %s890_s24 = scalar_lea.vmem %s973_s0, %s776_s21  ;;  %s777_s21 = smul.u32 24, %s979_s16 }
  0x11   : > { %v789_v3 = vld [vmem:[%s890_s24 + $0x80] sm:$0xff]   ;;  %v790_v4 = vld [vmem:[%s890_s24 + $0x88] sm:$0xff]   ;;  %v793_v7 = vld [vmem:[%s890_s24 + $0x90] sm:$0xff]  }
  0x12   : > { %509 = vmatpush1.bf16.msra.mxu1 %v789_v3  ;;  %v791_v5 = vld [vmem:[%s890_s24 + $0x40] sm:$0xff]   ;;  %v794_v8 = vld [vmem:[%s890_s24 + $0x48] sm:$0xff]   ;;  %v797_v10 = vld [vmem:[%s890_s24 + $0x50] sm:$0xff]  }
  0x13   : > { %510 = vmatprep.subr.bf16.mxu1 %v840_v0  ;;  %v792_v6 = vld [vmem:[%s890_s24] sm:$0xff]   ;;  %748 = vmatprep.subr.bf16.mxu0 %v791_v5  ;;  %v795_v9 = vld [vmem:[%s890_s24 + $0x8] sm:$0xff]   ;;  %v798_v11 = vld [vmem:[%s890_s24 + $0x10] sm:$0xff]  }
  0x14   : > { %749 = vmatpush3.bf16.msra.mxu0 %v792_v6  ;;  %v796_v12 = vld [vmem:[%s890_s24 + $0x98] sm:$0xff]   ;;  %v799_v14 = vld [vmem:[%s890_s24 + $0xa0] sm:$0xff]   ;;  %v802_v17 = vld [vmem:[%s890_s24 + $0xa8] sm:$0xff]  }
  0x15   : > { %750 = vmatprep.subr.bf16.mxu0 %v794_v8  ;;  %v800_v13 = vld [vmem:[%s890_s24 + $0x58] sm:$0xff]   ;;  %v803_v16 = vld [vmem:[%s890_s24 + $0x60] sm:$0xff]   ;;  %v806_v19 = vld [vmem:[%s890_s24 + $0x68] sm:$0xff]  }
  0x16   : > { %511 = vmatpush1.bf16.msra.mxu1 %v790_v4  ;;  %v801_v15 = vld [vmem:[%s890_s24 + $0x18] sm:$0xff]   ;;  %v804_v18 = vld [vmem:[%s890_s24 + $0x20] sm:$0xff]   ;;  %v805_v20 = vld [vmem:[%s890_s24 + $0xb0] sm:$0xff]  }
  0x17   : > { %512 = vmatprep.subr.bf16.mxu1 %v840_v0  ;;  %v807_v21 = vld [vmem:[%s890_s24 + $0x28] sm:$0xff]   ;;  %v809_v22 = vld [vmem:[%s890_s24 + $0x70] sm:$0xff]   ;;  %v808_v23 = vld [vmem:[%s890_s24 + $0xb8] sm:$0xff]  }
  0x18   : > { %751 = vmatpush3.bf16.msra.mxu0 %v795_v9  ;;  %v810_v24 = vld [vmem:[%s890_s24 + $0x30] sm:$0xff]   ;;  %v812_v25 = vld [vmem:[%s890_s24 + $0x78] sm:$0xff]   ;;  %v811_v27 = vld [vmem:[%s890_s24 + $0xc0] sm:$0xff]  }
  0x19   : > { %752 = vmatprep.subr.bf16.mxu0 %v797_v10  ;;  %v813_v26 = vld [vmem:[%s890_s24 + $0x38] sm:$0xff]   ;;  %v817_v31 = vld [vmem:[%s890_s24 + $0xc8] sm:$0xff]   ;;  %v818_v32 = vld [vmem:[%s890_s24 + $0xd0] sm:$0xff]   ;;  %s197_s24 = scalar_lea.vmem %s977_s4, %s777_s21 }
  0x1a   : > { %513 = vmatpush1.bf16.msra.mxu1 %v793_v7 }
  0x1b   : > { %514 = vmatprep.subr.bf16.mxu1 %v840_v0 }
  0x1c   : > { %753 = vmatpush3.bf16.msra.mxu0 %v798_v11  ;;  %v600_v11 = vld [vmem:[%s975_s2 + $0x8] sm:$0xff] }
  0x1d   : > { %754 = vmatprep.subr.bf16.mxu0 %v800_v13  ;;  %v620_v13 = vld [vmem:[%s976_s3] sm:$0xff] }
  0x1e   : > { %515 = vmatpush1.bf16.msra.mxu1 %v796_v12  ;;  %v601_v12 = vld [vmem:[%s975_s2 + $0x10] sm:$0xff] }
  0x1f   : > { %516 = vmatprep.subr.bf16.mxu1 %v840_v0 }
  0x20   : > { %755 = vmatpush3.bf16.msra.mxu0 %v801_v15  ;;  %v621_v15 = vld [vmem:[%s976_s3 + $0x8] sm:$0xff] }
  0x21   : > { %756 = vmatprep.subr.bf16.mxu0 %v803_v16 }
  0x22   : > { %517 = vmatpush1.bf16.msra.mxu1 %v799_v14  ;;  %v599_v14 = vld [vmem:[%s975_s2] sm:$0xff] }
  0x23   : > { %518 = vmatprep.subr.bf16.mxu1 %v840_v0 }
  0x24   : > { %757 = vmatpush3.bf16.msra.mxu0 %v804_v18 }
  0x25   : > { %758 = vmatprep.subr.bf16.mxu0 %v806_v19 }
  0x26   : > { %519 = vmatpush1.bf16.msra.mxu1 %v802_v17 }
  0x27   : > { %520 = vmatprep.subr.bf16.mxu1 %v840_v0 }
  0x28   : > { %759 = vmatpush3.bf16.msra.mxu0 %v807_v21  ;;  %v622_v21 = vld [vmem:[%s976_s3 + $0x10] sm:$0xff] }
  0x29   : > { %760 = vmatprep.subr.bf16.mxu0 %v809_v22 }
  0x2a   : > { %521 = vmatpush1.bf16.msra.mxu1 %v805_v20 }
  0x2b   : > { %522 = vmatprep.subr.bf16.mxu1 %v840_v0 }
  0x2c   : > { %761 = vmatpush3.bf16.msra.mxu0 %v810_v24 }
  0x2d   : > { %762 = vmatprep.subr.bf16.mxu0 %v812_v25 }
  0x2e   : > { %523 = vmatpush1.bf16.msra.mxu1 %v808_v23 }
  0x2f   : > { %524 = vmatprep.subr.bf16.mxu1 %v840_v0 }
  0x30   : > { %763 = vmatpush3.bf16.msra.mxu0 %v813_v26 }
  0x32   : > { %525 = vmatpush1.bf16.msra.mxu1 %v811_v27 }
  0x33   : > { %526 = vmatprep.subr.bf16.mxu1 %v840_v0  ;;  %493 = vmatmul.mubr.bf16.vlgmr.msra.gmra.mrb[0].mxu0 %v814_v29 }
  0x34   : > { %500 = vmatprep.mubr.bf16.mxu0 %v714_v30 }
  0x36   : > { %527 = vmatpush1.bf16.msra.mxu1 %v817_v31 }
  0x37   : > { %528 = vmatprep.subr.bf16.mxu1 %v840_v0 }
  0x3a   : > { %529 = vmatpush1.bf16.msra.mxu1 %v818_v32 }
  0x3b   : > { %501 = vmatmul.mubr.bf16.gmra.mrb[4].mxu0 %v713_v34 }
  0x3d   : > { %541 = vmatmul.mubr.bf16.vlgmr.msra.gmra.mrb[0].mxu1 %v819_v35 }
  0x3e   : > { %745 = vmatprep.mubr.msk.bf16.mxu1 %vm453_vm0, %v716_v36 }
  0x45   : > { %549 = vmatmul.mubr.bf16.gmra.mrb[4].mxu1 %v715_v37 }
 0x106   : > { %v764_v38 = vpop.f32.mrb[0].mxu0 }
 0x107   : > { %v765_v39 = vpop.f32.mrb[1].mxu0 }
 0x108   : > { %v766_v41 = vadd.f32 %v765_v39, %v764_v38  ;;  %v767_v42 = vpop.f32.mrb[2].mxu0 }
 0x109   : > { %v768_v43 = vpop.f32.mrb[3].mxu0 }
 0x10a   : > { %v769_v44 = vadd.f32 %v768_v43, %v767_v42 }
 0x10e   : > { %v770_v46 = vpop.f32.mrb[4].mxu0 }
 0x10f   : > { %v771_v48 = vpop.f32.mrb[5].mxu0 }
 0x110   : > { %v542_v47 = vpop.f32.mrb[0].mxu1  ;;  %v772_v51 = vadd.f32 %v771_v48, %v770_v46  ;;  %v773_v52 = vpop.f32.mrb[6].mxu0 }
 0x111   : > { %v543_v49 = vadd.f32 %v766_v41, %v542_v47  ;;  %v544_v50 = vpop.f32.mrb[1].mxu1  ;;  %v774_v54 = vpop.f32.mrb[7].mxu0 }
 0x112   : > { %v545_v53 = vpop.f32.mrb[2].mxu1 }
 0x113   : > { %v546_v55 = vadd.f32 %v769_v44, %v545_v53  ;;  %v547_v56 = vpop.f32.mrb[3].mxu1  ;;  %v559_v57 = vsel %vm558_vm1, %v543_v49, 0.0 }
 0x114   : > { %562 = vadd.xlane.f32.xlu0 %v559_v57 }
 0x115   : > { %v560_v58 = vsel %vm558_vm1, %v546_v55, 0.0 }
 0x118   : > { %v550_v59 = vpop.f32.mrb[4].mxu1  ;;  %564 = vadd.xlane.f32.xlu0 %v560_v58 }
 0x119   : > { %v551_v60 = vadd.f32 %v772_v51, %v550_v59  ;;  %v552_v61 = vpop.f32.mrb[5].mxu1 }
 0x11a   : > { %v553_v62 = vpop.f32.mrb[6].mxu1 }
 0x11b   : > { %v561_v63 = vsel %vm558_vm1, %v551_v60, 0.0  ;;  %v554_v0 = vpop.f32.mrb[7].mxu1 }
 0x11c   : > { %566 = vadd.xlane.f32.xlu1 %v561_v63 }
 0x1a1   : > { %v563_v1 = vpop.xlane.xlu0 %562 }
 0x1a2   : > { %v569_v2 = vmul.f32 0.5, %v563_v1 }
 0x1a4   : > { %v572_v3 = vsub.f32 %v543_v49, %v569_v2 }
 0x1a5   : > { %v565_v4 = vpop.xlane.xlu0 %564 }
 0x1a6   : > { %v570_v5 = vmul.f32 0.5, %v565_v4  ;;  %v575_v6 = vsel %vm558_vm1, %v572_v3, 0.0 }
 0x1a7   : > { %v578_v7 = vmul.f32 %v575_v6, %v575_v6 }
 0x1a8   : > { %v573_v8 = vsub.f32 %v546_v55, %v570_v5 }
 0x1a9   : > { %581 = vadd.xlane.f32.xlu1 %v578_v7  ;;  %v567_v16 = vpop.xlane.xlu1 %566 }
 0x1aa   : > { %v576_v9 = vsel %vm558_vm1, %v573_v8, 0.0  ;;  %v571_v17 = vmul.f32 0.5, %v567_v16 }
 0x1ab   : > { %v579_v10 = vmul.f32 %v576_v9, %v576_v9 }
 0x1ac   : > { %v574_v18 = vsub.f32 %v551_v60, %v571_v17 }
 0x1ad   : > { %583 = vadd.xlane.f32.xlu0 %v579_v10 }
 0x1ae   : > { %v577_v19 = vsel %vm558_vm1, %v574_v18, 0.0 }
 0x1af   : > { %v580_v20 = vmul.f32 %v577_v19, %v577_v19 }
 0x1ba   : > { %609 = vperm.xlu1 %788, %v600_v11  }
 0x1be   : > { %614 = vperm.xlu1 %788, %v601_v12  }
 0x1c2   : > { %625 = vperm.xlu1 %788, %v620_v13  }
 0x1c3   : > { %604 = vperm.xlu0 %787, %v599_v14  }
 0x1c6   : > { %630 = vperm.xlu1 %788, %v621_v15  }
 0x1ea   : > { %585 = vadd.xlane.f32.xlu1 %v580_v20 }
 0x1fb   : > { %635 = vperm.xlu1 %788, %v622_v21  }
 0x236   : > { %v582_v22 = vpop.xlane.xlu1 %581 }
 0x237   : > { %v587_v23 = vmul.f32 0.5, %v582_v22 }
 0x239   : > { %v590_v24 = vadd.f32 1e-05, %v587_v23 }
 0x23a   : > { %v584_v25 = vpop.xlane.xlu0 %583  ;;  %v610_v26 = vpop.permute.xlu1 %609 }
 0x23b   : > { %826 = vrsqrt.f32 %v590_v24  ;;  %v588_v27 = vmul.f32 0.5, %v584_v25 }
 0x23d   : > { %v591_v28 = vadd.f32 1e-05, %v588_v27 }
 0x23e   : > { %v615_v29 = vpop.permute.xlu1 %614 }
 0x23f   : > { %828 = vrsqrt.f32 %v591_v28 }
 0x242   : > { %v605_v31 = vpop.permute.xlu0 %604  ;;  %v626_v33 = vpop.permute.xlu1 %625 }
 0x245   : > { %v827_v30 = vpop.eup %826 }
 0x246   : > { %v596_v32 = vmul.f32 %v827_v30, %v572_v3  ;;  %v631_v40 = vpop.permute.xlu1 %630 }
 0x248   : > { %v617_v34 = vmul.f32 %v605_v31, %v596_v32 }
 0x249   : > { %v829_v35 = vpop.eup %828 }
 0x24a   : > { %v597_v36 = vmul.f32 %v829_v35, %v573_v8  ;;  %v638_v37 = vadd.f32 %v626_v33, %v617_v34 }
 0x24c   : > { %v618_v38 = vmul.f32 %v610_v26, %v597_v36  ;;  %v641_v39 = vmax.f32 %v638_v37, 0.0 }
 0x24e   : > { %v639_v41 = vadd.f32 %v631_v40, %v618_v38  ;;  %644 = vst [vmem:[%s197_s24] sm:$0xff] %v641_v39 }
 0x250   : > { %v642_v42 = vmax.f32 %v639_v41, 0.0 }
 0x252   : > { %645 = vst [vmem:[%s197_s24 + $0x8] sm:$0xff] %v642_v42 }
 0x277   : > { %v586_v43 = vpop.xlane.xlu1 %585 }
 0x278   : > { %v589_v44 = vmul.f32 0.5, %v586_v43 }
 0x27a   : > { %v592_v45 = vadd.f32 1e-05, %v589_v44 }
 0x27b   : > { %v636_v49 = vpop.permute.xlu1 %635 }
 0x27c   : > { %830 = vrsqrt.f32 %v592_v45 }
 0x286   : > { %v831_v46 = vpop.eup %830 }
 0x287   : > { %v598_v47 = vmul.f32 %v831_v46, %v574_v18 }
 0x289   : > { %v619_v48 = vmul.f32 %v615_v29, %v598_v47 }
 0x28b   : > { %v640_v50 = vadd.f32 %v636_v49, %v619_v48 }
 0x28d   : > { %v643_v51 = vmax.f32 %v640_v50, 0.0 }
 0x28f   : > { %646 = vst [vmem:[%s197_s24 + $0x10] sm:$0xff] %v643_v51 }
 0x290 PF: > { %s14_s15 = sadd.s32 1, %s838_s15  }
 0x291   : > { %p11_p4 = scmp.ge.s32.totalorder %s14_s15, 5  }
 0x293   :  { %13 = sbr.rel (!%p11_p4) target bundleno = 1 (0x1), region = 66 }

// kernel: forward.21
= control target key start
LH: loop header
LB: loop body
LE: loop exit
PB: predicated region body
PF: predicated region fallthrough
CT: control target
= control target key end

     0   :  { %s496_s15 = smov 0   ;;  %s547_s0 = inlined_call_operand.vmem [shape: bf16[3,16,128], index: 0, kind: input, shape index: {}]   ;;  %s548_s1 = inlined_call_operand.vmem [shape: bf16[24,16], index: 1, kind: input, shape index: {}]   ;;  %s549_s2 = inlined_call_operand.vmem [shape: f32[24,1], index: 2, kind: input, shape index: {}]   ;;  %s550_s3 = inlined_call_operand.vmem [shape: f32[24,1], index: 3, kind: input, shape index: {}]   ;;  %s551_s4 = inlined_call_operand.vmem [shape: f32[3,24,128], index: 4, kind: output, shape index: {}]  }
   0x1 LB: > { %s416_s16 = sadd.s32 4294967295, %s468_s15   ;;  %p420_p0 = scmp.ge.s32.totalorder %s468_s15, 1  ;;  %s468_s15 = sphi %s496_s15, %s14_s15  }
   0x2   : > { %p162_p1 = scmp.lt.s32.totalorder %s468_s15, 4 }
   0x4   : > { %p163_p2 = pnand %p420_p0, %p162_p1 }
   0x5   : > { %p188_p3 = scmp.lt.s32.totalorder (!%p163_p2), %s416_s16, 2  ;;  %v454_v0 = vld [vmem:[%s548_s1] sm:$0xff] (!%p163_p2)   ;;  %vm218_vm0 = vcmask (!%p163_p2), 130048   ;;  %v455_v2 = vld [vmem:[%s548_s1 + $0x8] ss:$0 sps:$4 sm:$0xff] (!%p163_p2)   ;;  %v273_v3 = vlaneseq (!%p163_p2)  ;;  %v470_v12 = vmov (!%p163_p2), 0  }
   0x6   : > { %166 = sbr.rel (%p163_p2) target bundleno = 552 (0x228), region = 36  ;;  %437 = vmatprep.mubr.msk.bf16.mxu0 (!%p163_p2), %vm218_vm0, %v454_v0  ;;  %452 = vset.pattern.permute.xlu1 (!%p163_p2), %v470_v12  ;;  %v317_v28 = vld [vmem:[%s549_s2 + $0x8] sm:$0xff] (!%p163_p2)  ;;  %v318_v29 = vld [vmem:[%s549_s2 + $0x10] sm:$0xff] (!%p163_p2)  ;;  %v316_v30 = vld [vmem:[%s549_s2] sm:$0xff] (!%p163_p2) }
   0x7   : > { %v274_v4 = vand.u32 (!%p163_p2), 127, %v273_v3  ;;  %451 = vset.pattern.permute.xlu0 (!%p163_p2), %v470_v12  ;;  %v337_v31 = vld [vmem:[%s550_s3] sm:$0xff] (!%p163_p2)  ;;  %v338_v32 = vld [vmem:[%s550_s3 + $0x8] sm:$0xff] (!%p163_p2)  ;;  %v339_v33 = vld [vmem:[%s550_s3 + $0x10] sm:$0xff] (!%p163_p2) }
   0x9   : > { %vm275_vm1 = vcmp.lt.s32.totalorder (!%p163_p2), %v274_v4, 2 }
   0xd   : > { %s553_s16 = smov (!%p188_p3, %s416_s16), 2 }
   0xe   : > { %s431_s19 = sshll.u32 %s553_s16, 3  ;;  %s441_s11 = smul.u32 24, %s553_s16 }
   0xf   : > { %s192_s22 = scalar_lea.vmem %s547_s0, %s431_s19 }
  0x10   : > { %v453_v1 = vld [vmem:[%s192_s22] sm:$0xff]   ;;  %s197_s14 = scalar_lea.vmem %s551_s4, %s441_s11 }
  0x11   : > { %435 = vmatprep.subr.bf16.mxu0 %v453_v1 }
  0x12   : > { %436 = vmatpush3.bf16.msra.mxu0 %v453_v1 }
  0x15   : > { %438 = vmatmul.mubr.msk.bf16.vlgmr.msra.gmra.mrb[0].mxu0 %vm218_vm0, %v455_v2 }
  0xe8   : > { %v439_v5 = vpop.f32.mrb[0].mxu0 }
  0xe9   : > { %v259_v6 = vpop.f32.mrb[1].mxu0  ;;  %v278_v7 = vsel %vm275_vm1, %v439_v5, 0.0 }
  0xea   : > { %283 = vadd.xlane.f32.xlu1 %v278_v7  ;;  %v440_v8 = vpop.f32.mrb[2].mxu0  ;;  %v276_v9 = vsel %vm275_vm1, %v259_v6, 0.0 }
  0xeb   : > { %279 = vadd.xlane.f32.xlu0 %v276_v9  ;;  %v262_v10 = vpop.f32.mrb[3].mxu0 }
  0xec   : > { %v277_v11 = vsel %vm275_vm1, %v262_v10, 0.0 }
  0xef   : > { %281 = vadd.xlane.f32.xlu0 %v277_v11 }
 0x177   : > { %v284_v13 = vpop.xlane.xlu1 %283 }
 0x178   : > { %v288_v14 = vmul.f32 0.5, %v284_v13  ;;  %v280_v15 = vpop.xlane.xlu0 %279 }
 0x179   : > { %v286_v16 = vmul.f32 0.5, %v280_v15 }
 0x17a   : > { %v291_v17 = vsub.f32 %v439_v5, %v288_v14 }
 0x17b   : > { %v289_v18 = vsub.f32 %v259_v6, %v286_v16 }
 0x17c   : > { %v282_v19 = vpop.xlane.xlu0 %281  ;;  %v294_v20 = vsel %vm275_vm1, %v291_v17, 0.0 }
 0x17d   : > { %v287_v21 = vmul.f32 0.5, %v282_v19  ;;  %v297_v22 = vmul.f32 %v294_v20, %v294_v20  ;;  %v292_v23 = vsel %vm275_vm1, %v289_v18, 0.0 }
 0x17e   : > { %v295_v25 = vmul.f32 %v292_v23, %v292_v23 }
 0x17f   : > { %v290_v24 = vsub.f32 %v262_v10, %v287_v21  ;;  %302 = vadd.xlane.f32.xlu1 %v297_v22 }
 0x181   : > { %v293_v26 = vsel %vm275_vm1, %v290_v24, 0.0 }
 0x182   : > { %v296_v27 = vmul.f32 %v293_v26, %v293_v26 }
 0x183   : > { %298 = vadd.xlane.f32.xlu1 %v295_v25 }
 0x184   : > { %300 = vadd.xlane.f32.xlu0 %v296_v27 }
 0x194   : > { %326 = vperm.xlu1 %452, %v317_v28  }
 0x198   : > { %331 = vperm.xlu1 %452, %v318_v29  }
 0x19a   : > { %321 = vperm.xlu0 %451, %v316_v30  }
 0x19c   : > { %342 = vperm.xlu1 %452, %v337_v31  }
 0x1a0   : > { %347 = vperm.xlu1 %452, %v338_v32  }
 0x1a4   : > { %352 = vperm.xlu1 %452, %v339_v33  }
 0x20c   : > { %v303_v34 = vpop.xlane.xlu1 %302 }
 0x20d   : > { %v306_v35 = vmul.f32 0.5, %v303_v34 }
 0x20f   : > { %v309_v36 = vadd.f32 1e-05, %v306_v35 }
 0x210   : > { %v299_v37 = vpop.xlane.xlu1 %298 }
 0x211   : > { %v304_v38 = vmul.f32 0.5, %v299_v37  ;;  %v301_v39 = vpop.xlane.xlu0 %300  ;;  %456 = vrsqrt.f32 %v309_v36 }
 0x212   : > { %v305_v40 = vmul.f32 0.5, %v301_v39 }
 0x213   : > { %v307_v41 = vadd.f32 1e-05, %v304_v38 }
 0x214   : > { %v308_v42 = vadd.f32 1e-05, %v305_v40  ;;  %v327_v43 = vpop.permute.xlu1 %326 }
 0x215   : > { %458 = vrsqrt.f32 %v307_v41 }
 0x216   : > { %460 = vrsqrt.f32 %v308_v42 }
 0x218   : > { %v332_v44 = vpop.permute.xlu1 %331 }
 0x219   : > { %v322_v49 = vpop.permute.xlu0 %321 }
 0x21b   : > { %v457_v45 = vpop.eup %456 }
 0x21c   : > { %v343_v46 = vpop.permute.xlu1 %342  ;;  %v315_v48 = vmul.f32 %v457_v45, %v291_v17 }
 0x21e   : > { %v336_v56 = vmul.f32 %v332_v44, %v315_v48 }
 0x21f   : > { %v459_v47 = vpop.eup %458 }
 0x220   : > { %v461_v50 = vpop.eup %460  ;;  %v348_v51 = vpop.permute.xlu1 %347  ;;  %v313_v52 = vmul.f32 %v459_v47, %v289_v18 }
 0x221   : > { %v314_v53 = vmul.f32 %v461_v50, %v290_v24 }
 0x222   : > { %v334_v54 = vmul.f32 %v322_v49, %v313_v52 }
 0x223   : > { %v335_v55 = vmul.f32 %v327_v43, %v314_v53 }
 0x224   : > { %v355_v57 = vadd.f32 %v343_v46, %v334_v54  ;;  %v353_v58 = vpop.permute.xlu1 %352 }
 0x225   : > { %v356_v59 = vadd.f32 %v348_v51, %v335_v55  ;;  %v357_v60 = vadd.f32 %v353_v58, %v336_v56 }
 0x226   : > { %358 = vst [vmem:[%s197_s14] sm:$0xff] %v355_v57 }
 0x227   : > { %359 = vst [vmem:[%s197_s14 + $0x8] sm:$0xff] %v356_v59  ;;  %360 = vst [vmem:[%s197_s14 + $0x10] sm:$0xff] %v357_v60 }
 0x228 PF: > { %s14_s15 = sadd.s32 1, %s468_s15  }
 0x229   : > { %p11_p4 = scmp.ge.s32.totalorder %s14_s15, 5  }
 0x22b   :  { %13 = sbr.rel (!%p11_p4) target bundleno = 1 (0x1), region = 66 }

// kernel: forward.22
= control target key start
LH: loop header
LB: loop body
LE: loop exit
PB: predicated region body
PF: predicated region fallthrough
CT: control target
= control target key end

     0   :  { %s1200_s18 = smov 0   ;;  %s1338_s0 = inlined_call_operand.vmem [shape: bf16[3,648,128], index: 0, kind: input, shape index: {}]   ;;  %s1339_s1 = inlined_call_operand.vmem [shape: bf16[24,648], index: 1, kind: input, shape index: {}]   ;;  %s1340_s2 = inlined_call_operand.vmem [shape: f32[24,1], index: 2, kind: input, shape index: {}]   ;;  %s1341_s3 = inlined_call_operand.vmem [shape: f32[24,1], index: 3, kind: input, shape index: {}]   ;;  %s1342_s4 = inlined_call_operand.vmem [shape: f32[3,24,128], index: 4, kind: input, shape index: {}]   ;;  %s1343_s5 = inlined_call_operand.vmem [shape: f32[3,24,128], index: 5, kind: output, shape index: {}]  }
   0x1 LB: > { %s947_s19 = sadd.s32 4294967295, %s1167_s18   ;;  %p951_p0 = scmp.ge.s32.totalorder %s1167_s18, 1  ;;  %s1167_s18 = sphi %s1200_s18, %s15_s18  }
   0x2   : > { %p197_p1 = scmp.lt.s32.totalorder %s1167_s18, 4 }
   0x4   : > { %p198_p2 = pnand %p951_p0, %p197_p1 }
   0x5   : > { %p230_p3 = scmp.lt.s32.totalorder (!%p198_p2), %s947_s19, 2  ;;  %v1133_v0 = vld [vmem:[%s1339_s1 + $0x4] ss:$24 sps:$4 sm:$0xff] (!%p198_p2)   ;;  %v1169_v1 = vmov (!%p198_p2), 0   ;;  %v1131_v33 = vld [vmem:[%s1339_s1] ss:$24 sps:$4 sm:$0xff] (!%p198_p2)  }
   0x6   : > { %201 = sbr.rel (%p198_p2) target bundleno = 624 (0x270), region = 40  ;;  %1098 = vset.pattern.permute.xlu1 (!%p198_p2), %v1169_v1  ;;  %1097 = vset.pattern.permute.xlu0 (!%p198_p2), %v1169_v1  ;;  %v1136_v2 = vld [vmem:[%s1339_s1 + $0xc] ss:$24 sps:$4 sm:$0xff] (!%p198_p2)   ;;  %v333_v34 = vld [vmem:[%s1339_s1 + $0x30] sm:$0xff] (!%p198_p2)  ;;  %v1134_v36 = vld [vmem:[%s1339_s1 + $0x8] ss:$24 sps:$4 sm:$0xff] (!%p198_p2)  }
   0x7   : > { %671 = vmatprep.mubr.bf16.mxu0 (!%p198_p2), %v1133_v0  ;;  %719 = vmatprep.mubr.bf16.mxu1 (!%p198_p2), %v1136_v2  ;;  %v334_v37 = vld [vmem:[%s1339_s1 + $0x38] sm:$0xff] (!%p198_p2)  ;;  %v962_v40 = vcombine.high (!%p198_p2), %v333_v34, %v333_v34  ;;  %v961_v43 = vcombine.low (!%p198_p2), %v333_v34, %v333_v34  ;;  %v335_v46 = vld [vmem:[%s1339_s1 + $0x40] sm:$0xff] (!%p198_p2)  ;;  %v1152_v47 = vld [vmem:[%s1339_s1 + $0x14] ss:$24 sps:$4 sm:$0xff] (!%p198_p2)   ;;  %vm628_vm0 = vcmask (!%p198_p2), 64512   ;;  %vm635_vm1 = vcmask (!%p198_p2), 1043456  }
   0x8   : > { %v964_v41 = vcombine.high (!%p198_p2), %v334_v37, %v334_v37  ;;  %v963_v45 = vcombine.low (!%p198_p2), %v334_v37, %v334_v37  ;;  %v966_v48 = vcombine.high (!%p198_p2), %v335_v46, %v335_v46  ;;  %v1150_v56 = vld [vmem:[%s1339_s1 + $0x10] ss:$24 sps:$4 sm:$0xff] (!%p198_p2)   ;;  %v965_v57 = vcombine.low (!%p198_p2), %v335_v46, %v335_v46 }
   0xd   : > { %s1345_s19 = smov (!%p230_p3, %s947_s19), 2 }
   0xe   : > { %s1086_s24 = smul.u32 324, %s1345_s19 }
   0xf   : > { %s1087_s6 = smul.u32 24, %s1345_s19 }
  0x10   : > { %s1222_s27 = scalar_lea.vmem %s1338_s0, %s1086_s24 }
  0x11   : > { %v1099_v3 = vld [vmem:[%s1222_s27 + $0x40] sm:$0xff]   ;;  %v1103_v7 = vld [vmem:[%s1222_s27 + $0x48] sm:$0xff]   ;;  %v1107_v11 = vld [vmem:[%s1222_s27 + $0x50] sm:$0xff]   ;;  %s239_s9 = scalar_lea.vmem %s1342_s4, %s1087_s6  ;;  %s244_s11 = scalar_lea.vmem %s1343_s5, %s1087_s6 }
  0x12   : > { %v1100_v4 = vld [vmem:[%s1222_s27 + $0xc0] sm:$0xff]   ;;  %1012 = vmatprep.subr.bf16.mxu0 %v1099_v3  ;;  %v1104_v8 = vld [vmem:[%s1222_s27 + $0xc8] sm:$0xff]   ;;  %v1108_v12 = vld [vmem:[%s1222_s27 + $0xd0] sm:$0xff]  }
  0x13   : > { %v1101_v5 = vld [vmem:[%s1222_s27] sm:$0xff]   ;;  %1040 = vmatprep.subr.bf16.mxu1 %v1100_v4  ;;  %v1105_v9 = vld [vmem:[%s1222_s27 + $0x8] sm:$0xff]   ;;  %v1109_v13 = vld [vmem:[%s1222_s27 + $0x10] sm:$0xff]  }
  0x14   : > { %v1102_v6 = vld [vmem:[%s1222_s27 + $0x80] sm:$0xff]   ;;  %1013 = vmatpush3.bf16.msra.mxu0 %v1101_v5  ;;  %v1106_v10 = vld [vmem:[%s1222_s27 + $0x88] sm:$0xff]   ;;  %v1110_v14 = vld [vmem:[%s1222_s27 + $0x90] sm:$0xff]  }
  0x15   : > { %1041 = vmatpush3.bf16.msra.mxu1 %v1102_v6  ;;  %1014 = vmatprep.subr.bf16.mxu0 %v1103_v7  ;;  %v1111_v15 = vld [vmem:[%s1222_s27 + $0x58] sm:$0xff]   ;;  %v1115_v19 = vld [vmem:[%s1222_s27 + $0x60] sm:$0xff]   ;;  %v1119_v23 = vld [vmem:[%s1222_s27 + $0x68] sm:$0xff]  }
  0x16   : > { %1042 = vmatprep.subr.bf16.mxu1 %v1104_v8  ;;  %v1112_v16 = vld [vmem:[%s1222_s27 + $0xd8] sm:$0xff]   ;;  %v1116_v20 = vld [vmem:[%s1222_s27 + $0xe0] sm:$0xff]   ;;  %v1120_v24 = vld [vmem:[%s1222_s27 + $0xe8] sm:$0xff]  }
  0x17   : > { %v1113_v17 = vld [vmem:[%s1222_s27 + $0x18] sm:$0xff]   ;;  %v1117_v21 = vld [vmem:[%s1222_s27 + $0x20] sm:$0xff]   ;;  %v1121_v25 = vld [vmem:[%s1222_s27 + $0x28] sm:$0xff]  }
  0x18   : > { %1015 = vmatpush3.bf16.msra.mxu0 %v1105_v9  ;;  %v1114_v18 = vld [vmem:[%s1222_s27 + $0x98] sm:$0xff]   ;;  %v1118_v22 = vld [vmem:[%s1222_s27 + $0xa0] sm:$0xff]   ;;  %v1122_v26 = vld [vmem:[%s1222_s27 + $0xa8] sm:$0xff]  }
  0x19   : > { %1043 = vmatpush3.bf16.msra.mxu1 %v1106_v10  ;;  %1016 = vmatprep.subr.bf16.mxu0 %v1107_v11  ;;  %v1123_v27 = vld [vmem:[%s1222_s27 + $0x70] sm:$0xff]   ;;  %v1127_v31 = vld [vmem:[%s1222_s27 + $0x78] sm:$0xff]   ;;  %v1137_v39 = vld [vmem:[%s1222_s27 + $0x100] sm:$0xff]  }
  0x1a   : > { %1044 = vmatprep.subr.bf16.mxu1 %v1108_v12  ;;  %v1124_v28 = vld [vmem:[%s1222_s27 + $0xf0] sm:$0xff]   ;;  %v1128_v32 = vld [vmem:[%s1222_s27 + $0xf8] sm:$0xff]   ;;  %v1138_v42 = vld [vmem:[%s1222_s27 + $0x108] sm:$0xff]  }
  0x1b   : > { %v1125_v29 = vld [vmem:[%s1222_s27 + $0x30] sm:$0xff]   ;;  %v1129_v35 = vld [vmem:[%s1222_s27 + $0x38] sm:$0xff]   ;;  %v1141_v50 = vld [vmem:[%s1222_s27 + $0x120] sm:$0xff]  }
  0x1c   : > { %1017 = vmatpush3.bf16.msra.mxu0 %v1109_v13  ;;  %v1126_v30 = vld [vmem:[%s1222_s27 + $0xb0] sm:$0xff]   ;;  %v1130_v38 = vld [vmem:[%s1222_s27 + $0xb8] sm:$0xff]   ;;  %v1142_v51 = vld [vmem:[%s1222_s27 + $0x128] sm:$0xff]  }
  0x1d   : > { %1045 = vmatpush3.bf16.msra.mxu1 %v1110_v14  ;;  %1018 = vmatprep.subr.bf16.mxu0 %v1111_v15  ;;  %v1139_v44 = vld [vmem:[%s1222_s27 + $0x110] sm:$0xff]   ;;  %v1140_v49 = vld [vmem:[%s1222_s27 + $0x118] sm:$0xff]   ;;  %v1149_v54 = vld [vmem:[%s1222_s27 + $0x140] ss:$0 sps:$4 sm:$0xff]  }
  0x1e   : > { %1046 = vmatprep.subr.bf16.mxu1 %v1112_v16  ;;  %v1145_v52 = vld [vmem:[%s1222_s27 + $0x130] sm:$0xff]   ;;  %v1148_v53 = vld [vmem:[%s1222_s27 + $0x138] sm:$0xff]   ;;  %v637_v55 = vsel %vm635_vm1, %v1149_v54, 0  ;;  %v848_v54 = vld [vmem:[%s1341_s3 + $0x8] sm:$0xff] }
  0x20   : > { %1019 = vmatpush3.bf16.msra.mxu0 %v1113_v17 }
  0x21   : > { %1047 = vmatpush3.bf16.msra.mxu1 %v1114_v18  ;;  %1020 = vmatprep.subr.bf16.mxu0 %v1115_v19  ;;  %v783_v19 = vlaneseq }
  0x22   : > { %1048 = vmatprep.subr.bf16.mxu1 %v1116_v20 }
  0x23   : > { %v784_v20 = vand.u32 127, %v783_v19  ;;  %v869_v19 = vld [vmem:[%s239_s9 + $0x8] sm:$0xff] }
  0x24   : > { %1021 = vmatpush3.bf16.msra.mxu0 %v1117_v21 }
  0x25   : > { %1049 = vmatpush3.bf16.msra.mxu1 %v1118_v22  ;;  %1022 = vmatprep.subr.bf16.mxu0 %v1119_v23  ;;  %vm785_vm2 = vcmp.lt.s32.totalorder %v784_v20, 2  ;;  %v870_v20 = vld [vmem:[%s239_s9 + $0x10] sm:$0xff] }
  0x26   : > { %1050 = vmatprep.subr.bf16.mxu1 %v1120_v24 }
  0x28   : > { %1023 = vmatpush3.bf16.msra.mxu0 %v1121_v25 }
  0x29   : > { %1051 = vmatpush3.bf16.msra.mxu1 %v1122_v26  ;;  %1024 = vmatprep.subr.bf16.mxu0 %v1123_v27 }
  0x2a   : > { %1052 = vmatprep.subr.bf16.mxu1 %v1124_v28 }
  0x2c   : > { %1025 = vmatpush3.bf16.msra.mxu0 %v1125_v29 }
  0x2d   : > { %1053 = vmatpush3.bf16.msra.mxu1 %v1126_v30  ;;  %1026 = vmatprep.subr.bf16.mxu0 %v1127_v31 }
  0x2e   : > { %1054 = vmatprep.subr.bf16.mxu1 %v1128_v32 }
  0x30   : > { %1027 = vmatpush3.bf16.msra.mxu0 %v1129_v35 }
  0x31   : > { %1055 = vmatpush3.bf16.msra.mxu1 %v1130_v38  ;;  %735 = vmatprep.subr.bf16.mxu0 %v1169_v1 }
  0x32   : > { %1068 = vmatprep.subr.bf16.mxu1 %v1169_v1 }
  0x33   : > { %672 = vmatmul.mubr.bf16.vlgmr.msra.gmra.mrb[0].mxu0 %v1131_v33 }
  0x34   : > { %720 = vmatmul.mubr.bf16.vlgmr.msra.gmra.mrb[0].mxu1 %v1134_v36  ;;  %736 = vmatpush1.bf16.msra.mxu0 %v1137_v39 }
  0x35   : > { %1077 = vmatpush1.bf16.msra.mxu1 %v1137_v39  ;;  %737 = vmatprep.subr.bf16.mxu0 %v1169_v1 }
  0x36   : > { %1069 = vmatprep.subr.bf16.mxu1 %v1169_v1  ;;  %679 = vmatprep.mubr.bf16.mxu0 %v962_v40 }
  0x37   : > { %727 = vmatprep.mubr.bf16.mxu1 %v964_v41 }
  0x38   : > { %738 = vmatpush1.bf16.msra.mxu0 %v1138_v42 }
  0x39   : > { %1078 = vmatpush1.bf16.msra.mxu1 %v1138_v42  ;;  %739 = vmatprep.subr.bf16.mxu0 %v1169_v1 }
  0x3a   : > { %1070 = vmatprep.subr.bf16.mxu1 %v1169_v1 }
  0x3b   : > { %680 = vmatmul.mubr.bf16.gmra.mrb[4].mxu0 %v961_v43 }
  0x3c   : > { %740 = vmatpush1.bf16.msra.mxu0 %v1139_v44  ;;  %728 = vmatmul.mubr.bf16.gmra.mrb[4].mxu1 %v963_v45 }
  0x3d   : > { %1079 = vmatpush1.bf16.msra.mxu1 %v1139_v44  ;;  %741 = vmatprep.subr.bf16.mxu0 %v1169_v1 }
  0x3e   : > { %1071 = vmatprep.subr.bf16.mxu1 %v1169_v1  ;;  %1008 = vmatprep.mubr.msk.bf16.mxu0 %vm628_vm0, %v1152_v47 }
  0x3f   : > { %1009 = vmatprep.mubr.msk.bf16.mxu1 %vm628_vm0, %v966_v48 }
  0x40   : > { %742 = vmatpush1.bf16.msra.mxu0 %v1140_v49 }
  0x41   : > { %1080 = vmatpush1.bf16.msra.mxu1 %v1140_v49  ;;  %743 = vmatprep.subr.bf16.mxu0 %v1169_v1 }
  0x42   : > { %1072 = vmatprep.subr.bf16.mxu1 %v1169_v1 }
  0x44   : > { %744 = vmatpush1.bf16.msra.mxu0 %v1141_v50 }
  0x45   : > { %1081 = vmatpush1.bf16.msra.mxu1 %v1141_v50  ;;  %745 = vmatprep.subr.bf16.mxu0 %v1169_v1  ;;  %v827_v50 = vld [vmem:[%s1340_s2 + $0x8] sm:$0xff] }
  0x46   : > { %1073 = vmatprep.subr.bf16.mxu1 %v1169_v1 }
  0x48   : > { %746 = vmatpush1.bf16.msra.mxu0 %v1142_v51 }
  0x49   : > { %1082 = vmatpush1.bf16.msra.mxu1 %v1142_v51  ;;  %747 = vmatprep.subr.bf16.mxu0 %v1169_v1  ;;  %v828_v51 = vld [vmem:[%s1340_s2 + $0x10] sm:$0xff] }
  0x4a   : > { %1074 = vmatprep.subr.bf16.mxu1 %v1169_v1 }
  0x4c   : > { %748 = vmatpush1.bf16.msra.mxu0 %v1145_v52 }
  0x4d   : > { %1083 = vmatpush1.bf16.msra.mxu1 %v1145_v52  ;;  %749 = vmatprep.subr.bf16.mxu0 %v1169_v1  ;;  %v826_v52 = vld [vmem:[%s1340_s2] sm:$0xff] }
  0x4e   : > { %1075 = vmatprep.subr.bf16.mxu1 %v1169_v1 }
  0x50   : > { %750 = vmatpush1.bf16.msra.mxu0 %v1148_v53 }
  0x51   : > { %1084 = vmatpush1.bf16.msra.mxu1 %v1148_v53  ;;  %751 = vmatprep.subr.bf16.mxu0 %v1169_v1  ;;  %v847_v53 = vld [vmem:[%s1341_s3] sm:$0xff] }
  0x52   : > { %1076 = vmatprep.subr.bf16.mxu1 %v1169_v1 }
  0x54   : > { %752 = vmatpush1.bf16.msra.mxu0 %v637_v55 }
  0x55   : > { %1085 = vmatpush1.bf16.msra.mxu1 %v637_v55  ;;  %v849_v55 = vld [vmem:[%s1341_s3 + $0x10] sm:$0xff] }
  0x57   : > { %768 = vmatmul.mubr.bf16.vlgmr.msra.gmra.mrb[8].mxu0 %v1150_v56 }
  0x58   : > { %776 = vmatmul.mubr.bf16.vlgmr.msra.gmra.mrb[8].mxu1 %v965_v57 }
 0x106   : > { %v1028_v58 = vpop.f32.mrb[0].mxu0 }
 0x107   : > { %v1056_v59 = vpop.f32.mrb[0].mxu1  ;;  %v1029_v60 = vpop.f32.mrb[1].mxu0 }
 0x108   : > { %v1030_v61 = vadd.f32 %v1029_v60, %v1028_v58  ;;  %v1057_v62 = vpop.f32.mrb[1].mxu1  ;;  %v1031_v63 = vpop.f32.mrb[2].mxu0 }
 0x109   : > { %v1058_v0 = vadd.f32 %v1057_v62, %v1056_v59  ;;  %v1059_v2 = vpop.f32.mrb[2].mxu1  ;;  %v1032_v3 = vpop.f32.mrb[3].mxu0 }
 0x10a   : > { %v1033_v4 = vadd.f32 %v1032_v3, %v1031_v63  ;;  %v1060_v1 = vpop.f32.mrb[3].mxu1 }
 0x10b   : > { %v1061_v5 = vadd.f32 %v1060_v1, %v1059_v2  ;;  %v722_v6 = vadd.f32 %v1058_v0, %v1030_v61 }
 0x10d   : > { %v725_v7 = vadd.f32 %v1061_v5, %v1033_v4 }
 0x10e   : > { %v1034_v8 = vpop.f32.mrb[4].mxu0 }
 0x10f   : > { %v1035_v9 = vpop.f32.mrb[5].mxu0  ;;  %v1062_v10 = vpop.f32.mrb[4].mxu1 }
 0x110   : > { %v1036_v11 = vadd.f32 %v1035_v9, %v1034_v8  ;;  %v1037_v12 = vpop.f32.mrb[6].mxu0  ;;  %v1063_v13 = vpop.f32.mrb[5].mxu1  ;;  %v868_v9 = vld [vmem:[%s239_s9] sm:$0xff] }
 0x111   : > { %v1038_v14 = vpop.f32.mrb[7].mxu0  ;;  %v1064_v15 = vadd.f32 %v1063_v13, %v1062_v10  ;;  %v1065_v16 = vpop.f32.mrb[6].mxu1 }
 0x112   : > { %v1066_v17 = vpop.f32.mrb[7].mxu1 }
 0x113   : > { %v730_v18 = vadd.f32 %v1064_v15, %v1036_v11 }
 0x12a   : > { %v769_v21 = vpop.f32.mrb[8].mxu0 }
 0x12b   : > { %v770_v22 = vadd.f32 %v769_v21, %v722_v6  ;;  %v777_v23 = vpop.f32.mrb[8].mxu1  ;;  %v771_v24 = vpop.f32.mrb[9].mxu0 }
 0x12c   : > { %v778_v25 = vadd.f32 %v777_v23, %v730_v18  ;;  %v772_v26 = vpop.f32.mrb[10].mxu0  ;;  %v779_v27 = vpop.f32.mrb[9].mxu1 }
 0x12d   : > { %v773_v28 = vadd.f32 %v772_v26, %v725_v7  ;;  %v774_v29 = vpop.f32.mrb[11].mxu0  ;;  %v780_v30 = vpop.f32.mrb[10].mxu1  ;;  %v786_v31 = vsel %vm785_vm2, %v770_v22, 0.0 }
 0x12e   : > { %v781_v32 = vpop.f32.mrb[11].mxu1  ;;  %v788_v33 = vsel %vm785_vm2, %v778_v25, 0.0  ;;  %789 = vadd.xlane.f32.xlu0 %v786_v31 }
 0x12f   : > { %793 = vadd.xlane.f32.xlu1 %v788_v33  ;;  %v787_v34 = vsel %vm785_vm2, %v773_v28, 0.0 }
 0x132   : > { %791 = vadd.xlane.f32.xlu0 %v787_v34 }
 0x1bb   : > { %v790_v35 = vpop.xlane.xlu0 %789 }
 0x1bc   : > { %v794_v36 = vpop.xlane.xlu1 %793  ;;  %v796_v37 = vmul.f32 0.5, %v790_v35 }
 0x1bd   : > { %v798_v38 = vmul.f32 0.5, %v794_v36 }
 0x1be   : > { %v799_v39 = vsub.f32 %v770_v22, %v796_v37 }
 0x1bf   : > { %v801_v40 = vsub.f32 %v778_v25, %v798_v38  ;;  %v792_v41 = vpop.xlane.xlu0 %791 }
 0x1c0   : > { %v797_v42 = vmul.f32 0.5, %v792_v41  ;;  %v802_v43 = vsel %vm785_vm2, %v799_v39, 0.0 }
 0x1c1   : > { %v805_v44 = vmul.f32 %v802_v43, %v802_v43  ;;  %v804_v46 = vsel %vm785_vm2, %v801_v40, 0.0 }
 0x1c2   : > { %v800_v45 = vsub.f32 %v773_v28, %v797_v42  ;;  %v807_v48 = vmul.f32 %v804_v46, %v804_v46 }
 0x1c3   : > { %808 = vadd.xlane.f32.xlu1 %v805_v44 }
 0x1c4   : > { %v803_v47 = vsel %vm785_vm2, %v800_v45, 0.0 }
 0x1c5   : > { %v806_v49 = vmul.f32 %v803_v47, %v803_v47 }
 0x1c7   : > { %812 = vadd.xlane.f32.xlu1 %v807_v48  ;;  %810 = vadd.xlane.f32.xlu0 %v806_v49 }
 0x1d8   : > { %836 = vperm.xlu1 %1098, %v827_v50  }
 0x1dc   : > { %841 = vperm.xlu1 %1098, %v828_v51  }
 0x1dd   : > { %831 = vperm.xlu0 %1097, %v826_v52  }
 0x1e0   : > { %852 = vperm.xlu1 %1098, %v847_v53  }
 0x1e4   : > { %857 = vperm.xlu1 %1098, %v848_v54  }
 0x1e8   : > { %862 = vperm.xlu1 %1098, %v849_v55  }
 0x250   : > { %v809_v56 = vpop.xlane.xlu1 %808 }
 0x251   : > { %v814_v57 = vmul.f32 0.5, %v809_v56 }
 0x253   : > { %v817_v58 = vadd.f32 1e-05, %v814_v57 }
 0x254   : > { %v813_v59 = vpop.xlane.xlu1 %812  ;;  %v811_v60 = vpop.xlane.xlu0 %810 }
 0x255   : > { %1155 = vrsqrt.f32 %v817_v58  ;;  %v816_v61 = vmul.f32 0.5, %v813_v59  ;;  %v815_v62 = vmul.f32 0.5, %v811_v60 }
 0x257   : > { %v819_v63 = vadd.f32 1e-05, %v816_v61  ;;  %v818_v0 = vadd.f32 1e-05, %v815_v62 }
 0x258   : > { %v837_v2 = vpop.permute.xlu1 %836 }
 0x259   : > { %1157 = vrsqrt.f32 %v819_v63 }
 0x25a   : > { %1159 = vrsqrt.f32 %v818_v0 }
 0x25c   : > { %v842_v3 = vpop.permute.xlu1 %841  ;;  %v832_v1 = vpop.permute.xlu0 %831 }
 0x25f   : > { %v1156_v4 = vpop.eup %1155 }
 0x260   : > { %v853_v5 = vpop.permute.xlu1 %852  ;;  %v823_v6 = vmul.f32 %v1156_v4, %v799_v39 }
 0x262   : > { %v844_v7 = vmul.f32 %v832_v1, %v823_v6 }
 0x263   : > { %v1158_v8 = vpop.eup %1157 }
 0x264   : > { %v1160_v10 = vpop.eup %1159  ;;  %v825_v11 = vmul.f32 %v1158_v8, %v801_v40  ;;  %v865_v12 = vadd.f32 %v853_v5, %v844_v7  ;;  %v858_v13 = vpop.permute.xlu1 %857 }
 0x265   : > { %v824_v14 = vmul.f32 %v1160_v10, %v800_v45 }
 0x266   : > { %v846_v15 = vmul.f32 %v842_v3, %v825_v11  ;;  %v871_v16 = vadd.f32 %v868_v9, %v865_v12 }
 0x267   : > { %v845_v17 = vmul.f32 %v837_v2, %v824_v14 }
 0x268   : > { %v874_v18 = vmax.f32 %v871_v16, 0.0  ;;  %v863_v21 = vpop.permute.xlu1 %862 }
 0x269   : > { %v866_v22 = vadd.f32 %v858_v13, %v845_v17  ;;  %v867_v23 = vadd.f32 %v863_v21, %v846_v15 }
 0x26a   : > { %877 = vst [vmem:[%s244_s11] sm:$0xff] %v874_v18 }
 0x26b   : > { %v872_v24 = vadd.f32 %v869_v19, %v866_v22  ;;  %v873_v25 = vadd.f32 %v870_v20, %v867_v23 }
 0x26d   : > { %v875_v26 = vmax.f32 %v872_v24, 0.0  ;;  %v876_v27 = vmax.f32 %v873_v25, 0.0 }
 0x26f   : > { %878 = vst [vmem:[%s244_s11 + $0x8] sm:$0xff] %v875_v26  ;;  %879 = vst [vmem:[%s244_s11 + $0x10] sm:$0xff] %v876_v27 }
 0x270 PF: > { %s15_s18 = sadd.s32 1, %s1167_s18  }
 0x271   : > { %p12_p4 = scmp.ge.s32.totalorder %s15_s18, 5  }
 0x273   :  { %14 = sbr.rel (!%p12_p4) target bundleno = 1 (0x1), region = 73 }

// kernel: forward.23
= control target key start
LH: loop header
LB: loop body
LE: loop exit
PB: predicated region body
PF: predicated region fallthrough
CT: control target
= control target key end

     0   :  { %s1179_s15 = smov 0   ;;  %s1331_s0 = inlined_call_operand.vmem [shape: bf16[3,648,128], index: 0, kind: input, shape index: {}]   ;;  %s1332_s1 = inlined_call_operand.vmem [shape: bf16[32,648], index: 1, kind: input, shape index: {}]   ;;  %s1333_s2 = inlined_call_operand.vmem [shape: f32[32,1], index: 2, kind: input, shape index: {}]   ;;  %s1334_s3 = inlined_call_operand.vmem [shape: f32[32,1], index: 3, kind: input, shape index: {}]   ;;  %s1335_s4 = inlined_call_operand.vmem [shape: f32[3,32,128], index: 4, kind: output, shape index: {}]  }
   0x1 LB: > { %s926_s16 = sadd.s32 4294967295, %s1151_s15   ;;  %p930_p0 = scmp.ge.s32.totalorder %s1151_s15, 1  ;;  %s1151_s15 = sphi %s1179_s15, %s14_s15  }
   0x2   : > { %p162_p1 = scmp.lt.s32.totalorder %s1151_s15, 4 }
   0x4   : > { %p163_p2 = pnand %p930_p0, %p162_p1 }
   0x5   : > { %p188_p3 = scmp.lt.s32.totalorder (!%p163_p2), %s926_s16, 2  ;;  %v1112_v0 = vld [vmem:[%s1332_s1 + $0x4] ss:$24 sps:$4 sm:$0xff] (!%p163_p2)   ;;  %v1153_v1 = vmov (!%p163_p2), 0   ;;  %v1110_v33 = vld [vmem:[%s1332_s1] ss:$24 sps:$4 sm:$0xff] (!%p163_p2)  }
   0x6   : > { %166 = sbr.rel (%p163_p2) target bundleno = 625 (0x271), region = 36  ;;  %1077 = vset.pattern.permute.xlu1 (!%p163_p2), %v1153_v1  ;;  %1076 = vset.pattern.permute.xlu0 (!%p163_p2), %v1153_v1  ;;  %v1115_v2 = vld [vmem:[%s1332_s1 + $0xc] ss:$24 sps:$4 sm:$0xff] (!%p163_p2)   ;;  %v1113_v35 = vld [vmem:[%s1332_s1 + $0x8] ss:$24 sps:$4 sm:$0xff] (!%p163_p2)   ;;  %vm593_vm0 = vcmask (!%p163_p2), 64512  }
   0x7   : > { %636 = vmatprep.mubr.bf16.mxu0 (!%p163_p2), %v1112_v0  ;;  %685 = vmatprep.mubr.bf16.mxu1 (!%p163_p2), %v1115_v2  ;;  %v1122_v38 = vld [vmem:[%s1332_s1 + $0x34] ss:$24 sps:$4 sm:$0xff] (!%p163_p2)   ;;  %v1126_v41 = vld [vmem:[%s1332_s1 + $0x30] ss:$24 sps:$4 sm:$0xff] (!%p163_p2)   ;;  %v1136_v45 = vld [vmem:[%s1332_s1 + $0x44] ss:$24 sps:$4 sm:$0xff] (!%p163_p2)  }
   0x8   : > { %v1124_v39 = vld [vmem:[%s1332_s1 + $0x3c] ss:$24 sps:$4 sm:$0xff] (!%p163_p2)   ;;  %v1127_v42 = vld [vmem:[%s1332_s1 + $0x38] ss:$24 sps:$4 sm:$0xff] (!%p163_p2)   ;;  %vm600_vm1 = vcmask (!%p163_p2), 1043456  }
   0x9   : > { %v1133_v44 = vld [vmem:[%s1332_s1 + $0x14] ss:$24 sps:$4 sm:$0xff] (!%p163_p2)   ;;  %v1131_v53 = vld [vmem:[%s1332_s1 + $0x10] ss:$24 sps:$4 sm:$0xff] (!%p163_p2)   ;;  %v1134_v54 = vld [vmem:[%s1332_s1 + $0x40] ss:$24 sps:$4 sm:$0xff] (!%p163_p2)  }
   0xd   : > { %s1337_s16 = smov (!%p188_p3, %s926_s16), 2 }
   0xe   : > { %s1066_s21 = smul.u32 324, %s1337_s16  ;;  %s991_s11 = sshll.u32 %s1337_s16, 5 }
   0xf   : > { %s197_s14 = scalar_lea.vmem %s1335_s4, %s991_s11 }
  0x10   : > { %s1201_s24 = scalar_lea.vmem %s1331_s0, %s1066_s21 }
  0x11   : > { %v1078_v3 = vld [vmem:[%s1201_s24 + $0x40] sm:$0xff]   ;;  %v1082_v7 = vld [vmem:[%s1201_s24 + $0x48] sm:$0xff]   ;;  %v1086_v11 = vld [vmem:[%s1201_s24 + $0x50] sm:$0xff]  }
  0x12   : > { %v1079_v4 = vld [vmem:[%s1201_s24 + $0xc0] sm:$0xff]   ;;  %992 = vmatprep.subr.bf16.mxu0 %v1078_v3  ;;  %v1083_v8 = vld [vmem:[%s1201_s24 + $0xc8] sm:$0xff]   ;;  %v1087_v12 = vld [vmem:[%s1201_s24 + $0xd0] sm:$0xff]  }
  0x13   : > { %v1080_v5 = vld [vmem:[%s1201_s24] sm:$0xff]   ;;  %1020 = vmatprep.subr.bf16.mxu1 %v1079_v4  ;;  %v1084_v9 = vld [vmem:[%s1201_s24 + $0x8] sm:$0xff]   ;;  %v1088_v13 = vld [vmem:[%s1201_s24 + $0x10] sm:$0xff]  }
  0x14   : > { %v1081_v6 = vld [vmem:[%s1201_s24 + $0x80] sm:$0xff]   ;;  %993 = vmatpush3.bf16.msra.mxu0 %v1080_v5  ;;  %v1085_v10 = vld [vmem:[%s1201_s24 + $0x88] sm:$0xff]   ;;  %v1089_v14 = vld [vmem:[%s1201_s24 + $0x90] sm:$0xff]  }
  0x15   : > { %1021 = vmatpush3.bf16.msra.mxu1 %v1081_v6  ;;  %994 = vmatprep.subr.bf16.mxu0 %v1082_v7  ;;  %v1090_v15 = vld [vmem:[%s1201_s24 + $0x58] sm:$0xff]   ;;  %v1094_v19 = vld [vmem:[%s1201_s24 + $0x60] sm:$0xff]   ;;  %v1098_v23 = vld [vmem:[%s1201_s24 + $0x68] sm:$0xff]  }
  0x16   : > { %1022 = vmatprep.subr.bf16.mxu1 %v1083_v8  ;;  %v1091_v16 = vld [vmem:[%s1201_s24 + $0xd8] sm:$0xff]   ;;  %v1095_v20 = vld [vmem:[%s1201_s24 + $0xe0] sm:$0xff]   ;;  %v1099_v24 = vld [vmem:[%s1201_s24 + $0xe8] sm:$0xff]  }
  0x17   : > { %v1092_v17 = vld [vmem:[%s1201_s24 + $0x18] sm:$0xff]   ;;  %v1096_v21 = vld [vmem:[%s1201_s24 + $0x20] sm:$0xff]   ;;  %v1100_v25 = vld [vmem:[%s1201_s24 + $0x28] sm:$0xff]  }
  0x18   : > { %995 = vmatpush3.bf16.msra.mxu0 %v1084_v9  ;;  %v1093_v18 = vld [vmem:[%s1201_s24 + $0x98] sm:$0xff]   ;;  %v1097_v22 = vld [vmem:[%s1201_s24 + $0xa0] sm:$0xff]   ;;  %v1101_v26 = vld [vmem:[%s1201_s24 + $0xa8] sm:$0xff]  }
  0x19   : > { %1023 = vmatpush3.bf16.msra.mxu1 %v1085_v10  ;;  %996 = vmatprep.subr.bf16.mxu0 %v1086_v11  ;;  %v1102_v27 = vld [vmem:[%s1201_s24 + $0x70] sm:$0xff]   ;;  %v1106_v31 = vld [vmem:[%s1201_s24 + $0x78] sm:$0xff]   ;;  %v1116_v37 = vld [vmem:[%s1201_s24 + $0x100] sm:$0xff]  }
  0x1a   : > { %1024 = vmatprep.subr.bf16.mxu1 %v1087_v12  ;;  %v1103_v28 = vld [vmem:[%s1201_s24 + $0xf0] sm:$0xff]   ;;  %v1107_v32 = vld [vmem:[%s1201_s24 + $0xf8] sm:$0xff]   ;;  %v1117_v40 = vld [vmem:[%s1201_s24 + $0x108] sm:$0xff]  }
  0x1b   : > { %v1104_v29 = vld [vmem:[%s1201_s24 + $0x30] sm:$0xff]   ;;  %v1108_v34 = vld [vmem:[%s1201_s24 + $0x38] sm:$0xff]   ;;  %v1120_v47 = vld [vmem:[%s1201_s24 + $0x120] sm:$0xff]  }
  0x1c   : > { %997 = vmatpush3.bf16.msra.mxu0 %v1088_v13  ;;  %v1105_v30 = vld [vmem:[%s1201_s24 + $0xb0] sm:$0xff]   ;;  %v1109_v36 = vld [vmem:[%s1201_s24 + $0xb8] sm:$0xff]   ;;  %v1121_v48 = vld [vmem:[%s1201_s24 + $0x128] sm:$0xff]  }
  0x1d   : > { %1025 = vmatpush3.bf16.msra.mxu1 %v1089_v14  ;;  %998 = vmatprep.subr.bf16.mxu0 %v1090_v15  ;;  %v1118_v43 = vld [vmem:[%s1201_s24 + $0x110] sm:$0xff]   ;;  %v1119_v46 = vld [vmem:[%s1201_s24 + $0x118] sm:$0xff]   ;;  %v1130_v51 = vld [vmem:[%s1201_s24 + $0x140] ss:$0 sps:$4 sm:$0xff]  }
  0x1e   : > { %1026 = vmatprep.subr.bf16.mxu1 %v1091_v16  ;;  %v1128_v49 = vld [vmem:[%s1201_s24 + $0x130] sm:$0xff]   ;;  %v1129_v50 = vld [vmem:[%s1201_s24 + $0x138] sm:$0xff]   ;;  %v602_v52 = vsel %vm600_vm1, %v1130_v51, 0 }
  0x20   : > { %999 = vmatpush3.bf16.msra.mxu0 %v1092_v17 }
  0x21   : > { %1027 = vmatpush3.bf16.msra.mxu1 %v1093_v18  ;;  %1000 = vmatprep.subr.bf16.mxu0 %v1094_v19  ;;  %v751_v19 = vlaneseq }
  0x22   : > { %1028 = vmatprep.subr.bf16.mxu1 %v1095_v20 }
  0x23   : > { %v752_v20 = vand.u32 127, %v751_v19 }
  0x24   : > { %1001 = vmatpush3.bf16.msra.mxu0 %v1096_v21 }
  0x25   : > { %1029 = vmatpush3.bf16.msra.mxu1 %v1097_v22  ;;  %1002 = vmatprep.subr.bf16.mxu0 %v1098_v23  ;;  %vm753_vm2 = vcmp.lt.s32.totalorder %v752_v20, 2 }
  0x26   : > { %1030 = vmatprep.subr.bf16.mxu1 %v1099_v24 }
  0x28   : > { %1003 = vmatpush3.bf16.msra.mxu0 %v1100_v25 }
  0x29   : > { %1031 = vmatpush3.bf16.msra.mxu1 %v1101_v26  ;;  %1004 = vmatprep.subr.bf16.mxu0 %v1102_v27 }
  0x2a   : > { %1032 = vmatprep.subr.bf16.mxu1 %v1103_v28 }
  0x2c   : > { %1005 = vmatpush3.bf16.msra.mxu0 %v1104_v29 }
  0x2d   : > { %1033 = vmatpush3.bf16.msra.mxu1 %v1105_v30  ;;  %1006 = vmatprep.subr.bf16.mxu0 %v1106_v31 }
  0x2e   : > { %1034 = vmatprep.subr.bf16.mxu1 %v1107_v32 }
  0x30   : > { %1007 = vmatpush3.bf16.msra.mxu0 %v1108_v34 }
  0x31   : > { %1035 = vmatpush3.bf16.msra.mxu1 %v1109_v36  ;;  %702 = vmatprep.subr.bf16.mxu0 %v1153_v1 }
  0x32   : > { %1048 = vmatprep.subr.bf16.mxu1 %v1153_v1 }
  0x33   : > { %637 = vmatmul.mubr.bf16.vlgmr.msra.gmra.mrb[0].mxu0 %v1110_v33 }
  0x34   : > { %686 = vmatmul.mubr.bf16.vlgmr.msra.gmra.mrb[0].mxu1 %v1113_v35  ;;  %703 = vmatpush1.bf16.msra.mxu0 %v1116_v37 }
  0x35   : > { %1057 = vmatpush1.bf16.msra.mxu1 %v1116_v37  ;;  %704 = vmatprep.subr.bf16.mxu0 %v1153_v1  ;;  %v808_v37 = vld [vmem:[%s1333_s2 + $0x8] sm:$0xff] }
  0x36   : > { %1049 = vmatprep.subr.bf16.mxu1 %v1153_v1  ;;  %644 = vmatprep.mubr.bf16.mxu0 %v1122_v38  ;;  %v809_v38 = vld [vmem:[%s1333_s2 + $0x10] sm:$0xff] }
  0x37   : > { %693 = vmatprep.mubr.bf16.mxu1 %v1124_v39  ;;  %v810_v39 = vld [vmem:[%s1333_s2 + $0x18] sm:$0xff] }
  0x38   : > { %705 = vmatpush1.bf16.msra.mxu0 %v1117_v40 }
  0x39   : > { %1058 = vmatpush1.bf16.msra.mxu1 %v1117_v40  ;;  %706 = vmatprep.subr.bf16.mxu0 %v1153_v1  ;;  %v835_v40 = vld [vmem:[%s1334_s3] sm:$0xff] }
  0x3a   : > { %1050 = vmatprep.subr.bf16.mxu1 %v1153_v1 }
  0x3b   : > { %645 = vmatmul.mubr.bf16.gmra.mrb[4].mxu0 %v1126_v41  ;;  %v836_v41 = vld [vmem:[%s1334_s3 + $0x8] sm:$0xff] }
  0x3c   : > { %707 = vmatpush1.bf16.msra.mxu0 %v1118_v43  ;;  %694 = vmatmul.mubr.bf16.gmra.mrb[4].mxu1 %v1127_v42  ;;  %v837_v42 = vld [vmem:[%s1334_s3 + $0x10] sm:$0xff] }
  0x3d   : > { %1059 = vmatpush1.bf16.msra.mxu1 %v1118_v43  ;;  %708 = vmatprep.subr.bf16.mxu0 %v1153_v1 }
  0x3e   : > { %1051 = vmatprep.subr.bf16.mxu1 %v1153_v1  ;;  %987 = vmatprep.mubr.msk.bf16.mxu0 %vm593_vm0, %v1133_v44 }
  0x3f   : > { %988 = vmatprep.mubr.msk.bf16.mxu1 %vm593_vm0, %v1136_v45 }
  0x40   : > { %709 = vmatpush1.bf16.msra.mxu0 %v1119_v46 }
  0x41   : > { %1060 = vmatpush1.bf16.msra.mxu1 %v1119_v46  ;;  %710 = vmatprep.subr.bf16.mxu0 %v1153_v1 }
  0x42   : > { %1052 = vmatprep.subr.bf16.mxu1 %v1153_v1 }
  0x44   : > { %711 = vmatpush1.bf16.msra.mxu0 %v1120_v47 }
  0x45   : > { %1061 = vmatpush1.bf16.msra.mxu1 %v1120_v47  ;;  %712 = vmatprep.subr.bf16.mxu0 %v1153_v1 }
  0x46   : > { %1053 = vmatprep.subr.bf16.mxu1 %v1153_v1 }
  0x48   : > { %713 = vmatpush1.bf16.msra.mxu0 %v1121_v48 }
  0x49   : > { %1062 = vmatpush1.bf16.msra.mxu1 %v1121_v48  ;;  %714 = vmatprep.subr.bf16.mxu0 %v1153_v1 }
  0x4a   : > { %1054 = vmatprep.subr.bf16.mxu1 %v1153_v1 }
  0x4c   : > { %715 = vmatpush1.bf16.msra.mxu0 %v1128_v49 }
  0x4d   : > { %1063 = vmatpush1.bf16.msra.mxu1 %v1128_v49  ;;  %716 = vmatprep.subr.bf16.mxu0 %v1153_v1 }
  0x4e   : > { %1055 = vmatprep.subr.bf16.mxu1 %v1153_v1 }
  0x50   : > { %717 = vmatpush1.bf16.msra.mxu0 %v1129_v50 }
  0x51   : > { %1064 = vmatpush1.bf16.msra.mxu1 %v1129_v50  ;;  %718 = vmatprep.subr.bf16.mxu0 %v1153_v1 }
  0x52   : > { %1056 = vmatprep.subr.bf16.mxu1 %v1153_v1 }
  0x54   : > { %719 = vmatpush1.bf16.msra.mxu0 %v602_v52 }
  0x55   : > { %1065 = vmatpush1.bf16.msra.mxu1 %v602_v52 }
  0x57   : > { %735 = vmatmul.mubr.bf16.vlgmr.msra.gmra.mrb[8].mxu0 %v1131_v53 }
  0x58   : > { %743 = vmatmul.mubr.bf16.vlgmr.msra.gmra.mrb[8].mxu1 %v1134_v54 }
 0x106   : > { %v1008_v55 = vpop.f32.mrb[0].mxu0 }
 0x107   : > { %v1036_v56 = vpop.f32.mrb[0].mxu1  ;;  %v1009_v57 = vpop.f32.mrb[1].mxu0 }
 0x108   : > { %v1010_v58 = vadd.f32 %v1009_v57, %v1008_v55  ;;  %v1037_v59 = vpop.f32.mrb[1].mxu1  ;;  %v1011_v60 = vpop.f32.mrb[2].mxu0 }
 0x109   : > { %v1038_v61 = vadd.f32 %v1037_v59, %v1036_v56  ;;  %v1039_v62 = vpop.f32.mrb[2].mxu1  ;;  %v1012_v63 = vpop.f32.mrb[3].mxu0 }
 0x10a   : > { %v1013_v0 = vadd.f32 %v1012_v63, %v1011_v60  ;;  %v1040_v1 = vpop.f32.mrb[3].mxu1  ;;  %v838_v63 = vld [vmem:[%s1334_s3 + $0x18] sm:$0xff] }
 0x10b   : > { %v1041_v2 = vadd.f32 %v1040_v1, %v1039_v62  ;;  %v688_v3 = vadd.f32 %v1038_v61, %v1010_v58 }
 0x10d   : > { %v691_v4 = vadd.f32 %v1041_v2, %v1013_v0  ;;  %v807_v0 = vld [vmem:[%s1333_s2] sm:$0xff] }
 0x10e   : > { %v1014_v5 = vpop.f32.mrb[4].mxu0 }
 0x10f   : > { %v1042_v6 = vpop.f32.mrb[4].mxu1  ;;  %v1015_v7 = vpop.f32.mrb[5].mxu0 }
 0x110   : > { %v1016_v8 = vadd.f32 %v1015_v7, %v1014_v5  ;;  %v1043_v9 = vpop.f32.mrb[5].mxu1  ;;  %v1017_v10 = vpop.f32.mrb[6].mxu0 }
 0x111   : > { %v1044_v11 = vadd.f32 %v1043_v9, %v1042_v6  ;;  %v1045_v12 = vpop.f32.mrb[6].mxu1  ;;  %v1018_v13 = vpop.f32.mrb[7].mxu0 }
 0x112   : > { %v1019_v14 = vadd.f32 %v1018_v13, %v1017_v10  ;;  %v1046_v15 = vpop.f32.mrb[7].mxu1 }
 0x113   : > { %v1047_v16 = vadd.f32 %v1046_v15, %v1045_v12  ;;  %v696_v17 = vadd.f32 %v1044_v11, %v1016_v8 }
 0x115   : > { %v699_v18 = vadd.f32 %v1047_v16, %v1019_v14 }
 0x12a   : > { %v736_v21 = vpop.f32.mrb[8].mxu0 }
 0x12b   : > { %v737_v22 = vadd.f32 %v736_v21, %v688_v3  ;;  %v744_v23 = vpop.f32.mrb[8].mxu1  ;;  %v738_v24 = vpop.f32.mrb[9].mxu0 }
 0x12c   : > { %v745_v25 = vadd.f32 %v744_v23, %v696_v17  ;;  %v746_v26 = vpop.f32.mrb[9].mxu1  ;;  %v739_v27 = vpop.f32.mrb[10].mxu0 }
 0x12d   : > { %v740_v28 = vadd.f32 %v739_v27, %v691_v4  ;;  %v747_v29 = vpop.f32.mrb[10].mxu1  ;;  %v741_v30 = vpop.f32.mrb[11].mxu0  ;;  %v754_v31 = vsel %vm753_vm2, %v737_v22, 0.0 }
 0x12e   : > { %v748_v32 = vadd.f32 %v747_v29, %v699_v18  ;;  %v749_v33 = vpop.f32.mrb[11].mxu1  ;;  %v756_v34 = vsel %vm753_vm2, %v745_v25, 0.0  ;;  %758 = vadd.xlane.f32.xlu0 %v754_v31 }
 0x12f   : > { %762 = vadd.xlane.f32.xlu1 %v756_v34  ;;  %v755_v35 = vsel %vm753_vm2, %v740_v28, 0.0 }
 0x130   : > { %v757_v36 = vsel %vm753_vm2, %v748_v32, 0.0 }
 0x132   : > { %760 = vadd.xlane.f32.xlu0 %v755_v35 }
 0x133   : > { %764 = vadd.xlane.f32.xlu1 %v757_v36 }
 0x144   : > { %818 = vperm.xlu1 %1077, %v808_v37  }
 0x148   : > { %823 = vperm.xlu1 %1077, %v809_v38  }
 0x14c   : > { %828 = vperm.xlu1 %1077, %v810_v39  }
 0x150   : > { %841 = vperm.xlu1 %1077, %v835_v40  }
 0x154   : > { %846 = vperm.xlu1 %1077, %v836_v41  }
 0x158   : > { %851 = vperm.xlu1 %1077, %v837_v42  }
 0x1bb   : > { %v759_v43 = vpop.xlane.xlu0 %758 }
 0x1bc   : > { %v763_v44 = vpop.xlane.xlu1 %762  ;;  %v767_v45 = vmul.f32 0.5, %v759_v43 }
 0x1bd   : > { %v769_v46 = vmul.f32 0.5, %v763_v44 }
 0x1be   : > { %v771_v47 = vsub.f32 %v737_v22, %v767_v45 }
 0x1bf   : > { %v773_v48 = vsub.f32 %v745_v25, %v769_v46  ;;  %v761_v49 = vpop.xlane.xlu0 %760 }
 0x1c0   : > { %v765_v50 = vpop.xlane.xlu1 %764  ;;  %v768_v51 = vmul.f32 0.5, %v761_v49  ;;  %v775_v52 = vsel %vm753_vm2, %v771_v47, 0.0 }
 0x1c1   : > { %v770_v53 = vmul.f32 0.5, %v765_v50  ;;  %v779_v54 = vmul.f32 %v775_v52, %v775_v52  ;;  %v777_v56 = vsel %vm753_vm2, %v773_v48, 0.0 }
 0x1c2   : > { %v772_v55 = vsub.f32 %v740_v28, %v768_v51  ;;  %v781_v59 = vmul.f32 %v777_v56, %v777_v56 }
 0x1c3   : > { %v774_v57 = vsub.f32 %v748_v32, %v770_v53  ;;  %783 = vadd.xlane.f32.xlu0 %v779_v54 }
 0x1c4   : > { %v776_v58 = vsel %vm753_vm2, %v772_v55, 0.0  ;;  %v819_v1 = vpop.permute.xlu1 %818 }
 0x1c5   : > { %v780_v60 = vmul.f32 %v776_v58, %v776_v58  ;;  %v778_v61 = vsel %vm753_vm2, %v774_v57, 0.0 }
 0x1c6   : > { %v782_v62 = vmul.f32 %v778_v61, %v778_v61 }
 0x1c7   : > { %787 = vadd.xlane.f32.xlu0 %v781_v59  ;;  %785 = vadd.xlane.f32.xlu1 %v780_v60 }
 0x1c8   : > { %v824_v2 = vpop.permute.xlu1 %823 }
 0x1cb   : > { %789 = vadd.xlane.f32.xlu1 %v782_v62 }
 0x1cc   : > { %v829_v3 = vpop.permute.xlu1 %828 }
 0x1d0   : > { %v842_v4 = vpop.permute.xlu1 %841 }
 0x1d4   : > { %v847_v5 = vpop.permute.xlu1 %846 }
 0x1d8   : > { %v852_v6 = vpop.permute.xlu1 %851 }
 0x1dc   : > { %856 = vperm.xlu1 %1077, %v838_v63  }
 0x1dd   : > { %813 = vperm.xlu0 %1076, %v807_v0  }
 0x250   : > { %v784_v7 = vpop.xlane.xlu0 %783 }
 0x251   : > { %v791_v8 = vmul.f32 0.5, %v784_v7 }
 0x253   : > { %v795_v9 = vadd.f32 1e-05, %v791_v8 }
 0x254   : > { %v786_v10 = vpop.xlane.xlu1 %785  ;;  %v788_v11 = vpop.xlane.xlu0 %787 }
 0x255   : > { %1137 = vrsqrt.f32 %v795_v9  ;;  %v792_v12 = vmul.f32 0.5, %v786_v10  ;;  %v793_v13 = vmul.f32 0.5, %v788_v11 }
 0x257   : > { %v796_v14 = vadd.f32 1e-05, %v792_v12  ;;  %v797_v15 = vadd.f32 1e-05, %v793_v13 }
 0x258   : > { %v790_v16 = vpop.xlane.xlu1 %789 }
 0x259   : > { %1139 = vrsqrt.f32 %v796_v14  ;;  %v794_v17 = vmul.f32 0.5, %v790_v16 }
 0x25a   : > { %1141 = vrsqrt.f32 %v797_v15 }
 0x25b   : > { %v798_v18 = vadd.f32 1e-05, %v794_v17 }
 0x25c   : > { %v814_v20 = vpop.permute.xlu0 %813  ;;  %v857_v37 = vpop.permute.xlu1 %856 }
 0x25d   : > { %1143 = vrsqrt.f32 %v798_v18 }
 0x25f   : > { %v1138_v19 = vpop.eup %1137 }
 0x260   : > { %v803_v21 = vmul.f32 %v1138_v19, %v771_v47 }
 0x262   : > { %v831_v22 = vmul.f32 %v814_v20, %v803_v21 }
 0x263   : > { %v1140_v23 = vpop.eup %1139 }
 0x264   : > { %v1142_v24 = vpop.eup %1141  ;;  %v804_v25 = vmul.f32 %v1140_v23, %v772_v55  ;;  %v859_v26 = vadd.f32 %v842_v4, %v831_v22 }
 0x265   : > { %v805_v27 = vmul.f32 %v1142_v24, %v773_v48 }
 0x266   : > { %v832_v28 = vmul.f32 %v819_v1, %v804_v25  ;;  %v863_v29 = vmax.f32 %v859_v26, 0.0 }
 0x267   : > { %v1144_v30 = vpop.eup %1143  ;;  %v833_v31 = vmul.f32 %v824_v2, %v805_v27 }
 0x268   : > { %v806_v32 = vmul.f32 %v1144_v30, %v774_v57  ;;  %v860_v33 = vadd.f32 %v847_v5, %v832_v28  ;;  %867 = vst [vmem:[%s197_s14] sm:$0xff] %v863_v29 }
 0x269   : > { %v861_v34 = vadd.f32 %v852_v6, %v833_v31 }
 0x26a   : > { %v834_v35 = vmul.f32 %v829_v3, %v806_v32  ;;  %v864_v36 = vmax.f32 %v860_v33, 0.0 }
 0x26b   : > { %v865_v38 = vmax.f32 %v861_v34, 0.0 }
 0x26c   : > { %868 = vst [vmem:[%s197_s14 + $0x8] sm:$0xff] %v864_v36  ;;  %v862_v39 = vadd.f32 %v857_v37, %v834_v35 }
 0x26d   : > { %869 = vst [vmem:[%s197_s14 + $0x10] sm:$0xff] %v865_v38 }
 0x26e   : > { %v866_v40 = vmax.f32 %v862_v39, 0.0 }
 0x270   : > { %870 = vst [vmem:[%s197_s14 + $0x18] sm:$0xff] %v866_v40 }
 0x271 PF: > { %s14_s15 = sadd.s32 1, %s1151_s15  }
 0x272   : > { %p11_p4 = scmp.ge.s32.totalorder %s14_s15, 5  }
 0x274   :  { %13 = sbr.rel (!%p11_p4) target bundleno = 1 (0x1), region = 66 }

// kernel: forward.24
= control target key start
LH: loop header
LB: loop body
LE: loop exit
PB: predicated region body
PF: predicated region fallthrough
CT: control target
= control target key end

     0   :  { %s544_s15 = smov 0   ;;  %s603_s0 = inlined_call_operand.vmem [shape: bf16[3,24,128], index: 0, kind: input, shape index: {}]   ;;  %s604_s1 = inlined_call_operand.vmem [shape: bf16[32,24], index: 1, kind: input, shape index: {}]   ;;  %s605_s2 = inlined_call_operand.vmem [shape: f32[32,1], index: 2, kind: input, shape index: {}]   ;;  %s606_s3 = inlined_call_operand.vmem [shape: f32[32,1], index: 3, kind: input, shape index: {}]   ;;  %s607_s4 = inlined_call_operand.vmem [shape: f32[3,32,128], index: 4, kind: output, shape index: {}]  }
   0x1 LB: > { %s456_s16 = sadd.s32 4294967295, %s516_s15   ;;  %p460_p0 = scmp.ge.s32.totalorder %s516_s15, 1  ;;  %s516_s15 = sphi %s544_s15, %s14_s15  }
   0x2   : > { %p162_p1 = scmp.lt.s32.totalorder %s516_s15, 4 }
   0x4   : > { %p163_p2 = pnand %p460_p0, %p162_p1 }
   0x5   : > { %p188_p3 = scmp.lt.s32.totalorder (!%p163_p2), %s456_s16, 2  ;;  %v500_v0 = vld [vmem:[%s604_s1] sm:$0xff] (!%p163_p2)   ;;  %vm225_vm0 = vcmask (!%p163_p2), 195584   ;;  %vm232_vm1 = vcmask (!%p163_p2), 1043456   ;;  %v501_v4 = vld [vmem:[%s604_s1 + $0x8] sm:$0xff] (!%p163_p2)   ;;  %v518_v5 = vmov (!%p163_p2), 0   ;;  %v285_v6 = vlaneseq (!%p163_p2) }
   0x6   : > { %166 = sbr.rel (%p163_p2) target bundleno = 560 (0x230), region = 36  ;;  %481 = vmatprep.mubr.msk.bf16.mxu0 (!%p163_p2), %vm225_vm0, %v500_v0  ;;  %497 = vset.pattern.permute.xlu1 (!%p163_p2), %v518_v5  ;;  %v342_v16 = vld [vmem:[%s605_s2 + $0x8] sm:$0xff] (!%p163_p2)  ;;  %v343_v17 = vld [vmem:[%s605_s2 + $0x10] sm:$0xff] (!%p163_p2)  ;;  %v344_v18 = vld [vmem:[%s605_s2 + $0x18] sm:$0xff] (!%p163_p2) }
   0x7   : > { %496 = vset.pattern.permute.xlu0 (!%p163_p2), %v518_v5  ;;  %v286_v7 = vand.u32 (!%p163_p2), 127, %v285_v6  ;;  %v369_v19 = vld [vmem:[%s606_s3] sm:$0xff] (!%p163_p2)  ;;  %v370_v20 = vld [vmem:[%s606_s3 + $0x8] sm:$0xff] (!%p163_p2)  ;;  %v371_v21 = vld [vmem:[%s606_s3 + $0x10] sm:$0xff] (!%p163_p2) }
   0x8   : > { %v372_v42 = vld [vmem:[%s606_s3 + $0x18] sm:$0xff] (!%p163_p2)  ;;  %v341_v43 = vld [vmem:[%s605_s2] sm:$0xff] (!%p163_p2) }
   0x9   : > { %vm287_vm2 = vcmp.lt.s32.totalorder (!%p163_p2), %v286_v7, 2 }
   0xd   : > { %s609_s16 = smov (!%p188_p3, %s456_s16), 2 }
   0xe   : > { %s486_s19 = smul.u32 12, %s609_s16  ;;  %s472_s17 = sshll.u32 %s609_s16, 5 }
   0xf   : > { %s197_s20 = scalar_lea.vmem %s607_s4, %s472_s17 }
  0x10   : > { %s192_s22 = scalar_lea.vmem %s603_s0, %s486_s19 }
  0x11   : > { %v498_v1 = vld [vmem:[%s192_s22] sm:$0xff]   ;;  %v499_v2 = vld [vmem:[%s192_s22 + $0x8] ss:$0 sps:$4 sm:$0xff]  }
  0x12   : > { %477 = vmatprep.subr.bf16.mxu0 %v498_v1  ;;  %v234_v3 = vsel %vm232_vm1, %v499_v2, 0 }
  0x13   : > { %478 = vmatpush3.bf16.msra.mxu0 %v498_v1 }
  0x14   : > { %485 = vmatprep.subr.msk.bf16.mxu0 %vm232_vm1, %v499_v2 }
  0x17   : > { %480 = vmatpush3.bf16.msra.mxu0 %v234_v3 }
  0x1a   : > { %482 = vmatmul.mubr.msk.bf16.vlgmr.msra.gmra.mrb[0].mxu0 %vm225_vm0, %v501_v4 }
  0xed   : > { %v483_v8 = vpop.f32.mrb[0].mxu0 }
  0xee   : > { %v270_v9 = vpop.f32.mrb[1].mxu0  ;;  %v290_v10 = vsel %vm287_vm2, %v483_v8, 0.0 }
  0xef   : > { %296 = vadd.xlane.f32.xlu1 %v290_v10  ;;  %v484_v11 = vpop.f32.mrb[2].mxu0  ;;  %v288_v12 = vsel %vm287_vm2, %v270_v9, 0.0 }
  0xf0   : > { %292 = vadd.xlane.f32.xlu0 %v288_v12  ;;  %v273_v13 = vpop.f32.mrb[3].mxu0  ;;  %v291_v14 = vsel %vm287_vm2, %v484_v11, 0.0 }
  0xf1   : > { %v289_v15 = vsel %vm287_vm2, %v273_v13, 0.0 }
  0xf3   : > { %298 = vadd.xlane.f32.xlu1 %v291_v14 }
  0xf4   : > { %294 = vadd.xlane.f32.xlu0 %v289_v15 }
 0x104   : > { %352 = vperm.xlu1 %497, %v342_v16  }
 0x108   : > { %357 = vperm.xlu1 %497, %v343_v17  }
 0x10c   : > { %362 = vperm.xlu1 %497, %v344_v18  }
 0x110   : > { %375 = vperm.xlu1 %497, %v369_v19  }
 0x114   : > { %380 = vperm.xlu1 %497, %v370_v20  }
 0x118   : > { %385 = vperm.xlu1 %497, %v371_v21  }
 0x17c   : > { %v297_v22 = vpop.xlane.xlu1 %296 }
 0x17d   : > { %v303_v23 = vmul.f32 0.5, %v297_v22  ;;  %v293_v24 = vpop.xlane.xlu0 %292 }
 0x17e   : > { %v301_v25 = vmul.f32 0.5, %v293_v24 }
 0x17f   : > { %v307_v26 = vsub.f32 %v483_v8, %v303_v23 }
 0x180   : > { %v305_v27 = vsub.f32 %v270_v9, %v301_v25  ;;  %v299_v28 = vpop.xlane.xlu1 %298 }
 0x181   : > { %v304_v29 = vmul.f32 0.5, %v299_v28  ;;  %v295_v30 = vpop.xlane.xlu0 %294  ;;  %v311_v31 = vsel %vm287_vm2, %v307_v26, 0.0 }
 0x182   : > { %v302_v32 = vmul.f32 0.5, %v295_v30  ;;  %v315_v33 = vmul.f32 %v311_v31, %v311_v31  ;;  %v309_v35 = vsel %vm287_vm2, %v305_v27, 0.0 }
 0x183   : > { %v308_v34 = vsub.f32 %v484_v11, %v304_v29  ;;  %v313_v39 = vmul.f32 %v309_v35, %v309_v35 }
 0x184   : > { %v306_v36 = vsub.f32 %v273_v13, %v302_v32  ;;  %321 = vadd.xlane.f32.xlu0 %v315_v33  ;;  %v353_v44 = vpop.permute.xlu1 %352 }
 0x185   : > { %v312_v37 = vsel %vm287_vm2, %v308_v34, 0.0 }
 0x186   : > { %v316_v38 = vmul.f32 %v312_v37, %v312_v37  ;;  %v310_v40 = vsel %vm287_vm2, %v306_v36, 0.0 }
 0x187   : > { %v314_v41 = vmul.f32 %v310_v40, %v310_v40 }
 0x188   : > { %323 = vadd.xlane.f32.xlu1 %v316_v38  ;;  %317 = vadd.xlane.f32.xlu0 %v313_v39  ;;  %v358_v45 = vpop.permute.xlu1 %357 }
 0x18c   : > { %319 = vadd.xlane.f32.xlu1 %v314_v41  ;;  %v363_v46 = vpop.permute.xlu1 %362 }
 0x190   : > { %v376_v47 = vpop.permute.xlu1 %375 }
 0x194   : > { %v381_v48 = vpop.permute.xlu1 %380 }
 0x198   : > { %v386_v49 = vpop.permute.xlu1 %385 }
 0x19d   : > { %390 = vperm.xlu1 %497, %v372_v42  }
 0x19e   : > { %347 = vperm.xlu0 %496, %v341_v43  }
 0x211   : > { %v322_v50 = vpop.xlane.xlu0 %321 }
 0x212   : > { %v327_v51 = vmul.f32 0.5, %v322_v50 }
 0x214   : > { %v331_v52 = vadd.f32 1e-05, %v327_v51 }
 0x215   : > { %v324_v53 = vpop.xlane.xlu1 %323  ;;  %v318_v54 = vpop.xlane.xlu0 %317 }
 0x216   : > { %502 = vrsqrt.f32 %v331_v52  ;;  %v328_v55 = vmul.f32 0.5, %v324_v53  ;;  %v325_v56 = vmul.f32 0.5, %v318_v54 }
 0x218   : > { %v332_v57 = vadd.f32 1e-05, %v328_v55  ;;  %v329_v58 = vadd.f32 1e-05, %v325_v56 }
 0x219   : > { %v320_v59 = vpop.xlane.xlu1 %319 }
 0x21a   : > { %504 = vrsqrt.f32 %v332_v57  ;;  %v326_v60 = vmul.f32 0.5, %v320_v59 }
 0x21b   : > { %506 = vrsqrt.f32 %v329_v58 }
 0x21c   : > { %v330_v61 = vadd.f32 1e-05, %v326_v60 }
 0x21d   : > { %v348_v5 = vpop.permute.xlu0 %347  ;;  %v391_v9 = vpop.permute.xlu1 %390 }
 0x21e   : > { %508 = vrsqrt.f32 %v330_v61 }
 0x220   : > { %v503_v62 = vpop.eup %502 }
 0x221   : > { %v339_v63 = vmul.f32 %v503_v62, %v307_v26 }
 0x223   : > { %v367_v0 = vmul.f32 %v358_v45, %v339_v63 }
 0x224   : > { %v505_v1 = vpop.eup %504 }
 0x225   : > { %v507_v2 = vpop.eup %506  ;;  %v340_v3 = vmul.f32 %v505_v1, %v308_v34  ;;  %v395_v4 = vadd.f32 %v386_v49, %v367_v0 }
 0x226   : > { %v337_v6 = vmul.f32 %v507_v2, %v305_v27 }
 0x227   : > { %v368_v7 = vmul.f32 %v363_v46, %v340_v3  ;;  %399 = vst [vmem:[%s197_s20 + $0x10] sm:$0xff] %v395_v4 }
 0x228   : > { %v509_v8 = vpop.eup %508  ;;  %v365_v10 = vmul.f32 %v348_v5, %v337_v6 }
 0x229   : > { %v338_v11 = vmul.f32 %v509_v8, %v306_v36  ;;  %v396_v12 = vadd.f32 %v391_v9, %v368_v7 }
 0x22a   : > { %v393_v13 = vadd.f32 %v376_v47, %v365_v10 }
 0x22b   : > { %v366_v14 = vmul.f32 %v353_v44, %v338_v11  ;;  %400 = vst [vmem:[%s197_s20 + $0x18] sm:$0xff] %v396_v12 }
 0x22c   : > { %397 = vst [vmem:[%s197_s20] sm:$0xff] %v393_v13 }
 0x22d   : > { %v394_v15 = vadd.f32 %v381_v48, %v366_v14 }
 0x22f   : > { %398 = vst [vmem:[%s197_s20 + $0x8] sm:$0xff] %v394_v15 }
 0x230 PF: > { %s14_s15 = sadd.s32 1, %s516_s15  }
 0x231   : > { %p11_p4 = scmp.ge.s32.totalorder %s14_s15, 5  }
 0x233   :  { %13 = sbr.rel (!%p11_p4) target bundleno = 1 (0x1), region = 66 }

// kernel: forward.25
= control target key start
LH: loop header
LB: loop body
LE: loop exit
PB: predicated region body
PF: predicated region fallthrough
CT: control target
= control target key end

     0   :  { %s1487_s18 = smov 0   ;;  %s1660_s0 = inlined_call_operand.vmem [shape: bf16[3,864,128], index: 0, kind: input, shape index: {}]   ;;  %s1661_s1 = inlined_call_operand.vmem [shape: bf16[32,864], index: 1, kind: input, shape index: {}]   ;;  %s1662_s2 = inlined_call_operand.vmem [shape: f32[32,1], index: 2, kind: input, shape index: {}]   ;;  %s1663_s3 = inlined_call_operand.vmem [shape: f32[32,1], index: 3, kind: input, shape index: {}]   ;;  %s1664_s4 = inlined_call_operand.vmem [shape: f32[3,32,128], index: 4, kind: input, shape index: {}]   ;;  %s1665_s5 = inlined_call_operand.vmem [shape: f32[3,32,128], index: 5, kind: output, shape index: {}]  }
   0x1 LB: > { %s1162_s19 = sadd.s32 4294967295, %s1454_s18   ;;  %p1166_p0 = scmp.ge.s32.totalorder %s1454_s18, 1  ;;  %s1454_s18 = sphi %s1487_s18, %s15_s18  }
   0x2   : > { %p197_p1 = scmp.lt.s32.totalorder %s1454_s18, 4 }
   0x4   : > { %p198_p2 = pnand %p1166_p0, %p197_p1 }
   0x5   : > { %p230_p3 = scmp.lt.s32.totalorder (!%p198_p2), %s1162_s19, 2  ;;  %v1400_v0 = vld [vmem:[%s1661_s1 + $0x4] ss:$28 sps:$4 sm:$0xff] (!%p198_p2)   ;;  %v1403_v1 = vld [vmem:[%s1661_s1 + $0xc] ss:$28 sps:$4 sm:$0xff] (!%p198_p2)   ;;  %vm764_vm0 = vcmask (!%p198_p2), 785408  }
   0x6   : > { %201 = sbr.rel (%p198_p2) target bundleno = 697 (0x2b9), region = 40  ;;  %803 = vmatprep.mubr.bf16.mxu0 (!%p198_p2), %v1400_v0  ;;  %852 = vmatprep.mubr.bf16.mxu1 (!%p198_p2), %v1403_v1  ;;  %v1398_v32 = vld [vmem:[%s1661_s1] ss:$28 sps:$4 sm:$0xff] (!%p198_p2)   ;;  %v1401_v34 = vld [vmem:[%s1661_s1 + $0x8] ss:$28 sps:$4 sm:$0xff] (!%p198_p2)  }
   0x7   : > { %v1417_v36 = vld [vmem:[%s1661_s1 + $0x3c] ss:$28 sps:$4 sm:$0xff] (!%p198_p2)   ;;  %v1419_v38 = vld [vmem:[%s1661_s1 + $0x44] ss:$28 sps:$4 sm:$0xff] (!%p198_p2)   ;;  %v1434_v49 = vld [vmem:[%s1661_s1 + $0x14] ss:$28 sps:$4 sm:$0xff] (!%p198_p2)  }
   0x8   : > { %v1422_v43 = vld [vmem:[%s1661_s1 + $0x38] ss:$28 sps:$4 sm:$0xff] (!%p198_p2)   ;;  %v1423_v45 = vld [vmem:[%s1661_s1 + $0x40] ss:$28 sps:$4 sm:$0xff] (!%p198_p2)   ;;  %v1436_v0 = vld [vmem:[%s1661_s1 + $0x50] ss:$28 sps:$4 sm:$0xff] (!%p198_p2)  }
   0x9   : > { %v1435_v60 = vld [vmem:[%s1661_s1 + $0x18] ss:$28 sps:$4 sm:$0xff] (!%p198_p2)   ;;  %v1432_v1 = vld [vmem:[%s1661_s1 + $0x10] ss:$28 sps:$4 sm:$0xff] (!%p198_p2)  }
   0xd   : > { %s1667_s19 = smov (!%p230_p3, %s1162_s19), 2 }
   0xe   : > { %s1354_s24 = smul.u32 432, %s1667_s19  ;;  %s1244_s22 = sshll.u32 %s1667_s19, 5 }
   0xf   : > { %s1648_s25 = scalar_lea.vmem %s1664_s4, %s1244_s22 }
  0x10   : > { %s1507_s27 = scalar_lea.vmem %s1660_s0, %s1354_s24 }
  0x11   : > { %v1366_v2 = vld [vmem:[%s1507_s27 + $0x40] sm:$0xff]   ;;  %v1370_v6 = vld [vmem:[%s1507_s27 + $0x48] sm:$0xff]   ;;  %v1374_v10 = vld [vmem:[%s1507_s27 + $0x50] sm:$0xff]  }
  0x12   : > { %v1367_v3 = vld [vmem:[%s1507_s27 + $0xc0] sm:$0xff]   ;;  %1246 = vmatprep.subr.bf16.mxu0 %v1366_v2  ;;  %v1371_v7 = vld [vmem:[%s1507_s27 + $0xc8] sm:$0xff]   ;;  %v1375_v11 = vld [vmem:[%s1507_s27 + $0xd0] sm:$0xff]  }
  0x13   : > { %v1368_v4 = vld [vmem:[%s1507_s27] sm:$0xff]   ;;  %1274 = vmatprep.subr.bf16.mxu1 %v1367_v3  ;;  %v1372_v8 = vld [vmem:[%s1507_s27 + $0x8] sm:$0xff]   ;;  %v1376_v12 = vld [vmem:[%s1507_s27 + $0x10] sm:$0xff]  }
  0x14   : > { %v1369_v5 = vld [vmem:[%s1507_s27 + $0x80] sm:$0xff]   ;;  %1247 = vmatpush3.bf16.msra.mxu0 %v1368_v4  ;;  %v1373_v9 = vld [vmem:[%s1507_s27 + $0x88] sm:$0xff]   ;;  %v1377_v13 = vld [vmem:[%s1507_s27 + $0x90] sm:$0xff]  }
  0x15   : > { %1275 = vmatpush3.bf16.msra.mxu1 %v1369_v5  ;;  %1248 = vmatprep.subr.bf16.mxu0 %v1370_v6  ;;  %v1378_v14 = vld [vmem:[%s1507_s27 + $0x58] sm:$0xff]   ;;  %v1382_v18 = vld [vmem:[%s1507_s27 + $0x60] sm:$0xff]   ;;  %v1386_v22 = vld [vmem:[%s1507_s27 + $0x68] sm:$0xff]  }
  0x16   : > { %1276 = vmatprep.subr.bf16.mxu1 %v1371_v7  ;;  %v1379_v15 = vld [vmem:[%s1507_s27 + $0xd8] sm:$0xff]   ;;  %v1383_v19 = vld [vmem:[%s1507_s27 + $0xe0] sm:$0xff]   ;;  %v1387_v23 = vld [vmem:[%s1507_s27 + $0xe8] sm:$0xff]  }
  0x17   : > { %v1380_v16 = vld [vmem:[%s1507_s27 + $0x18] sm:$0xff]   ;;  %v1384_v20 = vld [vmem:[%s1507_s27 + $0x20] sm:$0xff]   ;;  %v1388_v24 = vld [vmem:[%s1507_s27 + $0x28] sm:$0xff]  }
  0x18   : > { %1249 = vmatpush3.bf16.msra.mxu0 %v1372_v8  ;;  %v1381_v17 = vld [vmem:[%s1507_s27 + $0x98] sm:$0xff]   ;;  %v1385_v21 = vld [vmem:[%s1507_s27 + $0xa0] sm:$0xff]   ;;  %v1389_v25 = vld [vmem:[%s1507_s27 + $0xa8] sm:$0xff]  }
  0x19   : > { %1277 = vmatpush3.bf16.msra.mxu1 %v1373_v9  ;;  %1250 = vmatprep.subr.bf16.mxu0 %v1374_v10  ;;  %v1390_v26 = vld [vmem:[%s1507_s27 + $0x70] sm:$0xff]   ;;  %v1394_v30 = vld [vmem:[%s1507_s27 + $0x78] sm:$0xff]   ;;  %v1404_v37 = vld [vmem:[%s1507_s27 + $0x140] sm:$0xff]  }
  0x1a   : > { %1278 = vmatprep.subr.bf16.mxu1 %v1375_v11  ;;  %v1391_v27 = vld [vmem:[%s1507_s27 + $0xf0] sm:$0xff]   ;;  %v1395_v31 = vld [vmem:[%s1507_s27 + $0xf8] sm:$0xff]   ;;  %v1405_v39 = vld [vmem:[%s1507_s27 + $0x100] sm:$0xff]  }
  0x1b   : > { %v1392_v28 = vld [vmem:[%s1507_s27 + $0x30] sm:$0xff]   ;;  %v1396_v33 = vld [vmem:[%s1507_s27 + $0x38] sm:$0xff]   ;;  %v1406_v40 = vld [vmem:[%s1507_s27 + $0x148] sm:$0xff]  }
  0x1c   : > { %1251 = vmatpush3.bf16.msra.mxu0 %v1376_v12  ;;  %v1393_v29 = vld [vmem:[%s1507_s27 + $0xb0] sm:$0xff]   ;;  %v1397_v35 = vld [vmem:[%s1507_s27 + $0xb8] sm:$0xff]   ;;  %v1407_v41 = vld [vmem:[%s1507_s27 + $0x108] sm:$0xff]  }
  0x1d   : > { %1279 = vmatpush3.bf16.msra.mxu1 %v1377_v13  ;;  %1252 = vmatprep.subr.bf16.mxu0 %v1378_v14  ;;  %v1408_v42 = vld [vmem:[%s1507_s27 + $0x150] sm:$0xff]   ;;  %v1410_v44 = vld [vmem:[%s1507_s27 + $0x180] sm:$0xff]   ;;  %v1411_v47 = vld [vmem:[%s1507_s27 + $0x158] sm:$0xff]  }
  0x1e   : > { %1280 = vmatprep.subr.bf16.mxu1 %v1379_v15  ;;  %v1409_v46 = vld [vmem:[%s1507_s27 + $0x110] sm:$0xff]   ;;  %v1413_v48 = vld [vmem:[%s1507_s27 + $0x188] sm:$0xff]   ;;  %v1412_v50 = vld [vmem:[%s1507_s27 + $0x118] sm:$0xff]  }
  0x1f   : > { %v1416_v51 = vld [vmem:[%s1507_s27 + $0x190] sm:$0xff]   ;;  %v1414_v52 = vld [vmem:[%s1507_s27 + $0x160] sm:$0xff]   ;;  %v1425_v53 = vld [vmem:[%s1507_s27 + $0x198] sm:$0xff]  }
  0x20   : > { %1253 = vmatpush3.bf16.msra.mxu0 %v1380_v16  ;;  %v1415_v54 = vld [vmem:[%s1507_s27 + $0x120] sm:$0xff]   ;;  %v1421_v55 = vld [vmem:[%s1507_s27 + $0x168] sm:$0xff]   ;;  %v1426_v58 = vld [vmem:[%s1507_s27 + $0x170] sm:$0xff]  }
  0x21   : > { %1281 = vmatpush3.bf16.msra.mxu1 %v1381_v17  ;;  %1254 = vmatprep.subr.bf16.mxu0 %v1382_v18  ;;  %v1428_v56 = vld [vmem:[%s1507_s27 + $0x1a0] sm:$0xff]   ;;  %v1424_v57 = vld [vmem:[%s1507_s27 + $0x128] sm:$0xff]   ;;  %v1427_v61 = vld [vmem:[%s1507_s27 + $0x130] sm:$0xff]  }
  0x22   : > { %1282 = vmatprep.subr.bf16.mxu1 %v1383_v19  ;;  %v1431_v59 = vld [vmem:[%s1507_s27 + $0x1a8] sm:$0xff]   ;;  %v1429_v62 = vld [vmem:[%s1507_s27 + $0x178] sm:$0xff]  }
  0x23   : > { %v1430_v63 = vld [vmem:[%s1507_s27 + $0x138] sm:$0xff]   ;;  %v1437_v2 = vld [vmem:[%s1661_s1 + $0x4c] ss:$28 sps:$4 sm:$0xff]   ;;  %s244_s27 = scalar_lea.vmem %s1665_s5, %s1244_s22 }
  0x24   : > { %1255 = vmatpush3.bf16.msra.mxu0 %v1384_v20  ;;  %v1439_v3 = vld [vmem:[%s1661_s1 + $0x48] ss:$28 sps:$4 sm:$0xff]  }
  0x25   : > { %1283 = vmatpush3.bf16.msra.mxu1 %v1385_v21  ;;  %1256 = vmatprep.subr.bf16.mxu0 %v1386_v22 }
  0x26   : > { %1284 = vmatprep.subr.bf16.mxu1 %v1387_v23 }
  0x28   : > { %1257 = vmatpush3.bf16.msra.mxu0 %v1388_v24 }
  0x29   : > { %1285 = vmatpush3.bf16.msra.mxu1 %v1389_v25  ;;  %1258 = vmatprep.subr.bf16.mxu0 %v1390_v26 }
  0x2a   : > { %1286 = vmatprep.subr.bf16.mxu1 %v1391_v27 }
  0x2c   : > { %1259 = vmatpush3.bf16.msra.mxu0 %v1392_v28 }
  0x2d   : > { %1287 = vmatpush3.bf16.msra.mxu1 %v1393_v29  ;;  %1260 = vmatprep.subr.bf16.mxu0 %v1394_v30 }
  0x2e   : > { %1288 = vmatprep.subr.bf16.mxu1 %v1395_v31 }
  0x30   : > { %1261 = vmatpush3.bf16.msra.mxu0 %v1396_v33  ;;  %v967_v33 = vlaneseq }
  0x31   : > { %1289 = vmatpush3.bf16.msra.mxu1 %v1397_v35  ;;  %1302 = vmatprep.subr.bf16.mxu0 %v1404_v37 }
  0x32   : > { %1338 = vmatprep.subr.bf16.mxu1 %v1410_v44 }
  0x33   : > { %804 = vmatmul.mubr.bf16.vlgmr.msra.gmra.mrb[0].mxu0 %v1398_v32 }
  0x34   : > { %853 = vmatmul.mubr.bf16.vlgmr.msra.gmra.mrb[0].mxu1 %v1401_v34  ;;  %1303 = vmatpush3.bf16.msra.mxu0 %v1405_v39  ;;  %v1601_v39 = vand.u32 127, %v967_v33 }
  0x35   : > { %1304 = vmatprep.subr.bf16.mxu0 %v1406_v40  ;;  %811 = vmatprep.mubr.bf16.mxu0 %v1417_v36 }
  0x36   : > { %860 = vmatprep.mubr.bf16.mxu1 %v1419_v38  ;;  %1339 = vmatpush3.bf16.msra.mxu1 %v1410_v44  ;;  %vm969_vm1 = vcmp.lt.s32.totalorder %v1601_v39, 2 }
  0x37   : > { %1340 = vmatprep.subr.bf16.mxu1 %v1413_v48 }
  0x38   : > { %1305 = vmatpush3.bf16.msra.mxu0 %v1407_v41 }
  0x39   : > { %1306 = vmatprep.subr.bf16.mxu0 %v1408_v42 }
  0x3a   : > { %1341 = vmatpush3.bf16.msra.mxu1 %v1413_v48 }
  0x3b   : > { %812 = vmatmul.mubr.bf16.gmra.mrb[4].mxu0 %v1422_v43  ;;  %1342 = vmatprep.subr.bf16.mxu1 %v1416_v51 }
  0x3c   : > { %1307 = vmatpush3.bf16.msra.mxu0 %v1409_v46  ;;  %861 = vmatmul.mubr.bf16.gmra.mrb[4].mxu1 %v1423_v45 }
  0x3d   : > { %1308 = vmatprep.subr.bf16.mxu0 %v1411_v47  ;;  %901 = vmatprep.mubr.bf16.mxu0 %v1434_v49 }
  0x3e   : > { %1343 = vmatpush3.bf16.msra.mxu1 %v1416_v51  ;;  %1350 = vmatprep.mubr.msk.bf16.mxu1 %vm764_vm0, %v1435_v60 }
  0x3f   : > { %1344 = vmatprep.subr.bf16.mxu1 %v1425_v53 }
  0x40   : > { %1309 = vmatpush3.bf16.msra.mxu0 %v1412_v50 }
  0x41   : > { %1310 = vmatprep.subr.bf16.mxu0 %v1414_v52 }
  0x42   : > { %1345 = vmatpush3.bf16.msra.mxu1 %v1425_v53 }
  0x43   : > { %1346 = vmatprep.subr.bf16.mxu1 %v1428_v56 }
  0x44   : > { %1311 = vmatpush3.bf16.msra.mxu0 %v1415_v54 }
  0x45   : > { %1312 = vmatprep.subr.bf16.mxu0 %v1421_v55 }
  0x46   : > { %1347 = vmatpush3.bf16.msra.mxu1 %v1428_v56 }
  0x47   : > { %1348 = vmatprep.subr.bf16.mxu1 %v1431_v59 }
  0x48   : > { %1313 = vmatpush3.bf16.msra.mxu0 %v1424_v57 }
  0x49   : > { %1314 = vmatprep.subr.bf16.mxu0 %v1426_v58 }
  0x4a   : > { %1349 = vmatpush3.bf16.msra.mxu1 %v1431_v59 }
  0x4c   : > { %1315 = vmatpush3.bf16.msra.mxu0 %v1427_v61 }
  0x4d   : > { %1316 = vmatprep.subr.bf16.mxu0 %v1429_v62  ;;  %1351 = vmatmul.mubr.msk.bf16.vlgmr.msra.gmra.mrb[8].mxu1 %vm764_vm0, %v1436_v0  ;;  %v1456_v62 = vmov 0  }
  0x4e   : > { %1365 = vset.pattern.permute.xlu1 %v1456_v62  ;;  %1364 = vset.pattern.permute.xlu0 %v1456_v62 }
  0x50   : > { %1317 = vmatpush3.bf16.msra.mxu0 %v1430_v63 }
  0x53   : > { %902 = vmatmul.mubr.bf16.vlgmr.msra.gmra.mrb[8].mxu0 %v1432_v1 }
  0x54   : > { %909 = vmatprep.mubr.bf16.mxu0 %v1437_v2 }
  0x5b   : > { %910 = vmatmul.mubr.bf16.gmra.mrb[12].mxu0 %v1439_v3 }
 0x106   : > { %v1262_v4 = vpop.f32.mrb[0].mxu0 }
 0x107   : > { %v1290_v5 = vpop.f32.mrb[0].mxu1  ;;  %v1263_v6 = vpop.f32.mrb[1].mxu0 }
 0x108   : > { %v1264_v7 = vadd.f32 %v1263_v6, %v1262_v4  ;;  %v1291_v8 = vpop.f32.mrb[1].mxu1  ;;  %v1265_v9 = vpop.f32.mrb[2].mxu0 }
 0x109   : > { %v1292_v10 = vadd.f32 %v1291_v8, %v1290_v5  ;;  %v1293_v11 = vpop.f32.mrb[2].mxu1  ;;  %v1266_v12 = vpop.f32.mrb[3].mxu0 }
 0x10a   : > { %v1267_v13 = vadd.f32 %v1266_v12, %v1265_v9  ;;  %v1294_v14 = vpop.f32.mrb[3].mxu1 }
 0x10b   : > { %v855_v15 = vadd.f32 %v1292_v10, %v1264_v7  ;;  %v1295_v16 = vadd.f32 %v1294_v14, %v1293_v11  ;;  %v1024_v14 = vld [vmem:[%s1662_s2 + $0x8] sm:$0xff] }
 0x10d   : > { %v858_v17 = vadd.f32 %v1295_v16, %v1267_v13  ;;  %v1026_v16 = vld [vmem:[%s1662_s2 + $0x18] sm:$0xff] }
 0x10e   : > { %v1268_v18 = vpop.f32.mrb[4].mxu0 }
 0x10f   : > { %v1296_v19 = vpop.f32.mrb[4].mxu1  ;;  %v1269_v20 = vpop.f32.mrb[5].mxu0 }
 0x110   : > { %v1270_v21 = vadd.f32 %v1269_v20, %v1268_v18  ;;  %v1297_v22 = vpop.f32.mrb[5].mxu1  ;;  %v1271_v23 = vpop.f32.mrb[6].mxu0  ;;  %v1051_v18 = vld [vmem:[%s1663_s3] sm:$0xff]  ;;  %v1053_v20 = vld [vmem:[%s1663_s3 + $0x10] sm:$0xff] }
 0x111   : > { %v1298_v24 = vadd.f32 %v1297_v22, %v1296_v19  ;;  %v1299_v25 = vpop.f32.mrb[6].mxu1  ;;  %v1272_v26 = vpop.f32.mrb[7].mxu0  ;;  %v1052_v19 = vld [vmem:[%s1663_s3 + $0x8] sm:$0xff] }
 0x112   : > { %v1273_v27 = vadd.f32 %v1272_v26, %v1271_v23  ;;  %v1300_v28 = vpop.f32.mrb[7].mxu1  ;;  %v1054_v26 = vld [vmem:[%s1663_s3 + $0x18] sm:$0xff] }
 0x113   : > { %v863_v29 = vadd.f32 %v1298_v24, %v1270_v21  ;;  %v1301_v30 = vadd.f32 %v1300_v28, %v1299_v25 }
 0x115   : > { %v866_v31 = vadd.f32 %v1301_v30, %v1273_v27 }
 0x120   : > { %v1352_v32 = vpop.f32.mrb[8].mxu1 }
 0x121   : > { %v952_v34 = vpop.f32.mrb[9].mxu1 }
 0x122   : > { %v1353_v35 = vpop.f32.mrb[10].mxu1 }
 0x123   : > { %v955_v37 = vpop.f32.mrb[11].mxu1 }
 0x126   : > { %v1318_v36 = vpop.f32.mrb[8].mxu0 }
 0x127   : > { %v1319_v38 = vpop.f32.mrb[9].mxu0 }
 0x128   : > { %v1320_v40 = vadd.f32 %v1319_v38, %v1318_v36  ;;  %v1321_v41 = vpop.f32.mrb[10].mxu0 }
 0x129   : > { %v1322_v42 = vpop.f32.mrb[11].mxu0 }
 0x12a   : > { %v904_v43 = vadd.f32 %v1320_v40, %v855_v15  ;;  %v1323_v44 = vadd.f32 %v1322_v42, %v1321_v41  ;;  %v1025_v15 = vld [vmem:[%s1662_s2 + $0x10] sm:$0xff] }
 0x12c   : > { %v953_v45 = vadd.f32 %v952_v34, %v904_v43  ;;  %v907_v46 = vadd.f32 %v1323_v44, %v858_v17  ;;  %v1023_v17 = vld [vmem:[%s1662_s2] sm:$0xff] }
 0x12e   : > { %v956_v47 = vadd.f32 %v955_v37, %v907_v46  ;;  %v1324_v48 = vpop.f32.mrb[12].mxu0  ;;  %v970_v49 = vsel %vm969_vm1, %v953_v45, 0.0 }
 0x12f   : > { %v1325_v50 = vpop.f32.mrb[13].mxu0  ;;  %974 = vadd.xlane.f32.xlu0 %v970_v49 }
 0x130   : > { %v1326_v51 = vadd.f32 %v1325_v50, %v1324_v48  ;;  %v1327_v52 = vpop.f32.mrb[14].mxu0  ;;  %v971_v56 = vsel %vm969_vm1, %v956_v47, 0.0 }
 0x131   : > { %v1328_v53 = vpop.f32.mrb[15].mxu0 }
 0x132   : > { %v912_v54 = vadd.f32 %v1326_v51, %v863_v29  ;;  %v1329_v55 = vadd.f32 %v1328_v53, %v1327_v52  ;;  %v1080_v52 = vld [vmem:[%s1648_s25 + $0x8] sm:$0xff] }
 0x133   : > { %976 = vadd.xlane.f32.xlu0 %v971_v56 }
 0x134   : > { %v915_v57 = vadd.f32 %v1329_v55, %v866_v31  ;;  %v961_v58 = vadd.f32 %v1352_v32, %v912_v54 }
 0x136   : > { %v972_v59 = vsel %vm969_vm1, %v961_v58, 0.0  ;;  %v964_v60 = vadd.f32 %v1353_v35, %v915_v57 }
 0x137   : > { %978 = vadd.xlane.f32.xlu1 %v972_v59 }
 0x138   : > { %v973_v61 = vsel %vm969_vm1, %v964_v60, 0.0 }
 0x13b   : > { %980 = vadd.xlane.f32.xlu1 %v973_v61 }
 0x1bc   : > { %v975_v63 = vpop.xlane.xlu0 %974 }
 0x1bd   : > { %v983_v0 = vmul.f32 0.5, %v975_v63 }
 0x1bf   : > { %v987_v1 = vsub.f32 %v953_v45, %v983_v0  ;;  %v1079_v45 = vld [vmem:[%s1648_s25] sm:$0xff] }
 0x1c0   : > { %v977_v2 = vpop.xlane.xlu0 %976 }
 0x1c1   : > { %v984_v3 = vmul.f32 0.5, %v977_v2  ;;  %v991_v4 = vsel %vm969_vm1, %v987_v1, 0.0 }
 0x1c2   : > { %v995_v5 = vmul.f32 %v991_v4, %v991_v4 }
 0x1c3   : > { %v988_v6 = vsub.f32 %v956_v47, %v984_v3 }
 0x1c4   : > { %v979_v7 = vpop.xlane.xlu1 %978  ;;  %999 = vadd.xlane.f32.xlu0 %v995_v5 }
 0x1c5   : > { %v985_v8 = vmul.f32 0.5, %v979_v7  ;;  %v992_v9 = vsel %vm969_vm1, %v988_v6, 0.0 }
 0x1c6   : > { %v996_v10 = vmul.f32 %v992_v9, %v992_v9 }
 0x1c7   : > { %v989_v11 = vsub.f32 %v961_v58, %v985_v8  ;;  %v1081_v58 = vld [vmem:[%s1648_s25 + $0x10] sm:$0xff] }
 0x1c8   : > { %1001 = vadd.xlane.f32.xlu1 %v996_v10  ;;  %v981_v21 = vpop.xlane.xlu1 %980 }
 0x1c9   : > { %v993_v12 = vsel %vm969_vm1, %v989_v11, 0.0  ;;  %v986_v22 = vmul.f32 0.5, %v981_v21 }
 0x1ca   : > { %v997_v13 = vmul.f32 %v993_v12, %v993_v12 }
 0x1cb   : > { %v990_v23 = vsub.f32 %v964_v60, %v986_v22 }
 0x1cc   : > { %1003 = vadd.xlane.f32.xlu0 %v997_v13 }
 0x1cd   : > { %v994_v24 = vsel %vm969_vm1, %v990_v23, 0.0 }
 0x1ce   : > { %v998_v25 = vmul.f32 %v994_v24, %v994_v24 }
 0x1d9   : > { %1034 = vperm.xlu1 %1365, %v1024_v14  }
 0x1dd   : > { %1039 = vperm.xlu1 %1365, %v1025_v15  }
 0x1e1   : > { %1044 = vperm.xlu1 %1365, %v1026_v16  }
 0x1e2   : > { %1029 = vperm.xlu0 %1364, %v1023_v17  }
 0x1e5   : > { %1057 = vperm.xlu1 %1365, %v1051_v18  }
 0x1e9   : > { %1062 = vperm.xlu1 %1365, %v1052_v19  }
 0x1ed   : > { %1067 = vperm.xlu1 %1365, %v1053_v20  }
 0x211   : > { %1005 = vadd.xlane.f32.xlu1 %v998_v25 }
 0x222   : > { %1072 = vperm.xlu1 %1365, %v1054_v26  }
 0x251   : > { %v1000_v27 = vpop.xlane.xlu0 %999 }
 0x252   : > { %v1007_v28 = vmul.f32 0.5, %v1000_v27 }
 0x254   : > { %v1011_v29 = vadd.f32 1e-05, %v1007_v28 }
 0x255   : > { %v1002_v30 = vpop.xlane.xlu1 %1001 }
 0x256   : > { %1440 = vrsqrt.f32 %v1011_v29  ;;  %v1008_v31 = vmul.f32 0.5, %v1002_v30 }
 0x258   : > { %v1012_v32 = vadd.f32 1e-05, %v1008_v31 }
 0x259   : > { %v1035_v33 = vpop.permute.xlu1 %1034  ;;  %v1004_v34 = vpop.xlane.xlu0 %1003 }
 0x25a   : > { %1442 = vrsqrt.f32 %v1012_v32  ;;  %v1009_v35 = vmul.f32 0.5, %v1004_v34 }
 0x25c   : > { %v1013_v36 = vadd.f32 1e-05, %v1009_v35 }
 0x25d   : > { %v1040_v37 = vpop.permute.xlu1 %1039 }
 0x25e   : > { %1444 = vrsqrt.f32 %v1013_v36 }
 0x260   : > { %v1441_v38 = vpop.eup %1440 }
 0x261   : > { %v1045_v39 = vpop.permute.xlu1 %1044  ;;  %v1019_v40 = vmul.f32 %v1441_v38, %v987_v1  ;;  %v1030_v41 = vpop.permute.xlu0 %1029 }
 0x263   : > { %v1047_v42 = vmul.f32 %v1030_v41, %v1019_v40 }
 0x264   : > { %v1443_v43 = vpop.eup %1442 }
 0x265   : > { %v1020_v44 = vmul.f32 %v1443_v43, %v988_v6  ;;  %v1058_v46 = vpop.permute.xlu1 %1057  ;;  %v1082_v6 = vld [vmem:[%s1648_s25 + $0x18] sm:$0xff] }
 0x266   : > { %v1075_v47 = vadd.f32 %v1058_v46, %v1047_v42 }
 0x267   : > { %v1048_v48 = vmul.f32 %v1035_v33, %v1020_v44 }
 0x268   : > { %v1445_v49 = vpop.eup %1444  ;;  %v1083_v50 = vadd.f32 %v1079_v45, %v1075_v47 }
 0x269   : > { %v1021_v51 = vmul.f32 %v1445_v49, %v989_v11  ;;  %v1063_v53 = vpop.permute.xlu1 %1062 }
 0x26a   : > { %v1087_v54 = vmax.f32 %v1083_v50, 0.0  ;;  %v1076_v55 = vadd.f32 %v1063_v53, %v1048_v48 }
 0x26b   : > { %v1049_v56 = vmul.f32 %v1040_v37, %v1021_v51 }
 0x26c   : > { %1091 = vst [vmem:[%s244_s27] sm:$0xff] %v1087_v54  ;;  %v1084_v57 = vadd.f32 %v1080_v52, %v1076_v55 }
 0x26d   : > { %v1068_v59 = vpop.permute.xlu1 %1067 }
 0x26e   : > { %v1088_v60 = vmax.f32 %v1084_v57, 0.0  ;;  %v1077_v61 = vadd.f32 %v1068_v59, %v1049_v56 }
 0x270   : > { %1092 = vst [vmem:[%s244_s27 + $0x8] sm:$0xff] %v1088_v60  ;;  %v1085_v62 = vadd.f32 %v1081_v58, %v1077_v61 }
 0x272   : > { %v1089_v63 = vmax.f32 %v1085_v62, 0.0 }
 0x274   : > { %1093 = vst [vmem:[%s244_s27 + $0x10] sm:$0xff] %v1089_v63 }
 0x29e   : > { %v1006_v0 = vpop.xlane.xlu1 %1005 }
 0x29f   : > { %v1010_v1 = vmul.f32 0.5, %v1006_v0 }
 0x2a1   : > { %v1014_v2 = vadd.f32 1e-05, %v1010_v1 }
 0x2a2   : > { %v1073_v7 = vpop.permute.xlu1 %1072 }
 0x2a3   : > { %1446 = vrsqrt.f32 %v1014_v2 }
 0x2ad   : > { %v1447_v3 = vpop.eup %1446 }
 0x2ae   : > { %v1022_v4 = vmul.f32 %v1447_v3, %v990_v23 }
 0x2b0   : > { %v1050_v5 = vmul.f32 %v1045_v39, %v1022_v4 }
 0x2b2   : > { %v1078_v8 = vadd.f32 %v1073_v7, %v1050_v5 }
 0x2b4   : > { %v1086_v9 = vadd.f32 %v1082_v6, %v1078_v8 }
 0x2b6   : > { %v1090_v10 = vmax.f32 %v1086_v9, 0.0 }
 0x2b8   : > { %1094 = vst [vmem:[%s244_s27 + $0x18] sm:$0xff] %v1090_v10 }
 0x2b9 PF: > { %s15_s18 = sadd.s32 1, %s1454_s18  }
 0x2ba   : > { %p12_p4 = scmp.ge.s32.totalorder %s15_s18, 5  }
 0x2bc   :  { %14 = sbr.rel (!%p12_p4) target bundleno = 1 (0x1), region = 73 }

// kernel: forward.26
= control target key start
LH: loop header
LB: loop body
LE: loop exit
PB: predicated region body
PF: predicated region fallthrough
CT: control target
= control target key end

     0   :  { %v2374_v0 = vmov 0.0|0.0   ;;  %vm117_vm0 = vcmask 1042432   ;;  %vm2375_vm1 = vmmov 0   ;;  %v2376_v6 = vmov 0.0   ;;  %s2867_s3 = inlined_call_operand.vmem [shape: f32[27,24], index: 3, kind: input, shape index: {}]   ;;  %s2868_s0 = inlined_call_operand.vmem [shape: f32[54,27], index: 0, kind: input, shape index: {}]   ;;  %s2869_s1 = inlined_call_operand.vmem [shape: f32[16,54], index: 1, kind: input, shape index: {}]   ;;  %s2870_s4 = inlined_call_operand.vmem [shape: f32[1,24], index: 4, kind: input, shape index: {}]   ;;  %s2871_s7 = inlined_call_operand.vmem [shape: f32[24,24], index: 7, kind: input, shape index: {}]   ;;  %s2872_s9 = inlined_call_operand.vmem [shape: f32[24,24], index: 9, kind: input, shape index: {}]   ;;  %s2873_s5 = inlined_call_operand.vmem [shape: f32[16,24], index: 5, kind: input, shape index: {}]   ;;  %s2874_s6 = inlined_call_operand.vmem [shape: f32[1,24], index: 6, kind: input, shape index: {}]   ;;  %s2875_s11 = inlined_call_operand.vmem [shape: f32[24,24], index: 11, kind: input, shape index: {}]   ;;  %s2876_s8 = inlined_call_operand.vmem [shape: f32[1,24], index: 8, kind: input, shape index: {}]   ;;  %s2877_s10 = inlined_call_operand.vmem [shape: f32[1,24], index: 10, kind: input, shape index: {}]   ;;  %s2878_s12 = inlined_call_operand.vmem [shape: f32[1,24], index: 12, kind: input, shape index: {}]   ;;  %s2879_s2 = inlined_call_operand.vmem [shape: f32[16,16], index: 2, kind: input, shape index: {}]   ;;  %s2880_s14 = inlined_call_operand.vmem [shape: f32[24,24], index: 14, kind: input, shape index: {}]   ;;  %s2881_s16 = inlined_call_operand.vmem [shape: f32[24,24], index: 16, kind: input, shape index: {}]   ;;  %s2882_s18 = inlined_call_operand.vmem [shape: f32[24,24], index: 18, kind: input, shape index: {}]   ;;  %s2883_s13 = inlined_call_operand.vmem [shape: f32[1,24], index: 13, kind: input, shape index: {}]   ;;  %s2884_s17 = inlined_call_operand.vmem [shape: f32[1,24], index: 17, kind: input, shape index: {}]   ;;  %s2885_s15 = inlined_call_operand.vmem [shape: f32[1,24], index: 15, kind: input, shape index: {}]   ;;  %s2886_s19 = inlined_call_operand.vmem [shape: f32[1,24], index: 19, kind: input, shape index: {}]   ;;  %s2887_s20 = inlined_call_operand.vmem [shape: f32[8,24,96], index: 20, kind: input, shape index: {}]   ;;  %s2888_s21 = inlined_call_operand.vmem [shape: f32[1,96], index: 21, kind: input, shape index: {}]   ;;  %s2889_s22 = inlined_call_operand.vmem [shape: f32[1,96], index: 22, kind: input, shape index: {}]   ;;  %s2890_s23 = inlined_call_operand.vmem [shape: f32[1,96], index: 23, kind: input, shape index: {}]   ;;  %s2891_s24 = inlined_call_operand.vmem [shape: f32[2,96], index: 24, kind: output, shape index: {}]  }
   0x1   :  { %2899 = sst [smem:[#allocation2_spill]] %s2867_s3  ;;  %2265 = vmatprep.subr.bf16.mxu0 %v2374_v0  ;;  %2073 = vmatprep.mubr.msk.f32.mxu0 %vm2375_vm1, %v2376_v6  ;;  %vm2377_vm2 = vmmov 1   ;;  %vm95_vm4 = vcmask 220160   ;;  %vm225_vm5 = vcmask 441344   ;;  %vm232_vm6 = vcmask 1045504  }
   0x2   :  { %2900 = sst [smem:[#allocation3_spill]] %s2868_s0  ;;  %s2908_s27 = sld [smem:[#allocation2_spill]]  ;;  %vm2270_vm3 = vmpackc.low %vm117_vm0, %vm2377_vm2  ;;  %vm340_vm7 = vcmask 195584   ;;  %v1925_v63 = vld [vmem:[%s2876_s8] ss:$0 sm:$0xff]  ;;  %vm677_vm10 = vcmask 130048  }
   0x3   :  { %2901 = sst [smem:[#allocation4_spill]] %s2869_s1  ;;  %s2909_s25 = sld [smem:[#allocation3_spill]]  ;;  %vm2631_vm8 = vmpackc.low %vm340_vm7, %vm340_vm7  ;;  %vm1867_vm12 = vcmask 779264  }
   0x4   :  { %2902 = sst [smem:[#allocation5_spill]] %s2870_s4 }
   0x5   :  { %2903 = sst [smem:[#allocation6_spill]] %s2871_s7 }
   0x6   :  { %2904 = sst [smem:[#allocation7_spill]] %s2872_s9  ;;  %s2911_s9 = sld [smem:[#allocation5_spill]] }
   0x7   :  { %2905 = sst [smem:[#allocation8_spill]] %s2873_s5  ;;  %s2912_s5 = sld [smem:[#allocation6_spill]] }
   0x8   :  { %2906 = sst [smem:[#allocation9_spill]] %s2874_s6  ;;  %v84_v1 = vld [vmem:[%s2908_s27] sm:$0xff]  ;;  %v85_v2 = vld [vmem:[%s2908_s27 + $0x8] sm:$0xff]  ;;  %v86_v3 = vld [vmem:[%s2908_s27 + $0x10] sm:$0xff]  ;;  %s2914_s26 = sld [smem:[#allocation8_spill]] }
   0x9   :  { %2907 = sst [smem:[#allocation10_spill]] %s2875_s11  ;;  %v2266_v4 = vpack.c.bf16 %v85_v2, %v84_v1  ;;  %v87_v5 = vld [vmem:[%s2908_s27 + $0x18] sm:$0x7]  ;;  %v77_v8 = vld [vmem:[%s2909_s25] sm:$0xff]  ;;  %v78_v9 = vld [vmem:[%s2909_s25 + $0x8] sm:$0xff]  ;;  %s2910_s11 = sld [smem:[#allocation4_spill]] }
   0xa   :  { %v2269_v7 = vpack.c.bf16 %v87_v5, %v86_v3  ;;  %v79_v10 = vld [vmem:[%s2909_s25 + $0x10] sm:$0xff]  ;;  %v80_v11 = vld [vmem:[%s2909_s25 + $0x18] sm:$0xff]  ;;  %v81_v12 = vld [vmem:[%s2909_s25 + $0x20] sm:$0xff]  ;;  %s2915_s29 = sld [smem:[#allocation9_spill]]  ;;  %s2916_s7 = sld [smem:[#allocation10_spill]] }
   0xb   :  { %2267 = vmatpush3.bf16.msra.mxu0 %v2266_v4  ;;  %v82_v13 = vld [vmem:[%s2909_s25 + $0x28] sm:$0xff]  ;;  %v83_v14 = vld [vmem:[%s2909_s25 + $0x30] sm:$0x3f]  ;;  %v1928_v4 = vld [vmem:[%s2877_s10] ss:$0 sm:$0xff] }
   0xc   :  { %2268 = vmatprep.subr.bf16.mxu0 %v2374_v0  ;;  %v1912_v18 = vld [vmem:[%s2911_s9] ss:$0 sm:$0xff] }
   0xd   :  { %v314_v42 = vld [vmem:[%s2912_s5] sm:$0xff]  ;;  %v315_v43 = vld [vmem:[%s2912_s5 + $0x8] sm:$0xff]  ;;  %v316_v45 = vld [vmem:[%s2912_s5 + $0x10] sm:$0xff] }
   0xe   :  { %v2284_v44 = vpack.c.bf16 %v315_v43, %v314_v42  ;;  %v224_v49 = vld [vmem:[%s2914_s26 + $0x8] sm:$0xff]  ;;  %v223_v50 = vld [vmem:[%s2914_s26] sm:$0xff] }
   0xf   :  { %2271 = vmatpush3.bf16.msk.msra.mxu0 %vm2270_vm3, %v2269_v7  ;;  %v221_v15 = vld [vmem:[%s2910_s11] sm:$0xff]  ;;  %v222_v41 = vld [vmem:[%s2910_s11 + $0x8] sm:$0xff]  ;;  %s2913_s11 = sld [smem:[#allocation7_spill]] }
  0x10   :  { %2108 = vmatprep.mubr.msk.f32.mxu1 %vm225_vm5, %v221_v15  ;;  %v1924_v53 = vld [vmem:[%s2915_s29] ss:$0 sm:$0xff]  ;;  %v323_v60 = vld [vmem:[%s2916_s7 + $0x8] sm:$0xff]  ;;  %v324_v62 = vld [vmem:[%s2916_s7 + $0x10] sm:$0xff] }
  0x11   :  { %v322_v59 = vld [vmem:[%s2916_s7] sm:$0xff] }
  0x12   :  { %2074 = vmatmul.mubr.msk.f32.vlgmr.msra.gmra.mrb[0].mxu0 %vm95_vm4, %v77_v8  ;;  %v2292_v61 = vpack.c.bf16 %v323_v60, %v322_v59  ;;  %v1940_v60 = vld [vmem:[%s2883_s13] ss:$0 sm:$0xff] }
  0x13   :  { %2076 = vmatprep.mubr.msk.f32.mxu0 %vm2375_vm1, %v2376_v6 }
  0x15   :  { %v318_v46 = vld [vmem:[%s2913_s11] sm:$0xff]  ;;  %v319_v47 = vld [vmem:[%s2913_s11 + $0x8] sm:$0xff]  ;;  %v320_v58 = vld [vmem:[%s2913_s11 + $0x10] sm:$0xff] }
  0x16   :  { %2077 = vmatmul.mubr.msk.f32.gmra.mrb[2].mxu0 %vm95_vm4, %v78_v9  ;;  %v2288_v48 = vpack.c.bf16 %v319_v47, %v318_v46  ;;  %v783_v46 = vld [vmem:[%s2880_s14 + $0x8] sm:$0xff] }
  0x17   :  { %2079 = vmatprep.mubr.msk.f32.mxu0 %vm2375_vm1, %v2376_v6 }
  0x1a   :  { %2080 = vmatmul.mubr.msk.f32.gmra.mrb[4].mxu0 %vm95_vm4, %v79_v10 }
  0x1b   :  { %2082 = vmatprep.mubr.msk.f32.mxu0 %vm2375_vm1, %v2376_v6 }
  0x1e   :  { %2083 = vmatmul.mubr.msk.f32.gmra.mrb[6].mxu0 %vm95_vm4, %v80_v11 }
  0x1f   :  { %2085 = vmatprep.mubr.msk.f32.mxu0 %vm2375_vm1, %v2376_v6 }
  0x22   :  { %2086 = vmatmul.mubr.msk.f32.gmra.mrb[8].mxu0 %vm95_vm4, %v81_v12  ;;  %v1931_v12 = vld [vmem:[%s2878_s12] ss:$0 sm:$0xff] }
  0x23   :  { %2088 = vmatprep.mubr.msk.f32.mxu0 %vm2375_vm1, %v2376_v6 }
  0x26   :  { %2089 = vmatmul.mubr.msk.f32.gmra.mrb[10].mxu0 %vm95_vm4, %v82_v13 }
  0x27   :  { %2091 = vmatprep.mubr.msk.f32.mxu0 %vm2375_vm1, %v2376_v6 }
  0x2a   :  { %2092 = vmatmul.mubr.msk.f32.gmra.mrb[12].mxu0 %vm95_vm4, %v83_v14 }
  0xe5   :  { %v187_v16 = vpop.f32.mrb[0].mxu0 }
  0xe6   :  { %v2075_v17 = vpop.f32.mrb[1].mxu0  ;;  %v188_v20 = vadd.f32 %v1912_v18, %v187_v16 }
  0xe9   :  { %v192_v19 = vpop.f32.mrb[2].mxu0 }
  0xea   :  { %v193_v21 = vadd.f32 %v1912_v18, %v192_v19  ;;  %v2078_v22 = vpop.f32.mrb[3].mxu0  ;;  %v2646_v19 = vld [vmem:[%s2879_s2] sm:$0xff] }
  0xeb   :  { %vm673_vm9 = vcmp.gt.f32.partialorder %v2646_v19, 0.5 }
  0xec   :  { %v2272_v23 = vpack.c.bf16 %v193_v21, %v188_v20  ;;  %v2651_v21 = vld [vmem:[%s2879_s2 + $0x8] sm:$0xff] }
  0xed   :  { %v197_v24 = vpop.f32.mrb[4].mxu0  ;;  %vm674_vm11 = vcmp.gt.f32.partialorder %v2651_v21, 0.5 }
  0xee   :  { %v2081_v25 = vpop.f32.mrb[5].mxu0  ;;  %2273 = vmatprep.subr.bf16.mxu1 %v2272_v23  ;;  %v198_v27 = vadd.f32 %v1912_v18, %v197_v24 }
  0xef   :  { %2275 = vmatpush3.bf16.msra.mxu1 %v2272_v23 }
  0xf1   :  { %v202_v26 = vpop.f32.mrb[6].mxu0 }
  0xf2   :  { %v203_v28 = vadd.f32 %v1912_v18, %v202_v26  ;;  %v2084_v29 = vpop.f32.mrb[7].mxu0 }
  0xf4   :  { %v2276_v30 = vpack.c.bf16 %v203_v28, %v198_v27 }
  0xf5   :  { %v207_v31 = vpop.f32.mrb[8].mxu0 }
  0xf6   :  { %v2087_v32 = vpop.f32.mrb[9].mxu0  ;;  %2277 = vmatprep.subr.bf16.mxu1 %v2276_v30  ;;  %v208_v34 = vadd.f32 %v1912_v18, %v207_v31 }
  0xf7   :  { %2279 = vmatpush3.bf16.msra.mxu1 %v2276_v30 }
  0xf9   :  { %v212_v33 = vpop.f32.mrb[10].mxu0 }
  0xfa   :  { %v213_v35 = vadd.f32 %v1912_v18, %v212_v33  ;;  %v2090_v36 = vpop.f32.mrb[11].mxu0 }
  0xfc   :  { %v2280_v37 = vpack.c.bf16 %v213_v35, %v208_v34 }
  0xfd   :  { %v217_v38 = vpop.f32.mrb[12].mxu0 }
  0xfe   :  { %v218_v39 = vadd.f32 %v1912_v18, %v217_v38  ;;  %2281 = vmatprep.subr.bf16.mxu1 %v2280_v37  ;;  %v2093_v40 = vpop.f32.mrb[13].mxu0 }
  0xff   :  { %2283 = vmatpush3.bf16.msra.mxu1 %v2280_v37 }
 0x100   :  { %2106 = vmatprep.subr.msk.mxu1 %vm232_vm6, %v218_v39 }
 0x103   :  { %2107 = vmatpush3.msk.msra.mxu1 %vm232_vm6, %v218_v39 }
 0x104   :  { %2109 = vmatmul.mubr.msk.f32.vlgmr.msra.gmra.mrb[0].mxu1 %vm225_vm5, %v222_v41  ;;  %2285 = vmatprep.subr.bf16.mxu1 %v2284_v44 }
 0x105   :  { %2287 = vmatpush3.bf16.msra.mxu1 %v2284_v44 }
 0x106   :  { %2115 = vmatprep.subr.mxu1 %v316_v45 }
 0x109   :  { %2116 = vmatpush3.msra.mxu1 %v316_v45  ;;  %v782_v45 = vld [vmem:[%s2880_s14] sm:$0xff] }
 0x10a   :  { %2289 = vmatprep.subr.bf16.mxu1 %v2288_v48  ;;  %v2306_v47 = vpack.c.bf16 %v783_v46, %v782_v45  ;;  %v1248_v46 = vld [vmem:[%s2887_s20 + $0x18] sm:$0xff] }
 0x1d7   :  { %v2110_v51 = vpop.f32.mrb[0].mxu1 }
 0x1d8   :  { %v308_v52 = vadd.f32 %v2110_v51, %v224_v49  ;;  %v302_v54 = vpop.f32.mrb[1].mxu1  ;;  %v787_v49 = vld [vmem:[%s2881_s16 + $0x8] sm:$0xff]  ;;  %v784_v51 = vld [vmem:[%s2880_s14 + $0x10] sm:$0xff] }
 0x1d9   :  { %v303_v55 = vadd.f32 %v302_v54, %v223_v50  ;;  %v788_v54 = vld [vmem:[%s2881_s16 + $0x10] sm:$0xff] }
 0x1da   :  { %v2596_v57 = vadd.f32 %v1924_v53, %v308_v52  ;;  %v790_v52 = vld [vmem:[%s2882_s18] sm:$0xff] }
 0x1db   :  { %v2594_v56 = vadd.f32 %v1924_v53, %v303_v55  ;;  %v791_v53 = vld [vmem:[%s2882_s18 + $0x8] sm:$0xff] }
 0x1dc   :  { %v2314_v55 = vpack.c.bf16 %v791_v53, %v790_v52  ;;  %v1255_v52 = vld [vmem:[%s2887_s20 + $0x50] sm:$0xff] }
 0x1dd   :  { %2117 = vmatprep.mubr.msk.f32.mxu1 %vm340_vm7, %v2594_v56 }
 0x1de   :  { %2118 = vmatmul.mubr.msk.f32.vlgmr.msra.gmra.mrb[2].mxu1 %vm340_vm7, %v2596_v57 }
 0x1df   :  { %2291 = vmatpush3.bf16.msra.mxu1 %v2288_v48  ;;  %2126 = vmatprep.mubr.msk.f32.mxu1 %vm340_vm7, %v2594_v56  ;;  %v786_v48 = vld [vmem:[%s2881_s16] sm:$0xff] }
 0x1e0   :  { %2124 = vmatprep.subr.mxu1 %v320_v58  ;;  %v2310_v50 = vpack.c.bf16 %v787_v49, %v786_v48  ;;  %v1247_v49 = vld [vmem:[%s2887_s20 + $0x10] sm:$0xff] }
 0x1e3   :  { %2125 = vmatpush3.msra.mxu1 %v320_v58 }
 0x1e4   :  { %2127 = vmatmul.mubr.msk.f32.vlgmr.msra.gmra.mrb[4].mxu1 %vm340_vm7, %v2596_v57  ;;  %2293 = vmatprep.subr.bf16.mxu1 %v2292_v61 }
 0x1e5   :  { %2295 = vmatpush3.bf16.msra.mxu1 %v2292_v61  ;;  %2135 = vmatprep.mubr.msk.f32.mxu1 %vm340_vm7, %v2594_v56 }
 0x1e6   :  { %2133 = vmatprep.subr.mxu1 %v324_v62 }
 0x1e9   :  { %2134 = vmatpush3.msra.mxu1 %v324_v62 }
 0x1ea   :  { %2136 = vmatmul.mubr.msk.f32.vlgmr.msra.gmra.mrb[6].mxu1 %vm340_vm7, %v2596_v57 }
 0x2b1   :  { %v2119_v1 = vpop.f32.mrb[2].mxu1 }
 0x2b2   :  { %v413_v2 = vpop.f32.mrb[3].mxu1  ;;  %v419_v18 = vadd.f32 %v2119_v1, %v1925_v63 }
 0x2b3   :  { %v414_v3 = vadd.f32 %v1925_v63, %v413_v2  ;;  %v1941_v2 = vld [vmem:[%s2885_s15] ss:$0 sm:$0xff] }
 0x2b5   :  { %2142 = vmatprep.mubr.msk.f32.mxu0 %vm340_vm7, %v414_v3 }
 0x2b7   :  { %v2128_v5 = vpop.f32.mrb[4].mxu1 }
 0x2b8   :  { %v500_v7 = vadd.f32 %v2128_v5, %v1928_v4  ;;  %v494_v8 = vpop.f32.mrb[5].mxu1 }
 0x2b9   :  { %v495_v9 = vadd.f32 %v1928_v4, %v494_v8 }
 0x2bb   :  { %v2296_v11 = vpack.c.bf16 %v500_v7, %v495_v9 }
 0x2bd   :  { %v2137_v13 = vpop.f32.mrb[6].mxu1  ;;  %2298 = vmatprep.subr.msk.bf16.mxu0 %vm2631_vm8, %v2296_v11 }
 0x2be   :  { %v581_v14 = vadd.f32 %v2137_v13, %v1931_v12  ;;  %v575_v15 = vpop.f32.mrb[7].mxu1  ;;  %2301 = vmatpush3.bf16.xpose.msk.msra.mxu0 %vm2631_vm8, %v2296_v11  ;;  %v1947_v13 = vld [vmem:[%s2886_s19] ss:$0 sm:$0xff] }
 0x2bf   :  { %v576_v16 = vadd.f32 %v1931_v12, %v575_v15  ;;  %2307 = vmatprep.subr.bf16.mxu0 %v2306_v47 }
 0x2c1   :  { %v2302_v17 = vpack.c.bf16 %v581_v14, %v576_v16 }
 0x2c3   :  { %2303 = vmatprep.subr.bf16.mxu1 %v2302_v17 }
 0x2c4   :  { %2305 = vmatpush3.bf16.msra.mxu1 %v2302_v17 }
 0x2c5   :  { %2143 = vmatmul.mubr.msk.f32.vlgmr.msra.gmra.mrb[14].mxu0 %vm340_vm7, %v419_v18  ;;  %2311 = vmatprep.subr.bf16.mxu1 %v2310_v50 }
 0x2c6   :  { %2309 = vmatpush3.bf16.msra.mxu0 %v2306_v47  ;;  %v1249_v47 = vld [vmem:[%s2887_s20 + $0x20] sm:$0xff] }
 0x2c7   :  { %2156 = vmatprep.subr.mxu0 %v784_v51  ;;  %v2329_v48 = vpack.c.bf16 %v1249_v47, %v1248_v46 }
 0x2ca   :  { %2157 = vmatpush3.msra.mxu0 %v784_v51  ;;  %v1254_v51 = vld [vmem:[%s2887_s20 + $0x48] sm:$0xff] }
 0x2cb   :  { %2315 = vmatprep.subr.bf16.mxu0 %v2314_v55 }
 0x398   :  { %v2144_v20 = vpop.f32.mrb[14].mxu0 }
 0x399   :  { %v662_v22 = vpop.f32.mrb[15].mxu0  ;;  %v672_v23 = vmul.f32 0.20412415, %v2144_v20 }
 0x39a   :  { %v671_v24 = vmul.f32 0.20412415, %v662_v22 }
 0x39b   :  { %v676_v27 = vsel %vm674_vm11, %v672_v23, -1e+30 }
 0x39c   :  { %v675_v25 = vsel %vm673_vm9, %v671_v24, -1e+30  ;;  %v681_v28 = vsel %vm677_vm10, %v676_v27, -inf }
 0x39d   :  { %v678_v26 = vsel %vm677_vm10, %v675_v25, -inf }
 0x39e   :  { %679 = vmax.xlane.f32.xlu0 %v678_v26 }
 0x3a2   :  { %682 = vmax.xlane.f32.xlu0 %v681_v28 }
 0x42b   :  { %v680_v29 = vpop.xlane.xlu0 %679 }
 0x42c   :  { %v684_v30 = vsub.f32 %v675_v25, %v680_v29 }
 0x42e   :  { %v686_v31 = vmul.f32 1.442695, %v684_v30 }
 0x42f   :  { %v683_v32 = vpop.xlane.xlu0 %682 }
 0x430   :  { %2356 = vpow2.f32 %v686_v31  ;;  %v685_v33 = vsub.f32 %v676_v27, %v683_v32 }
 0x432   :  { %v688_v34 = vmul.f32 1.442695, %v685_v33 }
 0x434   :  { %2358 = vpow2.f32 %v688_v34 }
 0x43a   :  { %v2357_v35 = vpop.eup %2356 }
 0x43b   :  { %v690_v36 = vsel %vm677_vm10, %v2357_v35, 0.0 }
 0x43c   :  { %691 = vadd.xlane.f32.xlu1 %v690_v36 }
 0x43e   :  { %v2359_v37 = vpop.eup %2358 }
 0x43f   :  { %v693_v38 = vsel %vm677_vm10, %v2359_v37, 0.0 }
 0x440   :  { %694 = vadd.xlane.f32.xlu1 %v693_v38 }
 0x4c9   :  { %v692_v39 = vpop.xlane.xlu1 %691 }
 0x4ca   :  { %2360 = vrcp.f32 %v692_v39  ;;  %v1245_v39 = vld [vmem:[%s2887_s20] sm:$0xff] }
 0x4cd   :  { %v695_v40 = vpop.xlane.xlu1 %694 }
 0x4ce   :  { %2362 = vrcp.f32 %v695_v40  ;;  %v1246_v40 = vld [vmem:[%s2887_s20 + $0x8] sm:$0xff] }
 0x4d4   :  { %v2361_v41 = vpop.eup %2360 }
 0x4d5   :  { %v697_v42 = vmul.f32 %v2361_v41, %v2357_v35 }
 0x4d7   :  { %2149 = vmatprep.mubr.msk.f32.mxu1 %vm677_vm10, %v697_v42 }
 0x4d8   :  { %v2363_v43 = vpop.eup %2362 }
 0x4d9   :  { %v699_v44 = vmul.f32 %v2363_v43, %v2359_v37 }
 0x4db   :  { %2150 = vmatmul.mubr.msk.f32.vlgmr.msra.gmra.mrb[8].mxu1 %vm677_vm10, %v699_v44  ;;  %v2332_v44 = vpack.c.bf16 %v1246_v40, %v1245_v39 }
 0x4dc   :  { %2313 = vmatpush3.bf16.msra.mxu1 %v2310_v50  ;;  %v1250_v50 = vld [vmem:[%s2887_s20 + $0x28] sm:$0xff] }
 0x4dd   :  { %2165 = vmatprep.subr.mxu1 %v788_v54 }
 0x4e0   :  { %2166 = vmatpush3.msra.mxu1 %v788_v54  ;;  %v1251_v54 = vld [vmem:[%s2887_s20 + $0x30] sm:$0xff] }
 0x5ae   :  { %v2151_v58 = vpop.f32.mrb[8].mxu1 }
 0x5af   :  { %v778_v59 = vadd.f32 %v2151_v58, %v2596_v57  ;;  %v772_v61 = vpop.f32.mrb[9].mxu1  ;;  %v792_v57 = vld [vmem:[%s2882_s18 + $0x10] sm:$0xff] }
 0x5b0   :  { %v773_v62 = vadd.f32 %v772_v61, %v2594_v56  ;;  %v1944_v56 = vld [vmem:[%s2884_s17] ss:$0 sm:$0xff] }
 0x5b1   :  { %v2696_v1 = vadd.f32 %v1940_v60, %v778_v59  ;;  %v2338_v59 = vpack.c.bf16 %v1255_v52, %v1254_v51 }
 0x5b2   :  { %v2694_v63 = vadd.f32 %v1940_v60, %v773_v62 }
 0x5b4   :  { %2158 = vmatprep.mubr.msk.f32.mxu0 %vm340_vm7, %v2694_v63  ;;  %2167 = vmatprep.mubr.msk.f32.mxu1 %vm340_vm7, %v2694_v63 }
 0x5b5   :  { %2159 = vmatmul.mubr.msk.f32.vlgmr.msra.gmra.mrb[16].mxu0 %vm340_vm7, %v2696_v1  ;;  %2168 = vmatmul.mubr.msk.f32.vlgmr.msra.gmra.mrb[10].mxu1 %vm340_vm7, %v2696_v1 }
 0x5b6   :  { %2317 = vmatpush3.bf16.msra.mxu0 %v2314_v55  ;;  %2176 = vmatprep.mubr.msk.f32.mxu0 %vm340_vm7, %v2694_v63  ;;  %v1252_v55 = vld [vmem:[%s2887_s20 + $0x38] sm:$0xff] }
 0x5b7   :  { %2174 = vmatprep.subr.mxu0 %v792_v57  ;;  %v2335_v61 = vpack.c.bf16 %v1252_v55, %v1251_v54 }
 0x5ba   :  { %2175 = vmatpush3.msra.mxu0 %v792_v57  ;;  %v1260_v57 = vld [vmem:[%s2887_s20 + $0x78] sm:$0xff] }
 0x5bb   :  { %2177 = vmatmul.mubr.msk.f32.vlgmr.msra.gmra.mrb[18].mxu0 %vm340_vm7, %v2696_v1 }
 0x688   :  { %v2160_v3 = vpop.f32.mrb[16].mxu0  ;;  %v2169_v4 = vpop.f32.mrb[10].mxu1 }
 0x689   :  { %v967_v5 = vadd.f32 %v2169_v4, %v1944_v56  ;;  %v880_v7 = vpop.f32.mrb[17].mxu0  ;;  %v961_v8 = vpop.f32.mrb[11].mxu1  ;;  %v886_v20 = vadd.f32 %v2160_v3, %v1941_v2  ;;  %v1258_v3 = vld [vmem:[%s2887_s20 + $0x68] sm:$0xff] }
 0x68a   :  { %v881_v9 = vadd.f32 %v1941_v2, %v880_v7  ;;  %v962_v11 = vadd.f32 %v1944_v56, %v961_v8  ;;  %v1261_v56 = vld [vmem:[%s2887_s20 + $0x80] sm:$0xff] }
 0x68b   :  { %v1257_v2 = vld [vmem:[%s2887_s20 + $0x60] sm:$0xff]  ;;  %v2344_v4 = vpack.c.bf16 %v1261_v56, %v1260_v57 }
 0x68c   :  { %v2318_v12 = vpack.c.bf16 %v967_v5, %v962_v11  ;;  %2183 = vmatprep.mubr.msk.f32.mxu1 %vm340_vm7, %v881_v9  ;;  %v1253_v7 = vld [vmem:[%s2887_s20 + $0x40] sm:$0xff]  ;;  %v2341_v8 = vpack.c.bf16 %v1258_v3, %v1257_v2 }
 0x68e   :  { %v2178_v14 = vpop.f32.mrb[18].mxu0  ;;  %2320 = vmatprep.subr.msk.bf16.mxu1 %vm2631_vm8, %v2318_v12 }
 0x68f   :  { %v1048_v15 = vadd.f32 %v2178_v14, %v1947_v13  ;;  %v1042_v16 = vpop.f32.mrb[19].mxu0  ;;  %2323 = vmatpush3.bf16.xpose.msk.msra.mxu1 %vm2631_vm8, %v2318_v12  ;;  %v1266_v12 = vld [vmem:[%s2887_s20 + $0xa8] sm:$0xff]  ;;  %v1263_v14 = vld [vmem:[%s2887_s20 + $0x90] sm:$0xff] }
 0x690   :  { %v1043_v17 = vadd.f32 %v1947_v13, %v1042_v16  ;;  %2328 = vmatprep.subr.bf16.mxu1 %v2374_v0  ;;  %v1267_v13 = vld [vmem:[%s2887_s20 + $0xb0] sm:$0xff] }
 0x691   :  { %v2350_v16 = vpack.c.bf16 %v1267_v13, %v1266_v12 }
 0x692   :  { %v2324_v18 = vpack.c.bf16 %v1048_v15, %v1043_v17  ;;  %v1264_v15 = vld [vmem:[%s2887_s20 + $0x98] sm:$0xff] }
 0x694   :  { %2325 = vmatprep.subr.bf16.mxu0 %v2324_v18 }
 0x695   :  { %2327 = vmatpush3.bf16.msra.mxu0 %v2324_v18  ;;  %v1259_v18 = vld [vmem:[%s2887_s20 + $0x70] sm:$0xff] }
 0x696   :  { %2184 = vmatmul.mubr.msk.f32.vlgmr.msra.gmra.mrb[12].mxu1 %vm340_vm7, %v886_v20  ;;  %2331 = vmatprep.subr.bf16.mxu0 %v2374_v0  ;;  %v2347_v20 = vpack.c.bf16 %v1264_v15, %v1263_v14 }
 0x697   :  { %2199 = vmatprep.mubr.msk.f32.mxu1 %vm2375_vm1, %v2376_v6  ;;  %2330 = vmatpush3.bf16.msra.mxu1 %v2329_v48 }
 0x698   :  { %2197 = vmatprep.subr.mxu1 %v2376_v6 }
 0x69b   :  { %2198 = vmatpush3.msra.mxu1 %v1250_v50 }
 0x69c   :  { %2334 = vmatprep.subr.bf16.mxu1 %v2374_v0 }
 0x769   :  { %v2185_v22 = vpop.f32.mrb[12].mxu1 }
 0x76a   :  { %v1139_v23 = vmul.f32 0.20412415, %v2185_v22  ;;  %v1129_v24 = vpop.f32.mrb[13].mxu1  ;;  %v1268_v22 = vld [vmem:[%s2887_s20 + $0xb8] sm:$0xff] }
 0x76b   :  { %v1138_v25 = vmul.f32 0.20412415, %v1129_v24  ;;  %v1265_v24 = vld [vmem:[%s2887_s20 + $0xa0] sm:$0xff] }
 0x76c   :  { %v1141_v10 = vsel %vm674_vm11, %v1139_v23, -1e+30 }
 0x76d   :  { %v1145_v26 = vsel %vm677_vm10, %v1141_v10, -inf  ;;  %v1140_v27 = vsel %vm673_vm9, %v1138_v25, -1e+30 }
 0x76e   :  { %1146 = vmax.xlane.f32.xlu1 %v1145_v26  ;;  %v1142_v28 = vsel %vm677_vm10, %v1140_v27, -inf }
 0x76f   :  { %1143 = vmax.xlane.f32.xlu0 %v1142_v28 }
 0x7fb   :  { %v1147_v29 = vpop.xlane.xlu1 %1146 }
 0x7fc   :  { %v1149_v30 = vsub.f32 %v1141_v10, %v1147_v29  ;;  %v1144_v31 = vpop.xlane.xlu0 %1143 }
 0x7fd   :  { %v1148_v32 = vsub.f32 %v1140_v27, %v1144_v31 }
 0x7fe   :  { %v1152_v33 = vmul.f32 1.442695, %v1149_v30 }
 0x7ff   :  { %v1150_v34 = vmul.f32 1.442695, %v1148_v32 }
 0x800   :  { %2364 = vpow2.f32 %v1152_v33 }
 0x801   :  { %2366 = vpow2.f32 %v1150_v34 }
 0x80a   :  { %v2365_v35 = vpop.eup %2364 }
 0x80b   :  { %v2367_v21 = vpop.eup %2366  ;;  %v1157_v36 = vsel %vm677_vm10, %v2365_v35, 0.0 }
 0x80c   :  { %1158 = vadd.xlane.f32.xlu1 %v1157_v36  ;;  %v1154_v19 = vsel %vm677_vm10, %v2367_v21, 0.0 }
 0x80d   :  { %1155 = vadd.xlane.f32.xlu0 %v1154_v19 }
 0x899   :  { %v1159_v37 = vpop.xlane.xlu1 %1158 }
 0x89a   :  { %2368 = vrcp.f32 %v1159_v37  ;;  %v1156_v38 = vpop.xlane.xlu0 %1155 }
 0x89b   :  { %2370 = vrcp.f32 %v1156_v38 }
 0x8a4   :  { %v2369_v41 = vpop.eup %2368 }
 0x8a5   :  { %v2371_v42 = vpop.eup %2370  ;;  %v1163_v45 = vmul.f32 %v2369_v41, %v2365_v35 }
 0x8a6   :  { %v1161_v43 = vmul.f32 %v2371_v42, %v2367_v21 }
 0x8a8   :  { %2190 = vmatprep.mubr.msk.f32.mxu0 %vm677_vm10, %v1161_v43  ;;  %v1964_v43 = vld [vmem:[%s2888_s21] ss:$0 sm:$0xff] }
 0x8a9   :  { %2191 = vmatmul.mubr.msk.f32.vlgmr.msra.gmra.mrb[20].mxu0 %vm677_vm10, %v1163_v45 }
 0x8aa   :  { %2333 = vmatpush3.bf16.msra.mxu0 %v2332_v44  ;;  %2208 = vmatprep.mubr.msk.f32.mxu0 %vm2375_vm1, %v2376_v6 }
 0x8ab   :  { %2206 = vmatprep.subr.mxu0 %v2376_v6 }
 0x8ae   :  { %2207 = vmatpush3.msra.mxu0 %v1247_v49 }
 0x8af   :  { %2337 = vmatprep.subr.bf16.mxu0 %v2374_v0 }
 0x97c   :  { %v2192_v53 = vpop.f32.mrb[20].mxu0 }
 0x97d   :  { %v1236_v58 = vpop.f32.mrb[21].mxu0  ;;  %v1242_v9 = vadd.f32 %v2192_v53, %v2696_v1  ;;  %v1262_v1 = vld [vmem:[%s2887_s20 + $0x88] sm:$0xff] }
 0x97e   :  { %v1237_v60 = vadd.f32 %v1236_v58, %v2694_v63  ;;  %v1256_v63 = vld [vmem:[%s2887_s20 + $0x58] sm:$0xff] }
 0x97f   :  { %v1637_v17 = vrot.slane %v1242_v9, 2  ;;  %v1785_v23 = vrot.slane %v1242_v9, 6 }
 0x980   :  { %v1270_v62 = vrot.slane %v1237_v60, 2  ;;  %2209 = vmatmul.mubr.msk.f32.vlgmr.msra.gmra.mrb[22].mxu0 %vm340_vm7, %v1237_v60  ;;  %v1489_v5 = vrot.slane %v1237_v60, 6  ;;  %v1415_v11 = vrot.slane %v1237_v60, 4 }
 0x981   :  { %2339 = vmatpush3.bf16.msra.mxu0 %v2338_v59  ;;  %2226 = vmatprep.mubr.msk.f32.mxu0 %vm2375_vm1, %v2376_v6 }
 0x982   :  { %2200 = vmatmul.mubr.msk.f32.vlgmr.msra.gmra.mrb[14].mxu1 %vm340_vm7, %v1270_v62  ;;  %2224 = vmatprep.subr.mxu0 %v2376_v6 }
 0x983   :  { %2336 = vmatpush3.bf16.msra.mxu1 %v2335_v61  ;;  %2217 = vmatprep.mubr.msk.f32.mxu1 %vm2375_vm1, %v2376_v6 }
 0x984   :  { %2215 = vmatprep.subr.mxu1 %v2376_v6 }
 0x985   :  { %2225 = vmatpush3.msra.mxu0 %v1256_v63 }
 0x986   :  { %2227 = vmatmul.mubr.msk.f32.vlgmr.msra.gmra.mrb[24].mxu0 %vm340_vm7, %v1489_v5  ;;  %2343 = vmatprep.subr.bf16.mxu0 %v2374_v0 }
 0x987   :  { %2216 = vmatpush3.msra.mxu1 %v1253_v7  ;;  %2345 = vmatpush3.bf16.msra.mxu0 %v2344_v4  ;;  %v1965_v4 = vld [vmem:[%s2889_s22] ss:$0 sm:$0xff] }
 0x988   :  { %2218 = vmatmul.mubr.msk.f32.vlgmr.msra.gmra.mrb[16].mxu1 %vm340_vm7, %v1415_v11  ;;  %2340 = vmatprep.subr.bf16.mxu1 %v2374_v0  ;;  %v1966_v7 = vld [vmem:[%s2890_s23] ss:$0 sm:$0xff] }
 0x989   :  { %2342 = vmatpush3.bf16.msra.mxu1 %v2341_v8  ;;  %2242 = vmatprep.subr.mxu0 %v2376_v6 }
 0x98a   :  { %2244 = vmatprep.mubr.msk.f32.mxu0 %vm2375_vm1, %v2376_v6  ;;  %2233 = vmatprep.subr.mxu1 %v2376_v6 }
 0x98b   :  { %2243 = vmatpush3.msra.mxu0 %v1262_v1  ;;  %2235 = vmatprep.mubr.msk.f32.mxu1 %vm2375_vm1, %v2376_v6 }
 0x98c   :  { %2245 = vmatmul.mubr.msk.f32.vlgmr.msra.gmra.mrb[26].mxu0 %vm340_vm7, %v1637_v17  ;;  %2349 = vmatprep.subr.bf16.mxu0 %v2374_v0 }
 0x98d   :  { %2234 = vmatpush3.msra.mxu1 %v1259_v18  ;;  %2351 = vmatpush3.bf16.msra.mxu0 %v2350_v16 }
 0x98e   :  { %2236 = vmatmul.mubr.msk.f32.vlgmr.msra.gmra.mrb[18].mxu1 %vm340_vm7, %v1242_v9  ;;  %2346 = vmatprep.subr.bf16.mxu1 %v2374_v0  ;;  %v1711_v0 = vrot.slane %v1242_v9, 4 }
 0x98f   :  { %2348 = vmatpush3.bf16.msra.mxu1 %v2347_v20  ;;  %2260 = vmatprep.subr.mxu0 %v2376_v6 }
 0x990   :  { %2262 = vmatprep.mubr.msk.f32.mxu0 %vm2375_vm1, %v2376_v6  ;;  %2251 = vmatprep.subr.mxu1 %v2376_v6 }
 0x991   :  { %2261 = vmatpush3.msra.mxu0 %v1268_v22  ;;  %2253 = vmatprep.mubr.msk.f32.mxu1 %vm2375_vm1, %v2376_v6 }
 0x992   :  { %2263 = vmatmul.mubr.msk.f32.vlgmr.msra.gmra.mrb[28].mxu0 %vm340_vm7, %v1785_v23 }
 0x993   :  { %2252 = vmatpush3.msra.mxu1 %v1265_v24 }
 0x994   :  { %2254 = vmatmul.mubr.msk.f32.vlgmr.msra.gmra.mrb[20].mxu1 %vm340_vm7, %v1711_v0 }
 0xa53   :  { %v1411_v25 = vpop.f32.mrb[22].mxu0 }
 0xa54   :  { %v2210_v10 = vpop.f32.mrb[23].mxu0 }
 0xa55   :  { %v1339_v26 = vpop.f32.mrb[14].mxu1 }
 0xa56   :  { %v1412_v27 = vadd.f32 %v1411_v25, %v1339_v26  ;;  %v2201_v28 = vpop.f32.mrb[15].mxu1 }
 0xa59   :  { %v1558_v29 = vpop.f32.mrb[24].mxu0 }
 0xa5a   :  { %v2228_v30 = vpop.f32.mrb[25].mxu0 }
 0xa5b   :  { %v1484_v31 = vpop.f32.mrb[16].mxu1 }
 0xa5c   :  { %v1488_v32 = vadd.f32 %v1484_v31, %v1412_v27  ;;  %v2219_v33 = vpop.f32.mrb[17].mxu1 }
 0xa5e   :  { %v1562_v34 = vadd.f32 %v1558_v29, %v1488_v32 }
 0xa5f   :  { %v1706_v35 = vpop.f32.mrb[26].mxu0 }
 0xa60   :  { %v2246_v21 = vpop.f32.mrb[27].mxu0 }
 0xa61   :  { %v1632_v6 = vpop.f32.mrb[18].mxu1 }
 0xa62   :  { %v1636_v36 = vadd.f32 %v1632_v6, %v1562_v34  ;;  %v2237_v19 = vpop.f32.mrb[19].mxu1 }
 0xa64   :  { %v1710_v37 = vadd.f32 %v1706_v35, %v1636_v36 }
 0xa65   :  { %v1854_v38 = vpop.f32.mrb[28].mxu0 }
 0xa66   :  { %v2264_v39 = vpop.f32.mrb[29].mxu0 }
 0xa67   :  { %v1780_v40 = vpop.f32.mrb[20].mxu1 }
 0xa68   :  { %v1784_v41 = vadd.f32 %v1780_v40, %v1710_v37  ;;  %v2255_v42 = vpop.f32.mrb[21].mxu1 }
 0xa6a   :  { %v1858_v44 = vadd.f32 %v1854_v38, %v1784_v41 }
 0xa6c   :  { %v1866_v45 = vadd.f32 %v1964_v43, %v1858_v44 }
 0xa6e   :  { %v1868_v46 = vsel %vm1867_vm12, %v1866_v45, 0.0 }
 0xa6f   :  { %v1869_v47 = vrot.slane %v1868_v46, 4 }
 0xa71   :  { %v1870_v48 = vadd.f32 %v1869_v47, %v1868_v46 }
 0xa73   :  { %v1871_v49 = vrot.slane %v1870_v48, 2 }
 0xa75   :  { %v1872_v50 = vadd.f32 %v1871_v49, %v1870_v48 }
 0xa77   :  { %v1873_v51 = vrot.slane %v1872_v50, 1 }
 0xa79   :  { %v1874_v52 = vadd.f32 %v1873_v51, %v1872_v50 }
 0xa7b   :  { %v1876_v53 = vmul.f32 0.5, %v1874_v52 }
 0xa7d   :  { %v1877_v54 = vsub.f32 %v1866_v45, %v1876_v53 }
 0xa7f   :  { %v1878_v55 = vmul.f32 %v1877_v54, %v1877_v54 }
 0xa81   :  { %v1879_v58 = vsel %vm1867_vm12, %v1878_v55, 0.0 }
 0xa82   :  { %v1880_v59 = vrot.slane %v1879_v58, 4 }
 0xa84   :  { %v1881_v60 = vadd.f32 %v1880_v59, %v1879_v58 }
 0xa86   :  { %v1882_v61 = vrot.slane %v1881_v60, 2 }
 0xa88   :  { %v1883_v62 = vadd.f32 %v1882_v61, %v1881_v60 }
 0xa8a   :  { %v1884_v57 = vrot.slane %v1883_v62, 1 }
 0xa8c   :  { %v1885_v56 = vadd.f32 %v1884_v57, %v1883_v62 }
 0xa8e   :  { %v1886_v63 = vmul.f32 0.5, %v1885_v56 }
 0xa90   :  { %v1887_v2 = vadd.f32 1e-05, %v1886_v63 }
 0xa92   :  { %2372 = vrsqrt.f32 %v1887_v2 }
 0xa9c   :  { %v2373_v3 = vpop.eup %2372 }
 0xa9d   :  { %v1889_v5 = vmul.f32 %v2373_v3, %v1877_v54 }
 0xa9f   :  { %v1897_v8 = vmul.f32 %v1965_v4, %v1889_v5 }
 0xaa1   :  { %v1905_v9 = vadd.f32 %v1966_v7, %v1897_v8 }
 0xaa3   :  { %v1906_v11 = vmax.f32 %v1905_v9, 0.0 }
 0xaa5   :  { %1907 = vst.msk [vmem:[%s2891_s24] sm:$0x3] %vm1867_vm12, %v1906_v11 }

// kernel: forward.27
= control target key start
LH: loop header
LB: loop body
LE: loop exit
PB: predicated region body
PF: predicated region fallthrough
CT: control target
= control target key end

     0   :  { %s2860_s0 = inlined_call_operand.vmem [shape: f32[3,2,32], index: 0, kind: input, shape index: {}]   ;;  %s2861_s1 = inlined_call_operand.vmem [shape: f32[2,96], index: 1, kind: input, shape index: {}]   ;;  %s2862_s2 = inlined_call_operand.vmem [shape: f32[32,25], index: 2, kind: input, shape index: {}]   ;;  %s2863_s3 = inlined_call_operand.vmem [shape: f32[1,25], index: 3, kind: input, shape index: {}]   ;;  %s2864_s4 = inlined_call_operand.vmem [shape: f32[25,24], index: 4, kind: input, shape index: {}]   ;;  %s2865_s5 = inlined_call_operand.vmem [shape: f32[96,24], index: 5, kind: input, shape index: {}]   ;;  %s2866_s6 = inlined_call_operand.vmem [shape: f32[1,24], index: 6, kind: input, shape index: {}]   ;;  %s2867_s7 = inlined_call_operand.vmem [shape: f32[1,24], index: 7, kind: input, shape index: {}]   ;;  %s2868_s8 = inlined_call_operand.hbm [shape: f32[1,24], index: 8, kind: input, shape index: {}]   ;;  %s2869_s9 = inlined_call_operand.vmem [shape: f32[24,1], index: 9, kind: input, shape index: {}]   ;;  %s2870_s10 = inlined_call_operand.<no memory space> [shape: f32[1,1], index: 10, kind: input, shape index: {}]   ;;  %s2871_s11 = inlined_call_operand.vmem [shape: f32[25,24], index: 11, kind: input, shape index: {}]   ;;  %s2872_s12 = inlined_call_operand.vmem [shape: f32[96,24], index: 12, kind: input, shape index: {}]   ;;  %s2873_s13 = inlined_call_operand.hbm [shape: f32[1,24], index: 13, kind: input, shape index: {}]   ;;  %s2874_s14 = inlined_call_operand.hbm [shape: f32[1,24], index: 14, kind: input, shape index: {}]   ;;  %s2875_s15 = inlined_call_operand.hbm [shape: f32[1,24], index: 15, kind: input, shape index: {}]   ;;  %s2876_s16 = inlined_call_operand.vmem [shape: f32[24,1], index: 16, kind: input, shape index: {}]   ;;  %s2877_s18 = inlined_call_operand.vmem [shape: f32[2,1], index: 18, kind: output, shape index: {0}]   ;;  %s2878_s19 = inlined_call_operand.vmem [shape: f32[2,1], index: 19, kind: output, shape index: {1}]   ;;  %s2879_s20 = inlined_call_operand.vmem [shape: f32[2,1], index: 20, kind: output, shape index: {2}]   ;;  %s2880_s17 = inlined_call_operand.<no memory space> [shape: f32[1,1], index: 17, kind: input, shape index: {}]  }
   0x1   :  { %2884 = sst [smem:[#allocation14_spill]] %s2860_s0  ;;  %v26_v0 = vstv %s2870_s10  ;;  %v28_v1 = vstv %s2880_s17 }
   0x2   :  { %2885 = sst [smem:[#allocation15_spill]] %s2861_s1  ;;  %27 = vst [vmem:[#allocation2] sm:$0x1] %v26_v0  ;;  %29 = vst [vmem:[#allocation3] sm:$0x1] %v28_v1 }
   0x3   :  { %2886 = sst [smem:[#allocation16_spill]] %s2862_s2 }
   0x4   :  { %2887 = sst [smem:[#allocation17_spill]] %s2863_s3 }
   0x5   :  { %2888 = sst [smem:[#allocation18_spill]] %s2864_s4 }
   0x6   :  { %30 = vsyncpa [#allocation5], 0 }
   0x7   :  { %31 = vsyncpa [#allocation7], 0 }
   0x8   :  { %32 = vsyncpa [#allocation10], 0  ;;  %s2286_s2 = smov [#allocation6]   ;;  %s2287_s3 = smov [#allocation4]  }
   0x9   :  { %s73_s25 = sshll.u32 %s2286_s2, 4  ;;  %s55_s26 = sshll.u32 %s2287_s3, 4  ;;  %s74_s25 = int_to_ptr.vmem [resolvable:$true] %s73_s25  ;;  %s56_s26 = int_to_ptr.vmem [resolvable:$true] %s55_s26 }
   0xa   :  { %s2192_s4 = scalar_lea.hbm %s2873_s13, 16 }
   0xb   :  { %p2193_p0 = scmp.ne.s32.totalorder %s2873_s13, %s2192_s4  ;;  %p2196_p1 = scmp.lt.u32.totalorder %s2192_s4, %s2873_s13 }
   0xd   :  { %p2198_p2 = pnand %p2196_p1, %p2193_p0 }
   0xf   :  { %2201 = shalt.err (!%p2198_p2)
}
  0x10   :  { %s2202_s0 = scalar_lea.vmem %s74_s25, 16  ;;  %s2206_s21 = scalar_lea.vmem %s74_s25, 32 }
  0x11   :  { %p2203_p3 = scmp.ne.s32.totalorder %s74_s25, %s2202_s0  ;;  %p2207_p4 = scmp.lt.s32.totalorder %s74_s25, %s74_s25 }
  0x12   :  { %p2208_p5 = scmp.lt.s32.totalorder %s2206_s21, %s2202_s0 }
  0x14   :  { %p2209_p6 = por %p2208_p5, %p2207_p4 }
  0x16   :  { %p2210_p7 = pnand %p2209_p6, %p2203_p3 }
  0x18   :  { %2213 = shalt.err (!%p2210_p7)
}
  0x19   :  { %76 = dma.hbm_to_vmem [thread:$0]  %s2873_s13, 16, %s74_s25, [#allocation7]  }
  0x1a   :  { %s2214_s2 = scalar_lea.hbm %s2868_s8, 16 }
  0x1b   :  { %p2215_p8 = scmp.ne.s32.totalorder %s2868_s8, %s2214_s2  ;;  %p2218_p9 = scmp.lt.u32.totalorder %s2214_s2, %s2868_s8 }
  0x1d   :  { %p2220_p10 = pnand %p2218_p9, %p2215_p8 }
  0x1f   :  { %2223 = shalt.err (!%p2220_p10)
}
  0x20   :  { %s2224_s10 = scalar_lea.vmem %s56_s26, 16  ;;  %s2228_s29 = scalar_lea.vmem %s56_s26, 32 }
  0x21   :  { %p2225_p11 = scmp.ne.s32.totalorder %s56_s26, %s2224_s10  ;;  %p2229_p12 = scmp.lt.s32.totalorder %s56_s26, %s56_s26 }
  0x22   :  { %p2230_p13 = scmp.lt.s32.totalorder %s2228_s29, %s2224_s10 }
  0x24   :  { %p2231_p0 = por %p2230_p13, %p2229_p12 }
  0x26   :  { %p2232_p1 = pnand %p2231_p0, %p2225_p11 }
  0x28   :  { %2235 = shalt.err (!%p2232_p1)
}
  0x29   :  { %58 = dma.hbm_to_vmem [thread:$0]  %s2868_s8, 16, %s56_s26, [#allocation5]  }
  0x2a   :  { %s2288_s17 = smov [#allocation8]   ;;  %s2289_s0 = smov [#allocation9]  }
  0x2b   :  { %s83_s30 = sshll.u32 %s2288_s17, 4  ;;  %s93_s21 = sshll.u32 %s2289_s0, 4  ;;  %s84_s30 = int_to_ptr.vmem [resolvable:$true] %s83_s30  ;;  %s94_s21 = int_to_ptr.vmem [resolvable:$true] %s93_s21 }
  0x2c   :  { %s2236_s23 = scalar_lea.hbm %s2874_s14, 16 }
  0x2d   :  { %p2237_p2 = scmp.ne.s32.totalorder %s2874_s14, %s2236_s23  ;;  %p2240_p3 = scmp.lt.u32.totalorder %s2236_s23, %s2874_s14 }
  0x2f   :  { %p2242_p4 = pnand %p2240_p3, %p2237_p2 }
  0x31   :  { %2245 = shalt.err (!%p2242_p4)
}
  0x32   :  { %s2246_s8 = scalar_lea.vmem %s84_s30, 16  ;;  %s2250_s26 = scalar_lea.vmem %s84_s30, 32 }
  0x33   :  { %p2247_p5 = scmp.ne.s32.totalorder %s84_s30, %s2246_s8  ;;  %p2251_p6 = scmp.lt.s32.totalorder %s84_s30, %s84_s30 }
  0x34   :  { %p2252_p7 = scmp.lt.s32.totalorder %s2250_s26, %s2246_s8 }
  0x36   :  { %p2253_p8 = por %p2252_p7, %p2251_p6 }
  0x38   :  { %p2254_p9 = pnand %p2253_p8, %p2247_p5 }
  0x3a   :  { %2257 = shalt.err (!%p2254_p9)
}
  0x3b   :  { %86 = dma.hbm_to_vmem [thread:$0]  %s2874_s14, 16, %s84_s30, [#allocation7]  }
  0x3c   :  { %s2258_s13 = scalar_lea.hbm %s2875_s15, 16 }
  0x3d   :  { %p2259_p10 = scmp.ne.s32.totalorder %s2875_s15, %s2258_s13  ;;  %p2262_p11 = scmp.lt.u32.totalorder %s2258_s13, %s2875_s15 }
  0x3f   :  { %p2264_p12 = pnand %p2262_p11, %p2259_p10 }
  0x41   :  { %2267 = shalt.err (!%p2264_p12)
}
  0x42   :  { %s2268_s22 = scalar_lea.vmem %s94_s21, 16  ;;  %s2272_s23 = scalar_lea.vmem %s94_s21, 32 }
  0x43   :  { %p2269_p13 = scmp.ne.s32.totalorder %s94_s21, %s2268_s22  ;;  %p2273_p0 = scmp.lt.s32.totalorder %s94_s21, %s94_s21 }
  0x44   :  { %p2274_p1 = scmp.lt.s32.totalorder %s2272_s23, %s2268_s22 }
  0x46   :  { %p2275_p2 = por %p2274_p1, %p2273_p0 }
  0x48   :  { %p2276_p3 = pnand %p2275_p2, %p2269_p13 }
  0x4a   :  { %2279 = shalt.err (!%p2276_p3)
}
  0x4b   :  { %96 = dma.hbm_to_vmem [thread:$0]  %s2875_s15, 16, %s94_s21, [#allocation10]  }
  0x4c   :  { %2280 = dma.done.wait [#allocation5], 16  }
  0x4d   :  { %2281 = vsyncadd [#allocation5], 4294967280 }
  0x4e   :  { %2282 = dma.done.wait [#allocation7], 32  }
  0x4f   :  { %2283 = vsyncadd [#allocation7], 4294967264 }
  0x50   :  { %2284 = dma.done.wait [#allocation10], 16  }
  0x51   :  { %2285 = vsyncadd [#allocation10], 4294967280  ;;  %v2290_v2 = vmov 0.0|0.0   ;;  %vm2291_vm0 = vmmov 0   ;;  %v2292_v3 = vmov 0.0   ;;  %v114_v4 = vld [vmem:[%s2865_s5] sm:$0xff] }
  0x52   :  { %2034 = vmatprep.subr.bf16.mxu0 %v2290_v2  ;;  %1851 = vmatprep.mubr.msk.f32.mxu0 %vm2291_vm0, %v2292_v3  ;;  %v115_v5 = vld [vmem:[%s2865_s5 + $0x8] sm:$0xff]  ;;  %v116_v6 = vld [vmem:[%s2865_s5 + $0x10] sm:$0xff]  ;;  %v117_v8 = vld [vmem:[%s2865_s5 + $0x18] sm:$0xff]  ;;  %s2889_s3 = sld [smem:[#allocation16_spill]]  ;;  %s2890_s28 = sld [smem:[#allocation15_spill]]  ;;  %vm126_vm1 = vcmask 785408  }
  0x53   :  { %2052 = vmatprep.subr.bf16.mxu1 %v2290_v2  ;;  %1878 = vmatprep.mubr.msk.f32.mxu1 %vm2291_vm0, %v2292_v3  ;;  %v2035_v7 = vpack.c.bf16 %v115_v5, %v114_v4  ;;  %v2038_v9 = vpack.c.bf16 %v117_v8, %v116_v6  ;;  %v118_v10 = vld [vmem:[%s2865_s5 + $0x20] sm:$0xff]  ;;  %v119_v11 = vld [vmem:[%s2865_s5 + $0x28] sm:$0xff]  ;;  %v202_v14 = vld [vmem:[%s2872_s12 + $0x10] sm:$0xff]  ;;  %s2891_s0 = sld [smem:[#allocation14_spill]]  ;;  %vm294_vm2 = vcmask 261120   ;;  %s2892_s21 = sld [smem:[#allocation18_spill]] }
  0x54   :  { %v200_v12 = vld [vmem:[%s2872_s12] sm:$0xff]  ;;  %v201_v13 = vld [vmem:[%s2872_s12 + $0x8] sm:$0xff]  ;;  %v2041_v15 = vpack.c.bf16 %v119_v11, %v118_v10  ;;  %v203_v17 = vld [vmem:[%s2872_s12 + $0x18] sm:$0xff]  ;;  %vm377_vm3 = vcmask 1040384   ;;  %vm2293_vm4 = vmmov 1   ;;  %vm373_vm6 = vcmask 203776  }
  0x55   :  { %2036 = vmatpush3.bf16.msra.mxu0 %v2035_v7  ;;  %v2053_v16 = vpack.c.bf16 %v201_v13, %v200_v12  ;;  %v120_v18 = vld [vmem:[%s2865_s5 + $0x30] sm:$0xff]  ;;  %v121_v19 = vld [vmem:[%s2865_s5 + $0x38] sm:$0xff]  ;;  %v2056_v20 = vpack.c.bf16 %v203_v17, %v202_v14  ;;  %v204_v21 = vld [vmem:[%s2872_s12 + $0x20] sm:$0xff]  ;;  %vm461_vm7 = vcmask 189440   ;;  %vm509_vm8 = vcmask 195584  }
  0x56   :  { %2037 = vmatprep.subr.bf16.mxu0 %v2290_v2  ;;  %v205_v22 = vld [vmem:[%s2872_s12 + $0x28] sm:$0xff]  ;;  %v2044_v23 = vpack.c.bf16 %v121_v19, %v120_v18  ;;  %v122_v24 = vld [vmem:[%s2865_s5 + $0x40] sm:$0xff]  ;;  %v206_v27 = vld [vmem:[%s2872_s12 + $0x30] sm:$0xff]  ;;  %vm1663_vm9 = vcmask 1024  }
  0x57   :  { %2054 = vmatpush3.bf16.msra.mxu1 %v2053_v16  ;;  %v123_v25 = vld [vmem:[%s2865_s5 + $0x48] sm:$0xff]  ;;  %v2059_v26 = vpack.c.bf16 %v205_v22, %v204_v21  ;;  %v207_v28 = vld [vmem:[%s2872_s12 + $0x38] sm:$0xff]  ;;  %v124_v30 = vld [vmem:[%s2865_s5 + $0x50] sm:$0xff] }
  0x58   :  { %2055 = vmatprep.subr.bf16.mxu1 %v2290_v2  ;;  %v2047_v29 = vpack.c.bf16 %v123_v25, %v122_v24  ;;  %v125_v31 = vld [vmem:[%s2865_s5 + $0x58] sm:$0xff]  ;;  %v2062_v32 = vpack.c.bf16 %v207_v28, %v206_v27  ;;  %v208_v33 = vld [vmem:[%s2872_s12 + $0x40] sm:$0xff]  ;;  %v209_v34 = vld [vmem:[%s2872_s12 + $0x48] sm:$0xff] }
  0x59   :  { %2039 = vmatpush3.bf16.msra.mxu0 %v2038_v9  ;;  %v2050_v35 = vpack.c.bf16 %v125_v31, %v124_v30  ;;  %v283_v36 = vld [vmem:[%s2889_s3] sm:$0xff]  ;;  %v284_v37 = vld [vmem:[%s2889_s3 + $0x8] sm:$0xff]  ;;  %v2065_v38 = vpack.c.bf16 %v209_v34, %v208_v33  ;;  %v285_v41 = vld [vmem:[%s2889_s3 + $0x10] sm:$0xff] }
  0x5a   :  { %2040 = vmatprep.subr.bf16.mxu0 %v2290_v2  ;;  %v113_v39 = vld [vmem:[%s2890_s28] sm:$0x3]  ;;  %v2543_v40 = vpack.c.bf16 %v284_v37, %v283_v36  ;;  %v286_v42 = vld [vmem:[%s2889_s3 + $0x18] sm:$0xff]  ;;  %v210_v45 = vld [vmem:[%s2872_s12 + $0x50] sm:$0xff]  ;;  %s2895_s28 = sld [smem:[#allocation17_spill]] }
  0x5b   :  { %2057 = vmatpush3.bf16.msra.mxu1 %v2056_v20  ;;  %v2555_v43 = vpack.c.bf16 %v286_v42, %v285_v41  ;;  %v282_v44 = vld [vmem:[%s2891_s0] sm:$0x3]  ;;  %v211_v46 = vld [vmem:[%s2872_s12 + $0x58] sm:$0xff]  ;;  %v370_v49 = vld [vmem:[%s2892_s21 + $0x8] sm:$0xff] }
  0x5c   :  { %2058 = vmatprep.subr.bf16.mxu1 %v2290_v2  ;;  %v2068_v47 = vpack.c.bf16 %v211_v46, %v210_v45  ;;  %v369_v48 = vld [vmem:[%s2892_s21] sm:$0xff]  ;;  %v371_v51 = vld [vmem:[%s2892_s21 + $0x10] sm:$0xff]  ;;  %v372_v52 = vld [vmem:[%s2892_s21 + $0x18] sm:$0x1] }
  0x5d   :  { %2042 = vmatpush3.bf16.msra.mxu0 %v2041_v15  ;;  %v2581_v50 = vpack.c.bf16 %v370_v49, %v369_v48  ;;  %v2594_v53 = vpack.c.bf16 %v372_v52, %v371_v51  ;;  %vm2596_vm5 = vmpackc.low %vm377_vm3, %vm2293_vm4  ;;  %v589_v58 = vld [vmem:[%s2871_s11] sm:$0xff]  ;;  %v590_v59 = vld [vmem:[%s2871_s11 + $0x8] sm:$0xff] }
  0x5e   :  { %2043 = vmatprep.subr.bf16.mxu0 %v2290_v2  ;;  %v2618_v63 = vpack.c.bf16 %v590_v59, %v589_v58  ;;  %v591_v1 = vld [vmem:[%s2871_s11 + $0x10] sm:$0xff]  ;;  %v592_v4 = vld [vmem:[%s2871_s11 + $0x18] sm:$0x1]  ;;  %v1712_v6 = vld [vmem:[%s2891_s0 + $0x2] sm:$0x3] }
  0x5f   :  { %2060 = vmatpush3.bf16.msra.mxu1 %v2059_v26  ;;  %v2628_v5 = vpack.c.bf16 %v592_v4, %v591_v1  ;;  %v499_v9 = vld [vmem:[%s2869_s9] sm:$0xff]  ;;  %v500_v10 = vld [vmem:[%s2869_s9 + $0x8] sm:$0xff]  ;;  %v2667_v12 = vld [vmem:[%s2869_s9 + $0x10] sm:$0xff] }
  0x60   :  { %2061 = vmatprep.subr.bf16.mxu1 %v2290_v2  ;;  %v2609_v57 = vld [vmem:[%s2895_s28] ss:$0 sm:$0xff]  ;;  %v2658_v11 = vpack.c.bf16 %v500_v10, %v499_v9  ;;  %v2681_v22 = vld [vmem:[#allocation6] ss:$0 sm:$0xff] }
  0x61   :  { %2045 = vmatpush3.bf16.msra.mxu0 %v2044_v23  ;;  %v2676_v14 = vld [vmem:[%s2866_s6] ss:$0 sm:$0xff] }
  0x62   :  { %2046 = vmatprep.subr.bf16.mxu0 %v2290_v2 }
  0x63   :  { %2063 = vmatpush3.bf16.msra.mxu1 %v2062_v32 }
  0x64   :  { %2064 = vmatprep.subr.bf16.mxu1 %v2290_v2 }
  0x65   :  { %2048 = vmatpush3.bf16.msra.mxu0 %v2047_v29 }
  0x66   :  { %2049 = vmatprep.subr.bf16.mxu0 %v2290_v2 }
  0x67   :  { %2066 = vmatpush3.bf16.msra.mxu1 %v2065_v38 }
  0x68   :  { %2067 = vmatprep.subr.bf16.mxu1 %v2290_v2 }
  0x69   :  { %2051 = vmatpush3.bf16.msra.mxu0 %v2050_v35 }
  0x6a   :  { %2070 = vmatprep.subr.bf16.mxu0 %v2290_v2 }
  0x6b   :  { %2069 = vmatpush3.bf16.msra.mxu1 %v2068_v47 }
  0x6c   :  { %1852 = vmatmul.mubr.msk.f32.vlgmr.msra.gmra.mrb[0].mxu0 %vm126_vm1, %v113_v39  ;;  %2076 = vmatprep.subr.bf16.mxu1 %v2290_v2 }
  0x6d   :  { %2072 = vmatpush3.bf16.msra.mxu0 %v2543_v40  ;;  %1889 = vmatprep.mubr.msk.f32.mxu0 %vm2291_vm0, %v2292_v3 }
  0x6e   :  { %2073 = vmatprep.subr.bf16.mxu0 %v2290_v2  ;;  %1879 = vmatmul.mubr.msk.f32.vlgmr.msra.gmra.mrb[0].mxu1 %vm126_vm1, %v113_v39 }
  0x6f   :  { %2078 = vmatpush3.bf16.msra.mxu1 %v2581_v50  ;;  %1900 = vmatprep.mubr.msk.f32.mxu1 %vm2291_vm0, %v2292_v3 }
  0x70   :  { %2079 = vmatprep.subr.bf16.mxu1 %v2290_v2 }
  0x71   :  { %2075 = vmatpush3.bf16.msra.mxu0 %v2555_v43 }
  0x72   :  { %2083 = vmatprep.subr.bf16.mxu0 %v2290_v2 }
  0x73   :  { %2082 = vmatpush3.bf16.msk.msra.mxu1 %vm2596_vm5, %v2594_v53 }
  0x74   :  { %1890 = vmatmul.mubr.msk.f32.vlgmr.msra.gmra.mrb[2].mxu0 %vm294_vm2, %v282_v44  ;;  %2086 = vmatprep.subr.bf16.mxu1 %v2290_v2 }
  0x75   :  { %1909 = vmatprep.mubr.msk.f32.mxu0 %vm2291_vm0, %v2292_v3  ;;  %2085 = vmatpush3.bf16.msra.mxu0 %v2658_v11 }
  0x76   :  { %1907 = vmatprep.subr.mxu0 %v2292_v3 }
  0x79   :  { %1908 = vmatpush3.msra.mxu0 %v2667_v12 }
  0x7a   :  { %2093 = vmatprep.subr.bf16.mxu0 %v2290_v2 }
 0x13f   :  { %v2604_v55 = vpop.f32.mrb[0].mxu0 }
 0x140   :  { %v1853_v56 = vpop.f32.mrb[1].mxu0 }
 0x141   :  { %v2650_v7 = vpop.f32.mrb[0].mxu1 }
 0x142   :  { %v1880_v8 = vpop.f32.mrb[1].mxu1 }
 0x147   :  { %v364_v60 = vpop.f32.mrb[2].mxu0 }
 0x148   :  { %v365_v61 = vadd.f32 %v2609_v57, %v364_v60  ;;  %v1891_v62 = vpop.f32.mrb[3].mxu0 }
 0x14a   :  { %v368_v0 = vmax.f32 %v365_v61, 0.0 }
 0x14c   :  { %1901 = vmatmul.mubr.msk.f32.vlgmr.msra.gmra.mrb[2].mxu1 %vm373_vm6, %v368_v0 }
 0x14d   :  { %2088 = vmatpush3.bf16.msra.mxu1 %v2618_v63  ;;  %1920 = vmatprep.mubr.msk.f32.mxu1 %vm2291_vm0, %v2292_v3 }
 0x14e   :  { %2089 = vmatprep.subr.bf16.mxu1 %v2290_v2 }
 0x151   :  { %2092 = vmatpush3.bf16.msk.msra.mxu1 %vm2596_vm5, %v2628_v5 }
 0x152   :  { %2096 = vmatprep.subr.bf16.mxu1 %v2290_v2 }
 0x154   :  { %1921 = vmatmul.mubr.msk.f32.vlgmr.msra.gmra.mrb[4].mxu1 %vm373_vm6, %v368_v0 }
 0x155   :  { %2098 = vmatpush3.bf16.msra.mxu1 %v2543_v40  ;;  %1940 = vmatprep.mubr.msk.f32.mxu1 %vm2291_vm0, %v2292_v3 }
 0x156   :  { %2099 = vmatprep.subr.bf16.mxu1 %v2290_v2 }
 0x159   :  { %2101 = vmatpush3.bf16.msra.mxu1 %v2555_v43 }
 0x15a   :  { %2109 = vmatprep.subr.bf16.mxu1 %v2290_v2 }
 0x15c   :  { %1941 = vmatmul.mubr.msk.f32.vlgmr.msra.gmra.mrb[6].mxu1 %vm294_vm2, %v1712_v6 }
 0x15d   :  { %1960 = vmatprep.mubr.msk.f32.mxu1 %vm2291_vm0, %v2292_v3  ;;  %2111 = vmatpush3.bf16.msra.mxu1 %v2658_v11 }
 0x15e   :  { %1958 = vmatprep.subr.mxu1 %v2292_v3 }
 0x161   :  { %1959 = vmatpush3.msra.mxu1 %v2667_v12 }
 0x162   :  { %2119 = vmatprep.subr.bf16.mxu1 %v2290_v2 }
 0x21f   :  { %v447_v13 = vpop.f32.mrb[2].mxu1 }
 0x220   :  { %v448_v15 = vadd.f32 %v447_v13, %v2604_v55  ;;  %v1902_v16 = vpop.f32.mrb[3].mxu1 }
 0x222   :  { %v458_v17 = vadd.f32 %v2676_v14, %v448_v15  ;;  %v2691_v15 = vld [vmem:[%s2867_s7] ss:$0 sm:$0xff] }
 0x224   :  { %v462_v18 = vsel %vm461_vm7, %v458_v17, 0.0 }
 0x225   :  { %v463_v19 = vrot.slane %v462_v18, 4 }
 0x227   :  { %v464_v20 = vadd.f32 %v463_v19, %v462_v18  ;;  %v662_v21 = vpop.f32.mrb[4].mxu1  ;;  %v712_v19 = vld [vmem:[%s2876_s16] sm:$0xff] }
 0x228   :  { %v663_v23 = vadd.f32 %v662_v21, %v2650_v7  ;;  %v1922_v24 = vpop.f32.mrb[5].mxu1 }
 0x229   :  { %v465_v25 = vrot.slane %v464_v20, 2 }
 0x22a   :  { %v673_v26 = vadd.f32 %v2681_v22, %v663_v23 }
 0x22b   :  { %v466_v27 = vadd.f32 %v465_v25, %v464_v20  ;;  %v713_v20 = vld [vmem:[%s2876_s16 + $0x8] sm:$0xff] }
 0x22c   :  { %v676_v28 = vsel %vm461_vm7, %v673_v26, 0.0  ;;  %v2703_v23 = vpack.c.bf16 %v713_v20, %v712_v19 }
 0x22d   :  { %v467_v29 = vrot.slane %v466_v27, 1  ;;  %v677_v30 = vrot.slane %v676_v28, 4 }
 0x22f   :  { %v468_v31 = vadd.f32 %v467_v29, %v466_v27  ;;  %v678_v32 = vadd.f32 %v677_v30, %v676_v28  ;;  %v872_v33 = vpop.f32.mrb[6].mxu1  ;;  %v2708_v28 = vld [vmem:[#allocation9] ss:$0 sm:$0xff]  ;;  %v2718_v30 = vld [vmem:[%s2876_s16 + $0x10] sm:$0xff] }
 0x230   :  { %v1942_v34 = vpop.f32.mrb[7].mxu1 }
 0x231   :  { %v470_v35 = vmul.f32 0.5, %v468_v31  ;;  %v679_v36 = vrot.slane %v678_v32, 2  ;;  %v873_v34 = vadd.f32 %v2609_v57, %v872_v33  ;;  %v1722_v33 = vld [vmem:[%s2891_s0 + $0x4] sm:$0x3] }
 0x233   :  { %v471_v37 = vsub.f32 %v458_v17, %v470_v35  ;;  %v680_v38 = vadd.f32 %v679_v36, %v678_v32  ;;  %v2693_v17 = vld [vmem:[#allocation4] ss:$0 sm:$0xff]  ;;  %v876_v35 = vmax.f32 %v873_v34, 0.0 }
 0x235   :  { %v472_v39 = vmul.f32 %v471_v37, %v471_v37  ;;  %v681_v41 = vrot.slane %v680_v38, 1 }
 0x237   :  { %v473_v42 = vsel %vm461_vm7, %v472_v39, 0.0  ;;  %v682_v44 = vadd.f32 %v681_v41, %v680_v38  ;;  %v2762_v39 = vld [vmem:[#allocation3] ss:$0 sm:$0xff] }
 0x238   :  { %v474_v45 = vrot.slane %v473_v42, 4 }
 0x239   :  { %v683_v46 = vmul.f32 0.5, %v682_v44 }
 0x23a   :  { %v475_v47 = vadd.f32 %v474_v45, %v473_v42 }
 0x23b   :  { %v684_v48 = vsub.f32 %v673_v26, %v683_v46  ;;  %v2705_v26 = vld [vmem:[#allocation8] ss:$0 sm:$0xff] }
 0x23c   :  { %v476_v49 = vrot.slane %v475_v47, 2 }
 0x23d   :  { %v685_v51 = vmul.f32 %v684_v48, %v684_v48 }
 0x23e   :  { %v477_v52 = vadd.f32 %v476_v49, %v475_v47 }
 0x23f   :  { %v686_v56 = vsel %vm461_vm7, %v685_v51, 0.0 }
 0x240   :  { %v478_v58 = vrot.slane %v477_v52, 1  ;;  %v687_v59 = vrot.slane %v686_v56, 4 }
 0x242   :  { %v479_v60 = vadd.f32 %v478_v58, %v477_v52  ;;  %v688_v61 = vadd.f32 %v687_v59, %v686_v56 }
 0x244   :  { %v480_v62 = vmul.f32 0.5, %v479_v60  ;;  %v689_v0 = vrot.slane %v688_v61, 2 }
 0x246   :  { %v481_v1 = vadd.f32 1e-05, %v480_v62  ;;  %v690_v4 = vadd.f32 %v689_v0, %v688_v61 }
 0x248   :  { %2156 = vrsqrt.f32 %v481_v1  ;;  %v691_v6 = vrot.slane %v690_v4, 1 }
 0x24a   :  { %v692_v8 = vadd.f32 %v691_v6, %v690_v4 }
 0x24c   :  { %v693_v9 = vmul.f32 0.5, %v692_v8 }
 0x24e   :  { %v694_v10 = vadd.f32 1e-05, %v693_v9 }
 0x250   :  { %2158 = vrsqrt.f32 %v694_v10 }
 0x252   :  { %v2157_v13 = vpop.eup %2156 }
 0x253   :  { %v483_v16 = vmul.f32 %v2157_v13, %v471_v37 }
 0x255   :  { %v490_v18 = vmul.f32 %v2691_v15, %v483_v16 }
 0x257   :  { %v497_v21 = vadd.f32 %v2693_v17, %v490_v18 }
 0x259   :  { %v498_v24 = vmax.f32 %v497_v21, 0.0 }
 0x25a   :  { %v2159_v25 = vpop.eup %2158 }
 0x25b   :  { %v696_v27 = vmul.f32 %v2159_v25, %v684_v48  ;;  %1910 = vmatmul.mubr.msk.f32.vlgmr.msra.gmra.mrb[4].mxu0 %vm509_vm8, %v498_v24 }
 0x25c   :  { %2095 = vmatpush3.bf16.msra.mxu0 %v2703_v23  ;;  %1929 = vmatprep.mubr.msk.f32.mxu0 %vm2291_vm0, %v2292_v3 }
 0x25d   :  { %v703_v29 = vmul.f32 %v2705_v26, %v696_v27  ;;  %1927 = vmatprep.subr.mxu0 %v2292_v3 }
 0x25f   :  { %v710_v31 = vadd.f32 %v2708_v28, %v703_v29 }
 0x260   :  { %1928 = vmatpush3.msra.mxu0 %v2718_v30 }
 0x261   :  { %v711_v32 = vmax.f32 %v710_v31, 0.0  ;;  %2102 = vmatprep.subr.bf16.mxu0 %v2290_v2 }
 0x263   :  { %1930 = vmatmul.mubr.msk.f32.vlgmr.msra.gmra.mrb[6].mxu0 %vm509_vm8, %v711_v32 }
 0x264   :  { %2104 = vmatpush3.bf16.msra.mxu0 %v2581_v50  ;;  %1951 = vmatprep.mubr.msk.f32.mxu0 %vm2291_vm0, %v2292_v3 }
 0x265   :  { %2105 = vmatprep.subr.bf16.mxu0 %v2290_v2 }
 0x268   :  { %2108 = vmatpush3.bf16.msk.msra.mxu0 %vm2596_vm5, %v2594_v53 }
 0x269   :  { %2112 = vmatprep.subr.bf16.mxu0 %v2290_v2 }
 0x26b   :  { %1952 = vmatmul.mubr.msk.f32.vlgmr.msra.gmra.mrb[8].mxu0 %vm373_vm6, %v876_v35 }
 0x26c   :  { %2114 = vmatpush3.bf16.msra.mxu0 %v2618_v63  ;;  %1971 = vmatprep.mubr.msk.f32.mxu0 %vm2291_vm0, %v2292_v3 }
 0x26d   :  { %2115 = vmatprep.subr.bf16.mxu0 %v2290_v2 }
 0x270   :  { %2118 = vmatpush3.bf16.msk.msra.mxu0 %vm2596_vm5, %v2628_v5 }
 0x271   :  { %2122 = vmatprep.subr.bf16.mxu0 %v2290_v2 }
 0x273   :  { %1972 = vmatmul.mubr.msk.f32.vlgmr.msra.gmra.mrb[10].mxu0 %vm373_vm6, %v876_v35 }
 0x274   :  { %2124 = vmatpush3.bf16.msra.mxu0 %v2543_v40  ;;  %1991 = vmatprep.mubr.msk.f32.mxu0 %vm2291_vm0, %v2292_v3  ;;  %v2759_v40 = vld [vmem:[#allocation2] ss:$0 sm:$0xff] }
 0x275   :  { %2125 = vmatprep.subr.bf16.mxu0 %v2290_v2 }
 0x278   :  { %2127 = vmatpush3.bf16.msra.mxu0 %v2555_v43 }
 0x279   :  { %2135 = vmatprep.subr.bf16.mxu0 %v2290_v2 }
 0x27b   :  { %1992 = vmatmul.mubr.msk.f32.vlgmr.msra.gmra.mrb[12].mxu0 %vm294_vm2, %v1722_v33 }
 0x27c   :  { %2137 = vmatpush3.bf16.msra.mxu0 %v2658_v11  ;;  %2011 = vmatprep.mubr.msk.f32.mxu0 %vm2291_vm0, %v2292_v3 }
 0x27d   :  { %2009 = vmatprep.subr.mxu0 %v2292_v3 }
 0x280   :  { %2010 = vmatpush3.msra.mxu0 %v2667_v12 }
 0x281   :  { %2145 = vmatprep.subr.bf16.mxu0 %v2290_v2 }
 0x32e   :  { %v579_v43 = vpop.f32.mrb[4].mxu0 }
 0x32f   :  { %v580_v36 = vadd.f32 %v2759_v40, %v579_v43  ;;  %v1911_v37 = vpop.f32.mrb[5].mxu0 }
 0x331   :  { %v1703_v38 = vmul.f32 -1.442695, %v580_v36 }
 0x333   :  { %2160 = vpow2.f32 %v1703_v38 }
 0x336   :  { %v791_v11 = vpop.f32.mrb[6].mxu0 }
 0x337   :  { %v792_v41 = vadd.f32 %v2762_v39, %v791_v11  ;;  %v1931_v42 = vpop.f32.mrb[7].mxu0 }
 0x339   :  { %v1711_v44 = vmul.f32 -1.442695, %v792_v41 }
 0x33b   :  { %2162 = vpow2.f32 %v1711_v44 }
 0x33d   :  { %v2161_v47 = vpop.eup %2160 }
 0x33e   :  { %v946_v45 = vpop.f32.mrb[8].mxu0  ;;  %v586_v49 = vadd.f32 1.0, %v2161_v47 }
 0x33f   :  { %v947_v12 = vadd.f32 %v946_v45, %v2604_v55  ;;  %v1953_v46 = vpop.f32.mrb[9].mxu0 }
 0x340   :  { %2164 = vrcp.f32 %v586_v49 }
 0x341   :  { %v950_v48 = vadd.f32 %v2676_v14, %v947_v12 }
 0x343   :  { %v951_v51 = vsel %vm461_vm7, %v950_v48, 0.0 }
 0x344   :  { %v952_v52 = vrot.slane %v951_v51, 4 }
 0x345   :  { %v2163_v56 = vpop.eup %2162 }
 0x346   :  { %v798_v58 = vadd.f32 1.0, %v2163_v56  ;;  %v953_v59 = vadd.f32 %v952_v52, %v951_v51  ;;  %v1120_v60 = vpop.f32.mrb[10].mxu0 }
 0x347   :  { %v1121_v61 = vadd.f32 %v1120_v60, %v2650_v7  ;;  %v1973_v62 = vpop.f32.mrb[11].mxu0 }
 0x348   :  { %2166 = vrcp.f32 %v798_v58  ;;  %v954_v0 = vrot.slane %v953_v59, 2 }
 0x349   :  { %v1124_v1 = vadd.f32 %v2681_v22, %v1121_v61 }
 0x34a   :  { %v955_v4 = vadd.f32 %v954_v0, %v953_v59  ;;  %v2771_v21 = vpop.eup %2164 }
 0x34b   :  { %v1125_v6 = vsel %vm461_vm7, %v1124_v1, 0.0 }
 0x34c   :  { %v956_v8 = vrot.slane %v955_v4, 1  ;;  %v1126_v9 = vrot.slane %v1125_v6, 4 }
 0x34e   :  { %v957_v10 = vadd.f32 %v956_v8, %v955_v4  ;;  %v1127_v13 = vadd.f32 %v1126_v9, %v1125_v6  ;;  %v1299_v16 = vpop.f32.mrb[12].mxu0 }
 0x34f   :  { %v1993_v18 = vpop.f32.mrb[13].mxu0 }
 0x350   :  { %v958_v19 = vmul.f32 0.5, %v957_v10  ;;  %v1128_v20 = vrot.slane %v1127_v13, 2 }
 0x352   :  { %v2773_v24 = vpop.eup %2166  ;;  %v959_v25 = vsub.f32 %v950_v48, %v958_v19  ;;  %v1129_v27 = vadd.f32 %v1128_v20, %v1127_v13  ;;  %v1300_v13 = vadd.f32 %v2609_v57, %v1299_v16 }
 0x353   :  { %v2777_v29 = vmul.f32 %v2773_v24, %v2771_v21 }
 0x354   :  { %v960_v31 = vmul.f32 %v959_v25, %v959_v25  ;;  %v1130_v32 = vrot.slane %v1129_v27, 1  ;;  %v1303_v18 = vmax.f32 %v1300_v13, 0.0 }
 0x356   :  { %v961_v34 = vsel %vm461_vm7, %v960_v31, 0.0  ;;  %v1131_v35 = vadd.f32 %v1130_v32, %v1129_v27 }
 0x357   :  { %v962_v33 = vrot.slane %v961_v34, 4 }
 0x358   :  { %v1132_v43 = vmul.f32 0.5, %v1131_v35 }
 0x359   :  { %v963_v36 = vadd.f32 %v962_v33, %v961_v34 }
 0x35a   :  { %v1133_v37 = vsub.f32 %v1124_v1, %v1132_v43 }
 0x35b   :  { %v964_v38 = vrot.slane %v963_v36, 2 }
 0x35c   :  { %v1134_v11 = vmul.f32 %v1133_v37, %v1133_v37 }
 0x35d   :  { %v965_v41 = vadd.f32 %v964_v38, %v963_v36 }
 0x35e   :  { %v1135_v42 = vsel %vm461_vm7, %v1134_v11, 0.0 }
 0x35f   :  { %v966_v44 = vrot.slane %v965_v41, 1  ;;  %v1136_v45 = vrot.slane %v1135_v42, 4 }
 0x361   :  { %v967_v12 = vadd.f32 %v966_v44, %v965_v41  ;;  %v1137_v46 = vadd.f32 %v1136_v45, %v1135_v42 }
 0x363   :  { %v968_v47 = vmul.f32 0.5, %v967_v12  ;;  %v1138_v48 = vrot.slane %v1137_v46, 2 }
 0x365   :  { %v969_v49 = vadd.f32 1e-05, %v968_v47  ;;  %v1139_v51 = vadd.f32 %v1138_v48, %v1137_v46 }
 0x367   :  { %2168 = vrsqrt.f32 %v969_v49  ;;  %v1140_v52 = vrot.slane %v1139_v51, 1 }
 0x369   :  { %v1141_v56 = vadd.f32 %v1140_v52, %v1139_v51 }
 0x36b   :  { %v1142_v58 = vmul.f32 0.5, %v1141_v56 }
 0x36d   :  { %v1143_v59 = vadd.f32 1e-05, %v1142_v58 }
 0x36f   :  { %2170 = vrsqrt.f32 %v1143_v59 }
 0x371   :  { %v2169_v60 = vpop.eup %2168 }
 0x372   :  { %v971_v61 = vmul.f32 %v2169_v60, %v959_v25 }
 0x374   :  { %v972_v62 = vmul.f32 %v2691_v15, %v971_v61 }
 0x376   :  { %v973_v0 = vadd.f32 %v2693_v17, %v972_v62 }
 0x378   :  { %v974_v1 = vmax.f32 %v973_v0, 0.0 }
 0x379   :  { %v2171_v4 = vpop.eup %2170 }
 0x37a   :  { %v1145_v6 = vmul.f32 %v2171_v4, %v1133_v37  ;;  %1961 = vmatmul.mubr.msk.f32.vlgmr.msra.gmra.mrb[8].mxu1 %vm509_vm8, %v974_v1 }
 0x37b   :  { %2121 = vmatpush3.bf16.msra.mxu1 %v2703_v23  ;;  %1980 = vmatprep.mubr.msk.f32.mxu1 %vm2291_vm0, %v2292_v3 }
 0x37c   :  { %v1146_v8 = vmul.f32 %v2705_v26, %v1145_v6  ;;  %1978 = vmatprep.subr.mxu1 %v2292_v3 }
 0x37e   :  { %v1147_v9 = vadd.f32 %v2708_v28, %v1146_v8 }
 0x37f   :  { %1979 = vmatpush3.msra.mxu1 %v2718_v30 }
 0x380   :  { %v1148_v10 = vmax.f32 %v1147_v9, 0.0  ;;  %2128 = vmatprep.subr.bf16.mxu1 %v2290_v2 }
 0x382   :  { %1981 = vmatmul.mubr.msk.f32.vlgmr.msra.gmra.mrb[10].mxu1 %vm509_vm8, %v1148_v10 }
 0x383   :  { %2130 = vmatpush3.bf16.msra.mxu1 %v2581_v50  ;;  %2002 = vmatprep.mubr.msk.f32.mxu1 %vm2291_vm0, %v2292_v3 }
 0x384   :  { %2131 = vmatprep.subr.bf16.mxu1 %v2290_v2 }
 0x387   :  { %2134 = vmatpush3.bf16.msk.msra.mxu1 %vm2596_vm5, %v2594_v53 }
 0x388   :  { %2138 = vmatprep.subr.bf16.mxu1 %v2290_v2 }
 0x38a   :  { %2003 = vmatmul.mubr.msk.f32.vlgmr.msra.gmra.mrb[12].mxu1 %vm373_vm6, %v1303_v18 }
 0x38b   :  { %2140 = vmatpush3.bf16.msra.mxu1 %v2618_v63  ;;  %2022 = vmatprep.mubr.msk.f32.mxu1 %vm2291_vm0, %v2292_v3 }
 0x38c   :  { %2141 = vmatprep.subr.bf16.mxu1 %v2290_v2 }
 0x38f   :  { %2144 = vmatpush3.bf16.msk.msra.mxu1 %vm2596_vm5, %v2628_v5 }
 0x392   :  { %2023 = vmatmul.mubr.msk.f32.vlgmr.msra.gmra.mrb[14].mxu1 %vm373_vm6, %v1303_v18 }
 0x44d   :  { %v1044_v50 = vpop.f32.mrb[8].mxu1 }
 0x44e   :  { %v1045_v53 = vadd.f32 %v2759_v40, %v1044_v50  ;;  %v1962_v57 = vpop.f32.mrb[9].mxu1 }
 0x450   :  { %v1717_v16 = vmul.f32 -1.442695, %v1045_v53 }
 0x452   :  { %2172 = vpow2.f32 %v1717_v16 }
 0x455   :  { %v1218_v19 = vpop.f32.mrb[10].mxu1 }
 0x456   :  { %v1219_v63 = vadd.f32 %v2762_v39, %v1218_v19  ;;  %v1982_v20 = vpop.f32.mrb[11].mxu1 }
 0x458   :  { %v1721_v25 = vmul.f32 -1.442695, %v1219_v63 }
 0x45a   :  { %2174 = vpow2.f32 %v1721_v25 }
 0x45c   :  { %v2173_v54 = vpop.eup %2172 }
 0x45d   :  { %v1373_v27 = vpop.f32.mrb[12].mxu1  ;;  %v1051_v32 = vadd.f32 1.0, %v2173_v54 }
 0x45e   :  { %v1374_v2 = vadd.f32 %v1373_v27, %v2604_v55  ;;  %v2004_v31 = vpop.f32.mrb[13].mxu1 }
 0x45f   :  { %2176 = vrcp.f32 %v1051_v32 }
 0x460   :  { %v1377_v5 = vadd.f32 %v2676_v14, %v1374_v2 }
 0x462   :  { %v1378_v34 = vsel %vm461_vm7, %v1377_v5, 0.0 }
 0x463   :  { %v1379_v35 = vrot.slane %v1378_v34, 4 }
 0x464   :  { %v2175_v33 = vpop.eup %2174 }
 0x465   :  { %v1225_v43 = vadd.f32 1.0, %v2175_v33  ;;  %v1380_v36 = vadd.f32 %v1379_v35, %v1378_v34  ;;  %v1547_v37 = vpop.f32.mrb[14].mxu1 }
 0x466   :  { %v1548_v38 = vadd.f32 %v1547_v37, %v2650_v7  ;;  %v2024_v11 = vpop.f32.mrb[15].mxu1 }
 0x467   :  { %2178 = vrcp.f32 %v1225_v43  ;;  %v1381_v41 = vrot.slane %v1380_v36, 2 }
 0x468   :  { %v1551_v55 = vadd.f32 %v2681_v22, %v1548_v38 }
 0x469   :  { %v1382_v42 = vadd.f32 %v1381_v41, %v1380_v36  ;;  %v2819_v49 = vpop.eup %2176 }
 0x46a   :  { %v1552_v44 = vsel %vm461_vm7, %v1551_v55, 0.0 }
 0x46b   :  { %v1383_v14 = vrot.slane %v1382_v42, 1  ;;  %v1553_v45 = vrot.slane %v1552_v44, 4 }
 0x46d   :  { %v1384_v12 = vadd.f32 %v1383_v14, %v1382_v42  ;;  %v1554_v46 = vadd.f32 %v1553_v45, %v1552_v44 }
 0x46f   :  { %v1385_v47 = vmul.f32 0.5, %v1384_v12  ;;  %v1555_v48 = vrot.slane %v1554_v46, 2 }
 0x471   :  { %v2821_v51 = vpop.eup %2178  ;;  %v1386_v52 = vsub.f32 %v1377_v5, %v1385_v47  ;;  %v1556_v7 = vadd.f32 %v1555_v48, %v1554_v46 }
 0x472   :  { %v2825_v56 = vmul.f32 %v2821_v51, %v2819_v49 }
 0x473   :  { %v1387_v22 = vmul.f32 %v1386_v52, %v1386_v52  ;;  %v1557_v58 = vrot.slane %v1556_v7, 1 }
 0x475   :  { %v1388_v59 = vsel %vm461_vm7, %v1387_v22, 0.0  ;;  %v1558_v60 = vadd.f32 %v1557_v58, %v1556_v7 }
 0x476   :  { %v1389_v61 = vrot.slane %v1388_v59, 4 }
 0x477   :  { %v1559_v62 = vmul.f32 0.5, %v1558_v60 }
 0x478   :  { %v1390_v0 = vadd.f32 %v1389_v61, %v1388_v59 }
 0x479   :  { %v1560_v1 = vsub.f32 %v1551_v55, %v1559_v62 }
 0x47a   :  { %v1391_v4 = vrot.slane %v1390_v0, 2 }
 0x47b   :  { %v1561_v6 = vmul.f32 %v1560_v1, %v1560_v1 }
 0x47c   :  { %v1392_v8 = vadd.f32 %v1391_v4, %v1390_v0 }
 0x47d   :  { %v1562_v9 = vsel %vm461_vm7, %v1561_v6, 0.0 }
 0x47e   :  { %v1393_v10 = vrot.slane %v1392_v8, 1  ;;  %v1563_v13 = vrot.slane %v1562_v9, 4 }
 0x480   :  { %v1394_v18 = vadd.f32 %v1393_v10, %v1392_v8  ;;  %v1564_v50 = vadd.f32 %v1563_v13, %v1562_v9 }
 0x482   :  { %v1395_v53 = vmul.f32 0.5, %v1394_v18  ;;  %v1565_v57 = vrot.slane %v1564_v50, 2 }
 0x484   :  { %v1396_v16 = vadd.f32 1e-05, %v1395_v53  ;;  %v1566_v19 = vadd.f32 %v1565_v57, %v1564_v50 }
 0x486   :  { %2180 = vrsqrt.f32 %v1396_v16  ;;  %v1567_v63 = vrot.slane %v1566_v19, 1 }
 0x488   :  { %v1568_v20 = vadd.f32 %v1567_v63, %v1566_v19 }
 0x48a   :  { %v1569_v25 = vmul.f32 0.5, %v1568_v20 }
 0x48c   :  { %v1570_v27 = vadd.f32 1e-05, %v1569_v25 }
 0x48e   :  { %2182 = vrsqrt.f32 %v1570_v27 }
 0x490   :  { %v2181_v2 = vpop.eup %2180 }
 0x491   :  { %v1398_v31 = vmul.f32 %v2181_v2, %v1386_v52 }
 0x493   :  { %v1399_v54 = vmul.f32 %v2691_v15, %v1398_v31 }
 0x495   :  { %v1400_v5 = vadd.f32 %v2693_v17, %v1399_v54 }
 0x497   :  { %v1401_v32 = vmax.f32 %v1400_v5, 0.0 }
 0x498   :  { %v2183_v34 = vpop.eup %2182 }
 0x499   :  { %v1572_v35 = vmul.f32 %v2183_v34, %v1560_v1  ;;  %2012 = vmatmul.mubr.msk.f32.vlgmr.msra.gmra.mrb[14].mxu0 %vm509_vm8, %v1401_v32 }
 0x49a   :  { %2147 = vmatpush3.bf16.msra.mxu0 %v2703_v23  ;;  %2031 = vmatprep.mubr.msk.f32.mxu0 %vm2291_vm0, %v2292_v3 }
 0x49b   :  { %v1573_v33 = vmul.f32 %v2705_v26, %v1572_v35  ;;  %2029 = vmatprep.subr.mxu0 %v2292_v3 }
 0x49d   :  { %v1574_v43 = vadd.f32 %v2708_v28, %v1573_v33 }
 0x49e   :  { %2030 = vmatpush3.msra.mxu0 %v2718_v30 }
 0x49f   :  { %v1575_v15 = vmax.f32 %v1574_v43, 0.0 }
 0x4a1   :  { %2032 = vmatmul.mubr.msk.f32.vlgmr.msra.gmra.mrb[16].mxu0 %vm509_vm8, %v1575_v15 }
 0x56c   :  { %v1471_v17 = vpop.f32.mrb[14].mxu0 }
 0x56d   :  { %v1472_v36 = vadd.f32 %v2759_v40, %v1471_v17  ;;  %v2013_v37 = vpop.f32.mrb[15].mxu0  ;;  %v1665_v40 = vmul.f32 0.4, %v2771_v21  ;;  %v1658_v21 = vmul.f32 0.4, %v2777_v29 }
 0x56f   :  { %v1727_v38 = vmul.f32 -1.442695, %v1472_v36 }
 0x571   :  { %2184 = vpow2.f32 %v1727_v38 }
 0x574   :  { %v1645_v23 = vpop.f32.mrb[16].mxu0 }
 0x575   :  { %v1646_v11 = vadd.f32 %v2762_v39, %v1645_v23  ;;  %v2033_v41 = vpop.f32.mrb[17].mxu0 }
 0x577   :  { %v1731_v26 = vmul.f32 -1.442695, %v1646_v11 }
 0x579   :  { %2186 = vpow2.f32 %v1731_v26 }
 0x57b   :  { %v2185_v3 = vpop.eup %2184 }
 0x57c   :  { %v1478_v55 = vadd.f32 1.0, %v2185_v3 }
 0x57e   :  { %2188 = vrcp.f32 %v1478_v55 }
 0x583   :  { %v2187_v28 = vpop.eup %2186 }
 0x584   :  { %v1652_v30 = vadd.f32 1.0, %v2187_v28 }
 0x586   :  { %2190 = vrcp.f32 %v1652_v30 }
 0x588   :  { %v2189_v42 = vpop.eup %2188 }
 0x589   :  { %v1666_v44 = vadd.f32 %v2189_v42, %v2819_v49  ;;  %v1671_v49 = vmul.f32 0.4, %v2773_v24 }
 0x58b   :  { %v1667_v14 = vmul.f32 0.6, %v1666_v44 }
 0x58d   :  { %v1668_v45 = vmul.f32 0.5, %v1667_v14 }
 0x58f   :  { %v1669_v12 = vadd.f32 %v1668_v45, %v1665_v40 }
 0x590   :  { %v2191_v46 = vpop.eup %2190 }
 0x591   :  { %1670 = vst.msk [vmem:[%s2878_s19] sm:$0x3] %vm1663_vm9, %v1669_v12  ;;  %v1657_v39 = vmul.f32 %v2191_v46, %v2189_v42  ;;  %v1672_v47 = vadd.f32 %v2191_v46, %v2821_v51 }
 0x593   :  { %v1659_v48 = vadd.f32 %v1657_v39, %v2825_v56  ;;  %v1673_v52 = vmul.f32 0.6, %v1672_v47 }
 0x595   :  { %v1660_v7 = vmul.f32 0.6, %v1659_v48  ;;  %v1674_v22 = vmul.f32 0.5, %v1673_v52 }
 0x597   :  { %v1661_v58 = vmul.f32 0.5, %v1660_v7  ;;  %v1675_v59 = vadd.f32 %v1674_v22, %v1671_v49 }
 0x599   :  { %v1662_v60 = vadd.f32 %v1661_v58, %v1658_v21  ;;  %1676 = vst.msk [vmem:[%s2879_s20] sm:$0x3] %vm1663_vm9, %v1675_v59 }
 0x59b   :  { %1664 = vst.msk [vmem:[%s2877_s18] sm:$0x3] %vm1663_vm9, %v1662_v60 }
 0x59c   :  { %1689 = vsyncpa [#allocation5], 1 }
 0x59d   :  { %1690 = vsyncpa [#allocation7], 1 }
 0x59e   :  { %1691 = vsyncpa [#allocation10], 1 }

</bundles_post_ra>
